<compile_context>
chip_gen: v7x
topology: tpu7x:2x2x1
jax: 0.10.0
libtpu: 0.0.40
codegen_flags: <defaults>
</compile_context>

<pallas_src>
import functools
import math

import jax
import jax.numpy as jnp
from jax.experimental import pallas as pl
from jax.experimental.pallas import tpu as pltpu


# ------------------------------ fused kernel ------------------------------

def _fused_kernel(feat_ref,
                  whr1_ref, bhr1_ref, wh2_ref, bh2_ref, wcls_ref, bcls_ref,
                  wr2_ref, br2_ref,
                  g0wp_ref, a0_ref, g0b_ref, g1wp_ref, a1_ref, g1b_ref,
                  sw1_ref, sb1_ref, sw2_ref, sb2_ref,
                  mw1_ref, mb1_ref, mw2_ref, mb2_ref, mw3_ref, mb3_ref,
                  mw4_ref, mb4_ref,
                  cls_ref, out_ref,
                  *, batch, n_nodes, neighbors, heads0, f0, f1):
    f32 = jnp.float32
    bf16 = jnp.bfloat16
    bn = batch * n_nodes
    neg = jnp.float32(-1e30)

    def mm(a, b):                          # bf16 MXU operands, f32 accumulation
        return jnp.dot(a.astype(bf16), b.astype(bf16), preferred_element_type=f32)

    def mm_dg(a, b, dn):
        return jax.lax.dot_general(a.astype(bf16), b.astype(bf16), dn,
                                   preferred_element_type=f32)

    x16 = feat_ref[...]                                    # (C, B*N) bf16, lane-dense
    c = wh2_ref.shape[0]

    # ---- shared conv head + relation_fc first conv: stacked (2C, C) weight, one MXU push
    t = jnp.maximum(mm(whr1_ref[...], x16) + bhr1_ref[...], 0.0)   # ReLU for both branches
    x1 = t[:c]                                             # semantic branch (C, B*N)
    z1 = t[c:]                                             # relation branch (C, B*N)

    # semantic head: conv2(+BN fold)+ReLU, then conv_cls
    x2 = jnp.maximum(mm(wh2_ref[...], x1) + bh2_ref[...], 0.0)
    cls = mm(wcls_ref[...], x2) + bcls_ref[...]            # (K, B*N)
    cls_ref[...] = cls                                     # lane-dense store

    # class softmax (over classes = sublane axis) + represent = softmax @ conv_cls.weight
    m = jnp.max(cls, axis=0, keepdims=True)
    e = jnp.exp(cls - m)
    p = e * pl.reciprocal(jnp.sum(e, axis=0, keepdims=True), approx=True)
    rep_cn = mm_dg(wcls_ref[...], p, (((0,), (0,)), ((), ())))     # (C, B*N), stays in VMEM

    # relation_fc second conv; full (B*N, B*N) gram in one 128-lane MXU op (f32 so the
    # discrete top-k selection stays faithful; cross-batch entries masked below)
    z = mm(wr2_ref[...], z1) + br2_ref[...]                        # (C, B*N)
    gram = jax.lax.dot_general(z, z, (((0,), (0,)), ((), ())),
                               preferred_element_type=f32)         # (B*N, B*N)

    # ---- exactly-k neighbor mask, rebuilt in-kernel (replaces XLA top_k).
    # Rows = target nodes, cols = source nodes; cross-batch edges excluded, so the edge
    # mask (and thus the attention matrix) is block-diagonal over batches.
    row_i = jax.lax.broadcasted_iota(jnp.int32, (bn, bn), 0)
    col_i = jax.lax.broadcasted_iota(jnp.int32, (bn, bn), 1)
    same = jnp.zeros((bn, bn), jnp.bool_)
    for b in range(batch):                                 # avoids int division on the VPU
        lo, hi = b * n_nodes, (b + 1) * n_nodes
        same = same | ((row_i >= lo) & (row_i < hi) & (col_i >= lo) & (col_i < hi))

    avail = jnp.where(same, gram, neg)
    edge = jnp.zeros((bn, bn), jnp.bool_)
    for _ in range(neighbors):                             # K iterations of row-argmax
        rmax = jnp.max(avail, axis=1, keepdims=True)
        ismax = avail == rmax
        first = jnp.min(jnp.where(ismax, col_i, bn), axis=1, keepdims=True)  # torch-style
        pick = col_i == first                              #   first-index tie-break
        edge = edge | pick
        avail = jnp.where(pick, neg, avail)

    # ---- GAT (channel-major, dense masked attention; add_skip_connection=False)
    def gat(x_cn, wp, a_mat, bias_col, heads, f_out, concat, act):
        proj = mm(wp, x_cn)                                # (H*F, B*N)
        # all per-head src/trg scores via the block-diagonal score matrix a_mat (H*F, 2H)
        sc_nm = mm_dg(proj, a_mat, (((0,), (0,)), ((), ())))   # (B*N, 2H) node-major
        sc_cm = mm_dg(a_mat, proj, (((0,), (0,)), ((), ())))   # (2H, B*N) channel-major
        outs = []
        for h in range(heads):                             # each head's logits built once
            raw = sc_nm[:, 2 * h + 1:2 * h + 2] + sc_cm[2 * h:2 * h + 1, :]  # trg_t + src_s
            leaky = jnp.where(raw >= 0, raw, 0.2 * raw)    # LeakyReLU(0.2)
            logit = jnp.where(edge, leaky, neg)
            rmax = jnp.max(logit, axis=1, keepdims=True)   # per-row max (shift-invariant)
            ex = jnp.exp(logit - rmax)                     # exactly 0 where masked
            denom = jnp.sum(ex, axis=1, keepdims=True)     # >= 1, no underflow collapse
            attn = ex * pl.reciprocal(denom + 1e-16, approx=True)
            ph = proj[h * f_out:(h + 1) * f_out]           # (F, B*N)
            # out[f, t] = sum_s ph[f, s] * attn[t, s]  -> aggregation stays channel-major
            outs.append(mm_dg(ph, attn, (((1,), (1,)), ((), ()))))
        if concat:
            out = jnp.concatenate(outs, axis=0) + bias_col     # (H*F, B*N)
        else:
            acc = outs[0]
            for h in range(1, heads):
                acc = acc + outs[h]
            out = acc * (1.0 / heads) + bias_col
        if act == "elu":
            out = jnp.where(out > 0, out, jnp.exp(jnp.minimum(out, 0.0)) - 1.0)
        return out

    g0 = gat(rep_cn, g0wp_ref[...], a0_ref[...], g0b_ref[...], heads0, f0, True, "elu")
    fcn = gat(g0, g1wp_ref[...], a1_ref[...], g1b_ref[...], 1, f1, False, None)   # (C, B*N)

    # ---- sg_conv, concat with input features, RelationFeatureFusion (all channel-major)
    h1 = jnp.maximum(mm(sw1_ref[...], fcn) + sb1_ref[...], 0.0)   # (2C, B*N)
    h2 = jnp.maximum(mm(sw2_ref[...], h1) + sb2_ref[...], 0.0)    # (C, B*N)

    y = jnp.concatenate([x16, h2.astype(bf16)], axis=0)           # (2C, B*N)
    y = jnp.maximum(mm(mw1_ref[...], y) + mb1_ref[...], 0.0)
    y = jnp.maximum(mm(mw2_ref[...], y) + mb2_ref[...], 0.0)
    y = jnp.maximum(mm(mw3_ref[...], y) + mb3_ref[...], 0.0)
    y = mm(mw4_ref[...], y) + mb4_ref[...]
    out_ref[...] = y                                              # (C, B*N) lane-dense store


# ------------------------------ model wrapper ------------------------------

def _score_matrix(a_src, a_trg):
    """Block-diagonal (H*F, 2H): col 2h = a_src head h, col 2h+1 = a_trg head h."""
    h, f = a_src.shape
    a = jnp.zeros((h * f, 2 * h), jnp.float32)
    for i in range(h):
        a = a.at[i * f:(i + 1) * f, 2 * i].set(a_src[i])
        a = a.at[i * f:(i + 1) * f, 2 * i + 1].set(a_trg[i])
    return a


def init_params(key, C, num_class):
    shapes = {
        # BaseConvSingleHead: two shared Conv1d+BN+ReLU, then conv_cls
        "h_w1": (C, C), "h_b1": (C,),
        "h_w2": (C, C), "h_b2": (C,),
        "w_cls": (num_class, C), "b_cls": (num_class,),
        # relation_fc
        "r_w1": (C, C), "r_b1": (C,),
        "r_w2": (C, C), "r_b2": (C,),
        # GAT layer 0: heads=4, out=C, concat, ELU
        "g0_wp": (4 * C, C), "g0_asrc": (4, C), "g0_atrg": (4, C), "g0_b": (4 * C,),
        # GAT layer 1: heads=1, in=4C, out=C, mean, no activation
        "g1_wp": (C, 4 * C), "g1_asrc": (1, C), "g1_atrg": (1, C), "g1_b": (C,),
        # sg_conv
        "s_w1": (2 * C, C), "s_b1": (2 * C,),
        "s_w2": (C, 2 * C), "s_b2": (C,),
        # RelationFeatureFusion(in=2C): 2C->2C, 2C->C, C->C (Conv+BN+ReLU), final C->C
        "m_w1": (2 * C, 2 * C), "m_b1": (2 * C,),
        "m_w2": (C, 2 * C), "m_b2": (C,),
        "m_w3": (C, C), "m_b3": (C,),
        "m_w4": (C, C), "m_b4": (C,),
    }
    keys = jax.random.split(key, len(shapes))
    return {name: (0.1 * jax.random.normal(k, shp)).astype(jnp.float32)
            for (name, shp), k in zip(shapes.items(), keys)}


def graph_relation_forward(params, features, *, neighbors):
    """features: (B, C, N) -> (new_features (B, C, N), cls_scores (B, N, num_class))."""
    bsz, c, n = features.shape
    assert neighbors <= n
    bn = bsz * n
    kcls = params["w_cls"].shape[0]
    # TODO(synk): eval-mode BN1d fold assumes default running stats (mean=0, var=1, affine
    # identity); a trained checkpoint's BN stats/affine must be folded here instead.
    bn_s = jnp.float32(1.0 / math.sqrt(1.0 + 1e-5))
    bf16 = jnp.bfloat16

    def w(x):                      # bf16 weights (native MXU dtype, halves weight DMA)
        return x.astype(bf16)

    def col(x):                    # f32 bias columns (added after f32 accumulation)
        return x.astype(jnp.float32)[:, None]

    # batch folded into lanes -> (C, B*N) lane-dense input slab (cast fuses with transpose)
    feat_cn = jnp.swapaxes(features, 0, 1).reshape(c, bn).astype(bf16)

    # first layer of the semantic head and relation_fc stacked -> one MXU push in-kernel
    w_hr1 = w(jnp.concatenate([params["h_w1"] * bn_s, params["r_w1"]], axis=0))
    b_hr1 = jnp.concatenate([params["h_b1"] * bn_s, params["r_b1"]])[:, None]

    a0 = w(_score_matrix(params["g0_asrc"], params["g0_atrg"]))   # (4C, 8)
    a1 = w(_score_matrix(params["g1_asrc"], params["g1_atrg"]))   # (C, 2)

    heads0 = params["g0_asrc"].shape[0]
    f0 = params["g0_wp"].shape[0] // heads0
    f1 = params["g1_wp"].shape[0]

    # explicit scoped-VMEM request from the resident set (the (B*N)^2 attention/gram tiles
    # dominate); stays well inside v7x's 64-MiB budget at these shapes.
    est = 12 * bn * bn * 4 + 16 * c * bn * 4 + (2 << 20)
    vmem_bytes = int(min(64 << 20, max(16 << 20, est)))

    cls_kn, new_cn = pl.pallas_call(
        functools.partial(_fused_kernel, batch=bsz, n_nodes=n, neighbors=neighbors,
                          heads0=heads0, f0=f0, f1=f1),
        out_shape=(jax.ShapeDtypeStruct((kcls, bn), jnp.float32),
                   jax.ShapeDtypeStruct((c, bn), jnp.float32)),
        compiler_params=pltpu.CompilerParams(vmem_limit_bytes=vmem_bytes),
    )(feat_cn,
      w_hr1, b_hr1,
      w(params["h_w2"] * bn_s), col(params["h_b2"] * bn_s),
      w(params["w_cls"]), col(params["b_cls"]),
      w(params["r_w2"]), col(params["r_b2"]),
      w(params["g0_wp"]), a0, col(params["g0_b"]),
      w(params["g1_wp"]), a1, col(params["g1_b"]),
      w(params["s_w1"]), col(params["s_b1"]), w(params["s_w2"]), col(params["s_b2"]),
      w(params["m_w1"] * bn_s), col(params["m_b1"] * bn_s),
      w(params["m_w2"] * bn_s), col(params["m_b2"] * bn_s),
      w(params["m_w3"] * bn_s), col(params["m_b3"] * bn_s),
      w(params["m_w4"]), col(params["m_b4"]))

    # only output-format plumbing remains in XLA (tiny, fused transposes)
    cls_scores = cls_kn.reshape(kcls, bsz, n).transpose(1, 2, 0)   # (B, N, num_class)
    new_features = new_cn.reshape(c, bsz, n).transpose(1, 0, 2)    # (B, C, N)
    return new_features, cls_scores


if __name__ == "__main__":
    B, C, N = 2, 32, 64            # batch, in_features, num_proposals (B*N = 128 lanes)
    NEIGHBORS, NUM_CLASS = 8, 10

    key = jax.random.PRNGKey(0)
    kp, kx = jax.random.split(key)
    params = init_params(kp, C, NUM_CLASS)
    features = jax.random.normal(kx, (B, C, N), dtype=jnp.float32)

    fwd = jax.jit(functools.partial(graph_relation_forward, neighbors=NEIGHBORS))
    new_features, cls_scores = fwd(params, features)
    jax.block_until_ready((new_features, cls_scores))

    assert new_features.shape == (B, C, N)
    assert cls_scores.shape == (B, N, NUM_CLASS)
    assert bool(jnp.all(jnp.isfinite(new_features))) and bool(jnp.all(jnp.isfinite(cls_scores)))
    print("KERNEL_OK")
</pallas_src>

<mosaic_0001>
module attributes {stable_mosaic.version = 11 : i64} {
  func.func @_fused_kernel(%arg0: memref<32x128xbf16, #tpu.memory_space<vmem>>, %arg1: memref<64x32xbf16, #tpu.memory_space<vmem>>, %arg2: memref<64x1xf32, #tpu.memory_space<vmem>>, %arg3: memref<32x32xbf16, #tpu.memory_space<vmem>>, %arg4: memref<32x1xf32, #tpu.memory_space<vmem>>, %arg5: memref<10x32xbf16, #tpu.memory_space<vmem>>, %arg6: memref<10x1xf32, #tpu.memory_space<vmem>>, %arg7: memref<32x32xbf16, #tpu.memory_space<vmem>>, %arg8: memref<32x1xf32, #tpu.memory_space<vmem>>, %arg9: memref<128x32xbf16, #tpu.memory_space<vmem>>, %arg10: memref<128x8xbf16, #tpu.memory_space<vmem>>, %arg11: memref<128x1xf32, #tpu.memory_space<vmem>>, %arg12: memref<32x128xbf16, #tpu.memory_space<vmem>>, %arg13: memref<32x2xbf16, #tpu.memory_space<vmem>>, %arg14: memref<32x1xf32, #tpu.memory_space<vmem>>, %arg15: memref<64x32xbf16, #tpu.memory_space<vmem>>, %arg16: memref<64x1xf32, #tpu.memory_space<vmem>>, %arg17: memref<32x64xbf16, #tpu.memory_space<vmem>>, %arg18: memref<32x1xf32, #tpu.memory_space<vmem>>, %arg19: memref<64x64xbf16, #tpu.memory_space<vmem>>, %arg20: memref<64x1xf32, #tpu.memory_space<vmem>>, %arg21: memref<32x64xbf16, #tpu.memory_space<vmem>>, %arg22: memref<32x1xf32, #tpu.memory_space<vmem>>, %arg23: memref<32x32xbf16, #tpu.memory_space<vmem>>, %arg24: memref<32x1xf32, #tpu.memory_space<vmem>>, %arg25: memref<32x32xbf16, #tpu.memory_space<vmem>>, %arg26: memref<32x1xf32, #tpu.memory_space<vmem>>, %arg27: memref<10x128xf32, #tpu.memory_space<vmem>>, %arg28: memref<32x128xf32, #tpu.memory_space<vmem>>) attributes {dimension_semantics = [], scalar_prefetch = 0 : i64, scratch_operands = 0 : i64, tpu.core_type = #tpu.core_type<tc>} {
    %c0 = arith.constant 0 : index
    %c0_0 = arith.constant 0 : index
    %0 = vector.load %arg0[%c0, %c0_0] : memref<32x128xbf16, #tpu.memory_space<vmem>>, vector<32x128xbf16>
    %c0_1 = arith.constant 0 : index
    %c0_2 = arith.constant 0 : index
    %1 = vector.load %arg1[%c0_1, %c0_2] : memref<64x32xbf16, #tpu.memory_space<vmem>>, vector<64x32xbf16>
    %cst = arith.constant dense<0.000000e+00> : vector<64x128xf32>
    %2 = tpu.matmul %1, %0, %cst {dimension_numbers = #tpu.dot_dimension_numbers<[1], [0], [0], [1], [0, 0, 1, 1], [], []>} : vector<64x32xbf16>, vector<32x128xbf16>, vector<64x128xf32> -> vector<64x128xf32>
    %c0_3 = arith.constant 0 : index
    %c0_4 = arith.constant 0 : index
    %3 = vector.load %arg2[%c0_3, %c0_4] : memref<64x1xf32, #tpu.memory_space<vmem>>, vector<64x1xf32>
    %4 = vector.broadcast %3 : vector<64x1xf32> to vector<64x128xf32>
    %5 = arith.addf %2, %4 : vector<64x128xf32>
    %cst_5 = arith.constant 0.000000e+00 : f32
    %6 = vector.broadcast %cst_5 : f32 to vector<64x128xf32>
    %7 = arith.maximumf %5, %6 : vector<64x128xf32>
    %8 = vector.extract_strided_slice %7 {offsets = [0, 0], sizes = [32, 128], strides = [1, 1]} : vector<64x128xf32> to vector<32x128xf32>
    %9 = vector.extract_strided_slice %7 {offsets = [32, 0], sizes = [32, 128], strides = [1, 1]} : vector<64x128xf32> to vector<32x128xf32>
    %c0_6 = arith.constant 0 : index
    %c0_7 = arith.constant 0 : index
    %10 = vector.load %arg3[%c0_6, %c0_7] : memref<32x32xbf16, #tpu.memory_space<vmem>>, vector<32x32xbf16>
    %11 = arith.truncf %8 : vector<32x128xf32> to vector<32x128xbf16>
    %cst_8 = arith.constant dense<0.000000e+00> : vector<32x128xf32>
    %12 = tpu.matmul %10, %11, %cst_8 {dimension_numbers = #tpu.dot_dimension_numbers<[1], [0], [0], [1], [0, 0, 1, 1], [], []>} : vector<32x32xbf16>, vector<32x128xbf16>, vector<32x128xf32> -> vector<32x128xf32>
    %c0_9 = arith.constant 0 : index
    %c0_10 = arith.constant 0 : index
    %13 = vector.load %arg4[%c0_9, %c0_10] : memref<32x1xf32, #tpu.memory_space<vmem>>, vector<32x1xf32>
    %14 = vector.broadcast %13 : vector<32x1xf32> to vector<32x128xf32>
    %15 = arith.addf %12, %14 : vector<32x128xf32>
    %cst_11 = arith.constant 0.000000e+00 : f32
    %16 = vector.broadcast %cst_11 : f32 to vector<32x128xf32>
    %17 = arith.maximumf %15, %16 : vector<32x128xf32>
    %c0_12 = arith.constant 0 : index
    %c0_13 = arith.constant 0 : index
    %18 = vector.load %arg5[%c0_12, %c0_13] : memref<10x32xbf16, #tpu.memory_space<vmem>>, vector<10x32xbf16>
    %19 = arith.truncf %17 : vector<32x128xf32> to vector<32x128xbf16>
    %cst_14 = arith.constant dense<0.000000e+00> : vector<10x128xf32>
    %20 = tpu.matmul %18, %19, %cst_14 {dimension_numbers = #tpu.dot_dimension_numbers<[1], [0], [0], [1], [0, 0, 1, 1], [], []>} : vector<10x32xbf16>, vector<32x128xbf16>, vector<10x128xf32> -> vector<10x128xf32>
    %c0_15 = arith.constant 0 : index
    %c0_16 = arith.constant 0 : index
    %21 = vector.load %arg6[%c0_15, %c0_16] : memref<10x1xf32, #tpu.memory_space<vmem>>, vector<10x1xf32>
    %22 = vector.broadcast %21 : vector<10x1xf32> to vector<10x128xf32>
    %23 = arith.addf %20, %22 : vector<10x128xf32>
    %c0_17 = arith.constant 0 : index
    %c0_18 = arith.constant 0 : index
    %24 = vector.load %arg27[%c0_17, %c0_18] : memref<10x128xf32, #tpu.memory_space<vmem>>, vector<10x128xf32>
    tpu.vector_store %arg27[%c0_17, %c0_18], %23 {strides = array<i32>} : memref<10x128xf32, #tpu.memory_space<vmem>>, vector<10x128xf32>,
    %cst_19 = arith.constant dense<0xFF800000> : vector<128xf32>
    %25 = vector.multi_reduction <maximumf>, %23, %cst_19 [0] : vector<10x128xf32> to vector<128xf32>
    %26 = vector.shape_cast %25 : vector<128xf32> to vector<1x128xf32>
    %27 = vector.broadcast %26 : vector<1x128xf32> to vector<10x128xf32>
    %28 = arith.subf %23, %27 : vector<10x128xf32>
    %29 = math.exp %28 : vector<10x128xf32>
    %cst_20 = arith.constant dense<0.000000e+00> : vector<128xf32>
    %30 = vector.multi_reduction <add>, %29, %cst_20 [0] : vector<10x128xf32> to vector<128xf32>
    %31 = vector.shape_cast %30 : vector<128xf32> to vector<1x128xf32>
    %32 = tpu.reciprocal %31 {approx = true} : vector<1x128xf32> -> vector<1x128xf32>
    %33 = vector.broadcast %32 : vector<1x128xf32> to vector<10x128xf32>
    %34 = arith.mulf %29, %33 : vector<10x128xf32>
    %c0_21 = arith.constant 0 : index
    %c0_22 = arith.constant 0 : index
    %35 = vector.load %arg5[%c0_21, %c0_22] : memref<10x32xbf16, #tpu.memory_space<vmem>>, vector<10x32xbf16>
    %36 = arith.truncf %34 : vector<10x128xf32> to vector<10x128xbf16>
    %cst_23 = arith.constant dense<0.000000e+00> : vector<32x128xf32>
    %37 = tpu.matmul %35, %36, %cst_23 {dimension_numbers = #tpu.dot_dimension_numbers<[0], [0], [1], [1], [0, 1, 1, 1], [], []>} : vector<10x32xbf16>, vector<10x128xbf16>, vector<32x128xf32> -> vector<32x128xf32>
    %c0_24 = arith.constant 0 : index
    %c0_25 = arith.constant 0 : index
    %38 = vector.load %arg7[%c0_24, %c0_25] : memref<32x32xbf16, #tpu.memory_space<vmem>>, vector<32x32xbf16>
    %39 = arith.truncf %9 : vector<32x128xf32> to vector<32x128xbf16>
    %cst_26 = arith.constant dense<0.000000e+00> : vector<32x128xf32>
    %40 = tpu.matmul %38, %39, %cst_26 {dimension_numbers = #tpu.dot_dimension_numbers<[1], [0], [0], [1], [0, 0, 1, 1], [], []>} : vector<32x32xbf16>, vector<32x128xbf16>, vector<32x128xf32> -> vector<32x128xf32>
    %c0_27 = arith.constant 0 : index
    %c0_28 = arith.constant 0 : index
    %41 = vector.load %arg8[%c0_27, %c0_28] : memref<32x1xf32, #tpu.memory_space<vmem>>, vector<32x1xf32>
    %42 = vector.broadcast %41 : vector<32x1xf32> to vector<32x128xf32>
    %43 = arith.addf %40, %42 : vector<32x128xf32>
    %cst_29 = arith.constant dense<0.000000e+00> : vector<128x128xf32>
    %44 = tpu.matmul %43, %43, %cst_29 {dimension_numbers = #tpu.dot_dimension_numbers<[0], [0], [1], [1], [0, 1, 1, 1], [], []>} : vector<32x128xf32>, vector<32x128xf32>, vector<128x128xf32> -> vector<128x128xf32>
    %45 = tpu.iota {dimensions = array<i32: 0>} : vector<128x128xi32>
    %46 = tpu.iota {dimensions = array<i32: 1>} : vector<128x128xi32>
    %false = arith.constant false
    %47 = vector.broadcast %false : i1 to vector<128x128xi1>
    %c0_i32 = arith.constant 0 : i32
    %48 = vector.broadcast %c0_i32 : i32 to vector<128x128xi32>
    %49 = arith.cmpi sge, %45, %48 : vector<128x128xi32>
    %c64_i32 = arith.constant 64 : i32
    %50 = vector.broadcast %c64_i32 : i32 to vector<128x128xi32>
    %51 = arith.cmpi slt, %45, %50 : vector<128x128xi32>
    %52 = arith.andi %49, %51 : vector<128x128xi1>
    %c0_i32_30 = arith.constant 0 : i32
    %53 = vector.broadcast %c0_i32_30 : i32 to vector<128x128xi32>
    %54 = arith.cmpi sge, %46, %53 : vector<128x128xi32>
    %55 = arith.andi %52, %54 : vector<128x128xi1>
    %c64_i32_31 = arith.constant 64 : i32
    %56 = vector.broadcast %c64_i32_31 : i32 to vector<128x128xi32>
    %57 = arith.cmpi slt, %46, %56 : vector<128x128xi32>
    %58 = arith.andi %55, %57 : vector<128x128xi1>
    %59 = arith.ori %47, %58 : vector<128x128xi1>
    %c64_i32_32 = arith.constant 64 : i32
    %60 = vector.broadcast %c64_i32_32 : i32 to vector<128x128xi32>
    %61 = arith.cmpi sge, %45, %60 : vector<128x128xi32>
    %c128_i32 = arith.constant 128 : i32
    %62 = vector.broadcast %c128_i32 : i32 to vector<128x128xi32>
    %63 = arith.cmpi slt, %45, %62 : vector<128x128xi32>
    %64 = arith.andi %61, %63 : vector<128x128xi1>
    %c64_i32_33 = arith.constant 64 : i32
    %65 = vector.broadcast %c64_i32_33 : i32 to vector<128x128xi32>
    %66 = arith.cmpi sge, %46, %65 : vector<128x128xi32>
    %67 = arith.andi %64, %66 : vector<128x128xi1>
    %c128_i32_34 = arith.constant 128 : i32
    %68 = vector.broadcast %c128_i32_34 : i32 to vector<128x128xi32>
    %69 = arith.cmpi slt, %46, %68 : vector<128x128xi32>
    %70 = arith.andi %67, %69 : vector<128x128xi1>
    %71 = arith.ori %59, %70 : vector<128x128xi1>
    %cst_35 = arith.constant -1.000000e+30 : f32
    %72 = vector.broadcast %cst_35 : f32 to vector<128x128xf32>
    %73 = arith.select %71, %44, %72 : vector<128x128xi1>, vector<128x128xf32>
    %false_36 = arith.constant false
    %74 = vector.broadcast %false_36 : i1 to vector<128x128xi1>
    %cst_37 = arith.constant dense<0xFF800000> : vector<128xf32>
    %75 = vector.multi_reduction <maximumf>, %73, %cst_37 [1] : vector<128x128xf32> to vector<128xf32>
    %76 = vector.shape_cast %75 : vector<128xf32> to vector<128x1xf32>
    %77 = vector.broadcast %76 : vector<128x1xf32> to vector<128x128xf32>
    %78 = arith.cmpf oeq, %73, %77 : vector<128x128xf32>
    %c128_i32_38 = arith.constant 128 : i32
    %79 = vector.broadcast %c128_i32_38 : i32 to vector<128x128xi32>
    %80 = arith.select %78, %46, %79 : vector<128x128xi1>, vector<128x128xi32>
    %cst_39 = arith.constant dense<2147483647> : vector<128xi32>
    %81 = vector.multi_reduction <minsi>, %80, %cst_39 [1] : vector<128x128xi32> to vector<128xi32>
    %82 = vector.shape_cast %81 : vector<128xi32> to vector<128x1xi32>
    %83 = vector.broadcast %82 : vector<128x1xi32> to vector<128x128xi32>
    %84 = arith.cmpi eq, %46, %83 : vector<128x128xi32>
    %85 = arith.ori %74, %84 : vector<128x128xi1>
    %cst_40 = arith.constant -1.000000e+30 : f32
    %86 = vector.broadcast %cst_40 : f32 to vector<128x128xf32>
    %87 = arith.select %84, %86, %73 : vector<128x128xi1>, vector<128x128xf32>
    %cst_41 = arith.constant dense<0xFF800000> : vector<128xf32>
    %88 = vector.multi_reduction <maximumf>, %87, %cst_41 [1] : vector<128x128xf32> to vector<128xf32>
    %89 = vector.shape_cast %88 : vector<128xf32> to vector<128x1xf32>
    %90 = vector.broadcast %89 : vector<128x1xf32> to vector<128x128xf32>
    %91 = arith.cmpf oeq, %87, %90 : vector<128x128xf32>
    %c128_i32_42 = arith.constant 128 : i32
    %92 = vector.broadcast %c128_i32_42 : i32 to vector<128x128xi32>
    %93 = arith.select %91, %46, %92 : vector<128x128xi1>, vector<128x128xi32>
    %cst_43 = arith.constant dense<2147483647> : vector<128xi32>
    %94 = vector.multi_reduction <minsi>, %93, %cst_43 [1] : vector<128x128xi32> to vector<128xi32>
    %95 = vector.shape_cast %94 : vector<128xi32> to vector<128x1xi32>
    %96 = vector.broadcast %95 : vector<128x1xi32> to vector<128x128xi32>
    %97 = arith.cmpi eq, %46, %96 : vector<128x128xi32>
    %98 = arith.ori %85, %97 : vector<128x128xi1>
    %cst_44 = arith.constant -1.000000e+30 : f32
    %99 = vector.broadcast %cst_44 : f32 to vector<128x128xf32>
    %100 = arith.select %97, %99, %87 : vector<128x128xi1>, vector<128x128xf32>
    %cst_45 = arith.constant dense<0xFF800000> : vector<128xf32>
    %101 = vector.multi_reduction <maximumf>, %100, %cst_45 [1] : vector<128x128xf32> to vector<128xf32>
    %102 = vector.shape_cast %101 : vector<128xf32> to vector<128x1xf32>
    %103 = vector.broadcast %102 : vector<128x1xf32> to vector<128x128xf32>
    %104 = arith.cmpf oeq, %100, %103 : vector<128x128xf32>
    %c128_i32_46 = arith.constant 128 : i32
    %105 = vector.broadcast %c128_i32_46 : i32 to vector<128x128xi32>
    %106 = arith.select %104, %46, %105 : vector<128x128xi1>, vector<128x128xi32>
    %cst_47 = arith.constant dense<2147483647> : vector<128xi32>
    %107 = vector.multi_reduction <minsi>, %106, %cst_47 [1] : vector<128x128xi32> to vector<128xi32>
    %108 = vector.shape_cast %107 : vector<128xi32> to vector<128x1xi32>
    %109 = vector.broadcast %108 : vector<128x1xi32> to vector<128x128xi32>
    %110 = arith.cmpi eq, %46, %109 : vector<128x128xi32>
    %111 = arith.ori %98, %110 : vector<128x128xi1>
    %cst_48 = arith.constant -1.000000e+30 : f32
    %112 = vector.broadcast %cst_48 : f32 to vector<128x128xf32>
    %113 = arith.select %110, %112, %100 : vector<128x128xi1>, vector<128x128xf32>
    %cst_49 = arith.constant dense<0xFF800000> : vector<128xf32>
    %114 = vector.multi_reduction <maximumf>, %113, %cst_49 [1] : vector<128x128xf32> to vector<128xf32>
    %115 = vector.shape_cast %114 : vector<128xf32> to vector<128x1xf32>
    %116 = vector.broadcast %115 : vector<128x1xf32> to vector<128x128xf32>
    %117 = arith.cmpf oeq, %113, %116 : vector<128x128xf32>
    %c128_i32_50 = arith.constant 128 : i32
    %118 = vector.broadcast %c128_i32_50 : i32 to vector<128x128xi32>
    %119 = arith.select %117, %46, %118 : vector<128x128xi1>, vector<128x128xi32>
    %cst_51 = arith.constant dense<2147483647> : vector<128xi32>
    %120 = vector.multi_reduction <minsi>, %119, %cst_51 [1] : vector<128x128xi32> to vector<128xi32>
    %121 = vector.shape_cast %120 : vector<128xi32> to vector<128x1xi32>
    %122 = vector.broadcast %121 : vector<128x1xi32> to vector<128x128xi32>
    %123 = arith.cmpi eq, %46, %122 : vector<128x128xi32>
    %124 = arith.ori %111, %123 : vector<128x128xi1>
    %cst_52 = arith.constant -1.000000e+30 : f32
    %125 = vector.broadcast %cst_52 : f32 to vector<128x128xf32>
    %126 = arith.select %123, %125, %113 : vector<128x128xi1>, vector<128x128xf32>
    %cst_53 = arith.constant dense<0xFF800000> : vector<128xf32>
    %127 = vector.multi_reduction <maximumf>, %126, %cst_53 [1] : vector<128x128xf32> to vector<128xf32>
    %128 = vector.shape_cast %127 : vector<128xf32> to vector<128x1xf32>
    %129 = vector.broadcast %128 : vector<128x1xf32> to vector<128x128xf32>
    %130 = arith.cmpf oeq, %126, %129 : vector<128x128xf32>
    %c128_i32_54 = arith.constant 128 : i32
    %131 = vector.broadcast %c128_i32_54 : i32 to vector<128x128xi32>
    %132 = arith.select %130, %46, %131 : vector<128x128xi1>, vector<128x128xi32>
    %cst_55 = arith.constant dense<2147483647> : vector<128xi32>
    %133 = vector.multi_reduction <minsi>, %132, %cst_55 [1] : vector<128x128xi32> to vector<128xi32>
    %134 = vector.shape_cast %133 : vector<128xi32> to vector<128x1xi32>
    %135 = vector.broadcast %134 : vector<128x1xi32> to vector<128x128xi32>
    %136 = arith.cmpi eq, %46, %135 : vector<128x128xi32>
    %137 = arith.ori %124, %136 : vector<128x128xi1>
    %cst_56 = arith.constant -1.000000e+30 : f32
    %138 = vector.broadcast %cst_56 : f32 to vector<128x128xf32>
    %139 = arith.select %136, %138, %126 : vector<128x128xi1>, vector<128x128xf32>
    %cst_57 = arith.constant dense<0xFF800000> : vector<128xf32>
    %140 = vector.multi_reduction <maximumf>, %139, %cst_57 [1] : vector<128x128xf32> to vector<128xf32>
    %141 = vector.shape_cast %140 : vector<128xf32> to vector<128x1xf32>
    %142 = vector.broadcast %141 : vector<128x1xf32> to vector<128x128xf32>
    %143 = arith.cmpf oeq, %139, %142 : vector<128x128xf32>
    %c128_i32_58 = arith.constant 128 : i32
    %144 = vector.broadcast %c128_i32_58 : i32 to vector<128x128xi32>
    %145 = arith.select %143, %46, %144 : vector<128x128xi1>, vector<128x128xi32>
    %cst_59 = arith.constant dense<2147483647> : vector<128xi32>
    %146 = vector.multi_reduction <minsi>, %145, %cst_59 [1] : vector<128x128xi32> to vector<128xi32>
    %147 = vector.shape_cast %146 : vector<128xi32> to vector<128x1xi32>
    %148 = vector.broadcast %147 : vector<128x1xi32> to vector<128x128xi32>
    %149 = arith.cmpi eq, %46, %148 : vector<128x128xi32>
    %150 = arith.ori %137, %149 : vector<128x128xi1>
    %cst_60 = arith.constant -1.000000e+30 : f32
    %151 = vector.broadcast %cst_60 : f32 to vector<128x128xf32>
    %152 = arith.select %149, %151, %139 : vector<128x128xi1>, vector<128x128xf32>
    %cst_61 = arith.constant dense<0xFF800000> : vector<128xf32>
    %153 = vector.multi_reduction <maximumf>, %152, %cst_61 [1] : vector<128x128xf32> to vector<128xf32>
    %154 = vector.shape_cast %153 : vector<128xf32> to vector<128x1xf32>
    %155 = vector.broadcast %154 : vector<128x1xf32> to vector<128x128xf32>
    %156 = arith.cmpf oeq, %152, %155 : vector<128x128xf32>
    %c128_i32_62 = arith.constant 128 : i32
    %157 = vector.broadcast %c128_i32_62 : i32 to vector<128x128xi32>
    %158 = arith.select %156, %46, %157 : vector<128x128xi1>, vector<128x128xi32>
    %cst_63 = arith.constant dense<2147483647> : vector<128xi32>
    %159 = vector.multi_reduction <minsi>, %158, %cst_63 [1] : vector<128x128xi32> to vector<128xi32>
    %160 = vector.shape_cast %159 : vector<128xi32> to vector<128x1xi32>
    %161 = vector.broadcast %160 : vector<128x1xi32> to vector<128x128xi32>
    %162 = arith.cmpi eq, %46, %161 : vector<128x128xi32>
    %163 = arith.ori %150, %162 : vector<128x128xi1>
    %cst_64 = arith.constant -1.000000e+30 : f32
    %164 = vector.broadcast %cst_64 : f32 to vector<128x128xf32>
    %165 = arith.select %162, %164, %152 : vector<128x128xi1>, vector<128x128xf32>
    %cst_65 = arith.constant dense<0xFF800000> : vector<128xf32>
    %166 = vector.multi_reduction <maximumf>, %165, %cst_65 [1] : vector<128x128xf32> to vector<128xf32>
    %167 = vector.shape_cast %166 : vector<128xf32> to vector<128x1xf32>
    %168 = vector.broadcast %167 : vector<128x1xf32> to vector<128x128xf32>
    %169 = arith.cmpf oeq, %165, %168 : vector<128x128xf32>
    %c128_i32_66 = arith.constant 128 : i32
    %170 = vector.broadcast %c128_i32_66 : i32 to vector<128x128xi32>
    %171 = arith.select %169, %46, %170 : vector<128x128xi1>, vector<128x128xi32>
    %cst_67 = arith.constant dense<2147483647> : vector<128xi32>
    %172 = vector.multi_reduction <minsi>, %171, %cst_67 [1] : vector<128x128xi32> to vector<128xi32>
    %173 = vector.shape_cast %172 : vector<128xi32> to vector<128x1xi32>
    %174 = vector.broadcast %173 : vector<128x1xi32> to vector<128x128xi32>
    %175 = arith.cmpi eq, %46, %174 : vector<128x128xi32>
    %176 = arith.ori %163, %175 : vector<128x128xi1>
    %c0_68 = arith.constant 0 : index
    %c0_69 = arith.constant 0 : index
    %177 = vector.load %arg9[%c0_68, %c0_69] : memref<128x32xbf16, #tpu.memory_space<vmem>>, vector<128x32xbf16>
    %c0_70 = arith.constant 0 : index
    %c0_71 = arith.constant 0 : index
    %178 = vector.load %arg10[%c0_70, %c0_71] : memref<128x8xbf16, #tpu.memory_space<vmem>>, vector<128x8xbf16>
    %c0_72 = arith.constant 0 : index
    %c0_73 = arith.constant 0 : index
    %179 = vector.load %arg11[%c0_72, %c0_73] : memref<128x1xf32, #tpu.memory_space<vmem>>, vector<128x1xf32>
    %180 = arith.truncf %37 : vector<32x128xf32> to vector<32x128xbf16>
    %cst_74 = arith.constant dense<0.000000e+00> : vector<128x128xf32>
    %181 = tpu.matmul %177, %180, %cst_74 {dimension_numbers = #tpu.dot_dimension_numbers<[1], [0], [0], [1], [0, 0, 1, 1], [], []>} : vector<128x32xbf16>, vector<32x128xbf16>, vector<128x128xf32> -> vector<128x128xf32>
    %182 = arith.truncf %181 : vector<128x128xf32> to vector<128x128xbf16>
    %cst_75 = arith.constant dense<0.000000e+00> : vector<128x8xf32>
    %183 = tpu.matmul %182, %178, %cst_75 {dimension_numbers = #tpu.dot_dimension_numbers<[0], [0], [1], [1], [0, 1, 1, 1], [], []>} : vector<128x128xbf16>, vector<128x8xbf16>, vector<128x8xf32> -> vector<128x8xf32>
    %184 = arith.truncf %181 : vector<128x128xf32> to vector<128x128xbf16>
    %cst_76 = arith.constant dense<0.000000e+00> : vector<8x128xf32>
    %185 = tpu.matmul %178, %184, %cst_76 {dimension_numbers = #tpu.dot_dimension_numbers<[0], [0], [1], [1], [0, 1, 1, 1], [], []>} : vector<128x8xbf16>, vector<128x128xbf16>, vector<8x128xf32> -> vector<8x128xf32>
    %186 = vector.extract_strided_slice %183 {offsets = [0, 1], sizes = [128, 1], strides = [1, 1]} : vector<128x8xf32> to vector<128x1xf32>
    %187 = vector.extract_strided_slice %185 {offsets = [0, 0], sizes = [1, 128], strides = [1, 1]} : vector<8x128xf32> to vector<1x128xf32>
    %188 = vector.broadcast %186 : vector<128x1xf32> to vector<128x128xf32>
    %189 = vector.broadcast %187 : vector<1x128xf32> to vector<128x128xf32>
    %190 = arith.addf %188, %189 : vector<128x128xf32>
    %cst_77 = arith.constant 0.000000e+00 : f32
    %191 = vector.broadcast %cst_77 : f32 to vector<128x128xf32>
    %192 = arith.cmpf oge, %190, %191 : vector<128x128xf32>
    %cst_78 = arith.constant 2.000000e-01 : f32
    %193 = vector.broadcast %cst_78 : f32 to vector<128x128xf32>
    %194 = arith.mulf %193, %190 : vector<128x128xf32>
    %195 = arith.select %192, %190, %194 : vector<128x128xi1>, vector<128x128xf32>
    %cst_79 = arith.constant -1.000000e+30 : f32
    %196 = vector.broadcast %cst_79 : f32 to vector<128x128xf32>
    %197 = arith.select %176, %195, %196 : vector<128x128xi1>, vector<128x128xf32>
    %cst_80 = arith.constant dense<0xFF800000> : vector<128xf32>
    %198 = vector.multi_reduction <maximumf>, %197, %cst_80 [1] : vector<128x128xf32> to vector<128xf32>
    %199 = vector.shape_cast %198 : vector<128xf32> to vector<128x1xf32>
    %200 = vector.broadcast %199 : vector<128x1xf32> to vector<128x128xf32>
    %201 = arith.subf %197, %200 : vector<128x128xf32>
    %202 = math.exp %201 : vector<128x128xf32>
    %cst_81 = arith.constant dense<0.000000e+00> : vector<128xf32>
    %203 = vector.multi_reduction <add>, %202, %cst_81 [1] : vector<128x128xf32> to vector<128xf32>
    %204 = vector.shape_cast %203 : vector<128xf32> to vector<128x1xf32>
    %cst_82 = arith.constant 1.000000e-16 : f32
    %205 = vector.broadcast %cst_82 : f32 to vector<128x1xf32>
    %206 = arith.addf %204, %205 : vector<128x1xf32>
    %207 = tpu.reciprocal %206 {approx = true} : vector<128x1xf32> -> vector<128x1xf32>
    %208 = vector.broadcast %207 : vector<128x1xf32> to vector<128x128xf32>
    %209 = arith.mulf %202, %208 : vector<128x128xf32>
    %210 = vector.extract_strided_slice %181 {offsets = [0, 0], sizes = [32, 128], strides = [1, 1]} : vector<128x128xf32> to vector<32x128xf32>
    %211 = arith.truncf %210 : vector<32x128xf32> to vector<32x128xbf16>
    %212 = arith.truncf %209 : vector<128x128xf32> to vector<128x128xbf16>
    %cst_83 = arith.constant dense<0.000000e+00> : vector<32x128xf32>
    %213 = tpu.matmul %211, %212, %cst_83 {dimension_numbers = #tpu.dot_dimension_numbers<[1], [1], [0], [0], [0, 0, 1, 0], [], []>} : vector<32x128xbf16>, vector<128x128xbf16>, vector<32x128xf32> -> vector<32x128xf32>
    %214 = vector.extract_strided_slice %183 {offsets = [0, 3], sizes = [128, 1], strides = [1, 1]} : vector<128x8xf32> to vector<128x1xf32>
    %215 = vector.extract_strided_slice %185 {offsets = [2, 0], sizes = [1, 128], strides = [1, 1]} : vector<8x128xf32> to vector<1x128xf32>
    %216 = vector.broadcast %214 : vector<128x1xf32> to vector<128x128xf32>
    %217 = vector.broadcast %215 : vector<1x128xf32> to vector<128x128xf32>
    %218 = arith.addf %216, %217 : vector<128x128xf32>
    %cst_84 = arith.constant 0.000000e+00 : f32
    %219 = vector.broadcast %cst_84 : f32 to vector<128x128xf32>
    %220 = arith.cmpf oge, %218, %219 : vector<128x128xf32>
    %cst_85 = arith.constant 2.000000e-01 : f32
    %221 = vector.broadcast %cst_85 : f32 to vector<128x128xf32>
    %222 = arith.mulf %221, %218 : vector<128x128xf32>
    %223 = arith.select %220, %218, %222 : vector<128x128xi1>, vector<128x128xf32>
    %cst_86 = arith.constant -1.000000e+30 : f32
    %224 = vector.broadcast %cst_86 : f32 to vector<128x128xf32>
    %225 = arith.select %176, %223, %224 : vector<128x128xi1>, vector<128x128xf32>
    %cst_87 = arith.constant dense<0xFF800000> : vector<128xf32>
    %226 = vector.multi_reduction <maximumf>, %225, %cst_87 [1] : vector<128x128xf32> to vector<128xf32>
    %227 = vector.shape_cast %226 : vector<128xf32> to vector<128x1xf32>
    %228 = vector.broadcast %227 : vector<128x1xf32> to vector<128x128xf32>
    %229 = arith.subf %225, %228 : vector<128x128xf32>
    %230 = math.exp %229 : vector<128x128xf32>
    %cst_88 = arith.constant dense<0.000000e+00> : vector<128xf32>
    %231 = vector.multi_reduction <add>, %230, %cst_88 [1] : vector<128x128xf32> to vector<128xf32>
    %232 = vector.shape_cast %231 : vector<128xf32> to vector<128x1xf32>
    %cst_89 = arith.constant 1.000000e-16 : f32
    %233 = vector.broadcast %cst_89 : f32 to vector<128x1xf32>
    %234 = arith.addf %232, %233 : vector<128x1xf32>
    %235 = tpu.reciprocal %234 {approx = true} : vector<128x1xf32> -> vector<128x1xf32>
    %236 = vector.broadcast %235 : vector<128x1xf32> to vector<128x128xf32>
    %237 = arith.mulf %230, %236 : vector<128x128xf32>
    %238 = vector.extract_strided_slice %181 {offsets = [32, 0], sizes = [32, 128], strides = [1, 1]} : vector<128x128xf32> to vector<32x128xf32>
    %239 = arith.truncf %238 : vector<32x128xf32> to vector<32x128xbf16>
    %240 = arith.truncf %237 : vector<128x128xf32> to vector<128x128xbf16>
    %cst_90 = arith.constant dense<0.000000e+00> : vector<32x128xf32>
    %241 = tpu.matmul %239, %240, %cst_90 {dimension_numbers = #tpu.dot_dimension_numbers<[1], [1], [0], [0], [0, 0, 1, 0], [], []>} : vector<32x128xbf16>, vector<128x128xbf16>, vector<32x128xf32> -> vector<32x128xf32>
    %242 = vector.extract_strided_slice %183 {offsets = [0, 5], sizes = [128, 1], strides = [1, 1]} : vector<128x8xf32> to vector<128x1xf32>
    %243 = vector.extract_strided_slice %185 {offsets = [4, 0], sizes = [1, 128], strides = [1, 1]} : vector<8x128xf32> to vector<1x128xf32>
    %244 = vector.broadcast %242 : vector<128x1xf32> to vector<128x128xf32>
    %245 = vector.broadcast %243 : vector<1x128xf32> to vector<128x128xf32>
    %246 = arith.addf %244, %245 : vector<128x128xf32>
    %cst_91 = arith.constant 0.000000e+00 : f32
    %247 = vector.broadcast %cst_91 : f32 to vector<128x128xf32>
    %248 = arith.cmpf oge, %246, %247 : vector<128x128xf32>
    %cst_92 = arith.constant 2.000000e-01 : f32
    %249 = vector.broadcast %cst_92 : f32 to vector<128x128xf32>
    %250 = arith.mulf %249, %246 : vector<128x128xf32>
    %251 = arith.select %248, %246, %250 : vector<128x128xi1>, vector<128x128xf32>
    %cst_93 = arith.constant -1.000000e+30 : f32
    %252 = vector.broadcast %cst_93 : f32 to vector<128x128xf32>
    %253 = arith.select %176, %251, %252 : vector<128x128xi1>, vector<128x128xf32>
    %cst_94 = arith.constant dense<0xFF800000> : vector<128xf32>
    %254 = vector.multi_reduction <maximumf>, %253, %cst_94 [1] : vector<128x128xf32> to vector<128xf32>
    %255 = vector.shape_cast %254 : vector<128xf32> to vector<128x1xf32>
    %256 = vector.broadcast %255 : vector<128x1xf32> to vector<128x128xf32>
    %257 = arith.subf %253, %256 : vector<128x128xf32>
    %258 = math.exp %257 : vector<128x128xf32>
    %cst_95 = arith.constant dense<0.000000e+00> : vector<128xf32>
    %259 = vector.multi_reduction <add>, %258, %cst_95 [1] : vector<128x128xf32> to vector<128xf32>
    %260 = vector.shape_cast %259 : vector<128xf32> to vector<128x1xf32>
    %cst_96 = arith.constant 1.000000e-16 : f32
    %261 = vector.broadcast %cst_96 : f32 to vector<128x1xf32>
    %262 = arith.addf %260, %261 : vector<128x1xf32>
    %263 = tpu.reciprocal %262 {approx = true} : vector<128x1xf32> -> vector<128x1xf32>
    %264 = vector.broadcast %263 : vector<128x1xf32> to vector<128x128xf32>
    %265 = arith.mulf %258, %264 : vector<128x128xf32>
    %266 = vector.extract_strided_slice %181 {offsets = [64, 0], sizes = [32, 128], strides = [1, 1]} : vector<128x128xf32> to vector<32x128xf32>
    %267 = arith.truncf %266 : vector<32x128xf32> to vector<32x128xbf16>
    %268 = arith.truncf %265 : vector<128x128xf32> to vector<128x128xbf16>
    %cst_97 = arith.constant dense<0.000000e+00> : vector<32x128xf32>
    %269 = tpu.matmul %267, %268, %cst_97 {dimension_numbers = #tpu.dot_dimension_numbers<[1], [1], [0], [0], [0, 0, 1, 0], [], []>} : vector<32x128xbf16>, vector<128x128xbf16>, vector<32x128xf32> -> vector<32x128xf32>
    %270 = vector.extract_strided_slice %183 {offsets = [0, 7], sizes = [128, 1], strides = [1, 1]} : vector<128x8xf32> to vector<128x1xf32>
    %271 = vector.extract_strided_slice %185 {offsets = [6, 0], sizes = [1, 128], strides = [1, 1]} : vector<8x128xf32> to vector<1x128xf32>
    %272 = vector.broadcast %270 : vector<128x1xf32> to vector<128x128xf32>
    %273 = vector.broadcast %271 : vector<1x128xf32> to vector<128x128xf32>
    %274 = arith.addf %272, %273 : vector<128x128xf32>
    %cst_98 = arith.constant 0.000000e+00 : f32
    %275 = vector.broadcast %cst_98 : f32 to vector<128x128xf32>
    %276 = arith.cmpf oge, %274, %275 : vector<128x128xf32>
    %cst_99 = arith.constant 2.000000e-01 : f32
    %277 = vector.broadcast %cst_99 : f32 to vector<128x128xf32>
    %278 = arith.mulf %277, %274 : vector<128x128xf32>
    %279 = arith.select %276, %274, %278 : vector<128x128xi1>, vector<128x128xf32>
    %cst_100 = arith.constant -1.000000e+30 : f32
    %280 = vector.broadcast %cst_100 : f32 to vector<128x128xf32>
    %281 = arith.select %176, %279, %280 : vector<128x128xi1>, vector<128x128xf32>
    %cst_101 = arith.constant dense<0xFF800000> : vector<128xf32>
    %282 = vector.multi_reduction <maximumf>, %281, %cst_101 [1] : vector<128x128xf32> to vector<128xf32>
    %283 = vector.shape_cast %282 : vector<128xf32> to vector<128x1xf32>
    %284 = vector.broadcast %283 : vector<128x1xf32> to vector<128x128xf32>
    %285 = arith.subf %281, %284 : vector<128x128xf32>
    %286 = math.exp %285 : vector<128x128xf32>
    %cst_102 = arith.constant dense<0.000000e+00> : vector<128xf32>
    %287 = vector.multi_reduction <add>, %286, %cst_102 [1] : vector<128x128xf32> to vector<128xf32>
    %288 = vector.shape_cast %287 : vector<128xf32> to vector<128x1xf32>
    %cst_103 = arith.constant 1.000000e-16 : f32
    %289 = vector.broadcast %cst_103 : f32 to vector<128x1xf32>
    %290 = arith.addf %288, %289 : vector<128x1xf32>
    %291 = tpu.reciprocal %290 {approx = true} : vector<128x1xf32> -> vector<128x1xf32>
    %292 = vector.broadcast %291 : vector<128x1xf32> to vector<128x128xf32>
    %293 = arith.mulf %286, %292 : vector<128x128xf32>
    %294 = vector.extract_strided_slice %181 {offsets = [96, 0], sizes = [32, 128], strides = [1, 1]} : vector<128x128xf32> to vector<32x128xf32>
    %295 = arith.truncf %294 : vector<32x128xf32> to vector<32x128xbf16>
    %296 = arith.truncf %293 : vector<128x128xf32> to vector<128x128xbf16>
    %cst_104 = arith.constant dense<0.000000e+00> : vector<32x128xf32>
    %297 = tpu.matmul %295, %296, %cst_104 {dimension_numbers = #tpu.dot_dimension_numbers<[1], [1], [0], [0], [0, 0, 1, 0], [], []>} : vector<32x128xbf16>, vector<128x128xbf16>, vector<32x128xf32> -> vector<32x128xf32>
    %298 = tpu.concatenate %213, %241, %269, %297 in 0 : vector<32x128xf32>, vector<32x128xf32>, vector<32x128xf32>, vector<32x128xf32> -> vector<128x128xf32>
    %299 = vector.broadcast %179 : vector<128x1xf32> to vector<128x128xf32>
    %300 = arith.addf %298, %299 : vector<128x128xf32>
    %cst_105 = arith.constant 0.000000e+00 : f32
    %301 = vector.broadcast %cst_105 : f32 to vector<128x128xf32>
    %302 = arith.cmpf ogt, %300, %301 : vector<128x128xf32>
    %cst_106 = arith.constant 0.000000e+00 : f32
    %303 = vector.broadcast %cst_106 : f32 to vector<128x128xf32>
    %304 = arith.minimumf %300, %303 : vector<128x128xf32>
    %305 = math.exp %304 : vector<128x128xf32>
    %cst_107 = arith.constant 1.000000e+00 : f32
    %306 = vector.broadcast %cst_107 : f32 to vector<128x128xf32>
    %307 = arith.subf %305, %306 : vector<128x128xf32>
    %308 = arith.select %302, %300, %307 : vector<128x128xi1>, vector<128x128xf32>
    %c0_108 = arith.constant 0 : index
    %c0_109 = arith.constant 0 : index
    %309 = vector.load %arg12[%c0_108, %c0_109] : memref<32x128xbf16, #tpu.memory_space<vmem>>, vector<32x128xbf16>
    %c0_110 = arith.constant 0 : index
    %c0_111 = arith.constant 0 : index
    %310 = vector.load %arg13[%c0_110, %c0_111] : memref<32x2xbf16, #tpu.memory_space<vmem>>, vector<32x2xbf16>
    %c0_112 = arith.constant 0 : index
    %c0_113 = arith.constant 0 : index
    %311 = vector.load %arg14[%c0_112, %c0_113] : memref<32x1xf32, #tpu.memory_space<vmem>>, vector<32x1xf32>
    %312 = arith.truncf %308 : vector<128x128xf32> to vector<128x128xbf16>
    %cst_114 = arith.constant dense<0.000000e+00> : vector<32x128xf32>
    %313 = tpu.matmul %309, %312, %cst_114 {dimension_numbers = #tpu.dot_dimension_numbers<[1], [0], [0], [1], [0, 0, 1, 1], [], []>} : vector<32x128xbf16>, vector<128x128xbf16>, vector<32x128xf32> -> vector<32x128xf32>
    %314 = arith.truncf %313 : vector<32x128xf32> to vector<32x128xbf16>
    %cst_115 = arith.constant dense<0.000000e+00> : vector<128x2xf32>
    %315 = tpu.matmul %314, %310, %cst_115 {dimension_numbers = #tpu.dot_dimension_numbers<[0], [0], [1], [1], [0, 1, 1, 1], [], []>} : vector<32x128xbf16>, vector<32x2xbf16>, vector<128x2xf32> -> vector<128x2xf32>
    %316 = arith.truncf %313 : vector<32x128xf32> to vector<32x128xbf16>
    %cst_116 = arith.constant dense<0.000000e+00> : vector<2x128xf32>
    %317 = tpu.matmul %310, %316, %cst_116 {dimension_numbers = #tpu.dot_dimension_numbers<[0], [0], [1], [1], [0, 1, 1, 1], [], []>} : vector<32x2xbf16>, vector<32x128xbf16>, vector<2x128xf32> -> vector<2x128xf32>
    %318 = vector.extract_strided_slice %315 {offsets = [0, 1], sizes = [128, 1], strides = [1, 1]} : vector<128x2xf32> to vector<128x1xf32>
    %319 = vector.extract_strided_slice %317 {offsets = [0, 0], sizes = [1, 128], strides = [1, 1]} : vector<2x128xf32> to vector<1x128xf32>
    %320 = vector.broadcast %318 : vector<128x1xf32> to vector<128x128xf32>
    %321 = vector.broadcast %319 : vector<1x128xf32> to vector<128x128xf32>
    %322 = arith.addf %320, %321 : vector<128x128xf32>
    %cst_117 = arith.constant 0.000000e+00 : f32
    %323 = vector.broadcast %cst_117 : f32 to vector<128x128xf32>
    %324 = arith.cmpf oge, %322, %323 : vector<128x128xf32>
    %cst_118 = arith.constant 2.000000e-01 : f32
    %325 = vector.broadcast %cst_118 : f32 to vector<128x128xf32>
    %326 = arith.mulf %325, %322 : vector<128x128xf32>
    %327 = arith.select %324, %322, %326 : vector<128x128xi1>, vector<128x128xf32>
    %cst_119 = arith.constant -1.000000e+30 : f32
    %328 = vector.broadcast %cst_119 : f32 to vector<128x128xf32>
    %329 = arith.select %176, %327, %328 : vector<128x128xi1>, vector<128x128xf32>
    %cst_120 = arith.constant dense<0xFF800000> : vector<128xf32>
    %330 = vector.multi_reduction <maximumf>, %329, %cst_120 [1] : vector<128x128xf32> to vector<128xf32>
    %331 = vector.shape_cast %330 : vector<128xf32> to vector<128x1xf32>
    %332 = vector.broadcast %331 : vector<128x1xf32> to vector<128x128xf32>
    %333 = arith.subf %329, %332 : vector<128x128xf32>
    %334 = math.exp %333 : vector<128x128xf32>
    %cst_121 = arith.constant dense<0.000000e+00> : vector<128xf32>
    %335 = vector.multi_reduction <add>, %334, %cst_121 [1] : vector<128x128xf32> to vector<128xf32>
    %336 = vector.shape_cast %335 : vector<128xf32> to vector<128x1xf32>
    %cst_122 = arith.constant 1.000000e-16 : f32
    %337 = vector.broadcast %cst_122 : f32 to vector<128x1xf32>
    %338 = arith.addf %336, %337 : vector<128x1xf32>
    %339 = tpu.reciprocal %338 {approx = true} : vector<128x1xf32> -> vector<128x1xf32>
    %340 = vector.broadcast %339 : vector<128x1xf32> to vector<128x128xf32>
    %341 = arith.mulf %334, %340 : vector<128x128xf32>
    %342 = arith.truncf %313 : vector<32x128xf32> to vector<32x128xbf16>
    %343 = arith.truncf %341 : vector<128x128xf32> to vector<128x128xbf16>
    %cst_123 = arith.constant dense<0.000000e+00> : vector<32x128xf32>
    %344 = tpu.matmul %342, %343, %cst_123 {dimension_numbers = #tpu.dot_dimension_numbers<[1], [1], [0], [0], [0, 0, 1, 0], [], []>} : vector<32x128xbf16>, vector<128x128xbf16>, vector<32x128xf32> -> vector<32x128xf32>
    %cst_124 = arith.constant 1.000000e+00 : f32
    %345 = vector.broadcast %cst_124 : f32 to vector<32x128xf32>
    %346 = arith.mulf %344, %345 : vector<32x128xf32>
    %347 = vector.broadcast %311 : vector<32x1xf32> to vector<32x128xf32>
    %348 = arith.addf %346, %347 : vector<32x128xf32>
    %c0_125 = arith.constant 0 : index
    %c0_126 = arith.constant 0 : index
    %349 = vector.load %arg15[%c0_125, %c0_126] : memref<64x32xbf16, #tpu.memory_space<vmem>>, vector<64x32xbf16>
    %350 = arith.truncf %348 : vector<32x128xf32> to vector<32x128xbf16>
    %cst_127 = arith.constant dense<0.000000e+00> : vector<64x128xf32>
    %351 = tpu.matmul %349, %350, %cst_127 {dimension_numbers = #tpu.dot_dimension_numbers<[1], [0], [0], [1], [0, 0, 1, 1], [], []>} : vector<64x32xbf16>, vector<32x128xbf16>, vector<64x128xf32> -> vector<64x128xf32>
    %c0_128 = arith.constant 0 : index
    %c0_129 = arith.constant 0 : index
    %352 = vector.load %arg16[%c0_128, %c0_129] : memref<64x1xf32, #tpu.memory_space<vmem>>, vector<64x1xf32>
    %353 = vector.broadcast %352 : vector<64x1xf32> to vector<64x128xf32>
    %354 = arith.addf %351, %353 : vector<64x128xf32>
    %cst_130 = arith.constant 0.000000e+00 : f32
    %355 = vector.broadcast %cst_130 : f32 to vector<64x128xf32>
    %356 = arith.maximumf %354, %355 : vector<64x128xf32>
    %c0_131 = arith.constant 0 : index
    %c0_132 = arith.constant 0 : index
    %357 = vector.load %arg17[%c0_131, %c0_132] : memref<32x64xbf16, #tpu.memory_space<vmem>>, vector<32x64xbf16>
    %358 = arith.truncf %356 : vector<64x128xf32> to vector<64x128xbf16>
    %cst_133 = arith.constant dense<0.000000e+00> : vector<32x128xf32>
    %359 = tpu.matmul %357, %358, %cst_133 {dimension_numbers = #tpu.dot_dimension_numbers<[1], [0], [0], [1], [0, 0, 1, 1], [], []>} : vector<32x64xbf16>, vector<64x128xbf16>, vector<32x128xf32> -> vector<32x128xf32>
    %c0_134 = arith.constant 0 : index
    %c0_135 = arith.constant 0 : index
    %360 = vector.load %arg18[%c0_134, %c0_135] : memref<32x1xf32, #tpu.memory_space<vmem>>, vector<32x1xf32>
    %361 = vector.broadcast %360 : vector<32x1xf32> to vector<32x128xf32>
    %362 = arith.addf %359, %361 : vector<32x128xf32>
    %cst_136 = arith.constant 0.000000e+00 : f32
    %363 = vector.broadcast %cst_136 : f32 to vector<32x128xf32>
    %364 = arith.maximumf %362, %363 : vector<32x128xf32>
    %365 = arith.truncf %364 : vector<32x128xf32> to vector<32x128xbf16>
    %366 = tpu.concatenate %0, %365 in 0 : vector<32x128xbf16>, vector<32x128xbf16> -> vector<64x128xbf16>
    %c0_137 = arith.constant 0 : index
    %c0_138 = arith.constant 0 : index
    %367 = vector.load %arg19[%c0_137, %c0_138] : memref<64x64xbf16, #tpu.memory_space<vmem>>, vector<64x64xbf16>
    %cst_139 = arith.constant dense<0.000000e+00> : vector<64x128xf32>
    %368 = tpu.matmul %367, %366, %cst_139 {dimension_numbers = #tpu.dot_dimension_numbers<[1], [0], [0], [1], [0, 0, 1, 1], [], []>} : vector<64x64xbf16>, vector<64x128xbf16>, vector<64x128xf32> -> vector<64x128xf32>
    %c0_140 = arith.constant 0 : index
    %c0_141 = arith.constant 0 : index
    %369 = vector.load %arg20[%c0_140, %c0_141] : memref<64x1xf32, #tpu.memory_space<vmem>>, vector<64x1xf32>
    %370 = vector.broadcast %369 : vector<64x1xf32> to vector<64x128xf32>
    %371 = arith.addf %368, %370 : vector<64x128xf32>
    %cst_142 = arith.constant 0.000000e+00 : f32
    %372 = vector.broadcast %cst_142 : f32 to vector<64x128xf32>
    %373 = arith.maximumf %371, %372 : vector<64x128xf32>
    %c0_143 = arith.constant 0 : index
    %c0_144 = arith.constant 0 : index
    %374 = vector.load %arg21[%c0_143, %c0_144] : memref<32x64xbf16, #tpu.memory_space<vmem>>, vector<32x64xbf16>
    %375 = arith.truncf %373 : vector<64x128xf32> to vector<64x128xbf16>
    %cst_145 = arith.constant dense<0.000000e+00> : vector<32x128xf32>
    %376 = tpu.matmul %374, %375, %cst_145 {dimension_numbers = #tpu.dot_dimension_numbers<[1], [0], [0], [1], [0, 0, 1, 1], [], []>} : vector<32x64xbf16>, vector<64x128xbf16>, vector<32x128xf32> -> vector<32x128xf32>
    %c0_146 = arith.constant 0 : index
    %c0_147 = arith.constant 0 : index
    %377 = vector.load %arg22[%c0_146, %c0_147] : memref<32x1xf32, #tpu.memory_space<vmem>>, vector<32x1xf32>
    %378 = vector.broadcast %377 : vector<32x1xf32> to vector<32x128xf32>
    %379 = arith.addf %376, %378 : vector<32x128xf32>
    %cst_148 = arith.constant 0.000000e+00 : f32
    %380 = vector.broadcast %cst_148 : f32 to vector<32x128xf32>
    %381 = arith.maximumf %379, %380 : vector<32x128xf32>
    %c0_149 = arith.constant 0 : index
    %c0_150 = arith.constant 0 : index
    %382 = vector.load %arg23[%c0_149, %c0_150] : memref<32x32xbf16, #tpu.memory_space<vmem>>, vector<32x32xbf16>
    %383 = arith.truncf %381 : vector<32x128xf32> to vector<32x128xbf16>
    %cst_151 = arith.constant dense<0.000000e+00> : vector<32x128xf32>
    %384 = tpu.matmul %382, %383, %cst_151 {dimension_numbers = #tpu.dot_dimension_numbers<[1], [0], [0], [1], [0, 0, 1, 1], [], []>} : vector<32x32xbf16>, vector<32x128xbf16>, vector<32x128xf32> -> vector<32x128xf32>
    %c0_152 = arith.constant 0 : index
    %c0_153 = arith.constant 0 : index
    %385 = vector.load %arg24[%c0_152, %c0_153] : memref<32x1xf32, #tpu.memory_space<vmem>>, vector<32x1xf32>
    %386 = vector.broadcast %385 : vector<32x1xf32> to vector<32x128xf32>
    %387 = arith.addf %384, %386 : vector<32x128xf32>
    %cst_154 = arith.constant 0.000000e+00 : f32
    %388 = vector.broadcast %cst_154 : f32 to vector<32x128xf32>
    %389 = arith.maximumf %387, %388 : vector<32x128xf32>
    %c0_155 = arith.constant 0 : index
    %c0_156 = arith.constant 0 : index
    %390 = vector.load %arg25[%c0_155, %c0_156] : memref<32x32xbf16, #tpu.memory_space<vmem>>, vector<32x32xbf16>
    %391 = arith.truncf %389 : vector<32x128xf32> to vector<32x128xbf16>
    %cst_157 = arith.constant dense<0.000000e+00> : vector<32x128xf32>
    %392 = tpu.matmul %390, %391, %cst_157 {dimension_numbers = #tpu.dot_dimension_numbers<[1], [0], [0], [1], [0, 0, 1, 1], [], []>} : vector<32x32xbf16>, vector<32x128xbf16>, vector<32x128xf32> -> vector<32x128xf32>
    %c0_158 = arith.constant 0 : index
    %c0_159 = arith.constant 0 : index
    %393 = vector.load %arg26[%c0_158, %c0_159] : memref<32x1xf32, #tpu.memory_space<vmem>>, vector<32x1xf32>
    %394 = vector.broadcast %393 : vector<32x1xf32> to vector<32x128xf32>
    %395 = arith.addf %392, %394 : vector<32x128xf32>
    %c0_160 = arith.constant 0 : index
    %c0_161 = arith.constant 0 : index
    %396 = vector.load %arg28[%c0_160, %c0_161] : memref<32x128xf32, #tpu.memory_space<vmem>>, vector<32x128xf32>
    tpu.vector_store %arg28[%c0_160, %c0_161], %395 {strides = array<i32>} : memref<32x128xf32, #tpu.memory_space<vmem>>, vector<32x128xf32>,
    return
  }
}

</mosaic_0001>

<bundles_post_ra>
// kernel: graph_relation_forward.1
= control target key start
LH: loop header
LB: loop body
LE: loop exit
PB: predicated region body
PF: predicated region fallthrough
CT: control target
= control target key end

     0   :  { %v13883_v1 = vmov 0   ;;  %vm13895_vm0 = vcmask 261120   ;;  %vm13896_vm1 = vmmov 0   ;;  %vm484_vm2 = vcmask 80896   ;;  %s13838_s0 = inlined_call_operand.vmem [shape: bf16[32,128], index: 0, kind: input, shape index: {}]   ;;  %s13839_s1 = inlined_call_operand.vmem [shape: bf16[64,32], index: 1, kind: input, shape index: {}]   ;;  %s13840_s2 = inlined_call_operand.vmem [shape: f32[64,1], index: 2, kind: input, shape index: {}]   ;;  %s13841_s4 = inlined_call_operand.vmem [shape: f32[32,1], index: 4, kind: input, shape index: {}]   ;;  %s13842_s6 = inlined_call_operand.vmem [shape: f32[10,1], index: 6, kind: input, shape index: {}]   ;;  %s13843_s8 = inlined_call_operand.vmem [shape: f32[32,1], index: 8, kind: input, shape index: {}]   ;;  %s13844_s3 = inlined_call_operand.vmem [shape: bf16[32,32], index: 3, kind: input, shape index: {}]   ;;  %s13845_s5 = inlined_call_operand.vmem [shape: bf16[10,32], index: 5, kind: input, shape index: {}]   ;;  %s13846_s7 = inlined_call_operand.vmem [shape: bf16[32,32], index: 7, kind: input, shape index: {}]   ;;  %s13847_s27 = inlined_call_operand.vmem [shape: f32[10,128], index: 27, kind: output, shape index: {0}]   ;;  %s13848_s9 = inlined_call_operand.vmem [shape: bf16[128,32], index: 9, kind: input, shape index: {}]   ;;  %s13849_s10 = inlined_call_operand.vmem [shape: bf16[128,8], index: 10, kind: input, shape index: {}]   ;;  %s13850_s11 = inlined_call_operand.vmem [shape: f32[128,1], index: 11, kind: input, shape index: {}]   ;;  %s13851_s12 = inlined_call_operand.vmem [shape: bf16[32,128], index: 12, kind: input, shape index: {}]   ;;  %s13852_s13 = inlined_call_operand.vmem [shape: bf16[32,2], index: 13, kind: input, shape index: {}]   ;;  %s13853_s14 = inlined_call_operand.vmem [shape: f32[32,1], index: 14, kind: input, shape index: {}]   ;;  %s13854_s16 = inlined_call_operand.vmem [shape: f32[64,1], index: 16, kind: input, shape index: {}]   ;;  %s13855_s18 = inlined_call_operand.vmem [shape: f32[32,1], index: 18, kind: input, shape index: {}]   ;;  %s13856_s20 = inlined_call_operand.vmem [shape: f32[64,1], index: 20, kind: input, shape index: {}]   ;;  %s13857_s22 = inlined_call_operand.vmem [shape: f32[32,1], index: 22, kind: input, shape index: {}]   ;;  %s13858_s24 = inlined_call_operand.vmem [shape: f32[32,1], index: 24, kind: input, shape index: {}]   ;;  %s13859_s26 = inlined_call_operand.vmem [shape: f32[32,1], index: 26, kind: input, shape index: {}]   ;;  %s13860_s15 = inlined_call_operand.vmem [shape: bf16[64,32], index: 15, kind: input, shape index: {}]   ;;  %s13861_s17 = inlined_call_operand.vmem [shape: bf16[32,64], index: 17, kind: input, shape index: {}]   ;;  %s13862_s19 = inlined_call_operand.vmem [shape: bf16[64,64], index: 19, kind: input, shape index: {}]   ;;  %s13863_s21 = inlined_call_operand.vmem [shape: bf16[32,64], index: 21, kind: input, shape index: {}]   ;;  %s13864_s23 = inlined_call_operand.vmem [shape: bf16[32,32], index: 23, kind: input, shape index: {}]   ;;  %s13865_s25 = inlined_call_operand.vmem [shape: bf16[32,32], index: 25, kind: input, shape index: {}]   ;;  %s13866_s28 = inlined_call_operand.vmem [shape: f32[32,128], index: 28, kind: output, shape index: {1}]  }
   0x1   :  { %14122 = sst [smem:[#allocation77_spill]] %s13838_s0  ;;  %7950 = vset.pattern.permute.xlu0 %v13883_v1  ;;  %7951 = vset.pattern.permute.xlu1 %v13883_v1  ;;  %vm433_vm3 = vcmask 1041408   ;;  %vm491_vm4 = vcmask 1044480  }
   0x2   :  { %14123 = sst [smem:[#allocation78_spill]] %s13839_s1 }
   0x3   :  { %14124 = sst [smem:[#allocation79_spill]] %s13840_s2  ;;  %s14136_s0 = sld [smem:[#allocation78_spill]] }
   0x4   :  { %14125 = sst [smem:[#allocation80_spill]] %s13841_s4 }
   0x5   :  { %14126 = sst [smem:[#allocation81_spill]] %s13842_s6  ;;  %s14138_s2 = sld [smem:[#allocation80_spill]] }
   0x6   :  { %14127 = sst [smem:[#allocation82_spill]] %s13843_s8  ;;  %s14139_s30 = sld [smem:[#allocation81_spill]] }
   0x7   :  { %14128 = sst [smem:[#allocation83_spill]] %s13844_s3  ;;  %s14140_s29 = sld [smem:[#allocation82_spill]] }
   0x8   :  { %14129 = sst [smem:[#allocation84_spill]] %s13845_s5 }
   0x9   :  { %14130 = sst [smem:[#allocation85_spill]] %s13846_s7  ;;  %v7994_v3 = vld [vmem:[%s14136_s0] sm:$0xff]   ;;  %v7995_v4 = vld [vmem:[%s14136_s0 + $0x8] sm:$0xff]   ;;  %v7996_v7 = vld [vmem:[%s14136_s0 + $0x10] sm:$0xff]  }
   0xa   :  { %14131 = sst [smem:[#allocation86_spill]] %s13847_s27  ;;  %s14135_s27 = sld [smem:[#allocation77_spill]]  ;;  %7576 = vmatprep.mubr.msk.bf16.mxu0 %vm13895_vm0, %v7994_v3  ;;  %v7997_v12 = vld [vmem:[%s14136_s0 + $0x18] sm:$0xff]  }
   0xb   :  { %14132 = sst [smem:[#allocation87_spill]] %s13848_s9  ;;  %v273_v10 = vld [vmem:[%s14138_s2] sm:$0xff]  ;;  %v274_v11 = vld [vmem:[%s14138_s2 + $0x8] sm:$0xff]  ;;  %v275_v13 = vld [vmem:[%s14138_s2 + $0x10] sm:$0xff]  ;;  %s14143_s6 = sld [smem:[#allocation85_spill]] }
   0xc   :  { %14133 = sst [smem:[#allocation88_spill]] %s13849_s10  ;;  %v276_v14 = vld [vmem:[%s14138_s2 + $0x18] sm:$0xff]  ;;  %v371_v19 = vld [vmem:[%s14139_s30 + $0x8] sm:$0x3]  ;;  %v370_v20 = vld [vmem:[%s14139_s30] sm:$0xff]  ;;  %s14141_s30 = sld [smem:[#allocation83_spill]] }
   0xd   :  { %14134 = sst [smem:[#allocation89_spill]] %s13850_s11  ;;  %s14137_s11 = sld [smem:[#allocation79_spill]]  ;;  %v550_v21 = vld [vmem:[%s14140_s29] sm:$0xff]  ;;  %v551_v22 = vld [vmem:[%s14140_s29 + $0x8] sm:$0xff]  ;;  %v552_v23 = vld [vmem:[%s14140_s29 + $0x10] sm:$0xff] }
   0xe   :  { %v553_v24 = vld [vmem:[%s14140_s29 + $0x18] sm:$0xff]  ;;  %s14142_s29 = sld [smem:[#allocation84_spill]]  ;;  %s14144_s3 = sld [smem:[#allocation86_spill]] }
   0xf   :  { %s14145_s0 = sld [smem:[#allocation87_spill]]  ;;  %s14157_s1 = sld [smem:[#allocation88_spill]] }
  0x10   :  { %v7992_v0 = vld [vmem:[%s14135_s27] sm:$0xff]   ;;  %v7993_v2 = vld [vmem:[%s14135_s27 + $0x8] sm:$0xff]   ;;  %s14827_s7 = sld [smem:[#allocation89_spill]] }
  0x11   :  { %7572 = vmatprep.subr.bf16.mxu0 %v7992_v0 }
  0x12   :  { %7573 = vmatpush3.bf16.msra.mxu0 %v7992_v0  ;;  %v7998_v25 = vld [vmem:[%s14141_s30] sm:$0xff]   ;;  %v7999_v0 = vld [vmem:[%s14141_s30 + $0x8] sm:$0xff]  }
  0x13   :  { %7574 = vmatprep.subr.bf16.mxu0 %v7993_v2  ;;  %v101_v5 = vld [vmem:[%s14137_s11] sm:$0xff]  ;;  %v103_v6 = vld [vmem:[%s14137_s11 + $0x10] sm:$0xff]  ;;  %v102_v8 = vld [vmem:[%s14137_s11 + $0x8] sm:$0xff]  ;;  %7588 = vmatprep.mubr.msk.bf16.mxu1 %vm13895_vm0, %v7998_v25 }
  0x14   :  { %111 = vperm.xlu0 %7950, %v101_v5   ;;  %121 = vperm.xlu1 %7951, %v103_v6   ;;  %v104_v9 = vld [vmem:[%s14137_s11 + $0x18] sm:$0xff]  ;;  %v105_v15 = vld [vmem:[%s14137_s11 + $0x20] sm:$0xff]  ;;  %v106_v16 = vld [vmem:[%s14137_s11 + $0x28] sm:$0xff] }
  0x15   :  { %v107_v17 = vld [vmem:[%s14137_s11 + $0x30] sm:$0xff]  ;;  %v108_v18 = vld [vmem:[%s14137_s11 + $0x38] sm:$0xff]  ;;  %v8003_v5 = vld [vmem:[%s14142_s29] sm:$0x1f]  }
  0x16   :  { %7575 = vmatpush3.bf16.msra.mxu0 %v7993_v2  ;;  %v9007_v1 = vld [vmem:[%s14157_s1 + $0x30] sm:$0xff]  }
  0x18   :  { %116 = vperm.xlu0 %7950, %v102_v8   ;;  %126 = vperm.xlu1 %7951, %v104_v9  }
  0x19   :  { %7577 = vmatmul.mubr.msk.bf16.vlgmr.msra.gmra.mrb[0].mxu0 %vm13895_vm0, %v7995_v4  ;;  %v13880_v4 = vmov 0.0  }
  0x1a   :  { %7580 = vmatprep.mubr.msk.bf16.mxu0 %vm13895_vm0, %v7996_v7 }
  0x1c   :  { %279 = vperm.xlu0 %7950, %v273_v10   ;;  %284 = vperm.xlu1 %7951, %v274_v11  }
  0x20   :  { %289 = vperm.xlu0 %7950, %v275_v13   ;;  %294 = vperm.xlu1 %7951, %v276_v14  }
  0x21   :  { %7581 = vmatmul.mubr.msk.bf16.gmra.mrb[4].mxu0 %vm13895_vm0, %v7997_v12 }
  0x24   :  { %131 = vperm.xlu0 %7950, %v105_v15   ;;  %136 = vperm.xlu1 %7951, %v106_v16  }
  0x28   :  { %141 = vperm.xlu0 %7950, %v107_v17   ;;  %146 = vperm.xlu1 %7951, %v108_v18  }
  0x2c   :  { %379 = vperm.xlu0 %7950, %v371_v19   ;;  %374 = vperm.xlu1 %7951, %v370_v20   ;;  %v8000_v20 = vld [vmem:[%s14142_s29] sm:$0x1f]  }
  0x30   :  { %556 = vperm.xlu0 %7950, %v550_v21   ;;  %561 = vperm.xlu1 %7951, %v551_v22   ;;  %v8001_v21 = vld [vmem:[%s14143_s6] sm:$0xff]   ;;  %v8002_v22 = vld [vmem:[%s14143_s6 + $0x8] sm:$0xff]  }
  0x34   :  { %566 = vperm.xlu0 %7950, %v552_v23   ;;  %571 = vperm.xlu1 %7951, %v553_v24  }
  0x52   :  { %468 = vxpose.xlu0.c.b16.start.end [1/1] (short) (narrow) %v8003_v5, 32 }
  0x93   :  { %v112_v26 = vpop.permute.xlu0 %111  ;;  %v122_v27 = vpop.permute.xlu1 %121 }
  0x97   :  { %v117_v28 = vpop.permute.xlu0 %116  ;;  %v127_v29 = vpop.permute.xlu1 %126 }
  0x9b   :  { %v280_v30 = vpop.permute.xlu0 %279  ;;  %v285_v31 = vpop.permute.xlu1 %284 }
  0x9f   :  { %v290_v32 = vpop.permute.xlu0 %289  ;;  %v295_v33 = vpop.permute.xlu1 %294 }
  0xa3   :  { %v132_v37 = vpop.permute.xlu0 %131  ;;  %v137_v42 = vpop.permute.xlu1 %136 }
  0xa7   :  { %v142_v49 = vpop.permute.xlu0 %141  ;;  %v147_v54 = vpop.permute.xlu1 %146 }
  0xab   :  { %v380_v23 = vpop.permute.xlu0 %379 }
  0xaf   :  { %v557_v24 = vpop.permute.xlu0 %556 }
  0xb3   :  { %v567_v25 = vpop.permute.xlu0 %566 }
  0xec   :  { %v7578_v34 = vpop.f32.mrb[0].mxu0 }
  0xed   :  { %v237_v35 = vadd.f32 %v7578_v34, %v122_v27  ;;  %v228_v36 = vpop.f32.mrb[1].mxu0  ;;  %v375_v27 = vpop.permute.xlu1 %374 }
  0xee   :  { %v229_v38 = vadd.f32 %v228_v36, %v112_v26  ;;  %v7579_v39 = vpop.f32.mrb[2].mxu0  ;;  %v476_v26 = vpop.trf.xlu0 }
  0xef   :  { %v240_v40 = vadd.f32 %v7579_v39, %v127_v29  ;;  %v231_v41 = vpop.f32.mrb[3].mxu0  ;;  %v261_v44 = vmax.f32 %v237_v35, 0.0  ;;  %7602 = vmatprep.mubr.msk.bf16.mxu0 %vm484_vm2, %v476_v26 }
  0xf0   :  { %v232_v43 = vadd.f32 %v231_v41, %v117_v28  ;;  %v259_v46 = vmax.f32 %v229_v38, 0.0 }
  0xf1   :  { %v262_v45 = vmax.f32 %v240_v40, 0.0  ;;  %v562_v34 = vpop.permute.xlu1 %561 }
  0xf2   :  { %v260_v47 = vmax.f32 %v232_v43, 0.0 }
  0xf3   :  { %v272_v48 = vpack.c.bf16 %v262_v45, %v261_v44 }
  0xf4   :  { %v7582_v50 = vpop.f32.mrb[4].mxu0  ;;  %v271_v51 = vpack.c.bf16 %v260_v47, %v259_v46 }
  0xf5   :  { %v253_v52 = vadd.f32 %v7582_v50, %v142_v49  ;;  %v244_v53 = vpop.f32.mrb[5].mxu0  ;;  %v572_v40 = vpop.permute.xlu1 %571 }
  0xf6   :  { %v245_v55 = vadd.f32 %v244_v53, %v132_v37  ;;  %v7583_v56 = vpop.f32.mrb[6].mxu0  ;;  %7584 = vmatprep.subr.bf16.mxu1 %v271_v51 }
  0xf7   :  { %v256_v57 = vadd.f32 %v7583_v56, %v147_v54  ;;  %v247_v58 = vpop.f32.mrb[7].mxu0  ;;  %7585 = vmatpush3.bf16.msra.mxu1 %v271_v51  ;;  %v265_v60 = vmax.f32 %v253_v52, 0.0 }
  0xf8   :  { %v248_v59 = vadd.f32 %v247_v58, %v137_v42  ;;  %7586 = vmatprep.subr.bf16.mxu1 %v272_v48  ;;  %v263_v62 = vmax.f32 %v245_v55, 0.0 }
  0xf9   :  { %v266_v61 = vmax.f32 %v256_v57, 0.0 }
  0xfa   :  { %v264_v63 = vmax.f32 %v248_v59, 0.0 }
  0xfb   :  { %v549_v2 = vpack.c.bf16 %v266_v61, %v265_v60  ;;  %7587 = vmatpush3.bf16.msra.mxu1 %v272_v48 }
  0xfc   :  { %v548_v3 = vpack.c.bf16 %v264_v63, %v263_v62  ;;  %7592 = vmatprep.subr.bf16.mxu1 %v13880_v4 }
  0xfe   :  { %7589 = vmatmul.mubr.msk.bf16.vlgmr.msra.gmra.mrb[0].mxu1 %vm13895_vm0, %v7999_v0 }
  0xff   :  { %7596 = vmatprep.mubr.msk.bf16.mxu1 %vm13896_vm1, %v13880_v4 }
 0x1d1   :  { %v7590_v6 = vpop.f32.mrb[0].mxu1 }
 0x1d2   :  { %v356_v7 = vadd.f32 %v7590_v6, %v290_v32  ;;  %v347_v8 = vpop.f32.mrb[1].mxu1 }
 0x1d3   :  { %v348_v9 = vadd.f32 %v347_v8, %v280_v30  ;;  %v7591_v10 = vpop.f32.mrb[2].mxu1 }
 0x1d4   :  { %v359_v11 = vadd.f32 %v7591_v10, %v295_v33  ;;  %v350_v12 = vpop.f32.mrb[3].mxu1  ;;  %v364_v14 = vmax.f32 %v356_v7, 0.0 }
 0x1d5   :  { %v351_v13 = vadd.f32 %v350_v12, %v285_v31  ;;  %v362_v16 = vmax.f32 %v348_v9, 0.0 }
 0x1d6   :  { %v365_v15 = vmax.f32 %v359_v11, 0.0  ;;  %v477_v11 = vpop.trf.xlu0 }
 0x1d7   :  { %v363_v17 = vmax.f32 %v351_v13, 0.0 }
 0x1d8   :  { %v369_v18 = vpack.c.bf16 %v365_v15, %v364_v14 }
 0x1d9   :  { %v368_v19 = vpack.c.bf16 %v363_v17, %v362_v16 }
 0x1db   :  { %7593 = vmatpush3.bf16.msra.mxu1 %v368_v19 }
 0x1dc   :  { %7594 = vmatprep.subr.bf16.mxu1 %v13880_v4 }
 0x1df   :  { %7595 = vmatpush3.bf16.msra.mxu1 %v369_v18 }
 0x1e0   :  { %7606 = vmatprep.subr.bf16.mxu1 %v548_v3 }
 0x1e2   :  { %7597 = vmatmul.mubr.msk.bf16.vlgmr.msra.gmra.mrb[4].mxu1 %vm13895_vm0, %v8000_v20 }
 0x1e3   :  { %7607 = vmatpush3.bf16.msra.mxu1 %v548_v3  ;;  %7610 = vmatprep.mubr.msk.bf16.mxu1 %vm13895_vm0, %v8001_v21 }
 0x1e4   :  { %7608 = vmatprep.subr.bf16.mxu1 %v549_v2 }
 0x1e7   :  { %7609 = vmatpush3.bf16.msra.mxu1 %v549_v2 }
 0x1ea   :  { %7611 = vmatmul.mubr.msk.bf16.vlgmr.msra.gmra.mrb[8].mxu1 %vm13895_vm0, %v8002_v22 }
 0x2b5   :  { %v424_v28 = vpop.f32.mrb[4].mxu1 }
 0x2b6   :  { %v425_v29 = vadd.f32 %v424_v28, %v375_v27  ;;  %v7598_v30 = vpop.f32.mrb[5].mxu1  ;;  %v8004_v28 = vld [vmem:[%s14145_s0] sm:$0xff]  }
 0x2b7   :  { %v427_v31 = vpop.f32.mrb[6].mxu1  ;;  %7650 = vmatprep.mubr.msk.bf16.mxu1 %vm13895_vm0, %v8004_v28 }
 0x2b8   :  { %431 = vst [vmem:[%s14144_s3] sm:$0xff] %v425_v29  ;;  %v428_v32 = vadd.f32 %v427_v31, %v380_v23  ;;  %v7599_v33 = vpop.f32.mrb[7].mxu1 }
 0x2ba   :  { %432 = vst [vmem:[%s14144_s3 + $0x8] sm:$0x3] %v428_v32  ;;  %v434_v35 = vsel %vm433_vm3, %v428_v32, -inf }
 0x2bb   :  { %v435_v36 = vmax.f32 %v425_v29, %v434_v35  ;;  %v8005_v35 = vld [vmem:[%s14145_s0 + $0x8] sm:$0xff]  }
 0x2bd   :  { %v436_v37 = vrot.slane %v435_v36, 4  ;;  %v7612_v38 = vpop.f32.mrb[8].mxu1 }
 0x2be   :  { %v624_v39 = vpop.f32.mrb[9].mxu1  ;;  %v633_v44 = vadd.f32 %v7612_v38, %v567_v25  ;;  %v8008_v38 = vld [vmem:[%s14145_s0 + $0x20] sm:$0xff]  }
 0x2bf   :  { %v437_v41 = vmax.f32 %v435_v36, %v436_v37  ;;  %v625_v42 = vadd.f32 %v624_v39, %v557_v24  ;;  %v7613_v43 = vpop.f32.mrb[10].mxu1  ;;  %v8006_v36 = vld [vmem:[%s14145_s0 + $0x10] sm:$0xff]   ;;  %v8007_v37 = vld [vmem:[%s14145_s0 + $0x18] sm:$0xff]   ;;  %v8009_v39 = vld [vmem:[%s14145_s0 + $0x28] sm:$0xff]  }
 0x2c0   :  { %v636_v45 = vadd.f32 %v7613_v43, %v572_v40  ;;  %v627_v46 = vpop.f32.mrb[11].mxu1  ;;  %v8010_v40 = vld [vmem:[%s14145_s0 + $0x30] sm:$0xff]  }
 0x2c1   :  { %v438_v47 = vrot.slane %v437_v41, 2  ;;  %v628_v48 = vadd.f32 %v627_v46, %v562_v34  ;;  %639 = vxpose.xlu1.b32.start [1/4] (short) %v625_v42, 128 }
 0x2c2   :  { %v7938_v49 = vpack.c.bf16 %v636_v45, %v633_v44 }
 0x2c3   :  { %v439_v50 = vmax.f32 %v437_v41, %v438_v47  ;;  %v7934_v51 = vpack.c.bf16 %v628_v48, %v625_v42  ;;  %v8011_v41 = vld [vmem:[%s14145_s0 + $0x38] sm:$0xff]   ;;  %v13882_v42 = vlaneseq }
 0x2c5   :  { %v440_v52 = vrot.slane %v439_v50, 1  ;;  %640 = vxpose.xlu1.b32.cont [2/4] (short) %v628_v48, 128  ;;  %v8719_v43 = vand.u32 127, %v13882_v42  ;;  %v9000_v42 = vld [vmem:[%s14157_s1 + $0x28] sm:$0xff]  }
 0x2c7   :  { %v441_v53 = vmax.f32 %v439_v50, %v440_v52  ;;  %vm948_vm5 = vcmp.lt.s32.totalorder %v8719_v43, 64  ;;  %vm1013_vm6 = vcmp.ge.s32.totalorder %v8719_v43, 64 }
 0x2c9   :  { %v442_v54 = vsub.f32 %v425_v29, %v441_v53  ;;  %v443_v55 = vsub.f32 %v428_v32, %v441_v53  ;;  %641 = vxpose.xlu1.b32.cont [3/4] (short) %v633_v44, 128 }
 0x2cb   :  { %v444_v56 = vmul.f32 1.442695, %v442_v54  ;;  %v446_v57 = vmul.f32 1.442695, %v443_v55 }
 0x2cd   :  { %8040 = vpow2.f32 %v444_v56  ;;  %642 = vxpose.xlu1.b32.end [4/4] (short) %v636_v45, 128 }
 0x2ce   :  { %8042 = vpow2.f32 %v446_v57 }
 0x2d7   :  { %v8041_v58 = vpop.eup %8040 }
 0x2d8   :  { %v8043_v59 = vpop.eup %8042 }
 0x2d9   :  { %v448_v60 = vsel %vm433_vm3, %v8043_v59, 0.0 }
 0x2da   :  { %v449_v61 = vadd.f32 %v8041_v58, %v448_v60 }
 0x2dc   :  { %v450_v62 = vrot.slane %v449_v61, 4 }
 0x2de   :  { %v451_v63 = vadd.f32 %v450_v62, %v449_v61 }
 0x2e0   :  { %v452_v0 = vrot.slane %v451_v63, 2 }
 0x2e2   :  { %v453_v2 = vadd.f32 %v452_v0, %v451_v63 }
 0x2e4   :  { %v454_v3 = vrot.slane %v453_v2, 1 }
 0x2e6   :  { %v455_v5 = vadd.f32 %v454_v3, %v453_v2 }
 0x2e8   :  { %8044 = vrcp.f32 %v455_v5 }
 0x2f2   :  { %v8045_v6 = vpop.eup %8044 }
 0x2f3   :  { %v457_v7 = vmul.f32 %v8045_v6, %v8041_v58  ;;  %v458_v8 = vmul.f32 %v8045_v6, %v8043_v59 }
 0x2f5   :  { %v461_v9 = vpack.c.bf16 %v458_v8, %v457_v7 }
 0x2f7   :  { %7942 = vmatprep.subr.msk.bf16.mxu0 %vm491_vm4, %v461_v9  ;;  %v493_v10 = vsel %vm491_vm4, %v461_v9, 0 }
 0x2f8   :  { %7601 = vmatpush3.bf16.msra.mxu0 %v493_v10 }
 0x2f9   :  { %7935 = vmatprep.subr.bf16.mxu0 %v7934_v51 }
 0x2fb   :  { %7603 = vmatmul.mubr.msk.bf16.vlgmr.msra.gmra.mrb[8].mxu0 %vm484_vm2, %v477_v11 }
 0x2fc   :  { %7937 = vmatpush3.bf16.msra.mxu0 %v7934_v51 }
 0x2fd   :  { %7939 = vmatprep.subr.bf16.mxu0 %v7938_v49 }
 0x300   :  { %7941 = vmatpush3.bf16.msra.mxu0 %v7938_v49 }
 0x341   :  { %v655_v12 = vpop.trf.xlu1 }
 0x342   :  { %7622 = vmatprep.mubr.msk.f32.mxu0 %vm13895_vm0, %v655_v12 }
 0x345   :  { %v656_v13 = vpop.trf.xlu1 }
 0x346   :  { %7623 = vmatmul.mubr.msk.f32.vlgmr.msra.gmra.mrb[12].mxu0 %vm13895_vm0, %v656_v13 }
 0x349   :  { %v657_v14 = vpop.trf.xlu1 }
 0x34a   :  { %7625 = vmatprep.mubr.msk.f32.mxu0 %vm13895_vm0, %v657_v14 }
 0x34d   :  { %v658_v15 = vpop.trf.xlu1 }
 0x34e   :  { %7626 = vmatmul.mubr.msk.f32.gmra.mrb[14].mxu0 %vm13895_vm0, %v658_v15 }
 0x351   :  { %v659_v16 = vpop.trf.xlu1 }
 0x352   :  { %7628 = vmatprep.mubr.msk.f32.mxu0 %vm13895_vm0, %v659_v16 }
 0x355   :  { %v660_v17 = vpop.trf.xlu1 }
 0x356   :  { %7629 = vmatmul.mubr.msk.f32.gmra.mrb[16].mxu0 %vm13895_vm0, %v660_v17 }
 0x359   :  { %v661_v18 = vpop.trf.xlu1 }
 0x35a   :  { %7631 = vmatprep.mubr.msk.f32.mxu0 %vm13895_vm0, %v661_v18 }
 0x35d   :  { %v662_v19 = vpop.trf.xlu1 }
 0x35e   :  { %7632 = vmatmul.mubr.msk.f32.gmra.mrb[18].mxu0 %vm13895_vm0, %v662_v19 }
 0x361   :  { %v663_v20 = vpop.trf.xlu1 }
 0x362   :  { %7634 = vmatprep.mubr.msk.f32.mxu0 %vm13895_vm0, %v663_v20 }
 0x365   :  { %v664_v21 = vpop.trf.xlu1 }
 0x366   :  { %7635 = vmatmul.mubr.msk.f32.gmra.mrb[20].mxu0 %vm13895_vm0, %v664_v21 }
 0x369   :  { %v665_v22 = vpop.trf.xlu1 }
 0x36a   :  { %7637 = vmatprep.mubr.msk.f32.mxu0 %vm13895_vm0, %v665_v22 }
 0x36d   :  { %v666_v23 = vpop.trf.xlu1 }
 0x36e   :  { %7638 = vmatmul.mubr.msk.f32.gmra.mrb[22].mxu0 %vm13895_vm0, %v666_v23 }
 0x371   :  { %v667_v24 = vpop.trf.xlu1 }
 0x372   :  { %7640 = vmatprep.mubr.msk.f32.mxu0 %vm13895_vm0, %v667_v24 }
 0x375   :  { %v668_v25 = vpop.trf.xlu1 }
 0x376   :  { %7641 = vmatmul.mubr.msk.f32.gmra.mrb[24].mxu0 %vm13895_vm0, %v668_v25 }
 0x379   :  { %v669_v26 = vpop.trf.xlu1 }
 0x37a   :  { %7643 = vmatprep.mubr.msk.f32.mxu0 %vm13895_vm0, %v669_v26 }
 0x37d   :  { %v670_v27 = vpop.trf.xlu1 }
 0x37e   :  { %7644 = vmatmul.mubr.msk.f32.gmra.mrb[26].mxu0 %vm13895_vm0, %v670_v27 }
 0x3ce   :  { %v7604_v29 = vpop.f32.mrb[8].mxu0 }
 0x3cf   :  { %v529_v30 = vpop.f32.mrb[9].mxu0 }
 0x3d0   :  { %v7605_v31 = vpop.f32.mrb[10].mxu0 }
 0x3d1   :  { %v3784_v32 = vpack.c.bf16 %v7605_v31, %v7604_v29  ;;  %v532_v33 = vpop.f32.mrb[11].mxu0 }
 0x3d2   :  { %v3783_v34 = vpack.c.bf16 %v532_v33, %v529_v30 }
 0x3d4   :  { %7646 = vmatprep.subr.bf16.mxu1 %v3783_v34 }
 0x3d5   :  { %7647 = vmatpush3.bf16.msra.mxu1 %v3783_v34 }
 0x3d6   :  { %7648 = vmatprep.subr.bf16.mxu1 %v3784_v32 }
 0x3d9   :  { %7649 = vmatpush3.bf16.msra.mxu1 %v3784_v32 }
 0x3da   :  { %7698 = vmatprep.subr.bf16.mxu1 %v13880_v4 }
 0x3dc   :  { %7651 = vmatmul.mubr.msk.bf16.vlgmr.msra.gmra.mrb[12].mxu1 %vm13895_vm0, %v8005_v35 }
 0x3dd   :  { %7654 = vmatprep.mubr.msk.bf16.mxu1 %vm13895_vm0, %v8006_v36 }
 0x3e4   :  { %7655 = vmatmul.mubr.msk.bf16.gmra.mrb[16].mxu1 %vm13895_vm0, %v8007_v37 }
 0x3e5   :  { %7658 = vmatprep.mubr.msk.bf16.mxu1 %vm13895_vm0, %v8008_v38 }
 0x3ec   :  { %7659 = vmatmul.mubr.msk.bf16.gmra.mrb[20].mxu1 %vm13895_vm0, %v8009_v39 }
 0x3ed   :  { %7662 = vmatprep.mubr.msk.bf16.mxu1 %vm13895_vm0, %v8010_v40 }
 0x3f4   :  { %7663 = vmatmul.mubr.msk.bf16.gmra.mrb[24].mxu1 %vm13895_vm0, %v8011_v41 }
 0x3f5   :  { %7714 = vmatprep.mubr.msk.bf16.mxu1 %vm13896_vm1, %v13880_v4 }
 0x419   :  { %v7624_v44 = vpop.f32.mrb[12].mxu0 }
 0x41a   :  { %v8724_v45 = vsel %vm948_vm5, %v7624_v44, -1e+30  ;;  %v785_v46 = vpop.f32.mrb[13].mxu0 }
 0x41b   :  { %1081 = vmax.xlane.f32.xlu0 %v8724_v45  ;;  %v8729_v47 = vsel %vm948_vm5, %v785_v46, -1e+30 }
 0x41f   :  { %1079 = vmax.xlane.f32.xlu0 %v8729_v47 }
 0x421   :  { %v7627_v48 = vpop.f32.mrb[14].mxu0 }
 0x422   :  { %v8734_v49 = vsel %vm948_vm5, %v7627_v48, -1e+30  ;;  %v795_v50 = vpop.f32.mrb[15].mxu0 }
 0x423   :  { %v8738_v51 = vsel %vm948_vm5, %v795_v50, -1e+30  ;;  %1085 = vmax.xlane.f32.xlu1 %v8734_v49 }
 0x424   :  { %1083 = vmax.xlane.f32.xlu0 %v8738_v51 }
 0x429   :  { %v7630_v52 = vpop.f32.mrb[16].mxu0 }
 0x42a   :  { %v8744_v53 = vsel %vm948_vm5, %v7630_v52, -1e+30  ;;  %v805_v54 = vpop.f32.mrb[17].mxu0 }
 0x42b   :  { %1089 = vmax.xlane.f32.xlu0 %v8744_v53  ;;  %v8749_v55 = vsel %vm948_vm5, %v805_v54, -1e+30 }
 0x42f   :  { %1087 = vmax.xlane.f32.xlu0 %v8749_v55 }
 0x431   :  { %v7633_v56 = vpop.f32.mrb[18].mxu0 }
 0x432   :  { %v8754_v57 = vsel %vm948_vm5, %v7633_v56, -1e+30  ;;  %v815_v58 = vpop.f32.mrb[19].mxu0 }
 0x433   :  { %1093 = vmax.xlane.f32.xlu0 %v8754_v57  ;;  %v8759_v59 = vsel %vm948_vm5, %v815_v58, -1e+30 }
 0x437   :  { %1091 = vmax.xlane.f32.xlu0 %v8759_v59 }
 0x439   :  { %v7636_v60 = vpop.f32.mrb[20].mxu0 }
 0x43a   :  { %v8765_v61 = vsel %vm1013_vm6, %v7636_v60, -1e+30  ;;  %v825_v62 = vpop.f32.mrb[21].mxu0 }
 0x43b   :  { %1097 = vmax.xlane.f32.xlu0 %v8765_v61  ;;  %v8770_v63 = vsel %vm1013_vm6, %v825_v62, -1e+30 }
 0x43f   :  { %1095 = vmax.xlane.f32.xlu0 %v8770_v63 }
 0x441   :  { %v7639_v0 = vpop.f32.mrb[22].mxu0 }
 0x442   :  { %v8775_v2 = vsel %vm1013_vm6, %v7639_v0, -1e+30  ;;  %v835_v3 = vpop.f32.mrb[23].mxu0 }
 0x443   :  { %14146 = vst [vmem:[#allocation2_spill] sm:$0xff] %v8775_v2  ;;  %1101 = vmax.xlane.f32.xlu0 %v8775_v2  ;;  %v8780_v5 = vsel %vm1013_vm6, %v835_v3, -1e+30 }
 0x447   :  { %1099 = vmax.xlane.f32.xlu0 %v8780_v5 }
 0x449   :  { %v7642_v6 = vpop.f32.mrb[24].mxu0 }
 0x44a   :  { %v8785_v7 = vsel %vm1013_vm6, %v7642_v6, -1e+30  ;;  %v845_v8 = vpop.f32.mrb[25].mxu0 }
 0x44b   :  { %14147 = vst [vmem:[#allocation3_spill] sm:$0xff] %v8785_v7  ;;  %1105 = vmax.xlane.f32.xlu0 %v8785_v7  ;;  %v8790_v9 = vsel %vm1013_vm6, %v845_v8, -1e+30 }
 0x44c   :  { %14148 = vst [vmem:[#allocation4_spill] sm:$0xff] %v8790_v9 }
 0x44f   :  { %1103 = vmax.xlane.f32.xlu0 %v8790_v9 }
 0x451   :  { %v7645_v10 = vpop.f32.mrb[26].mxu0 }
 0x452   :  { %v8795_v11 = vsel %vm1013_vm6, %v7645_v10, -1e+30  ;;  %v855_v12 = vpop.f32.mrb[27].mxu0 }
 0x453   :  { %14149 = vst [vmem:[#allocation5_spill] sm:$0xff] %v8795_v11  ;;  %1109 = vmax.xlane.f32.xlu0 %v8795_v11  ;;  %v8800_v13 = vsel %vm1013_vm6, %v855_v12, -1e+30 }
 0x454   :  { %14150 = vst [vmem:[#allocation6_spill] sm:$0xff] %v8800_v13 }
 0x457   :  { %1107 = vmax.xlane.f32.xlu0 %v8800_v13 }
 0x4a8   :  { %v1082_v14 = vpop.xlane.xlu0 %1081 }
 0x4a9   :  { %vm1112_vm7 = vcmp.eq.f32.partialorder %v8724_v45, %v1082_v14 }
 0x4aa   :  { %v8805_v15 = vsel %vm1112_vm7, %v8719_v43, 128 }
 0x4ab   :  { %v1158_v16 = vshra.s32 %v8805_v15, 16 }
 0x4ac   :  { %v1080_v17 = vpop.xlane.xlu0 %1079 }
 0x4ad   :  { %vm1111_vm8 = vcmp.eq.f32.partialorder %v8729_v47, %v1080_v17  ;;  %v8809_v18 = vcvt.s32.f32 %v1158_v16 }
 0x4ae   :  { %v8812_v19 = vsel %vm1111_vm8, %v8719_v43, 128 }
 0x4af   :  { %1161 = vmin.xlane.f32.xlu0 %v8809_v18  ;;  %v1144_v20 = vshra.s32 %v8812_v19, 16  ;;  %v7652_v21 = vpop.f32.mrb[12].mxu1 }
 0x4b0   :  { %v1086_v22 = vpop.xlane.xlu1 %1085  ;;  %v3883_v23 = vpop.f32.mrb[13].mxu1 }
 0x4b1   :  { %vm1114_vm9 = vcmp.eq.f32.partialorder %v8734_v49, %v1086_v22  ;;  %v1084_v24 = vpop.xlane.xlu0 %1083  ;;  %v8817_v25 = vcvt.s32.f32 %v1144_v20  ;;  %v7653_v26 = vpop.f32.mrb[14].mxu1 }
 0x4b2   :  { %v8820_v27 = vsel %vm1114_vm9, %v8719_v43, 128  ;;  %vm1113_vm10 = vcmp.eq.f32.partialorder %v8738_v51, %v1084_v24  ;;  %v8823_v28 = vpack.c.bf16 %v7653_v26, %v7652_v21  ;;  %v3886_v29 = vpop.f32.mrb[15].mxu1 }
 0x4b3   :  { %v8826_v30 = vsel %vm1113_vm10, %v8719_v43, 128  ;;  %1147 = vmin.xlane.f32.xlu0 %v8817_v25  ;;  %v1186_v31 = vshra.s32 %v8820_v27, 16  ;;  %v8830_v32 = vpack.c.bf16 %v3886_v29, %v3883_v23 }
 0x4b4   :  { %14151 = vst [vmem:[#allocation7_spill] sm:$0xff] %v8823_v28  ;;  %v1172_v34 = vshra.s32 %v8826_v30, 16 }
 0x4b5   :  { %v8832_v33 = vcvt.s32.f32 %v1186_v31  ;;  %7699 = vmatpush3.bf16.msra.mxu1 %v8830_v32 }
 0x4b6   :  { %7700 = vmatprep.subr.bf16.mxu1 %v13880_v4  ;;  %v8839_v38 = vcvt.s32.f32 %v1172_v34 }
 0x4b7   :  { %1189 = vmin.xlane.f32.xlu0 %v8832_v33  ;;  %v7656_v35 = vpop.f32.mrb[16].mxu1 }
 0x4b8   :  { %v1090_v36 = vpop.xlane.xlu0 %1089  ;;  %v3899_v37 = vpop.f32.mrb[17].mxu1 }
 0x4b9   :  { %vm1116_vm11 = vcmp.eq.f32.partialorder %v8744_v53, %v1090_v36  ;;  %v7657_v39 = vpop.f32.mrb[18].mxu1  ;;  %7701 = vmatpush3.bf16.msra.mxu1 %v8823_v28 }
 0x4ba   :  { %v8843_v40 = vsel %vm1116_vm11, %v8719_v43, 128  ;;  %v8845_v41 = vpack.c.bf16 %v7657_v39, %v7656_v35  ;;  %v3902_v44 = vpop.f32.mrb[19].mxu1  ;;  %7702 = vmatprep.subr.bf16.mxu1 %v13880_v4 }
 0x4bb   :  { %1175 = vmin.xlane.f32.xlu0 %v8839_v38  ;;  %v1214_v46 = vshra.s32 %v8843_v40, 16  ;;  %v8850_v48 = vpack.c.bf16 %v3902_v44, %v3899_v37 }
 0x4bc   :  { %14152 = vst [vmem:[#allocation8_spill] sm:$0xff] %v8845_v41  ;;  %v1088_v50 = vpop.xlane.xlu0 %1087 }
 0x4bd   :  { %vm1115_vm12 = vcmp.eq.f32.partialorder %v8749_v55, %v1088_v50  ;;  %v8853_v52 = vcvt.s32.f32 %v1214_v46  ;;  %7703 = vmatpush3.bf16.msra.mxu1 %v8850_v48 }
 0x4be   :  { %v8857_v54 = vsel %vm1115_vm12, %v8719_v43, 128  ;;  %7704 = vmatprep.subr.bf16.mxu1 %v13880_v4 }
 0x4bf   :  { %1217 = vmin.xlane.f32.xlu0 %v8853_v52  ;;  %v1200_v56 = vshra.s32 %v8857_v54, 16  ;;  %v7660_v58 = vpop.f32.mrb[20].mxu1 }
 0x4c0   :  { %v1094_v60 = vpop.xlane.xlu0 %1093  ;;  %v3915_v62 = vpop.f32.mrb[21].mxu1 }
 0x4c1   :  { %vm1118_vm13 = vcmp.eq.f32.partialorder %v8754_v57, %v1094_v60  ;;  %v8863_v0 = vcvt.s32.f32 %v1200_v56  ;;  %v7661_v3 = vpop.f32.mrb[22].mxu1  ;;  %7705 = vmatpush3.bf16.msra.mxu1 %v8845_v41 }
 0x4c2   :  { %v8867_v6 = vsel %vm1118_vm13, %v8719_v43, 128  ;;  %v8869_v8 = vpack.c.bf16 %v7661_v3, %v7660_v58  ;;  %v3918_v10 = vpop.f32.mrb[23].mxu1  ;;  %7706 = vmatprep.subr.bf16.mxu1 %v13880_v4 }
 0x4c3   :  { %1203 = vmin.xlane.f32.xlu0 %v8863_v0  ;;  %v1242_v12 = vshra.s32 %v8867_v6, 16  ;;  %v8874_v14 = vpack.c.bf16 %v3918_v10, %v3915_v62 }
 0x4c4   :  { %14153 = vst [vmem:[#allocation9_spill] sm:$0xff] %v8869_v8  ;;  %v1092_v16 = vpop.xlane.xlu0 %1091 }
 0x4c5   :  { %14154 = vst [vmem:[#allocation10_spill] sm:$0xff] %v8874_v14  ;;  %vm1117_vm14 = vcmp.eq.f32.partialorder %v8759_v59, %v1092_v16  ;;  %v8877_v17 = vcvt.s32.f32 %v1242_v12  ;;  %7707 = vmatpush3.bf16.msra.mxu1 %v8874_v14 }
 0x4c6   :  { %v8881_v20 = vsel %vm1117_vm14, %v8719_v43, 128  ;;  %7708 = vmatprep.subr.bf16.mxu1 %v13880_v4 }
 0x4c7   :  { %1245 = vmin.xlane.f32.xlu0 %v8877_v17  ;;  %v1228_v21 = vshra.s32 %v8881_v20, 16  ;;  %v7664_v22 = vpop.f32.mrb[24].mxu1 }
 0x4c8   :  { %v1098_v23 = vpop.xlane.xlu0 %1097  ;;  %v3931_v24 = vpop.f32.mrb[25].mxu1 }
 0x4c9   :  { %vm1120_vm15 = vcmp.eq.f32.partialorder %v8765_v61, %v1098_v23  ;;  %v8887_v26 = vcvt.s32.f32 %v1228_v21  ;;  %v7665_v29 = vpop.f32.mrb[26].mxu1  ;;  %7709 = vmatpush3.bf16.msra.mxu1 %v8869_v8 }
 0x4ca   :  { %v8891_v31 = vsel %vm1120_vm15, %v8719_v43, 128  ;;  %v8893_v34 = vpack.c.bf16 %v7665_v29, %v7664_v22  ;;  %v3934_v35 = vpop.f32.mrb[27].mxu1  ;;  %7710 = vmatprep.subr.bf16.mxu1 %v13880_v4 }
 0x4cb   :  { %1231 = vmin.xlane.f32.xlu0 %v8887_v26  ;;  %v1270_v36 = vshra.s32 %v8891_v31, 16  ;;  %v8898_v37 = vpack.c.bf16 %v3934_v35, %v3931_v24 }
 0x4cc   :  { %14155 = vst [vmem:[#allocation11_spill] sm:$0xff] %v8893_v34  ;;  %v1096_v39 = vpop.xlane.xlu0 %1095 }
 0x4cd   :  { %14156 = vst [vmem:[#allocation12_spill] sm:$0xff] %v8898_v37  ;;  %vm1119_vm2 = vcmp.eq.f32.partialorder %v8770_v63, %v1096_v39  ;;  %v8901_v44 = vcvt.s32.f32 %v1270_v36  ;;  %7711 = vmatpush3.bf16.msra.mxu1 %v8898_v37 }
 0x4ce   :  { %v8905_v46 = vsel %vm1119_vm2, %v8719_v43, 128  ;;  %7712 = vmatprep.subr.bf16.mxu1 %v13880_v4 }
 0x4cf   :  { %1273 = vmin.xlane.f32.xlu0 %v8901_v44  ;;  %v1256_v50 = vshra.s32 %v8905_v46, 16 }
 0x4d0   :  { %v1102_v56 = vpop.xlane.xlu0 %1101 }
 0x4d1   :  { %vm1122_vm3 = vcmp.eq.f32.partialorder %v8775_v2, %v1102_v56  ;;  %v8911_v58 = vcvt.s32.f32 %v1256_v50  ;;  %7713 = vmatpush3.bf16.msra.mxu1 %v8893_v34 }
 0x4d2   :  { %v8915_v60 = vsel %vm1122_vm3, %v8719_v43, 128 }
 0x4d3   :  { %1259 = vmin.xlane.f32.xlu0 %v8911_v58  ;;  %v1298_v62 = vshra.s32 %v8915_v60, 16 }
 0x4d4   :  { %v1100_v3 = vpop.xlane.xlu0 %1099 }
 0x4d5   :  { %vm1121_vm4 = vcmp.eq.f32.partialorder %v8780_v5, %v1100_v3  ;;  %v8920_v10 = vcvt.s32.f32 %v1298_v62  ;;  %v8952_v3 = vld [vmem:[%s14157_s1] sm:$0xff]  }
 0x4d6   :  { %v8923_v12 = vsel %vm1121_vm4, %v8719_v43, 128  ;;  %7666 = vmatprep.subr.bf16.mxu0 %v8952_v3 }
 0x4d7   :  { %1301 = vmin.xlane.f32.xlu0 %v8920_v10  ;;  %v1284_v16 = vshra.s32 %v8923_v12, 16  ;;  %7667 = vmatpush3.bf16.msra.mxu0 %v8952_v3 }
 0x4d8   :  { %v1106_v21 = vpop.xlane.xlu0 %1105 }
 0x4d9   :  { %vm1124_vm5 = vcmp.eq.f32.partialorder %v8785_v7, %v1106_v21  ;;  %v8928_v22 = vcvt.s32.f32 %v1284_v16  ;;  %v1157_v7 = vand.u32 65535, %v8805_v15 }
 0x4da   :  { %v8931_v23 = vsel %vm1124_vm5, %v8719_v43, 128 }
 0x4db   :  { %1287 = vmin.xlane.f32.xlu1 %v8928_v22  ;;  %v1326_v24 = vshra.s32 %v8931_v23, 16 }
 0x4dc   :  { %v1104_v29 = vpop.xlane.xlu0 %1103 }
 0x4dd   :  { %vm1123_vm6 = vcmp.eq.f32.partialorder %v8790_v9, %v1104_v29  ;;  %v8936_v35 = vcvt.s32.f32 %v1326_v24  ;;  %v1143_v9 = vand.u32 65535, %v8812_v19  ;;  %v1171_v19 = vand.u32 65535, %v8826_v30 }
 0x4de   :  { %v8939_v36 = vsel %vm1123_vm6, %v8719_v43, 128  ;;  %v1199_v30 = vand.u32 65535, %v8857_v54  ;;  %v1227_v54 = vand.u32 65535, %v8881_v20  ;;  %v1255_v20 = vand.u32 65535, %v8905_v46 }
 0x4df   :  { %1329 = vmin.xlane.f32.xlu0 %v8936_v35  ;;  %v1312_v39 = vshra.s32 %v8939_v36, 16 }
 0x4e0   :  { %v1110_v50 = vpop.xlane.xlu0 %1109 }
 0x4e1   :  { %vm1126_vm7 = vcmp.eq.f32.partialorder %v8795_v11, %v1110_v50  ;;  %v8944_v56 = vcvt.s32.f32 %v1312_v39  ;;  %v8967_v39 = vld [vmem:[%s14157_s1 + $0x8] sm:$0xff]   ;;  %v9014_v11 = vld [vmem:[%s14157_s1 + $0x38] sm:$0xff]  }
 0x4e2   :  { %v8947_v62 = vsel %vm1126_vm7, %v8719_v43, 128  ;;  %7668 = vmatprep.subr.bf16.mxu0 %v8967_v39 }
 0x4e3   :  { %1315 = vmin.xlane.f32.xlu1 %v8944_v56  ;;  %v1354_v16 = vshra.s32 %v8947_v62, 16  ;;  %7669 = vmatpush3.bf16.msra.mxu0 %v8967_v39 }
 0x4e4   :  { %v1108_v21 = vpop.xlane.xlu0 %1107 }
 0x4e5   :  { %vm1125_vm8 = vcmp.eq.f32.partialorder %v8800_v13, %v1108_v21  ;;  %v8958_v24 = vcvt.s32.f32 %v1354_v16  ;;  %v8978_v16 = vld [vmem:[%s14157_s1 + $0x10] sm:$0xff]   ;;  %v8986_v21 = vld [vmem:[%s14157_s1 + $0x18] sm:$0xff]   ;;  %v1159_v13 = vcvt.s32.f32 %v1157_v7 }
 0x4e6   :  { %v8962_v29 = vsel %vm1125_vm8, %v8719_v43, 128  ;;  %7670 = vmatprep.subr.bf16.mxu0 %v8978_v16 }
 0x4e7   :  { %1357 = vmin.xlane.f32.xlu0 %v8958_v24  ;;  %v1340_v50 = vshra.s32 %v8962_v29, 16  ;;  %7671 = vmatpush3.bf16.msra.mxu0 %v8978_v16 }
 0x4e8   :  { %7672 = vmatprep.subr.bf16.mxu0 %v8986_v21 }
 0x4e9   :  { %v8972_v4 = vcvt.s32.f32 %v1340_v50  ;;  %v8993_v50 = vld [vmem:[%s14157_s1 + $0x20] sm:$0xff]  }
 0x4eb   :  { %1343 = vmin.xlane.f32.xlu1 %v8972_v4  ;;  %7673 = vmatpush3.bf16.msra.mxu0 %v8986_v21 }
 0x4ec   :  { %7674 = vmatprep.subr.bf16.mxu0 %v8993_v50 }
 0x4ef   :  { %7675 = vmatpush3.bf16.msra.mxu0 %v8993_v50 }
 0x4f0   :  { %7676 = vmatprep.subr.bf16.mxu0 %v9000_v42 }
 0x4f3   :  { %7677 = vmatpush3.bf16.msra.mxu0 %v9000_v42 }
 0x4f4   :  { %7678 = vmatprep.subr.bf16.mxu0 %v9007_v1 }
 0x4f7   :  { %7679 = vmatpush3.bf16.msra.mxu0 %v9007_v1 }
 0x4f8   :  { %7680 = vmatprep.subr.bf16.mxu0 %v9014_v11 }
 0x4fb   :  { %7681 = vmatpush3.bf16.msra.mxu0 %v9014_v11 }
 0x518   :  { %3954 = vxpose.xlu1.c.b16.start [1/8] %v8830_v32, 128 }
 0x51c   :  { %3955 = vxpose.xlu1.c.b16.cont [2/8] %v8823_v28, 128 }
 0x520   :  { %3956 = vxpose.xlu1.c.b16.cont [3/8] %v8850_v48, 128 }
 0x524   :  { %3957 = vxpose.xlu1.c.b16.cont [4/8] %v8845_v41, 128 }
 0x528   :  { %3958 = vxpose.xlu1.c.b16.cont [5/8] %v8874_v14, 128  ;;  %v1145_v14 = vcvt.s32.f32 %v1143_v9  ;;  %v1173_v9 = vcvt.s32.f32 %v1171_v19 }
 0x52c   :  { %3959 = vxpose.xlu1.c.b16.cont [6/8] %v8869_v8, 128  ;;  %v1185_v8 = vand.u32 65535, %v8820_v27  ;;  %v1213_v27 = vand.u32 65535, %v8843_v40  ;;  %v1241_v40 = vand.u32 65535, %v8867_v6  ;;  %v1269_v6 = vand.u32 65535, %v8891_v31 }
 0x52e   :  { %v1187_v7 = vcvt.s32.f32 %v1185_v8  ;;  %v1215_v8 = vcvt.s32.f32 %v1213_v27  ;;  %v1243_v19 = vcvt.s32.f32 %v1241_v40 }
 0x530   :  { %3960 = vxpose.xlu1.c.b16.cont [7/8] %v8898_v37, 128 }
 0x534   :  { %3961 = vxpose.xlu1.c.b16.end [8/8] %v8893_v34, 128 }
 0x53c   :  { %v9027_v2 = vpop.xlane.xlu0 %1161 }
 0x53d   :  { %vm1163_vm9 = vcmp.eq.f32.partialorder %v8809_v18, %v9027_v2 }
 0x53e   :  { %v1164_v28 = vsel %vm1163_vm9, %v1159_v13, inf }
 0x53f   :  { %1165 = vmin.xlane.f32.xlu0 %v1164_v28 }
 0x540   :  { %v9032_v41 = vpop.xlane.xlu0 %1147 }
 0x541   :  { %vm1149_vm10 = vcmp.eq.f32.partialorder %v8817_v25, %v9032_v41 }
 0x542   :  { %v1150_v34 = vsel %vm1149_vm10, %v1145_v14, inf }
 0x543   :  { %1151 = vmin.xlane.f32.xlu1 %v1150_v34  ;;  %v1201_v34 = vcvt.s32.f32 %v1199_v30  ;;  %v1257_v30 = vcvt.s32.f32 %v1255_v20  ;;  %v1154_v20 = vcvt.f32.s32 %v9032_v41  ;;  %v13902_v41 = vmov 1  }
 0x544   :  { %v9037_v15 = vpop.xlane.xlu0 %1189  ;;  %7952 = vset.pattern.permute.xlu1 %v13902_v41 }
 0x545   :  { %vm1191_vm11 = vcmp.eq.f32.partialorder %v8832_v33, %v9037_v15 }
 0x546   :  { %v1192_v13 = vsel %vm1191_vm11, %v1187_v7, inf }
 0x547   :  { %1193 = vmin.xlane.f32.xlu0 %v1192_v13 }
 0x548   :  { %v9042_v18 = vpop.xlane.xlu0 %1175 }
 0x549   :  { %vm1177_vm12 = vcmp.eq.f32.partialorder %v8839_v38, %v9042_v18 }
 0x54a   :  { %v1178_v25 = vsel %vm1177_vm12, %v1173_v9, inf  ;;  %v1229_v9 = vcvt.s32.f32 %v1227_v54 }
 0x54b   :  { %1179 = vmin.xlane.f32.xlu1 %v1178_v25  ;;  %v1271_v25 = vcvt.s32.f32 %v1269_v6 }
 0x54c   :  { %v9047_v28 = vpop.xlane.xlu0 %1217 }
 0x54d   :  { %vm1219_vm13 = vcmp.eq.f32.partialorder %v8853_v52, %v9047_v28 }
 0x54e   :  { %v1220_v33 = vsel %vm1219_vm13, %v1215_v8, inf }
 0x54f   :  { %1221 = vmin.xlane.f32.xlu0 %v1220_v33 }
 0x550   :  { %v9052_v14 = vpop.xlane.xlu0 %1203 }
 0x551   :  { %vm1205_vm14 = vcmp.eq.f32.partialorder %v8863_v0, %v9052_v14 }
 0x552   :  { %v1206_v38 = vsel %vm1205_vm14, %v1201_v34, inf }
 0x553   :  { %1207 = vmin.xlane.f32.xlu1 %v1206_v38 }
 0x554   :  { %v9057_v7 = vpop.xlane.xlu0 %1245 }
 0x555   :  { %vm1247_vm15 = vcmp.eq.f32.partialorder %v8877_v17, %v9057_v7 }
 0x556   :  { %v1248_v52 = vsel %vm1247_vm15, %v1243_v19, inf }
 0x557   :  { %1249 = vmin.xlane.f32.xlu0 %v1248_v52 }
 0x558   :  { %v9062_v13 = vpop.xlane.xlu0 %1231 }
 0x559   :  { %vm1233_vm2 = vcmp.eq.f32.partialorder %v8887_v26, %v9062_v13  ;;  %v1283_v26 = vand.u32 65535, %v8923_v12  ;;  %v1339_v12 = vand.u32 65535, %v8962_v29 }
 0x55a   :  { %v1234_v0 = vsel %vm1233_vm2, %v1229_v9, inf }
 0x55b   :  { %1235 = vmin.xlane.f32.xlu1 %v1234_v0  ;;  %v1285_v34 = vcvt.s32.f32 %v1283_v26  ;;  %v1341_v54 = vcvt.s32.f32 %v1339_v12  ;;  %v1155_v26 = vshll.u32 %v1154_v20, 16 }
 0x55c   :  { %v9067_v27 = vpop.xlane.xlu0 %1273 }
 0x55d   :  { %vm1275_vm3 = vcmp.eq.f32.partialorder %v8901_v44, %v9067_v27  ;;  %v1311_v44 = vand.u32 65535, %v8939_v36 }
 0x55e   :  { %v1276_v17 = vsel %vm1275_vm3, %v1271_v25, inf }
 0x55f   :  { %1277 = vmin.xlane.f32.xlu0 %v1276_v17  ;;  %v1313_v38 = vcvt.s32.f32 %v1311_v44 }
 0x560   :  { %v9072_v8 = vpop.xlane.xlu0 %1259 }
 0x561   :  { %vm1261_vm4 = vcmp.eq.f32.partialorder %v8911_v58, %v9072_v8 }
 0x562   :  { %v1262_v31 = vsel %vm1261_vm4, %v1257_v30, inf }
 0x563   :  { %1263 = vmin.xlane.f32.xlu1 %v1262_v31 }
 0x568   :  { %v9077_v33 = vpop.xlane.xlu1 %1287 }
 0x569   :  { %vm1289_vm5 = vcmp.eq.f32.partialorder %v8928_v22, %v9077_v33 }
 0x56a   :  { %v1290_v46 = vsel %vm1289_vm5, %v1285_v34, inf }
 0x56b   :  { %1291 = vmin.xlane.f32.xlu1 %v1290_v46 }
 0x570   :  { %v9082_v40 = vpop.xlane.xlu1 %1315 }
 0x571   :  { %vm1317_vm6 = vcmp.eq.f32.partialorder %v8944_v56, %v9082_v40 }
 0x572   :  { %v1318_v58 = vsel %vm1317_vm6, %v1313_v38, inf  ;;  %v1182_v38 = vcvt.f32.s32 %v9042_v18 }
 0x573   :  { %1319 = vmin.xlane.f32.xlu1 %v1318_v58 }
 0x578   :  { %v9087_v19 = vpop.xlane.xlu1 %1343 }
 0x579   :  { %vm1345_vm7 = vcmp.eq.f32.partialorder %v8972_v4, %v9087_v19 }
 0x57a   :  { %v1346_v22 = vsel %vm1345_vm7, %v1341_v54, inf }
 0x57b   :  { %1347 = vmin.xlane.f32.xlu1 %v1346_v22  ;;  %v1183_v22 = vshll.u32 %v1182_v38, 16 }
 0x57e   :  { %v3962_v52 = vpop.trf.xlu1 }
 0x57f   :  { %7682 = vmatprep.mubr.bf16.mxu0 %v3962_v52  ;;  %v1224_v52 = vcvt.f32.s32 %v9047_v28 }
 0x582   :  { %v3963_v36 = vpop.trf.xlu1 }
 0x583   :  { %7683 = vmatmul.mubr.bf16.vlgmr.msra.gmra.mrb[28].mxu0 %v3963_v36 }
 0x586   :  { %v3964_v9 = vpop.trf.xlu1 }
 0x587   :  { %7686 = vmatprep.mubr.bf16.mxu0 %v3964_v9 }
 0x58a   :  { %v3965_v6 = vpop.trf.xlu1 }
 0x58b   :  { %7687 = vmatmul.mubr.bf16.gmra.mrb[32].mxu0 %v3965_v6  ;;  %v1225_v6 = vshll.u32 %v1224_v52, 16 }
 0x58c   :  { %4115 = vxpose.xlu0.c.b16.start [1/8] (narrow) %v8952_v3, 16  ;;  %v9100_v3 = vpop.xlane.xlu0 %1301 }
 0x58d   :  { %vm1303_vm8 = vcmp.eq.f32.partialorder %v8920_v10, %v9100_v3 }
 0x58e   :  { %v3966_v56 = vpop.trf.xlu1 }
 0x58f   :  { %7690 = vmatprep.mubr.bf16.mxu0 %v3966_v56  ;;  %v1210_v56 = vcvt.f32.s32 %v9052_v14 }
 0x590   :  { %4116 = vxpose.xlu0.c.b16.cont [2/8] (narrow) %v8967_v39, 16  ;;  %v1297_v39 = vand.u32 65535, %v8915_v60 }
 0x592   :  { %v3967_v29 = vpop.trf.xlu1 }
 0x593   :  { %7691 = vmatmul.mubr.bf16.gmra.mrb[36].mxu0 %v3967_v29 }
 0x594   :  { %4117 = vxpose.xlu0.c.b16.cont [3/8] (narrow) %v8978_v16, 16  ;;  %v9105_v16 = vpop.xlane.xlu0 %1329 }
 0x595   :  { %vm1331_vm9 = vcmp.eq.f32.partialorder %v8936_v35, %v9105_v16 }
 0x596   :  { %v3968_v4 = vpop.trf.xlu1 }
 0x597   :  { %7694 = vmatprep.mubr.bf16.mxu0 %v3968_v4 }
 0x598   :  { %4118 = vxpose.xlu0.c.b16.cont [4/8] (narrow) %v8986_v21, 16  ;;  %v1299_v21 = vcvt.s32.f32 %v1297_v39  ;;  %v1252_v39 = vcvt.f32.s32 %v9057_v7 }
 0x59a   :  { %v3969_v0 = vpop.trf.xlu1  ;;  %v1304_v25 = vsel %vm1303_vm8, %v1299_v21, inf }
 0x59b   :  { %7695 = vmatmul.mubr.bf16.gmra.mrb[40].mxu0 %v3969_v0  ;;  %v1211_v0 = vshll.u32 %v1210_v56, 16 }
 0x59c   :  { %7734 = vmatprep.mubr.bf16.mxu0 %v8830_v32  ;;  %4119 = vxpose.xlu0.c.b16.cont [5/8] (narrow) %v8993_v50, 16  ;;  %v1325_v32 = vand.u32 65535, %v8931_v23  ;;  %v1168_v23 = vcvt.f32.s32 %v9027_v2 }
 0x59e   :  { %v1169_v30 = vshll.u32 %v1168_v23, 16 }
 0x5a0   :  { %4120 = vxpose.xlu0.c.b16.cont [6/8] (narrow) %v9000_v42, 16  ;;  %v1327_v42 = vcvt.s32.f32 %v1325_v32 }
 0x5a2   :  { %v1332_v50 = vsel %vm1331_vm9, %v1327_v42, inf  ;;  %v1238_v42 = vcvt.f32.s32 %v9062_v13 }
 0x5a4   :  { %4121 = vxpose.xlu0.c.b16.cont [7/8] (narrow) %v9007_v1, 16  ;;  %v9110_v1 = vpop.xlane.xlu0 %1357 }
 0x5a5   :  { %vm1359_vm10 = vcmp.eq.f32.partialorder %v8958_v24, %v9110_v1 }
 0x5a8   :  { %4122 = vxpose.xlu0.c.b16.end [8/8] (narrow) %v9014_v11, 16  ;;  %v1353_v11 = vand.u32 65535, %v8947_v62  ;;  %v1196_v62 = vcvt.f32.s32 %v9037_v15 }
 0x5aa   :  { %v1355_v60 = vcvt.s32.f32 %v1353_v11  ;;  %v1197_v44 = vshll.u32 %v1196_v62, 16 }
 0x5ac   :  { %v1360_v10 = vsel %vm1359_vm10, %v1355_v60, inf  ;;  %v1239_v60 = vshll.u32 %v1238_v42, 16 }
 0x5b1   :  { %7956 = vset.pattern.permute.xlu0 %v13902_v41 }
 0x5b5   :  { %1305 = vmin.xlane.f32.xlu0 %v1304_v25  ;;  %v1253_v25 = vshll.u32 %v1252_v39, 16  ;;  %v1308_v39 = vcvt.f32.s32 %v9100_v3 }
 0x5b9   :  { %1333 = vmin.xlane.f32.xlu0 %v1332_v50 }
 0x5bd   :  { %1361 = vmin.xlane.f32.xlu0 %v1360_v10  ;;  %v1280_v10 = vcvt.f32.s32 %v9067_v27 }
 0x5cc   :  { %v1166_v17 = vpop.xlane.xlu0 %1165 }
 0x5cd   :  { %v1167_v35 = vcvt.f32.s32 %v1166_v17  ;;  %v1281_v17 = vshll.u32 %v1280_v10, 16  ;;  %v1364_v10 = vcvt.f32.s32 %v9110_v1  ;;  %v14177_v1 = vld [vmem:[#allocation3_spill] sm:$0xff] }
 0x5cf   :  { %v9117_v31 = vadd.s32 %v1169_v30, %v1167_v35  ;;  %v1266_v30 = vcvt.f32.s32 %v9072_v8 }
 0x5d0   :  { %v1152_v34 = vpop.xlane.xlu1 %1151 }
 0x5d1   :  { %14158 = vst [vmem:[#allocation13_spill] sm:$0xff] %v9117_v31  ;;  %v1153_v46 = vcvt.f32.s32 %v1152_v34  ;;  %vm1368_vm11 = vcmp.eq.s32.totalorder %v8719_v43, %v9117_v31  ;;  %v1267_v34 = vshll.u32 %v1266_v30, 16  ;;  %v1365_v30 = vshll.u32 %v1364_v10, 16 }
 0x5d2   :  { %v9126_v2 = vsel %vm1368_vm11, -1e+30, %v8724_v45 }
 0x5d3   :  { %v9130_v24 = vadd.s32 %v1155_v26, %v1153_v46  ;;  %1401 = vmax.xlane.f32.xlu0 %v9126_v2 }
 0x5d4   :  { %v1194_v15 = vpop.xlane.xlu0 %1193 }
 0x5d5   :  { %14159 = vst [vmem:[#allocation14_spill] sm:$0xff] %v9130_v24  ;;  %v1195_v58 = vcvt.f32.s32 %v1194_v15  ;;  %vm1367_vm12 = vcmp.eq.s32.totalorder %v8719_v43, %v9130_v24 }
 0x5d6   :  { %v9140_v45 = vsel %vm1367_vm12, -1e+30, %v8729_v47 }
 0x5d7   :  { %v9142_v12 = vadd.s32 %v1197_v44, %v1195_v58  ;;  %1399 = vmax.xlane.f32.xlu1 %v9140_v45 }
 0x5d8   :  { %v1180_v54 = vpop.xlane.xlu1 %1179 }
 0x5d9   :  { %14160 = vst [vmem:[#allocation15_spill] sm:$0xff] %v9142_v12  ;;  %v1181_v36 = vcvt.f32.s32 %v1180_v54  ;;  %vm1370_vm13 = vcmp.eq.s32.totalorder %v8719_v43, %v9142_v12 }
 0x5da   :  { %v9152_v18 = vsel %vm1370_vm13, -1e+30, %v8734_v49 }
 0x5db   :  { %v9154_v47 = vadd.s32 %v1183_v22, %v1181_v36  ;;  %1405 = vmax.xlane.f32.xlu0 %v9152_v18 }
 0x5dc   :  { %v1222_v9 = vpop.xlane.xlu0 %1221 }
 0x5dd   :  { %14161 = vst [vmem:[#allocation16_spill] sm:$0xff] %v9154_v47  ;;  %v1223_v29 = vcvt.f32.s32 %v1222_v9  ;;  %vm13958_vm14 = vcmp.eq.s32.totalorder %v8719_v43, %v9154_v47  ;;  %v1350_v9 = vcvt.f32.s32 %v9087_v19  ;;  %v14172_v19 = vld [vmem:[#allocation6_spill] sm:$0xff] }
 0x5de   :  { %v9164_v28 = vsel %vm13958_vm14, -1e+30, %v8738_v51 }
 0x5df   :  { %v9166_v49 = vadd.s32 %v1225_v6, %v1223_v29  ;;  %1403 = vmax.xlane.f32.xlu1 %v9164_v28  ;;  %v1351_v56 = vshll.u32 %v1350_v9, 16 }
 0x5e0   :  { %v1208_v4 = vpop.xlane.xlu1 %1207 }
 0x5e1   :  { %14162 = vst [vmem:[#allocation17_spill] sm:$0xff] %v9166_v49  ;;  %v1209_v21 = vcvt.f32.s32 %v1208_v4  ;;  %vm1372_vm15 = vcmp.eq.s32.totalorder %v8719_v43, %v9166_v49 }
 0x5e2   :  { %v9176_v14 = vsel %vm1372_vm15, -1e+30, %v8744_v53 }
 0x5e3   :  { %v9178_v51 = vadd.s32 %v1211_v0, %v1209_v21  ;;  %1409 = vmax.xlane.f32.xlu0 %v9176_v14 }
 0x5e4   :  { %v1250_v32 = vpop.xlane.xlu0 %1249 }
 0x5e5   :  { %14163 = vst [vmem:[#allocation18_spill] sm:$0xff] %v9178_v51  ;;  %v1251_v11 = vcvt.f32.s32 %v1250_v32  ;;  %vm13948_vm2 = vcmp.eq.s32.totalorder %v8719_v43, %v9178_v51  ;;  %v1309_v32 = vshll.u32 %v1308_v39, 16 }
 0x5e6   :  { %v9188_v7 = vsel %vm13948_vm2, -1e+30, %v8749_v55 }
 0x5e7   :  { %v9190_v53 = vadd.s32 %v1253_v25, %v1251_v11  ;;  %1407 = vmax.xlane.f32.xlu1 %v9188_v7  ;;  %v1336_v25 = vcvt.f32.s32 %v9105_v16 }
 0x5e8   :  { %v1236_v50 = vpop.xlane.xlu1 %1235 }
 0x5e9   :  { %14164 = vst [vmem:[#allocation19_spill] sm:$0xff] %v9190_v53  ;;  %v1237_v23 = vcvt.f32.s32 %v1236_v50  ;;  %vm1374_vm3 = vcmp.eq.s32.totalorder %v8719_v43, %v9190_v53 }
 0x5ea   :  { %v9200_v13 = vsel %vm1374_vm3, -1e+30, %v8754_v57 }
 0x5eb   :  { %v9202_v55 = vadd.s32 %v1239_v60, %v1237_v23  ;;  %1413 = vmax.xlane.f32.xlu0 %v9200_v13  ;;  %v1337_v60 = vshll.u32 %v1336_v25, 16 }
 0x5ec   :  { %v1278_v20 = vpop.xlane.xlu0 %1277 }
 0x5ed   :  { %14165 = vst [vmem:[#allocation20_spill] sm:$0xff] %v9202_v55  ;;  %v1279_v35 = vcvt.f32.s32 %v1278_v20  ;;  %vm13947_vm4 = vcmp.eq.s32.totalorder %v8719_v43, %v9202_v55  ;;  %v14175_v20 = vld [vmem:[#allocation2_spill] sm:$0xff] }
 0x5ee   :  { %v9212_v27 = vsel %vm13947_vm4, -1e+30, %v8759_v59  ;;  %v1294_v59 = vcvt.f32.s32 %v9077_v33 }
 0x5ef   :  { %v9214_v57 = vadd.s32 %v1281_v17, %v1279_v35  ;;  %1411 = vmax.xlane.f32.xlu1 %v9212_v27 }
 0x5f0   :  { %v1264_v26 = vpop.xlane.xlu1 %1263  ;;  %v1295_v38 = vshll.u32 %v1294_v59, 16 }
 0x5f1   :  { %14166 = vst [vmem:[#allocation21_spill] sm:$0xff] %v9214_v57  ;;  %v1265_v62 = vcvt.f32.s32 %v1264_v26  ;;  %vm1376_vm5 = vcmp.eq.s32.totalorder %v8719_v43, %v9214_v57  ;;  %v14197_v57 = vmov 1  }
 0x5f2   :  { %v4123_v8 = vpop.trf.xlu0  ;;  %v9223_v46 = vsel %vm1376_vm5, -1e+30, %v8765_v61 }
 0x5f3   :  { %v9225_v15 = vadd.s32 %v1267_v34, %v1265_v62  ;;  %1417 = vmax.xlane.f32.xlu0 %v9223_v46  ;;  %7715 = vmatmul.mubr.bf16.vlgmr.msra.gmra.mrb[28].mxu1 %v4123_v8  ;;  %v14179_v62 = vld [vmem:[#allocation5_spill] sm:$0xff] }
 0x5f4   :  { %7754 = vmatprep.mubr.bf16.mxu1 %v8850_v48  ;;  %v1322_v48 = vcvt.f32.s32 %v9082_v40  ;;  %v14170_v40 = vld [vmem:[#allocation4_spill] sm:$0xff] }
 0x5f5   :  { %14167 = vst [vmem:[#allocation22_spill] sm:$0xff] %v9225_v15  ;;  %vm13946_vm6 = vcmp.eq.s32.totalorder %v8719_v43, %v9225_v15 }
 0x5f6   :  { %v9236_v44 = vsel %vm13946_vm6, -1e+30, %v8770_v63  ;;  %v1323_v22 = vshll.u32 %v1322_v48, 16 }
 0x5f7   :  { %1415 = vmax.xlane.f32.xlu1 %v9236_v44 }
 0x5f8   :  { %v1292_v61 = vpop.xlane.xlu1 %1291 }
 0x5f9   :  { %v1293_v58 = vcvt.f32.s32 %v1292_v61 }
 0x5fb   :  { %v9239_v54 = vadd.s32 %v1295_v38, %v1293_v58 }
 0x5fd   :  { %14168 = vst [vmem:[#allocation23_spill] sm:$0xff] %v9239_v54  ;;  %vm13945_vm7 = vcmp.eq.s32.totalorder %v8719_v43, %v9239_v54 }
 0x5fe   :  { %v9248_v33 = vsel %vm13945_vm7, -1e+30, %v8780_v5 }
 0x5ff   :  { %1419 = vmax.xlane.f32.xlu1 %v9248_v33 }
 0x600   :  { %v1320_v63 = vpop.xlane.xlu1 %1319 }
 0x601   :  { %v1321_v52 = vcvt.f32.s32 %v1320_v63  ;;  %v13900_v63 = vmov 3  }
 0x603   :  { %v9251_v36 = vadd.s32 %v1323_v22, %v1321_v52 }
 0x605   :  { %14169 = vst [vmem:[#allocation24_spill] sm:$0xff] %v9251_v36  ;;  %vm13944_vm8 = vcmp.eq.s32.totalorder %v8719_v43, %v9251_v36 }
 0x606   :  { %v9260_v6 = vsel %vm13944_vm8, -1e+30, %v14170_v40 }
 0x607   :  { %1423 = vmax.xlane.f32.xlu1 %v9260_v6 }
 0x608   :  { %v1348_v5 = vpop.xlane.xlu1 %1347 }
 0x609   :  { %v1349_v29 = vcvt.f32.s32 %v1348_v5 }
 0x60b   :  { %v9263_v4 = vadd.s32 %v1351_v56, %v1349_v29 }
 0x60d   :  { %14171 = vst [vmem:[#allocation4_spill] sm:$0xff] %v9263_v4  ;;  %vm13897_vm9 = vcmp.eq.s32.totalorder %v8719_v43, %v9263_v4 }
 0x60e   :  { %v9271_v0 = vsel %vm13897_vm9, -1e+30, %v14172_v19 }
 0x60f   :  { %14173 = vst [vmem:[#allocation6_spill] sm:$0xff] %v9271_v0  ;;  %1427 = vmax.xlane.f32.xlu1 %v9271_v0 }
 0x642   :  { %v1306_v21 = vpop.xlane.xlu0 %1305 }
 0x643   :  { %v1307_v42 = vcvt.f32.s32 %v1306_v21 }
 0x645   :  { %v9276_v11 = vadd.s32 %v1309_v32, %v1307_v42 }
 0x646   :  { %v1334_v50 = vpop.xlane.xlu0 %1333 }
 0x647   :  { %14174 = vst [vmem:[#allocation25_spill] sm:$0xff] %v9276_v11  ;;  %v1335_v23 = vcvt.f32.s32 %v1334_v50  ;;  %vm13943_vm10 = vcmp.eq.s32.totalorder %v8719_v43, %v9276_v11 }
 0x648   :  { %v9285_v3 = vsel %vm13943_vm10, -1e+30, %v14175_v20 }
 0x649   :  { %v9287_v17 = vadd.s32 %v1337_v60, %v1335_v23  ;;  %1421 = vmax.xlane.f32.xlu0 %v9285_v3 }
 0x64a   :  { %v1362_v16 = vpop.xlane.xlu0 %1361 }
 0x64b   :  { %14176 = vst [vmem:[#allocation2_spill] sm:$0xff] %v9287_v17  ;;  %v1363_v35 = vcvt.f32.s32 %v1362_v16  ;;  %vm13899_vm0 = vcmp.eq.s32.totalorder %v8719_v43, %v9287_v17 }
 0x64c   :  { %v9296_v26 = vsel %vm13899_vm0, -1e+30, %v14177_v1 }
 0x64d   :  { %v9298_v34 = vadd.s32 %v1365_v30, %v1363_v35  ;;  %1425 = vmax.xlane.f32.xlu0 %v9296_v26 }
 0x64f   :  { %14178 = vst [vmem:[#allocation3_spill] sm:$0xff] %v9298_v34  ;;  %vm13898_vm1 = vcmp.eq.s32.totalorder %v8719_v43, %v9298_v34 }
 0x650   :  { %v9307_v8 = vsel %vm13898_vm1, -1e+30, %v14179_v62 }
 0x651   :  { %1429 = vmax.xlane.f32.xlu0 %v9307_v8 }
 0x656   :  { %v9310_v59 = vpop.f32.mrb[28].mxu0 }
 0x657   :  { %14180 = vst [vmem:[#allocation5_spill] sm:$0xff] %v9310_v59  ;;  %v9312_v61 = vpop.f32.mrb[29].mxu0  ;;  %4183 = vperm.xlu1 %7952, %v9310_v59  }
 0x658   :  { %14181 = vst [vmem:[#allocation26_spill] sm:$0xff] %v9312_v61  ;;  %v9315_v38 = vpop.f32.mrb[30].mxu0 }
 0x659   :  { %14182 = vst [vmem:[#allocation27_spill] sm:$0xff] %v9315_v38  ;;  %v9317_v58 = vpop.f32.mrb[31].mxu0 }
 0x65a   :  { %14183 = vst [vmem:[#allocation28_spill] sm:$0xff] %v9317_v58 }
 0x65b   :  { %4173 = vperm.xlu1 %7952, %v9312_v61  }
 0x65e   :  { %v9320_v48 = vpop.f32.mrb[32].mxu0 }
 0x65f   :  { %14184 = vst [vmem:[#allocation29_spill] sm:$0xff] %v9320_v48  ;;  %7953 = vset.pattern.permute.xlu1 %v13900_v63  ;;  %v9323_v22 = vpop.f32.mrb[33].mxu0 }
 0x660   :  { %14185 = vst [vmem:[#allocation30_spill] sm:$0xff] %v9323_v22  ;;  %4553 = vperm.xlu1 %7953, %v9312_v61   ;;  %v9326_v52 = vpop.f32.mrb[34].mxu0  ;;  %v1402_v25 = vpop.xlane.xlu0 %1401 }
 0x661   :  { %14186 = vst [vmem:[#allocation31_spill] sm:$0xff] %v9326_v52  ;;  %v9328_v9 = vpop.f32.mrb[35].mxu0  ;;  %vm1432_vm9 = vcmp.eq.f32.partialorder %v9126_v2, %v1402_v25 }
 0x662   :  { %14187 = vst [vmem:[#allocation32_spill] sm:$0xff] %v9328_v9  ;;  %v9365_v50 = vsel %vm1432_vm9, %v8719_v43, 128 }
 0x663   :  { %v1478_v10 = vshra.s32 %v9365_v50, 16 }
 0x664   :  { %7954 = vset.pattern.permute.xlu1 %v13902_v41 }
 0x665   :  { %4188 = vperm.xlu1 %7954, %v9315_v38   ;;  %v9375_v30 = vcvt.s32.f32 %v1478_v10 }
 0x666   :  { %v9332_v40 = vpop.f32.mrb[36].mxu0 }
 0x667   :  { %14188 = vst [vmem:[#allocation33_spill] sm:$0xff] %v9332_v40  ;;  %4178 = vperm.xlu0 %7956, %v9317_v58   ;;  %v9335_v5 = vpop.f32.mrb[37].mxu0 }
 0x668   :  { %14189 = vst [vmem:[#allocation34_spill] sm:$0xff] %v9335_v5  ;;  %v9337_v56 = vpop.f32.mrb[38].mxu0  ;;  %v1406_v42 = vpop.xlane.xlu0 %1405 }
 0x669   :  { %14190 = vst [vmem:[#allocation35_spill] sm:$0xff] %v9337_v56  ;;  %7955 = vset.pattern.permute.xlu1 %v13900_v63  ;;  %v9340_v29 = vpop.f32.mrb[39].mxu0  ;;  %vm1434_vm1 = vcmp.eq.f32.partialorder %v9152_v18, %v1406_v42 }
 0x66a   :  { %14191 = vst [vmem:[#allocation36_spill] sm:$0xff] %v9340_v29  ;;  %4565 = vperm.xlu1 %7955, %v9315_v38   ;;  %v9371_v23 = vsel %vm1434_vm1, %v8719_v43, 128 }
 0x66b   :  { %4203 = vperm.xlu0 %7956, %v9320_v48   ;;  %v1506_v16 = vshra.s32 %v9371_v23, 16 }
 0x66d   :  { %v9383_v25 = vcvt.s32.f32 %v1506_v16 }
 0x66e   :  { %7957 = vset.pattern.permute.xlu1 %v13902_v41  ;;  %v9345_v19 = vpop.f32.mrb[40].mxu0 }
 0x66f   :  { %14192 = vst [vmem:[#allocation37_spill] sm:$0xff] %v9345_v19  ;;  %4193 = vperm.xlu1 %7957, %v9323_v22   ;;  %4198 = vperm.xlu0 %7956, %v9328_v9   ;;  %v9349_v39 = vpop.f32.mrb[41].mxu0 }
 0x670   :  { %14193 = vst [vmem:[#allocation38_spill] sm:$0xff] %v9349_v39  ;;  %v9351_v21 = vpop.f32.mrb[42].mxu0  ;;  %v1410_v60 = vpop.xlane.xlu0 %1409 }
 0x671   :  { %14194 = vst [vmem:[#allocation39_spill] sm:$0xff] %v9351_v21  ;;  %v9353_v32 = vpop.f32.mrb[43].mxu0  ;;  %vm1436_vm0 = vcmp.eq.f32.partialorder %v9176_v14, %v1410_v60 }
 0x672   :  { %14195 = vst [vmem:[#allocation40_spill] sm:$0xff] %v9353_v32  ;;  %v9378_v35 = vsel %vm1436_vm0, %v8719_v43, 128 }
 0x673   :  { %7958 = vset.pattern.permute.xlu1 %v13900_v63  ;;  %v1534_v62 = vshra.s32 %v9378_v35, 16 }
 0x674   :  { %4569 = vperm.xlu1 %7958, %v9323_v22  }
 0x675   :  { %v9391_v10 = vcvt.s32.f32 %v1534_v62 }
 0x678   :  { %7959 = vset.pattern.permute.xlu1 %v13902_v41  ;;  %v1414_v20 = vpop.xlane.xlu0 %1413 }
 0x679   :  { %4208 = vperm.xlu1 %7959, %v9326_v52   ;;  %vm1438_vm9 = vcmp.eq.f32.partialorder %v9200_v13, %v1414_v20 }
 0x67a   :  { %v9386_v42 = vsel %vm1438_vm9, %v8719_v43, 128 }
 0x67b   :  { %v1562_v60 = vshra.s32 %v9386_v42, 16 }
 0x67d   :  { %7960 = vset.pattern.permute.xlu1 %v13900_v63 }
 0x67e   :  { %4573 = vperm.xlu1 %7960, %v9328_v9  }
 0x680   :  { %v1418_v1 = vpop.xlane.xlu0 %1417 }
 0x681   :  { %vm1440_vm1 = vcmp.eq.f32.partialorder %v9223_v46, %v1418_v1 }
 0x682   :  { %7961 = vset.pattern.permute.xlu1 %v13902_v41  ;;  %v9394_v20 = vsel %vm1440_vm1, %v8719_v43, 128  ;;  %v9398_v41 = vcvt.s32.f32 %v1562_v60 }
 0x683   :  { %4213 = vperm.xlu1 %7961, %v9335_v5   ;;  %v1590_v16 = vshra.s32 %v9394_v20, 16 }
 0x685   :  { %v9402_v37 = vcvt.s32.f32 %v1590_v16 }
 0x687   :  { %7962 = vset.pattern.permute.xlu1 %v13900_v63  ;;  %v1400_v63 = vpop.xlane.xlu1 %1399 }
 0x688   :  { %vm1431_vm0 = vcmp.eq.f32.partialorder %v9140_v45, %v1400_v63 }
 0x689   :  { %v9405_v62 = vsel %vm1431_vm0, %v8719_v43, 128 }
 0x68a   :  { %v1464_v9 = vshra.s32 %v9405_v62, 16 }
 0x68b   :  { %v1404_v1 = vpop.xlane.xlu1 %1403 }
 0x68c   :  { %vm1433_vm9 = vcmp.eq.f32.partialorder %v9164_v28, %v1404_v1  ;;  %v9415_v16 = vcvt.s32.f32 %v1464_v9 }
 0x68d   :  { %v9411_v60 = vsel %vm1433_vm9, %v8719_v43, 128 }
 0x68e   :  { %1481 = vmin.xlane.f32.xlu0 %v9375_v30  ;;  %v1492_v63 = vshra.s32 %v9411_v60, 16 }
 0x68f   :  { %v1408_v22 = vpop.xlane.xlu1 %1407 }
 0x690   :  { %vm1435_vm1 = vcmp.eq.f32.partialorder %v9188_v7, %v1408_v22  ;;  %v9423_v34 = vcvt.s32.f32 %v1492_v63 }
 0x691   :  { %v9418_v61 = vsel %vm1435_vm1, %v8719_v43, 128 }
 0x692   :  { %1509 = vmin.xlane.f32.xlu0 %v9383_v25  ;;  %v1520_v4 = vshra.s32 %v9418_v61, 16 }
 0x693   :  { %v1412_v38 = vpop.xlane.xlu1 %1411 }
 0x694   :  { %vm1437_vm0 = vcmp.eq.f32.partialorder %v9212_v27, %v1412_v38  ;;  %v9431_v11 = vcvt.s32.f32 %v1520_v4 }
 0x695   :  { %v9426_v17 = vsel %vm1437_vm0, %v8719_v43, 128 }
 0x696   :  { %1537 = vmin.xlane.f32.xlu0 %v9391_v10  ;;  %v1548_v9 = vshra.s32 %v9426_v17, 16 }
 0x697   :  { %v1416_v1 = vpop.xlane.xlu1 %1415 }
 0x698   :  { %vm1439_vm9 = vcmp.eq.f32.partialorder %v9236_v44, %v1416_v1  ;;  %v9439_v54 = vcvt.s32.f32 %v1548_v9 }
 0x699   :  { %v9434_v38 = vsel %vm1439_vm9, %v8719_v43, 128 }
 0x69a   :  { %1565 = vmin.xlane.f32.xlu0 %v9398_v41  ;;  %v1576_v36 = vshra.s32 %v9434_v38, 16 }
 0x69b   :  { %v1420_v22 = vpop.xlane.xlu1 %1419 }
 0x69c   :  { %vm1441_vm1 = vcmp.eq.f32.partialorder %v9248_v33, %v1420_v22  ;;  %v9447_v15 = vcvt.s32.f32 %v1576_v36 }
 0x69d   :  { %v9442_v1 = vsel %vm1441_vm1, %v8719_v43, 128 }
 0x69e   :  { %1593 = vmin.xlane.f32.xlu0 %v9402_v37  ;;  %v1604_v4 = vshra.s32 %v9442_v1, 16 }
 0x69f   :  { %v1424_v63 = vpop.xlane.xlu1 %1423 }
 0x6a0   :  { %vm1443_vm0 = vcmp.eq.f32.partialorder %v9260_v6, %v1424_v63  ;;  %v9454_v9 = vcvt.s32.f32 %v1604_v4 }
 0x6a1   :  { %v9450_v22 = vsel %vm1443_vm0, %v8719_v43, 128 }
 0x6a2   :  { %v1632_v55 = vshra.s32 %v9450_v22, 16 }
 0x6a4   :  { %v9457_v59 = vcvt.s32.f32 %v1632_v55 }
 0x6a7   :  { %1467 = vmin.xlane.f32.xlu1 %v9415_v16 }
 0x6ab   :  { %1495 = vmin.xlane.f32.xlu1 %v9423_v34 }
 0x6af   :  { %1523 = vmin.xlane.f32.xlu1 %v9431_v11 }
 0x6b3   :  { %1551 = vmin.xlane.f32.xlu1 %v9439_v54 }
 0x6b7   :  { %1579 = vmin.xlane.f32.xlu1 %v9447_v15 }
 0x6bb   :  { %1607 = vmin.xlane.f32.xlu1 %v9454_v9 }
 0x6bf   :  { %1635 = vmin.xlane.f32.xlu1 %v9457_v59 }
 0x6c6   :  { %v9460_v63 = vpop.f32.mrb[28].mxu1 }
 0x6c7   :  { %14196 = vst [vmem:[#allocation41_spill] sm:$0xff] %v9460_v63  ;;  %v7716_v51 = vpop.f32.mrb[29].mxu1 }
 0x6c8   :  { %v4168_v36 = vpop.f32.mrb[30].mxu1 }
 0x6c9   :  { %v7717_v47 = vpop.f32.mrb[31].mxu1 }
 0x6d0   :  { %4577 = vperm.xlu1 %7962, %v9320_v48  }
 0x6d4   :  { %4581 = vperm.xlu1 %7962, %v9326_v52  }
 0x6d6   :  { %v1422_v24 = vpop.xlane.xlu0 %1421 }
 0x6d7   :  { %vm1442_vm9 = vcmp.eq.f32.partialorder %v9285_v3, %v1422_v24 }
 0x6d8   :  { %v9466_v4 = vsel %vm1442_vm9, %v8719_v43, 128  ;;  %7963 = vset.pattern.permute.xlu1 %v14197_v57 }
 0x6d9   :  { %v1618_v55 = vshra.s32 %v9466_v4, 16 }
 0x6da   :  { %v1426_v53 = vpop.xlane.xlu0 %1425 }
 0x6db   :  { %vm1444_vm1 = vcmp.eq.f32.partialorder %v9296_v26, %v1426_v53  ;;  %v9471_v51 = vcvt.s32.f32 %v1618_v55  ;;  %v1428_v55 = vpop.xlane.xlu1 %1427 }
 0x6dc   :  { %v9474_v47 = vsel %vm1444_vm1, %v8719_v43, 128  ;;  %vm1445_vm9 = vcmp.eq.f32.partialorder %v9271_v0, %v1428_v55 }
 0x6dd   :  { %v1646_v36 = vshra.s32 %v9474_v47, 16  ;;  %1621 = vmin.xlane.f32.xlu0 %v9471_v51  ;;  %v9491_v49 = vsel %vm1445_vm9, %v8719_v43, 128 }
 0x6de   :  { %v1430_v24 = vpop.xlane.xlu0 %1429 }
 0x6df   :  { %vm1446_vm0 = vcmp.eq.f32.partialorder %v9307_v8, %v1430_v24  ;;  %v9479_v63 = vcvt.s32.f32 %v1646_v36  ;;  %v1660_v36 = vshra.s32 %v9491_v49, 16  ;;  %v9497_v12 = vpop.permute.xlu1 %4183 }
 0x6e0   :  { %v9482_v48 = vsel %vm1446_vm0, %v8719_v43, 128  ;;  %14198 = vst [vmem:[#allocation42_spill] sm:$0xff] %v9497_v12  ;;  %v1505_v12 = vand.u32 65535, %v9371_v23  ;;  %v1561_v23 = vand.u32 65535, %v9386_v42 }
 0x6e1   :  { %v1674_v52 = vshra.s32 %v9482_v48, 16  ;;  %1649 = vmin.xlane.f32.xlu0 %v9479_v63  ;;  %v9494_v24 = vcvt.s32.f32 %v1660_v36  ;;  %v1477_v36 = vand.u32 65535, %v9365_v50 }
 0x6e2   :  { %v1507_v50 = vcvt.s32.f32 %v1505_v12 }
 0x6e3   :  { %v9486_v53 = vcvt.s32.f32 %v1674_v52  ;;  %v9500_v52 = vpop.permute.xlu1 %4173 }
 0x6e4   :  { %14199 = vst [vmem:[#allocation43_spill] sm:$0xff] %v9500_v52  ;;  %v1479_v52 = vcvt.s32.f32 %v1477_v36 }
 0x6e5   :  { %1677 = vmin.xlane.f32.xlu0 %v9486_v53 }
 0x6e6   :  { %v9504_v19 = vpop.permute.xlu0 %4178 }
 0x6e7   :  { %v9502_v31 = vpop.permute.xlu1 %4553  ;;  %14201 = vst [vmem:[#allocation45_spill] sm:$0xff] %v9504_v19 }
 0x6e8   :  { %14200 = vst [vmem:[#allocation44_spill] sm:$0xff] %v9502_v31 }
 0x6ea   :  { %v9508_v58 = vpop.permute.xlu0 %4203 }
 0x6eb   :  { %v9506_v55 = vpop.permute.xlu1 %4188  ;;  %14203 = vst [vmem:[#allocation47_spill] sm:$0xff] %v9508_v58  ;;  %v1533_v58 = vand.u32 65535, %v9378_v35  ;;  %v1589_v35 = vand.u32 65535, %v9394_v20 }
 0x6ec   :  { %14202 = vst [vmem:[#allocation46_spill] sm:$0xff] %v9506_v55 }
 0x6ed   :  { %v1591_v42 = vcvt.s32.f32 %v1589_v35  ;;  %v1519_v35 = vand.u32 65535, %v9418_v61  ;;  %v1575_v61 = vand.u32 65535, %v9434_v38  ;;  %v1631_v38 = vand.u32 65535, %v9450_v22 }
 0x6ee   :  { %v9513_v32 = vpop.permute.xlu0 %4198  ;;  %v1617_v22 = vand.u32 65535, %v9466_v4 }
 0x6ef   :  { %v9510_v21 = vpop.permute.xlu1 %4565  ;;  %14205 = vst [vmem:[#allocation49_spill] sm:$0xff] %v9513_v32 }
 0x6f0   :  { %14204 = vst [vmem:[#allocation48_spill] sm:$0xff] %v9510_v21 }
 0x6f3   :  { %v9515_v39 = vpop.permute.xlu1 %4193 }
 0x6f4   :  { %14206 = vst [vmem:[#allocation50_spill] sm:$0xff] %v9515_v39  ;;  %v1535_v39 = vcvt.s32.f32 %v1533_v58 }
 0x6f7   :  { %v9522_v55 = vpop.permute.xlu1 %4569 }
 0x6f8   :  { %1663 = vmin.xlane.f32.xlu1 %v9494_v24  ;;  %14207 = vst [vmem:[#allocation51_spill] sm:$0xff] %v9522_v55 }
 0x6fb   :  { %4218 = vperm.xlu0 %7956, %v9340_v29  }
 0x71b   :  { %v9518_v0 = vpop.xlane.xlu0 %1481 }
 0x71c   :  { %vm1483_vm1 = vcmp.eq.f32.partialorder %v9375_v30, %v9518_v0  ;;  %v9532_v30 = vpop.permute.xlu1 %4208 }
 0x71d   :  { %v1484_v31 = vsel %vm1483_vm1, %v1479_v52, inf  ;;  %14208 = vst [vmem:[#allocation52_spill] sm:$0xff] %v9532_v30  ;;  %v1563_v52 = vcvt.s32.f32 %v1561_v23 }
 0x71e   :  { %1485 = vmin.xlane.f32.xlu0 %v1484_v31 }
 0x71f   :  { %v9525_v21 = vpop.xlane.xlu0 %1509 }
 0x720   :  { %vm1511_vm0 = vcmp.eq.f32.partialorder %v9383_v25, %v9525_v21  ;;  %v9541_v25 = vpop.permute.xlu1 %4573 }
 0x721   :  { %v1512_v32 = vsel %vm1511_vm0, %v1507_v50, inf  ;;  %14209 = vst [vmem:[#allocation53_spill] sm:$0xff] %v9541_v25  ;;  %v1491_v50 = vand.u32 65535, %v9411_v60  ;;  %v1547_v60 = vand.u32 65535, %v9426_v17  ;;  %v1603_v17 = vand.u32 65535, %v9442_v1 }
 0x722   :  { %1513 = vmin.xlane.f32.xlu0 %v1512_v32  ;;  %v1633_v1 = vcvt.s32.f32 %v1631_v38 }
 0x723   :  { %v9530_v36 = vpop.xlane.xlu0 %1537 }
 0x724   :  { %vm1539_vm9 = vcmp.eq.f32.partialorder %v9391_v10, %v9530_v36  ;;  %v1463_v10 = vand.u32 65535, %v9405_v62  ;;  %v9548_v20 = vpop.permute.xlu1 %4213 }
 0x725   :  { %v1540_v31 = vsel %vm1539_vm9, %v1535_v39, inf  ;;  %14210 = vst [vmem:[#allocation54_spill] sm:$0xff] %v9548_v20 }
 0x726   :  { %1541 = vmin.xlane.f32.xlu0 %v1540_v31 }
 0x727   :  { %v9537_v12 = vpop.xlane.xlu0 %1565 }
 0x728   :  { %vm1567_vm1 = vcmp.eq.f32.partialorder %v9398_v41, %v9537_v12  ;;  %v1465_v41 = vcvt.s32.f32 %v1463_v10  ;;  %v1549_v10 = vcvt.s32.f32 %v1547_v60 }
 0x729   :  { %v1568_v32 = vsel %vm1567_vm1, %v1563_v52, inf }
 0x72a   :  { %1569 = vmin.xlane.f32.xlu0 %v1568_v32 }
 0x72b   :  { %v9543_v58 = vpop.xlane.xlu0 %1593 }
 0x72c   :  { %vm1595_vm0 = vcmp.eq.f32.partialorder %v9402_v37, %v9543_v58  ;;  %v1493_v37 = vcvt.s32.f32 %v1491_v50 }
 0x72d   :  { %v1596_v39 = vsel %vm1595_vm0, %v1591_v42, inf  ;;  %v1521_v42 = vcvt.s32.f32 %v1519_v35  ;;  %v1605_v35 = vcvt.s32.f32 %v1603_v17 }
 0x72e   :  { %1597 = vmin.xlane.f32.xlu0 %v1596_v39 }
 0x734   :  { %v9551_v23 = vpop.xlane.xlu1 %1467 }
 0x735   :  { %vm1469_vm9 = vcmp.eq.f32.partialorder %v9415_v16, %v9551_v23 }
 0x736   :  { %v1470_v31 = vsel %vm1469_vm9, %v1465_v41, inf  ;;  %v1577_v41 = vcvt.s32.f32 %v1575_v61 }
 0x737   :  { %1471 = vmin.xlane.f32.xlu1 %v1470_v31 }
 0x738   :  { %v9556_v52 = vpop.xlane.xlu1 %1495 }
 0x739   :  { %vm1497_vm1 = vcmp.eq.f32.partialorder %v9423_v34, %v9556_v52 }
 0x73a   :  { %v1498_v62 = vsel %vm1497_vm1, %v1493_v37, inf }
 0x73b   :  { %1499 = vmin.xlane.f32.xlu1 %v1498_v62 }
 0x73c   :  { %v9561_v32 = vpop.xlane.xlu1 %1523 }
 0x73d   :  { %vm1525_vm0 = vcmp.eq.f32.partialorder %v9431_v11, %v9561_v32 }
 0x73e   :  { %v1526_v16 = vsel %vm1525_vm0, %v1521_v42, inf  ;;  %v1619_v42 = vcvt.s32.f32 %v1617_v22 }
 0x73f   :  { %1527 = vmin.xlane.f32.xlu1 %v1526_v16 }
 0x740   :  { %v9566_v39 = vpop.xlane.xlu1 %1551 }
 0x741   :  { %vm1553_vm9 = vcmp.eq.f32.partialorder %v9439_v54, %v9566_v39 }
 0x742   :  { %v1554_v34 = vsel %vm1553_vm9, %v1549_v10, inf }
 0x743   :  { %1555 = vmin.xlane.f32.xlu1 %v1554_v34 }
 0x744   :  { %v9571_v50 = vpop.xlane.xlu1 %1579 }
 0x745   :  { %vm1581_vm1 = vcmp.eq.f32.partialorder %v9447_v15, %v9571_v50  ;;  %v14211_v15 = vmov 3  }
 0x746   :  { %v1582_v11 = vsel %vm1581_vm1, %v1577_v41, inf }
 0x747   :  { %1583 = vmin.xlane.f32.xlu1 %v1582_v11 }
 0x748   :  { %v9576_v31 = vpop.xlane.xlu1 %1607 }
 0x749   :  { %vm1609_vm0 = vcmp.eq.f32.partialorder %v9454_v9, %v9576_v31  ;;  %v1645_v9 = vand.u32 65535, %v9474_v47 }
 0x74a   :  { %v1610_v54 = vsel %vm1609_vm0, %v1605_v35, inf }
 0x74b   :  { %1611 = vmin.xlane.f32.xlu1 %v1610_v54  ;;  %v1647_v10 = vcvt.s32.f32 %v1645_v9 }
 0x74c   :  { %v9580_v37 = vpop.xlane.xlu1 %1635 }
 0x74d   :  { %vm1637_vm9 = vcmp.eq.f32.partialorder %v9457_v59, %v9580_v37  ;;  %v1673_v59 = vand.u32 65535, %v9482_v48  ;;  %v1659_v48 = vand.u32 65535, %v9491_v49  ;;  %v1488_v49 = vcvt.f32.s32 %v9518_v0 }
 0x74e   :  { %v1638_v62 = vsel %vm1637_vm9, %v1633_v1, inf  ;;  %v1516_v1 = vcvt.f32.s32 %v9525_v21 }
 0x74f   :  { %1639 = vmin.xlane.f32.xlu1 %v1638_v62  ;;  %v1675_v47 = vcvt.s32.f32 %v1673_v59  ;;  %v1661_v38 = vcvt.s32.f32 %v1659_v48  ;;  %v1489_v54 = vshll.u32 %v1488_v49, 16 }
 0x750   :  { %v1517_v9 = vshll.u32 %v1516_v1, 16 }
 0x760   :  { %4228 = vperm.xlu1 %7963, %v9337_v56  }
 0x764   :  { %7964 = vset.pattern.permute.xlu1 %v14211_v15 }
 0x765   :  { %4585 = vperm.xlu1 %7964, %v9335_v5  }
 0x76a   :  { %v9589_v60 = vpop.xlane.xlu0 %1621 }
 0x76b   :  { %vm1623_vm1 = vcmp.eq.f32.partialorder %v9471_v51, %v9589_v60  ;;  %v9602_v51 = vpop.permute.xlu1 %4577 }
 0x76c   :  { %v1624_v16 = vsel %vm1623_vm1, %v1619_v42, inf  ;;  %14212 = vst [vmem:[#allocation55_spill] sm:$0xff] %v9602_v51  ;;  %v1544_v42 = vcvt.f32.s32 %v9530_v36 }
 0x76d   :  { %1625 = vmin.xlane.f32.xlu0 %v1624_v16 }
 0x76e   :  { %v9594_v61 = vpop.xlane.xlu0 %1649 }
 0x76f   :  { %vm1651_vm0 = vcmp.eq.f32.partialorder %v9479_v63, %v9594_v61  ;;  %v9605_v41 = vpop.permute.xlu1 %4581 }
 0x770   :  { %v1652_v34 = vsel %vm1651_vm0, %v1647_v10, inf  ;;  %14213 = vst [vmem:[#allocation56_spill] sm:$0xff] %v9605_v41  ;;  %v1545_v10 = vshll.u32 %v1544_v42, 16 }
 0x771   :  { %1653 = vmin.xlane.f32.xlu0 %v1652_v34  ;;  %v1572_v34 = vcvt.f32.s32 %v9537_v12 }
 0x772   :  { %v9598_v4 = vpop.xlane.xlu0 %1677 }
 0x773   :  { %vm1679_vm9 = vcmp.eq.f32.partialorder %v9486_v53, %v9598_v4  ;;  %v1573_v48 = vshll.u32 %v1572_v34, 16  ;;  %v1530_v34 = vcvt.f32.s32 %v9561_v32 }
 0x774   :  { %v1680_v17 = vsel %vm1679_vm9, %v1675_v47, inf }
 0x775   :  { %1681 = vmin.xlane.f32.xlu0 %v1680_v17 }
 0x77a   :  { %v9614_v53 = vpop.permute.xlu0 %4218 }
 0x77b   :  { %14214 = vst [vmem:[#allocation57_spill] sm:$0xff] %v9614_v53 }
 0x785   :  { %v9607_v11 = vpop.xlane.xlu1 %1663 }
 0x786   :  { %vm1665_vm1 = vcmp.eq.f32.partialorder %v9494_v24, %v9607_v11 }
 0x787   :  { %v1666_v63 = vsel %vm1665_vm1, %v1661_v38, inf  ;;  %v1600_v38 = vcvt.f32.s32 %v9543_v58 }
 0x789   :  { %1667 = vmin.xlane.f32.xlu1 %v1666_v63 }
 0x78b   :  { %4223 = vperm.xlu0 %7956, %v9332_v40  }
 0x79a   :  { %4589 = vperm.xlu1 %7964, %v9340_v29  }
 0x79e   :  { %7965 = vset.pattern.permute.xlu1 %v14197_v57 }
 0x7ab   :  { %v1486_v35 = vpop.xlane.xlu0 %1485 }
 0x7ac   :  { %v1487_v62 = vcvt.f32.s32 %v1486_v35  ;;  %v1601_v35 = vshll.u32 %v1600_v38, 16 }
 0x7ae   :  { %v9618_v22 = vadd.s32 %v1489_v54, %v1487_v62 }
 0x7af   :  { %v1514_v24 = vpop.xlane.xlu0 %1513 }
 0x7b0   :  { %v1515_v16 = vcvt.f32.s32 %v1514_v24  ;;  %vm1688_vm0 = vcmp.eq.s32.totalorder %v8719_v43, %v9618_v22 }
 0x7b1   :  { %v9627_v0 = vsel %vm1688_vm0, -1e+30, %v9126_v2 }
 0x7b2   :  { %v9629_v59 = vadd.s32 %v1517_v9, %v1515_v16  ;;  %1737 = vmax.xlane.f32.xlu0 %v9627_v0  ;;  %v1502_v9 = vcvt.f32.s32 %v9556_v52 }
 0x7b3   :  { %v1542_v21 = vpop.xlane.xlu0 %1541 }
 0x7b4   :  { %v1543_v47 = vcvt.f32.s32 %v1542_v21  ;;  %vm1690_vm9 = vcmp.eq.s32.totalorder %v8719_v43, %v9629_v59 }
 0x7b5   :  { %v9639_v36 = vsel %vm1690_vm9, -1e+30, %v9152_v18 }
 0x7b6   :  { %v9641_v2 = vadd.s32 %v1545_v10, %v1543_v47  ;;  %1741 = vmax.xlane.f32.xlu0 %v9639_v36  ;;  %v1503_v10 = vshll.u32 %v1502_v9, 16 }
 0x7b7   :  { %v1570_v17 = vpop.xlane.xlu0 %1569 }
 0x7b8   :  { %v1571_v63 = vcvt.f32.s32 %v1570_v17  ;;  %vm1692_vm1 = vcmp.eq.s32.totalorder %v8719_v43, %v9641_v2  ;;  %v1531_v17 = vshll.u32 %v1530_v34, 16 }
 0x7b9   :  { %v9651_v12 = vsel %vm1692_vm1, -1e+30, %v9176_v14  ;;  %v1474_v14 = vcvt.f32.s32 %v9551_v23 }
 0x7ba   :  { %v9653_v18 = vadd.s32 %v1573_v48, %v1571_v63  ;;  %1745 = vmax.xlane.f32.xlu0 %v9651_v12  ;;  %v1558_v48 = vcvt.f32.s32 %v9566_v39 }
 0x7bb   :  { %v1598_v49 = vpop.xlane.xlu0 %1597 }
 0x7bc   :  { %v1599_v54 = vcvt.f32.s32 %v1598_v49  ;;  %vm1694_vm10 = vcmp.eq.s32.totalorder %v8719_v43, %v9653_v18  ;;  %v1559_v49 = vshll.u32 %v1558_v48, 16 }
 0x7bd   :  { %v9662_v58 = vsel %vm1694_vm10, -1e+30, %v9200_v13  ;;  %v1475_v13 = vshll.u32 %v1474_v14, 16 }
 0x7be   :  { %v9664_v1 = vadd.s32 %v1601_v35, %v1599_v54  ;;  %1749 = vmax.xlane.f32.xlu0 %v9662_v58  ;;  %v1586_v35 = vcvt.f32.s32 %v9571_v50 }
 0x7c0   :  { %vm1696_vm8 = vcmp.eq.s32.totalorder %v8719_v43, %v9664_v1 }
 0x7c1   :  { %v9674_v62 = vsel %vm1696_vm8, -1e+30, %v9223_v46 }
 0x7c2   :  { %14215 = vst [vmem:[#allocation58_spill] sm:$0xff] %v9674_v62  ;;  %1753 = vmax.xlane.f32.xlu0 %v9674_v62 }
 0x7c4   :  { %v1472_v24 = vpop.xlane.xlu1 %1471 }
 0x7c5   :  { %v1473_v42 = vcvt.f32.s32 %v1472_v24  ;;  %v1587_v24 = vshll.u32 %v1586_v35, 16 }
 0x7c7   :  { %v9678_v16 = vadd.s32 %v1475_v13, %v1473_v42  ;;  %v1614_v13 = vcvt.f32.s32 %v9576_v31 }
 0x7c8   :  { %v1500_v21 = vpop.xlane.xlu1 %1499 }
 0x7c9   :  { %v1501_v23 = vcvt.f32.s32 %v1500_v21  ;;  %vm1687_vm7 = vcmp.eq.s32.totalorder %v8719_v43, %v9678_v16  ;;  %v1615_v21 = vshll.u32 %v1614_v13, 16  ;;  %v1684_v13 = vcvt.f32.s32 %v9598_v4 }
 0x7ca   :  { %v9687_v46 = vsel %vm1687_vm7, -1e+30, %v9140_v45 }
 0x7cb   :  { %v9689_v47 = vadd.s32 %v1503_v10, %v1501_v23  ;;  %1735 = vmax.xlane.f32.xlu1 %v9687_v46  ;;  %v1642_v10 = vcvt.f32.s32 %v9580_v37 }
 0x7cc   :  { %v1528_v52 = vpop.xlane.xlu1 %1527 }
 0x7cd   :  { %v1529_v38 = vcvt.f32.s32 %v1528_v52  ;;  %vm1689_vm6 = vcmp.eq.s32.totalorder %v8719_v43, %v9689_v47  ;;  %v1643_v52 = vshll.u32 %v1642_v10, 16 }
 0x7ce   :  { %v9699_v32 = vsel %vm1689_vm6, -1e+30, %v9164_v28 }
 0x7cf   :  { %v9701_v45 = vadd.s32 %v1531_v17, %v1529_v38  ;;  %1739 = vmax.xlane.f32.xlu1 %v9699_v32  ;;  %v1628_v38 = vcvt.f32.s32 %v9589_v60 }
 0x7d0   :  { %v1556_v63 = vpop.xlane.xlu1 %1555 }
 0x7d1   :  { %v1557_v54 = vcvt.f32.s32 %v1556_v63  ;;  %vm13949_vm4 = vcmp.eq.s32.totalorder %v8719_v43, %v9701_v45 }
 0x7d2   :  { %v9711_v39 = vsel %vm13949_vm4, -1e+30, %v9188_v7 }
 0x7d3   :  { %v9713_v28 = vadd.s32 %v1559_v49, %v1557_v54  ;;  %1743 = vmax.xlane.f32.xlu1 %v9711_v39  ;;  %v1656_v49 = vcvt.f32.s32 %v9594_v61 }
 0x7d4   :  { %v1584_v14 = vpop.xlane.xlu1 %1583 }
 0x7d5   :  { %v1585_v9 = vcvt.f32.s32 %v1584_v14  ;;  %vm13950_vm2 = vcmp.eq.s32.totalorder %v8719_v43, %v9713_v28 }
 0x7d6   :  { %v9723_v50 = vsel %vm13950_vm2, -1e+30, %v9212_v27 }
 0x7d7   :  { %v9725_v7 = vadd.s32 %v1587_v24, %v1585_v9  ;;  %1747 = vmax.xlane.f32.xlu1 %v9723_v50  ;;  %v1657_v24 = vshll.u32 %v1656_v49, 16  ;;  %v14230_v49 = vld [vmem:[#allocation38_spill] sm:$0xff] }
 0x7d8   :  { %v1612_v42 = vpop.xlane.xlu1 %1611 }
 0x7d9   :  { %v1613_v34 = vcvt.f32.s32 %v1612_v42  ;;  %vm13951_vm4 = vcmp.eq.s32.totalorder %v8719_v43, %v9725_v7  ;;  %v1685_v42 = vshll.u32 %v1684_v13, 16 }
 0x7da   :  { %v9735_v31 = vsel %vm13951_vm4, -1e+30, %v9236_v44 }
 0x7db   :  { %v9737_v27 = vadd.s32 %v1615_v21, %v1613_v34  ;;  %1751 = vmax.xlane.f32.xlu1 %v9735_v31 }
 0x7dc   :  { %v1640_v23 = vpop.xlane.xlu1 %1639 }
 0x7dd   :  { %v1641_v17 = vcvt.f32.s32 %v1640_v23  ;;  %vm13953_vm2 = vcmp.eq.s32.totalorder %v8719_v43, %v9737_v27 }
 0x7de   :  { %v9746_v37 = vsel %vm13953_vm2, -1e+30, %v9248_v33  ;;  %v1629_v33 = vshll.u32 %v1628_v38, 16 }
 0x7df   :  { %14216 = vst [vmem:[#allocation59_spill] sm:$0xff] %v9746_v37  ;;  %v9748_v48 = vadd.s32 %v1643_v52, %v1641_v17  ;;  %1755 = vmax.xlane.f32.xlu1 %v9746_v37 }
 0x7e0   :  { %v9796_v34 = vpop.permute.xlu1 %4228 }
 0x7e1   :  { %14217 = vst [vmem:[#allocation60_spill] sm:$0xff] %v9748_v48  ;;  %vm13952_vm4 = vcmp.eq.s32.totalorder %v8719_v43, %v9748_v48  ;;  %14225 = vst [vmem:[#allocation68_spill] sm:$0xff] %v9796_v34 }
 0x7e2   :  { %v9757_v44 = vsel %vm13952_vm4, -1e+30, %v9260_v6 }
 0x7e3   :  { %14218 = vst [vmem:[#allocation61_spill] sm:$0xff] %v9757_v44  ;;  %1759 = vmax.xlane.f32.xlu1 %v9757_v44 }
 0x7e4   :  { %v9798_v23 = vpop.permute.xlu1 %4585 }
 0x7e5   :  { %14226 = vst [vmem:[#allocation69_spill] sm:$0xff] %v9798_v23 }
 0x7fa   :  { %v1626_v63 = vpop.xlane.xlu0 %1625 }
 0x7fb   :  { %v1627_v35 = vcvt.f32.s32 %v1626_v63 }
 0x7fd   :  { %v9762_v54 = vadd.s32 %v1629_v33, %v1627_v35  ;;  %v14228_v33 = vld [vmem:[#allocation6_spill] sm:$0xff]  ;;  %v14231_v35 = vld [vmem:[#allocation40_spill] sm:$0xff] }
 0x7fe   :  { %v1654_v14 = vpop.xlane.xlu0 %1653 }
 0x7ff   :  { %14219 = vst [vmem:[#allocation62_spill] sm:$0xff] %v9762_v54  ;;  %v1655_v9 = vcvt.f32.s32 %v1654_v14  ;;  %vm13954_vm4 = vcmp.eq.s32.totalorder %v8719_v43, %v9762_v54 }
 0x800   :  { %v9771_v6 = vsel %vm13954_vm4, -1e+30, %v9285_v3 }
 0x801   :  { %14220 = vst [vmem:[#allocation63_spill] sm:$0xff] %v9771_v6  ;;  %v9773_v60 = vadd.s32 %v1657_v24, %v1655_v9  ;;  %1757 = vmax.xlane.f32.xlu0 %v9771_v6 }
 0x802   :  { %v1682_v61 = vpop.xlane.xlu0 %1681 }
 0x803   :  { %14221 = vst [vmem:[#allocation64_spill] sm:$0xff] %v9773_v60  ;;  %v1683_v21 = vcvt.f32.s32 %v1682_v61  ;;  %vm13955_vm2 = vcmp.eq.s32.totalorder %v8719_v43, %v9773_v60 }
 0x804   :  { %v9782_v4 = vsel %vm13955_vm2, -1e+30, %v9296_v26  ;;  %v1670_v26 = vcvt.f32.s32 %v9607_v11 }
 0x805   :  { %14222 = vst [vmem:[#allocation65_spill] sm:$0xff] %v9782_v4  ;;  %v9784_v10 = vadd.s32 %v1685_v42, %v1683_v21  ;;  %1761 = vmax.xlane.f32.xlu0 %v9782_v4 }
 0x806   :  { %v1671_v17 = vshll.u32 %v1670_v26, 16 }
 0x807   :  { %14223 = vst [vmem:[#allocation66_spill] sm:$0xff] %v9784_v10  ;;  %vm13956_vm4 = vcmp.eq.s32.totalorder %v8719_v43, %v9784_v10 }
 0x808   :  { %v9793_v3 = vsel %vm13956_vm4, -1e+30, %v9307_v8 }
 0x809   :  { %14224 = vst [vmem:[#allocation67_spill] sm:$0xff] %v9793_v3  ;;  %1765 = vmax.xlane.f32.xlu0 %v9793_v3 }
 0x80a   :  { %v9815_v11 = vpop.permute.xlu0 %4223 }
 0x80b   :  { %14232 = vst [vmem:[#allocation71_spill] sm:$0xff] %v9815_v11 }
 0x816   :  { %v1668_v52 = vpop.xlane.xlu1 %1667 }
 0x817   :  { %v1669_v38 = vcvt.f32.s32 %v1668_v52 }
 0x819   :  { %v9801_v63 = vadd.s32 %v1671_v17, %v1669_v38 }
 0x81b   :  { %14227 = vst [vmem:[#allocation70_spill] sm:$0xff] %v9801_v63  ;;  %vm13957_vm2 = vcmp.eq.s32.totalorder %v8719_v43, %v9801_v63 }
 0x81c   :  { %v9809_v8 = vsel %vm13957_vm2, -1e+30, %v14228_v33 }
 0x81d   :  { %14229 = vst [vmem:[#allocation6_spill] sm:$0xff] %v9809_v8  ;;  %1763 = vmax.xlane.f32.xlu1 %v9809_v8 }
 0x81f   :  { %4233 = vperm.xlu0 %7956, %v14230_v49  }
 0x82e   :  { %4238 = vperm.xlu1 %7965, %v14231_v35  }
 0x832   :  { %7966 = vset.pattern.permute.xlu1 %v14211_v15 }
 0x83f   :  { %v1738_v14 = vpop.xlane.xlu0 %1737 }
 0x840   :  { %vm1768_vm4 = vcmp.eq.f32.partialorder %v9627_v0, %v1738_v14 }
 0x841   :  { %v9819_v24 = vsel %vm1768_vm4, %v8719_v43, 128 }
 0x842   :  { %v1814_v13 = vshra.s32 %v9819_v24, 16 }
 0x843   :  { %v1742_v9 = vpop.xlane.xlu0 %1741 }
 0x844   :  { %vm1770_vm2 = vcmp.eq.f32.partialorder %v9639_v36, %v1742_v9  ;;  %v9823_v61 = vcvt.s32.f32 %v1814_v13 }
 0x845   :  { %v9826_v42 = vsel %vm1770_vm2, %v8719_v43, 128 }
 0x846   :  { %v1842_v21 = vshra.s32 %v9826_v42, 16  ;;  %1817 = vmin.xlane.f32.xlu0 %v9823_v61 }
 0x847   :  { %v1746_v26 = vpop.xlane.xlu0 %1745 }
 0x848   :  { %vm1772_vm14 = vcmp.eq.f32.partialorder %v9651_v12, %v1746_v26  ;;  %v9831_v52 = vcvt.s32.f32 %v1842_v21 }
 0x849   :  { %v9834_v17 = vsel %vm1772_vm14, %v8719_v43, 128 }
 0x84a   :  { %v1870_v38 = vshra.s32 %v9834_v17, 16  ;;  %1845 = vmin.xlane.f32.xlu0 %v9831_v52  ;;  %v1869_v48 = vand.u32 65535, %v9834_v17 }
 0x84b   :  { %v1750_v33 = vpop.xlane.xlu0 %1749 }
 0x84c   :  { %vm1774_vm2 = vcmp.eq.f32.partialorder %v9662_v58, %v1750_v33  ;;  %v9839_v14 = vcvt.s32.f32 %v1870_v38  ;;  %v9854_v38 = vpop.permute.xlu1 %4589 }
 0x84d   :  { %v9842_v13 = vsel %vm1774_vm2, %v8719_v43, 128  ;;  %14233 = vst [vmem:[#allocation72_spill] sm:$0xff] %v9854_v38 }
 0x84e   :  { %v1898_v9 = vshra.s32 %v9842_v13, 16  ;;  %1873 = vmin.xlane.f32.xlu0 %v9839_v14 }
 0x84f   :  { %v1754_v21 = vpop.xlane.xlu0 %1753 }
 0x850   :  { %vm1776_vm14 = vcmp.eq.f32.partialorder %v9674_v62, %v1754_v21  ;;  %v9847_v26 = vcvt.s32.f32 %v1898_v9 }
 0x851   :  { %v9850_v11 = vsel %vm1776_vm14, %v8719_v43, 128 }
 0x852   :  { %v1926_v23 = vshra.s32 %v9850_v11, 16  ;;  %1901 = vmin.xlane.f32.xlu0 %v9847_v26 }
 0x854   :  { %v9856_v33 = vcvt.s32.f32 %v1926_v23 }
 0x856   :  { %1929 = vmin.xlane.f32.xlu0 %v9856_v33 }
 0x858   :  { %v1736_v20 = vpop.xlane.xlu1 %1735 }
 0x859   :  { %vm1767_vm4 = vcmp.eq.f32.partialorder %v9687_v46, %v1736_v20 }
 0x85a   :  { %v9861_v21 = vsel %vm1767_vm4, %v8719_v43, 128 }
 0x85b   :  { %v1800_v9 = vshra.s32 %v9861_v21, 16 }
 0x85c   :  { %v1740_v34 = vpop.xlane.xlu1 %1739 }
 0x85d   :  { %vm1769_vm2 = vcmp.eq.f32.partialorder %v9699_v32, %v1740_v34  ;;  %v9865_v53 = vcvt.s32.f32 %v1800_v9 }
 0x85e   :  { %v9868_v51 = vsel %vm1769_vm2, %v8719_v43, 128 }
 0x85f   :  { %v1828_v23 = vshra.s32 %v9868_v51, 16  ;;  %1803 = vmin.xlane.f32.xlu1 %v9865_v53 }
 0x860   :  { %v1744_v38 = vpop.xlane.xlu1 %1743 }
 0x861   :  { %vm1771_vm14 = vcmp.eq.f32.partialorder %v9711_v39, %v1744_v38  ;;  %v9873_v20 = vcvt.s32.f32 %v1828_v23 }
 0x862   :  { %v9876_v41 = vsel %vm1771_vm14, %v8719_v43, 128 }
 0x863   :  { %v1856_v30 = vshra.s32 %v9876_v41, 16  ;;  %1831 = vmin.xlane.f32.xlu1 %v9873_v20 }
 0x864   :  { %v1748_v34 = vpop.xlane.xlu1 %1747 }
 0x865   :  { %vm1773_vm4 = vcmp.eq.f32.partialorder %v9723_v50, %v1748_v34  ;;  %v9881_v9 = vcvt.s32.f32 %v1856_v30 }
 0x866   :  { %v9884_v55 = vsel %vm1773_vm4, %v8719_v43, 128 }
 0x867   :  { %v1884_v25 = vshra.s32 %v9884_v55, 16  ;;  %1859 = vmin.xlane.f32.xlu1 %v9881_v9 }
 0x868   :  { %v1752_v38 = vpop.xlane.xlu1 %1751 }
 0x869   :  { %vm1775_vm2 = vcmp.eq.f32.partialorder %v9735_v31, %v1752_v38  ;;  %v9889_v23 = vcvt.s32.f32 %v1884_v25 }
 0x86a   :  { %v9892_v19 = vsel %vm1775_vm2, %v8719_v43, 128 }
 0x86b   :  { %v1912_v5 = vshra.s32 %v9892_v19, 16  ;;  %1887 = vmin.xlane.f32.xlu1 %v9889_v23 }
 0x86c   :  { %v1756_v30 = vpop.xlane.xlu1 %1755 }
 0x86d   :  { %vm1777_vm14 = vcmp.eq.f32.partialorder %v9746_v37, %v1756_v30  ;;  %v9897_v34 = vcvt.s32.f32 %v1912_v5 }
 0x86e   :  { %v9900_v29 = vsel %vm1777_vm14, %v8719_v43, 128 }
 0x86f   :  { %v1940_v35 = vshra.s32 %v9900_v29, 16  ;;  %1915 = vmin.xlane.f32.xlu1 %v9897_v34 }
 0x870   :  { %v1760_v25 = vpop.xlane.xlu1 %1759 }
 0x871   :  { %vm1779_vm4 = vcmp.eq.f32.partialorder %v9757_v44, %v1760_v25  ;;  %v9905_v38 = vcvt.s32.f32 %v1940_v35  ;;  %v1841_v44 = vand.u32 65535, %v9826_v42  ;;  %v1897_v42 = vand.u32 65535, %v9842_v13 }
 0x872   :  { %v9908_v49 = vsel %vm1779_vm4, %v8719_v43, 128 }
 0x873   :  { %v1968_v40 = vshra.s32 %v9908_v49, 16  ;;  %1943 = vmin.xlane.f32.xlu1 %v9905_v38 }
 0x875   :  { %v9912_v5 = vcvt.s32.f32 %v1968_v40 }
 0x877   :  { %1971 = vmin.xlane.f32.xlu1 %v9912_v5 }
 0x88e   :  { %v1758_v30 = vpop.xlane.xlu0 %1757 }
 0x88f   :  { %vm1778_vm2 = vcmp.eq.f32.partialorder %v9771_v6, %v1758_v30 }
 0x890   :  { %v9917_v63 = vsel %vm1778_vm2, %v8719_v43, 128 }
 0x891   :  { %v1954_v35 = vshra.s32 %v9917_v63, 16 }
 0x892   :  { %v1762_v25 = vpop.xlane.xlu0 %1761 }
 0x893   :  { %vm1780_vm14 = vcmp.eq.f32.partialorder %v9782_v4, %v1762_v25  ;;  %v9921_v10 = vcvt.s32.f32 %v1954_v35 }
 0x894   :  { %v9924_v60 = vsel %vm1780_vm14, %v8719_v43, 128 }
 0x895   :  { %v1982_v40 = vshra.s32 %v9924_v60, 16  ;;  %1957 = vmin.xlane.f32.xlu0 %v9921_v10 }
 0x896   :  { %v1766_v54 = vpop.xlane.xlu0 %1765 }
 0x897   :  { %vm1782_vm4 = vcmp.eq.f32.partialorder %v9793_v3, %v1766_v54  ;;  %v9929_v30 = vcvt.s32.f32 %v1982_v40 }
 0x898   :  { %v9932_v6 = vsel %vm1782_vm4, %v8719_v43, 128 }
 0x899   :  { %v2010_v62 = vshra.s32 %v9932_v6, 16  ;;  %1985 = vmin.xlane.f32.xlu0 %v9929_v30 }
 0x89b   :  { %v9936_v35 = vcvt.s32.f32 %v2010_v62  ;;  %v1813_v62 = vand.u32 65535, %v9819_v24 }
 0x89d   :  { %2013 = vmin.xlane.f32.xlu0 %v9936_v35 }
 0x89e   :  { %v9950_v3 = vpop.permute.xlu0 %4233 }
 0x89f   :  { %14234 = vst [vmem:[#allocation73_spill] sm:$0xff] %v9950_v3 }
 0x8aa   :  { %v1764_v25 = vpop.xlane.xlu1 %1763 }
 0x8ab   :  { %vm1781_vm2 = vcmp.eq.f32.partialorder %v9809_v8, %v1764_v25  ;;  %v1815_v8 = vcvt.s32.f32 %v1813_v62  ;;  %v1871_v62 = vcvt.s32.f32 %v1869_v48 }
 0x8ac   :  { %v9941_v4 = vsel %vm1781_vm2, %v8719_v43, 128 }
 0x8ad   :  { %v1996_v54 = vshra.s32 %v9941_v4, 16 }
 0x8af   :  { %v9944_v40 = vcvt.s32.f32 %v1996_v54 }
 0x8b1   :  { %1999 = vmin.xlane.f32.xlu1 %v9944_v40 }
 0x8c2   :  { %4597 = vperm.xlu1 %7966, %v9337_v56   ;;  %v1843_v56 = vcvt.s32.f32 %v1841_v44  ;;  %v1899_v44 = vcvt.s32.f32 %v1897_v42 }
 0x8c6   :  { %7967 = vset.pattern.permute.xlu1 %v14197_v57 }
 0x8d3   :  { %v9953_v25 = vpop.xlane.xlu0 %1817 }
 0x8d4   :  { %vm1819_vm14 = vcmp.eq.f32.partialorder %v9823_v61, %v9953_v25  ;;  %v1925_v61 = vand.u32 65535, %v9850_v11  ;;  %v1827_v11 = vand.u32 65535, %v9868_v51  ;;  %v1883_v51 = vand.u32 65535, %v9884_v55 }
 0x8d5   :  { %v1820_v54 = vsel %vm1819_vm14, %v1815_v8, inf  ;;  %v1939_v55 = vand.u32 65535, %v9900_v29 }
 0x8d6   :  { %1821 = vmin.xlane.f32.xlu0 %v1820_v54  ;;  %v1927_v13 = vcvt.s32.f32 %v1925_v61  ;;  %v9977_v54 = vpop.permute.xlu1 %4238 }
 0x8d7   :  { %v9958_v37 = vpop.xlane.xlu0 %1845  ;;  %14235 = vst [vmem:[#allocation74_spill] sm:$0xff] %v9977_v54 }
 0x8d8   :  { %vm1847_vm4 = vcmp.eq.f32.partialorder %v9831_v52, %v9958_v37 }
 0x8d9   :  { %v1848_v24 = vsel %vm1847_vm4, %v1843_v56, inf }
 0x8da   :  { %1849 = vmin.xlane.f32.xlu0 %v1848_v24 }
 0x8db   :  { %v9963_v57 = vpop.xlane.xlu0 %1873 }
 0x8dc   :  { %vm1875_vm2 = vcmp.eq.f32.partialorder %v9839_v14, %v9963_v57  ;;  %v1799_v14 = vand.u32 65535, %v9861_v21 }
 0x8dd   :  { %v1876_v8 = vsel %vm1875_vm2, %v1871_v62, inf  ;;  %v1855_v62 = vand.u32 65535, %v9876_v41  ;;  %v1911_v41 = vand.u32 65535, %v9892_v19  ;;  %v1967_v19 = vand.u32 65535, %v9908_v49 }
 0x8de   :  { %1877 = vmin.xlane.f32.xlu0 %v1876_v8  ;;  %v1801_v42 = vcvt.s32.f32 %v1799_v14  ;;  %v1981_v49 = vand.u32 65535, %v9924_v60 }
 0x8df   :  { %v9968_v17 = vpop.xlane.xlu0 %1901  ;;  %v1913_v14 = vcvt.s32.f32 %v1911_v41  ;;  %v1969_v29 = vcvt.s32.f32 %v1967_v19  ;;  %v1852_v19 = vcvt.f32.s32 %v9958_v37 }
 0x8e0   :  { %vm1903_vm14 = vcmp.eq.f32.partialorder %v9847_v26, %v9968_v17 }
 0x8e1   :  { %v1904_v56 = vsel %vm1903_vm14, %v1899_v44, inf  ;;  %v1857_v44 = vcvt.s32.f32 %v1855_v62 }
 0x8e2   :  { %1905 = vmin.xlane.f32.xlu0 %v1904_v56 }
 0x8e3   :  { %v9972_v52 = vpop.xlane.xlu0 %1929 }
 0x8e4   :  { %vm1931_vm4 = vcmp.eq.f32.partialorder %v9856_v33, %v9972_v52  ;;  %v1829_v33 = vcvt.s32.f32 %v1827_v11 }
 0x8e5   :  { %v1932_v48 = vsel %vm1931_vm4, %v1927_v13, inf  ;;  %v1885_v13 = vcvt.s32.f32 %v1883_v51  ;;  %v2009_v51 = vand.u32 65535, %v9932_v6 }
 0x8e6   :  { %1933 = vmin.xlane.f32.xlu0 %v1932_v48 }
 0x8e7   :  { %v2011_v60 = vcvt.s32.f32 %v2009_v51 }
 0x8ec   :  { %v9980_v24 = vpop.xlane.xlu1 %1803 }
 0x8ed   :  { %vm1805_vm2 = vcmp.eq.f32.partialorder %v9865_v53, %v9980_v24 }
 0x8ee   :  { %v1806_v26 = vsel %vm1805_vm2, %v1801_v42, inf  ;;  %v1941_v42 = vcvt.s32.f32 %v1939_v55  ;;  %v14237_v55 = vld [vmem:[#allocation28_spill] sm:$0xff] }
 0x8ef   :  { %1807 = vmin.xlane.f32.xlu1 %v1806_v26 }
 0x8f0   :  { %v9985_v8 = vpop.xlane.xlu1 %1831 }
 0x8f1   :  { %vm1833_vm14 = vcmp.eq.f32.partialorder %v9873_v20, %v9985_v8 }
 0x8f2   :  { %v1834_v21 = vsel %vm1833_vm14, %v1829_v33, inf }
 0x8f3   :  { %1835 = vmin.xlane.f32.xlu1 %v1834_v21 }
 0x8f4   :  { %v9990_v61 = vpop.xlane.xlu1 %1859 }
 0x8f5   :  { %vm1861_vm4 = vcmp.eq.f32.partialorder %v9881_v9, %v9990_v61 }
 0x8f6   :  { %v1862_v53 = vsel %vm1861_vm4, %v1857_v44, inf }
 0x8f7   :  { %1863 = vmin.xlane.f32.xlu1 %v1862_v53  ;;  %v1983_v53 = vcvt.s32.f32 %v1981_v49 }
 0x8f8   :  { %v9995_v56 = vpop.xlane.xlu1 %1887 }
 0x8f9   :  { %vm1889_vm2 = vcmp.eq.f32.partialorder %v9889_v23, %v9995_v56 }
 0x8fa   :  { %v1890_v20 = vsel %vm1889_vm2, %v1885_v13, inf }
 0x8fb   :  { %1891 = vmin.xlane.f32.xlu1 %v1890_v20 }
 0x8fc   :  { %v10000_v48 = vpop.xlane.xlu1 %1915 }
 0x8fd   :  { %vm1917_vm14 = vcmp.eq.f32.partialorder %v9897_v34, %v10000_v48  ;;  %v1953_v34 = vand.u32 65535, %v9917_v63 }
 0x8fe   :  { %v1918_v9 = vsel %vm1917_vm14, %v1913_v14, inf  ;;  %v14238_v14 = vld [vmem:[#allocation37_spill] sm:$0xff] }
 0x8ff   :  { %1919 = vmin.xlane.f32.xlu1 %v1918_v9  ;;  %v1955_v21 = vcvt.s32.f32 %v1953_v34  ;;  %v1880_v34 = vcvt.f32.s32 %v9963_v57 }
 0x900   :  { %v10005_v11 = vpop.xlane.xlu1 %1943 }
 0x901   :  { %vm1945_vm4 = vcmp.eq.f32.partialorder %v9905_v38, %v10005_v11  ;;  %v1881_v57 = vshll.u32 %v1880_v34, 16 }
 0x902   :  { %v1946_v23 = vsel %vm1945_vm4, %v1941_v42, inf }
 0x903   :  { %1947 = vmin.xlane.f32.xlu1 %v1946_v23 }
 0x904   :  { %v10009_v26 = vpop.xlane.xlu1 %1971 }
 0x905   :  { %vm1973_vm2 = vcmp.eq.f32.partialorder %v9912_v5, %v10009_v26 }
 0x906   :  { %v1974_v62 = vsel %vm1973_vm2, %v1969_v29, inf  ;;  %v1838_v29 = vcvt.f32.s32 %v9985_v8 }
 0x907   :  { %1975 = vmin.xlane.f32.xlu1 %v1974_v62  ;;  %v1853_v62 = vshll.u32 %v1852_v19, 16 }
 0x922   :  { %v10015_v33 = vpop.xlane.xlu0 %1957 }
 0x923   :  { %vm1959_vm14 = vcmp.eq.f32.partialorder %v9921_v10, %v10015_v33  ;;  %v1995_v10 = vand.u32 65535, %v9941_v4  ;;  %v1824_v4 = vcvt.f32.s32 %v9953_v25 }
 0x924   :  { %v1960_v38 = vsel %vm1959_vm14, %v1955_v21, inf }
 0x925   :  { %1961 = vmin.xlane.f32.xlu0 %v1960_v38  ;;  %v1997_v6 = vcvt.s32.f32 %v1995_v10  ;;  %v1825_v9 = vshll.u32 %v1824_v4, 16  ;;  %v1908_v38 = vcvt.f32.s32 %v9968_v17 }
 0x926   :  { %v10020_v44 = vpop.xlane.xlu0 %1985 }
 0x927   :  { %vm1987_vm4 = vcmp.eq.f32.partialorder %v9929_v30, %v10020_v44  ;;  %v14236_v30 = vld [vmem:[#allocation39_spill] sm:$0xff]  ;;  %v1909_v17 = vshll.u32 %v1908_v38, 16 }
 0x928   :  { %v1988_v5 = vsel %vm1987_vm4, %v1983_v53, inf  ;;  %vm1704_vm4 = vmor %vm1368_vm11, %vm1688_vm0 }
 0x929   :  { %1989 = vmin.xlane.f32.xlu0 %v1988_v5  ;;  %vm1706_vm11 = vmor %vm1370_vm13, %vm1690_vm9 }
 0x92a   :  { %v10024_v63 = vpop.xlane.xlu0 %2013  ;;  %vm1708_vm13 = vmor %vm1372_vm15, %vm1692_vm1 }
 0x92b   :  { %vm2015_vm2 = vcmp.eq.f32.partialorder %v9936_v35, %v10024_v63  ;;  %vm1710_vm15 = vmor %vm1374_vm3, %vm1694_vm10 }
 0x92c   :  { %v2016_v41 = vsel %vm2015_vm2, %v2011_v60, inf  ;;  %vm1712_vm3 = vmor %vm1376_vm5, %vm1696_vm8 }
 0x92d   :  { %2017 = vmin.xlane.f32.xlu0 %v2016_v41  ;;  %v1936_v41 = vcvt.f32.s32 %v9972_v52  ;;  %vm1703_vm5 = vmor %vm1367_vm12, %vm1687_vm7 }
 0x92f   :  { %v1937_v52 = vshll.u32 %v1936_v41, 16  ;;  %v14263_v41 = vld [vmem:[#allocation18_spill] sm:$0xff] }
 0x93e   :  { %v10029_v13 = vpop.xlane.xlu1 %1999 }
 0x93f   :  { %vm2001_vm14 = vcmp.eq.f32.partialorder %v9944_v40, %v10029_v13 }
 0x940   :  { %v2002_v20 = vsel %vm2001_vm14, %v1997_v6, inf }
 0x941   :  { %2003 = vmin.xlane.f32.xlu1 %v2002_v20 }
 0x943   :  { %4248 = vperm.xlu0 %7956, %v14236_v30  }
 0x947   :  { %7968 = vset.pattern.permute.xlu0 %v14211_v15 }
 0x948   :  { %4557 = vperm.xlu0 %7968, %v14237_v55  }
 0x952   :  { %4243 = vperm.xlu1 %7967, %v14238_v14  }
 0x956   :  { %7969 = vset.pattern.permute.xlu1 %v14211_v15 }
 0x963   :  { %v1822_v35 = vpop.xlane.xlu0 %1821 }
 0x964   :  { %v1823_v42 = vcvt.f32.s32 %v1822_v35 }
 0x966   :  { %v1826_v40 = vadd.s32 %v1825_v9, %v1823_v42  ;;  %v10111_v42 = vpop.permute.xlu1 %4597 }
 0x967   :  { %v1850_v23 = vpop.xlane.xlu0 %1849  ;;  %14252 = vst [vmem:[#allocation13_spill] sm:$0xff] %v10111_v42 }
 0x968   :  { %v1851_v15 = vcvt.f32.s32 %v1850_v23  ;;  %vm2024_vm2 = vcmp.eq.s32.totalorder %v8719_v43, %v1826_v40 }
 0x969   :  { %v10049_v25 = vsel %vm2024_vm2, -1e+30, %v9627_v0  ;;  %vm10051_vm14 = vmor %vm1704_vm4, %vm2024_vm2 }
 0x96a   :  { %v1854_v49 = vadd.s32 %v1853_v62, %v1851_v15  ;;  %2073 = vmax.xlane.f32.xlu0 %v10049_v25 }
 0x96b   :  { %v1878_v22 = vpop.xlane.xlu0 %1877 }
 0x96c   :  { %v1879_v0 = vcvt.f32.s32 %v1878_v22  ;;  %vm2026_vm0 = vcmp.eq.s32.totalorder %v8719_v43, %v1854_v49  ;;  %v1866_v22 = vcvt.f32.s32 %v9990_v61 }
 0x96d   :  { %v10065_v51 = vsel %vm2026_vm0, -1e+30, %v9639_v36  ;;  %vm10067_vm4 = vmor %vm1706_vm11, %vm2026_vm0 }
 0x96e   :  { %v1882_v5 = vadd.s32 %v1881_v57, %v1879_v0  ;;  %2077 = vmax.xlane.f32.xlu0 %v10065_v51  ;;  %v14258_v0 = vld [vmem:[#allocation16_spill] sm:$0xff]  ;;  %v1867_v61 = vshll.u32 %v1866_v22, 16 }
 0x96f   :  { %v1906_v59 = vpop.xlane.xlu0 %1905  ;;  %vm14259_vm12 = vcmp.eq.s32.totalorder %v8719_v43, %v14258_v0  ;;  %v14292_v0 = vld [vmem:[#allocation24_spill] sm:$0xff] }
 0x970   :  { %v1907_v36 = vcvt.f32.s32 %v1906_v59  ;;  %vm2028_vm9 = vcmp.eq.s32.totalorder %v8719_v43, %v1882_v5  ;;  %vm1705_vm7 = vmor %vm14259_vm12, %vm1689_vm6  ;;  %v1894_v5 = vcvt.f32.s32 %v9995_v56  ;;  %vm14262_vm6 = vcmp.eq.s32.totalorder %v8719_v43, %v9701_v45 }
 0x971   :  { %v10081_v10 = vsel %vm2028_vm9, -1e+30, %v9651_v12  ;;  %vm10083_vm2 = vmor %vm1708_vm13, %vm2028_vm9  ;;  %vm14268_vm12 = vcmp.eq.s32.totalorder %v8719_v43, %v9713_v28 }
 0x972   :  { %v1910_v20 = vadd.s32 %v1909_v17, %v1907_v36  ;;  %2081 = vmax.xlane.f32.xlu0 %v10081_v10  ;;  %v1895_v56 = vshll.u32 %v1894_v5, 16  ;;  %v1922_v36 = vcvt.f32.s32 %v10000_v48  ;;  %v14269_v48 = vld [vmem:[#allocation20_spill] sm:$0xff] }
 0x973   :  { %v1934_v2 = vpop.xlane.xlu0 %1933 }
 0x974   :  { %v1935_v35 = vcvt.f32.s32 %v1934_v2  ;;  %vm2030_vm1 = vcmp.eq.s32.totalorder %v8719_v43, %v1910_v20 }
 0x975   :  { %v10096_v12 = vsel %vm2030_vm1, -1e+30, %v9662_v58  ;;  %vm10098_vm11 = vmor %vm1710_vm15, %vm2030_vm1  ;;  %v1810_v58 = vcvt.f32.s32 %v9980_v24  ;;  %v1839_v24 = vshll.u32 %v1838_v29, 16  ;;  %vm14264_vm1 = vcmp.eq.s32.totalorder %v8719_v43, %v14263_v41  ;;  %v14276_v29 = vld [vmem:[#allocation22_spill] sm:$0xff] }
 0x976   :  { %v10102_v19 = vadd.s32 %v1937_v52, %v1935_v35  ;;  %2085 = vmax.xlane.f32.xlu0 %v10096_v12  ;;  %v14267_v52 = vld [vmem:[#allocation5_spill] sm:$0xff]  ;;  %v1923_v35 = vshll.u32 %v1922_v36, 16  ;;  %v1964_v41 = vcvt.f32.s32 %v10015_v33  ;;  %v14305_v33 = vld [vmem:[#allocation63_spill] sm:$0xff] }
 0x977   :  { %v1811_v1 = vshll.u32 %v1810_v58, 16 }
 0x978   :  { %vm13980_vm10 = vcmp.eq.s32.totalorder %v8719_v43, %v10102_v19  ;;  %v1965_v36 = vshll.u32 %v1964_v41, 16 }
 0x979   :  { %vm10119_vm0 = vmor %vm1712_vm3, %vm13980_vm10 }
 0x97a   :  { %vm1707_vm3 = vmor %vm14264_vm1, %vm14262_vm6 }
 0x97c   :  { %v1808_v23 = vpop.xlane.xlu1 %1807 }
 0x97d   :  { %v1809_v62 = vcvt.f32.s32 %v1808_v23  ;;  %v14272_v23 = vmov 0 }
 0x97f   :  { %v1812_v34 = vadd.s32 %v1811_v1, %v1809_v62  ;;  %v1978_v62 = vcvt.f32.s32 %v10009_v26 }
 0x980   :  { %v1836_v15 = vpop.xlane.xlu1 %1835 }
 0x981   :  { %v1837_v21 = vcvt.f32.s32 %v1836_v15  ;;  %vm2023_vm8 = vcmp.eq.s32.totalorder %v8719_v43, %v1812_v34  ;;  %v14279_v15 = vmov 0  ;;  %v1979_v26 = vshll.u32 %v1978_v62, 16  ;;  %v14308_v62 = vld [vmem:[#allocation64_spill] sm:$0xff] }
 0x982   :  { %v10133_v57 = vsel %vm2023_vm8, -1e+30, %v9687_v46  ;;  %vm10135_vm13 = vmor %vm1703_vm5, %vm2023_vm8 }
 0x983   :  { %v1840_v38 = vadd.s32 %v1839_v24, %v1837_v21  ;;  %2071 = vmax.xlane.f32.xlu1 %v10133_v57  ;;  %v14283_v24 = vld [vmem:[#allocation23_spill] sm:$0xff] }
 0x984   :  { %v1864_v16 = vpop.xlane.xlu1 %1863 }
 0x985   :  { %v1865_v46 = vcvt.f32.s32 %v1864_v16  ;;  %vm2025_vm9 = vcmp.eq.s32.totalorder %v8719_v43, %v1840_v38  ;;  %v14287_v38 = vmov 0 }
 0x986   :  { %v10149_v59 = vsel %vm2025_vm9, -1e+30, %v9699_v32  ;;  %vm10151_vm15 = vmor %vm1705_vm7, %vm2025_vm9  ;;  %vm14270_vm7 = vcmp.eq.s32.totalorder %v8719_v43, %v14269_v48 }
 0x987   :  { %v1868_v17 = vadd.s32 %v1867_v61, %v1865_v46  ;;  %2075 = vmax.xlane.f32.xlu1 %v10149_v59  ;;  %vm1709_vm9 = vmor %vm14270_vm7, %vm14268_vm12  ;;  %v14294_v61 = vld [vmem:[#allocation61_spill] sm:$0xff]  ;;  %v14296_v46 = vmov 0 }
 0x988   :  { %v1892_v47 = vpop.xlane.xlu1 %1891 }
 0x989   :  { %v1893_v32 = vcvt.f32.s32 %v1892_v47  ;;  %vm2027_vm5 = vcmp.eq.s32.totalorder %v8719_v43, %v1868_v17  ;;  %v14299_v17 = vld [vmem:[#allocation58_spill] sm:$0xff] }
 0x98a   :  { %v10165_v20 = vsel %vm2027_vm5, -1e+30, %v9711_v39  ;;  %vm10167_vm8 = vmor %vm1707_vm3, %vm2027_vm5  ;;  %v1950_v39 = vcvt.f32.s32 %v10005_v11  ;;  %vm14275_vm3 = vcmp.eq.s32.totalorder %v8719_v43, %v9725_v7  ;;  %vm14277_vm5 = vcmp.eq.s32.totalorder %v8719_v43, %v14276_v29 }
 0x98b   :  { %v1896_v4 = vadd.s32 %v1895_v56, %v1893_v32  ;;  %2079 = vmax.xlane.f32.xlu1 %v10165_v20  ;;  %vm1711_vm12 = vmor %vm14277_vm5, %vm14275_vm3  ;;  %vm14284_vm3 = vcmp.eq.s32.totalorder %v8719_v43, %v14283_v24  ;;  %v1992_v32 = vcvt.f32.s32 %v10020_v44  ;;  %v14306_v44 = vmov 0 }
 0x98c   :  { %v1920_v45 = vpop.xlane.xlu1 %1919  ;;  %4561 = vperm.xlu0 %7968, %v14267_v52   ;;  %v1951_v11 = vshll.u32 %v1950_v39, 16  ;;  %v14303_v39 = vld [vmem:[#allocation25_spill] sm:$0xff] }
 0x98d   :  { %v1921_v18 = vcvt.f32.s32 %v1920_v45  ;;  %vm2029_vm6 = vcmp.eq.s32.totalorder %v8719_v43, %v1896_v4 }
 0x98e   :  { %v10182_v58 = vsel %vm2029_vm6, -1e+30, %v9723_v50  ;;  %vm10184_vm1 = vmor %vm1709_vm9, %vm2029_vm6  ;;  %vm14282_vm6 = vcmp.eq.s32.totalorder %v8719_v43, %v9737_v27  ;;  %v14290_v27 = vld [vmem:[#allocation60_spill] sm:$0xff] }
 0x98f   :  { %14271 = vst [vmem:[#allocation15_spill] sm:$0xff] %v10182_v58  ;;  %v14273_v23 = vsel %vm10184_vm1, 4294967295, %v14272_v23  ;;  %v1924_v1 = vadd.s32 %v1923_v35, %v1921_v18  ;;  %2083 = vmax.xlane.f32.xlu1 %v10182_v58  ;;  %vm1713_vm5 = vmor %vm14284_vm3, %vm14282_vm6  ;;  %vm14293_vm6 = vcmp.eq.s32.totalorder %v8719_v43, %v14292_v0  ;;  %v14301_v35 = vld [vmem:[#allocation62_spill] sm:$0xff]  ;;  %v2020_v18 = vcvt.f32.s32 %v10024_v63 }
 0x990   :  { %14274 = vst [vmem:[#allocation17_spill] sm:$0xff] %v14273_v23  ;;  %v1948_v28 = vpop.xlane.xlu1 %1947 }
 0x991   :  { %v1949_v50 = vcvt.f32.s32 %v1948_v28  ;;  %vm2031_vm7 = vcmp.eq.s32.totalorder %v8719_v43, %v1924_v1  ;;  %v2021_v63 = vshll.u32 %v2020_v18, 16 }
 0x992   :  { %v10198_v34 = vsel %vm2031_vm7, -1e+30, %v9735_v31  ;;  %vm10200_vm9 = vmor %vm1711_vm12, %vm2031_vm7  ;;  %v14285_v31 = vld [vmem:[#allocation59_spill] sm:$0xff]  ;;  %vm14291_vm7 = vcmp.eq.s32.totalorder %v8719_v43, %v14290_v27 }
 0x993   :  { %14278 = vst [vmem:[#allocation19_spill] sm:$0xff] %v10198_v34  ;;  %v14280_v15 = vsel %vm10200_vm9, 4294967295, %v14279_v15  ;;  %v1952_v49 = vadd.s32 %v1951_v11, %v1949_v50  ;;  %2087 = vmax.xlane.f32.xlu1 %v10198_v34  ;;  %vm1715_vm3 = vmor %vm14293_vm6, %vm14291_vm7  ;;  %v14310_v50 = vld [vmem:[#allocation2_spill] sm:$0xff]  ;;  %v14319_v27 = vld [vmem:[#allocation67_spill] sm:$0xff] }
 0x994   :  { %14281 = vst [vmem:[#allocation21_spill] sm:$0xff] %v14280_v15  ;;  %v1976_v7 = vpop.xlane.xlu1 %1975 }
 0x995   :  { %v1977_v22 = vcvt.f32.s32 %v1976_v7  ;;  %vm2033_vm10 = vcmp.eq.s32.totalorder %v8719_v43, %v1952_v49  ;;  %v14312_v7 = vld [vmem:[#allocation65_spill] sm:$0xff] }
 0x996   :  { %v10213_v21 = vsel %vm2033_vm10, -1e+30, %v14285_v31  ;;  %vm10215_vm12 = vmor %vm1713_vm5, %vm2033_vm10  ;;  %vm14300_vm10 = vcmp.eq.s32.totalorder %v8719_v43, %v10102_v19  ;;  %vm14304_vm5 = vcmp.eq.s32.totalorder %v8719_v43, %v14303_v39  ;;  %v1993_v19 = vshll.u32 %v1992_v32, 16  ;;  %v14315_v31 = vld [vmem:[#allocation66_spill] sm:$0xff] }
 0x997   :  { %14286 = vst [vmem:[#allocation14_spill] sm:$0xff] %v10213_v21  ;;  %v14288_v38 = vsel %vm10215_vm12, 4294967295, %v14287_v38  ;;  %v1980_v16 = vadd.s32 %v1979_v26, %v1977_v22  ;;  %2091 = vmax.xlane.f32.xlu1 %v10213_v21  ;;  %v10239_v47 = vsel %vm14300_vm10, -1e+30, %v14299_v17  ;;  %vm14309_vm10 = vcmp.eq.s32.totalorder %v8719_v43, %v14308_v62 }
 0x998   :  { %14289 = vst [vmem:[#allocation16_spill] sm:$0xff] %v14288_v38  ;;  %v2006_v17 = vcvt.f32.s32 %v10029_v13  ;;  %v14330_v39 = vmov 0  ;;  %v14376_v26 = vmov 0 }
 0x999   :  { %vm2035_vm9 = vcmp.eq.s32.totalorder %v8719_v43, %v1980_v16  ;;  %v14317_v16 = vld [vmem:[#allocation3_spill] sm:$0xff] }
 0x99a   :  { %v10228_v5 = vsel %vm2035_vm9, -1e+30, %v14294_v61  ;;  %vm10230_vm1 = vmor %vm1715_vm3, %vm2035_vm9  ;;  %vm14302_vm9 = vcmp.eq.s32.totalorder %v8719_v43, %v14301_v35  ;;  %v14321_v61 = vmov 0 }
 0x99b   :  { %14295 = vst [vmem:[#allocation18_spill] sm:$0xff] %v10228_v5  ;;  %v14297_v46 = vsel %vm10230_vm1, 4294967295, %v14296_v46  ;;  %2095 = vmax.xlane.f32.xlu1 %v10228_v5  ;;  %vm1714_vm7 = vmor %vm14304_vm5, %vm14302_vm9  ;;  %vm14311_vm9 = vcmp.eq.s32.totalorder %v8719_v43, %v14310_v50 }
 0x99c   :  { %14298 = vst [vmem:[#allocation20_spill] sm:$0xff] %v14297_v46  ;;  %vm1716_vm5 = vmor %vm14311_vm9, %vm14309_vm10  ;;  %vm14318_vm10 = vcmp.eq.s32.totalorder %v8719_v43, %v14317_v16 }
 0x9ab   :  { %2089 = vmax.xlane.f32.xlu0 %v10239_v47 }
 0x9b2   :  { %v1962_v56 = vpop.xlane.xlu0 %1961 }
 0x9b3   :  { %v1963_v4 = vcvt.f32.s32 %v1962_v56  ;;  %v2007_v56 = vshll.u32 %v2006_v17, 16 }
 0x9b5   :  { %v1966_v45 = vadd.s32 %v1965_v36, %v1963_v4  ;;  %v14324_v4 = vld [vmem:[#allocation70_spill] sm:$0xff] }
 0x9b6   :  { %v1990_v48 = vpop.xlane.xlu0 %1989 }
 0x9b7   :  { %v1991_v1 = vcvt.f32.s32 %v1990_v48  ;;  %vm2034_vm6 = vcmp.eq.s32.totalorder %v8719_v43, %v1966_v45  ;;  %v14326_v45 = vld [vmem:[#allocation4_spill] sm:$0xff]  ;;  %v14328_v48 = vld [vmem:[#allocation6_spill] sm:$0xff] }
 0x9b8   :  { %v10253_v28 = vsel %vm2034_vm6, -1e+30, %v14305_v33  ;;  %vm10255_vm3 = vmor %vm1714_vm7, %vm2034_vm6  ;;  %vm14316_vm6 = vcmp.eq.s32.totalorder %v8719_v43, %v14315_v31 }
 0x9b9   :  { %v14307_v44 = vsel %vm10255_vm3, 4294967295, %v14306_v44  ;;  %v1994_v29 = vadd.s32 %v1993_v19, %v1991_v1  ;;  %2093 = vmax.xlane.f32.xlu0 %v10253_v28  ;;  %vm1718_vm9 = vmor %vm14318_vm10, %vm14316_vm6 }
 0x9ba   :  { %v2018_v11 = vpop.xlane.xlu0 %2017 }
 0x9bb   :  { %v2019_v49 = vcvt.f32.s32 %v2018_v11  ;;  %vm2036_vm1 = vcmp.eq.s32.totalorder %v8719_v43, %v1994_v29 }
 0x9bc   :  { %v10268_v24 = vsel %vm2036_vm1, -1e+30, %v14312_v7  ;;  %vm10270_vm7 = vmor %vm1716_vm5, %vm2036_vm1  ;;  %vm14325_vm1 = vcmp.eq.s32.totalorder %v8719_v43, %v14324_v4  ;;  %vm14327_vm5 = vcmp.eq.s32.totalorder %v8719_v43, %v14326_v45 }
 0x9bd   :  { %v2022_v22 = vadd.s32 %v2021_v63, %v2019_v49  ;;  %2097 = vmax.xlane.f32.xlu0 %v10268_v24  ;;  %vm1717_vm6 = vmor %vm14327_vm5, %vm14325_vm1 }
 0x9bf   :  { %vm2038_vm12 = vcmp.eq.s32.totalorder %v8719_v43, %v2022_v22 }
 0x9c0   :  { %v10283_v0 = vsel %vm2038_vm12, -1e+30, %v14319_v27  ;;  %vm10285_vm3 = vmor %vm1718_vm9, %vm2038_vm12 }
 0x9c1   :  { %14320 = vst [vmem:[#allocation22_spill] sm:$0xff] %v10283_v0  ;;  %v14322_v61 = vsel %vm10285_vm3, 4294967295, %v14321_v61  ;;  %2101 = vmax.xlane.f32.xlu0 %v10283_v0 }
 0x9c2   :  { %14323 = vst [vmem:[#allocation23_spill] sm:$0xff] %v14322_v61  ;;  %v10306_v13 = vpop.permute.xlu0 %4248 }
 0x9c3   :  { %14333 = vst [vmem:[#allocation24_spill] sm:$0xff] %v10306_v13 }
 0x9c7   :  { %v10308_v19 = vpop.permute.xlu0 %4557 }
 0x9c8   :  { %14334 = vst [vmem:[#allocation61_spill] sm:$0xff] %v10308_v19 }
 0x9ce   :  { %v2004_v41 = vpop.xlane.xlu1 %2003 }
 0x9cf   :  { %v2005_v36 = vcvt.f32.s32 %v2004_v41 }
 0x9d1   :  { %v2008_v32 = vadd.s32 %v2007_v56, %v2005_v36 }
 0x9d2   :  { %v10342_v56 = vpop.permute.xlu1 %4243 }
 0x9d3   :  { %vm2037_vm12 = vcmp.eq.s32.totalorder %v8719_v43, %v2008_v32  ;;  %14335 = vst [vmem:[#allocation58_spill] sm:$0xff] %v10342_v56 }
 0x9d4   :  { %v10299_v35 = vsel %vm2037_vm12, -1e+30, %v14328_v48  ;;  %vm10301_vm10 = vmor %vm1717_vm6, %vm2037_vm12 }
 0x9d5   :  { %14329 = vst [vmem:[#allocation59_spill] sm:$0xff] %v10299_v35  ;;  %v14331_v39 = vsel %vm10301_vm10, 4294967295, %v14330_v39  ;;  %2099 = vmax.xlane.f32.xlu1 %v10299_v35 }
 0x9d6   :  { %14332 = vst [vmem:[#allocation60_spill] sm:$0xff] %v14331_v39 }
 0x9f7   :  { %v2074_v18 = vpop.xlane.xlu0 %2073 }
 0x9f8   :  { %vm2104_vm9 = vcmp.eq.f32.partialorder %v10049_v25, %v2074_v18 }
 0x9f9   :  { %v10312_v1 = vsel %vm2104_vm9, %v8719_v43, 128 }
 0x9fa   :  { %v2150_v33 = vshra.s32 %v10312_v1, 16 }
 0x9fb   :  { %v2078_v29 = vpop.xlane.xlu0 %2077 }
 0x9fc   :  { %vm2106_vm1 = vcmp.eq.f32.partialorder %v10065_v51, %v2078_v29  ;;  %v10316_v11 = vcvt.s32.f32 %v2150_v33 }
 0x9fd   :  { %v10319_v62 = vsel %vm2106_vm1, %v8719_v43, 128 }
 0x9fe   :  { %v2178_v50 = vshra.s32 %v10319_v62, 16  ;;  %2153 = vmin.xlane.f32.xlu0 %v10316_v11  ;;  %v2177_v23 = vand.u32 65535, %v10319_v62 }
 0x9ff   :  { %v2082_v63 = vpop.xlane.xlu0 %2081 }
 0xa00   :  { %vm2108_vm5 = vcmp.eq.f32.partialorder %v10081_v10, %v2082_v63  ;;  %v10324_v49 = vcvt.s32.f32 %v2178_v50 }
 0xa01   :  { %v10327_v7 = vsel %vm2108_vm5, %v8719_v43, 128 }
 0xa02   :  { %v2206_v22 = vshra.s32 %v10327_v7, 16  ;;  %2181 = vmin.xlane.f32.xlu0 %v10324_v49 }
 0xa03   :  { %v2086_v31 = vpop.xlane.xlu0 %2085 }
 0xa04   :  { %vm2110_vm6 = vcmp.eq.f32.partialorder %v10096_v12, %v2086_v31  ;;  %v10332_v16 = vcvt.s32.f32 %v2206_v22 }
 0xa05   :  { %v10335_v27 = vsel %vm2110_vm6, %v8719_v43, 128 }
 0xa06   :  { %v2234_v17 = vshra.s32 %v10335_v27, 16  ;;  %2209 = vmin.xlane.f32.xlu0 %v10332_v16 }
 0xa08   :  { %v10339_v41 = vcvt.s32.f32 %v2234_v17  ;;  %v14336_v17 = vld [vmem:[#allocation33_spill] sm:$0xff] }
 0xa0a   :  { %2237 = vmin.xlane.f32.xlu0 %v10339_v41 }
 0xa10   :  { %v2072_v36 = vpop.xlane.xlu1 %2071 }
 0xa11   :  { %vm2103_vm12 = vcmp.eq.f32.partialorder %v10133_v57, %v2072_v36  ;;  %v14337_v36 = vld [vmem:[#allocation38_spill] sm:$0xff] }
 0xa12   :  { %v10346_v32 = vsel %vm2103_vm12, %v8719_v43, 128 }
 0xa13   :  { %v2136_v4 = vshra.s32 %v10346_v32, 16 }
 0xa14   :  { %v2076_v45 = vpop.xlane.xlu1 %2075 }
 0xa15   :  { %vm2105_vm9 = vcmp.eq.f32.partialorder %v10149_v59, %v2076_v45  ;;  %v10350_v48 = vcvt.s32.f32 %v2136_v4  ;;  %v10370_v4 = vpop.permute.xlu0 %4561  ;;  %v14339_v45 = vld [vmem:[#allocation40_spill] sm:$0xff] }
 0xa16   :  { %v10353_v18 = vsel %vm2105_vm9, %v8719_v43, 128  ;;  %14338 = vst [vmem:[#allocation62_spill] sm:$0xff] %v10370_v4 }
 0xa17   :  { %v2164_v33 = vshra.s32 %v10353_v18, 16  ;;  %2139 = vmin.xlane.f32.xlu1 %v10350_v48 }
 0xa18   :  { %v2080_v29 = vpop.xlane.xlu1 %2079 }
 0xa19   :  { %vm2107_vm1 = vcmp.eq.f32.partialorder %v10165_v20, %v2080_v29  ;;  %v10358_v50 = vcvt.s32.f32 %v2164_v33 }
 0xa1a   :  { %v10361_v63 = vsel %vm2107_vm1, %v8719_v43, 128 }
 0xa1b   :  { %v2192_v22 = vshra.s32 %v10361_v63, 16  ;;  %2167 = vmin.xlane.f32.xlu1 %v10358_v50 }
 0xa1c   :  { %v2084_v13 = vpop.xlane.xlu1 %2083 }
 0xa1d   :  { %v10365_v31 = vcvt.s32.f32 %v2192_v22  ;;  %vm2109_vm9 = vcmp.eq.f32.partialorder %v10182_v58, %v2084_v13 }
 0xa1f   :  { %2195 = vmin.xlane.f32.xlu1 %v10365_v31 }
 0xa20   :  { %4593 = vperm.xlu0 %7968, %v14336_v17   ;;  %v2088_v54 = vpop.xlane.xlu1 %2087 }
 0xa24   :  { %v2092_v17 = vpop.xlane.xlu1 %2091 }
 0xa30   :  { %4601 = vperm.xlu1 %7969, %v14337_v36  }
 0xa34   :  { %4605 = vperm.xlu1 %7969, %v14339_v45   ;;  %v10396_v45 = vsel %vm2109_vm9, %v8719_v43, 128 }
 0xa38   :  { %v2090_v33 = vpop.xlane.xlu0 %2089 }
 0xa39   :  { %vm2112_vm5 = vcmp.eq.f32.partialorder %v10239_v47, %v2090_v33 }
 0xa3a   :  { %v10375_v29 = vsel %vm2112_vm5, %v8719_v43, 128  ;;  %vm2111_vm5 = vcmp.eq.f32.partialorder %v10198_v34, %v2088_v54 }
 0xa3b   :  { %v2262_v56 = vshra.s32 %v10375_v29, 16  ;;  %v10409_v55 = vsel %vm2111_vm5, %v8719_v43, 128 }
 0xa3c   :  { %v2248_v54 = vshra.s32 %v10409_v55, 16 }
 0xa3d   :  { %v10378_v22 = vcvt.s32.f32 %v2262_v56 }
 0xa3f   :  { %2265 = vmin.xlane.f32.xlu0 %v10378_v22 }
 0xa46   :  { %v2094_v3 = vpop.xlane.xlu0 %2093 }
 0xa47   :  { %vm2114_vm6 = vcmp.eq.f32.partialorder %v10253_v28, %v2094_v3 }
 0xa48   :  { %v10383_v42 = vsel %vm2114_vm6, %v8719_v43, 128  ;;  %vm2113_vm6 = vcmp.eq.f32.partialorder %v10213_v21, %v2092_v17 }
 0xa49   :  { %v2290_v4 = vshra.s32 %v10383_v42, 16  ;;  %v10419_v46 = vsel %vm2113_vm6, %v8719_v43, 128 }
 0xa4a   :  { %v2098_v33 = vpop.xlane.xlu0 %2097  ;;  %v2276_v38 = vshra.s32 %v10419_v46, 16 }
 0xa4b   :  { %vm2116_vm12 = vcmp.eq.f32.partialorder %v10268_v24, %v2098_v33  ;;  %v10387_v19 = vcvt.s32.f32 %v2290_v4  ;;  %v2220_v33 = vshra.s32 %v10396_v45, 16 }
 0xa4c   :  { %v10391_v56 = vsel %vm2116_vm12, %v8719_v43, 128 }
 0xa4d   :  { %v2318_v36 = vshra.s32 %v10391_v56, 16  ;;  %2293 = vmin.xlane.f32.xlu0 %v10387_v19 }
 0xa4e   :  { %v2102_v3 = vpop.xlane.xlu0 %2101 }
 0xa4f   :  { %vm2118_vm1 = vcmp.eq.f32.partialorder %v10283_v0, %v2102_v3  ;;  %v10399_v52 = vcvt.s32.f32 %v2318_v36  ;;  %v2096_v36 = vpop.xlane.xlu1 %2095  ;;  %v10416_v3 = vcvt.s32.f32 %v2220_v33  ;;  %v10431_v33 = vcvt.s32.f32 %v2276_v38 }
 0xa50   :  { %v10403_v13 = vsel %vm2118_vm1, %v8719_v43, 128  ;;  %vm2115_vm12 = vcmp.eq.f32.partialorder %v10228_v5, %v2096_v36  ;;  %v2149_v38 = vand.u32 65535, %v10312_v1  ;;  %v2233_v1 = vand.u32 65535, %v10335_v27 }
 0xa51   :  { %v2346_v4 = vshra.s32 %v10403_v13, 16  ;;  %2321 = vmin.xlane.f32.xlu0 %v10399_v52  ;;  %v10427_v17 = vsel %vm2115_vm12, %v8719_v43, 128 }
 0xa52   :  { %v2304_v21 = vshra.s32 %v10427_v17, 16 }
 0xa53   :  { %v10411_v39 = vcvt.s32.f32 %v2346_v4  ;;  %v10424_v4 = vcvt.s32.f32 %v2248_v54 }
 0xa54   :  { %v10434_v34 = vcvt.s32.f32 %v2304_v21  ;;  %v2151_v21 = vcvt.s32.f32 %v2149_v38 }
 0xa55   :  { %2349 = vmin.xlane.f32.xlu0 %v10411_v39 }
 0xa58   :  { %2223 = vmin.xlane.f32.xlu1 %v10416_v3 }
 0xa5c   :  { %2251 = vmin.xlane.f32.xlu1 %v10424_v4 }
 0xa60   :  { %2279 = vmin.xlane.f32.xlu1 %v10431_v33 }
 0xa62   :  { %v2100_v15 = vpop.xlane.xlu1 %2099 }
 0xa63   :  { %vm2117_vm9 = vcmp.eq.f32.partialorder %v10299_v35, %v2100_v15  ;;  %v2205_v35 = vand.u32 65535, %v10327_v7  ;;  %v2235_v7 = vcvt.s32.f32 %v2233_v1 }
 0xa64   :  { %v10438_v36 = vsel %vm2117_vm9, %v8719_v43, 128  ;;  %2307 = vmin.xlane.f32.xlu1 %v10434_v34 }
 0xa65   :  { %v2332_v54 = vshra.s32 %v10438_v36, 16  ;;  %v2207_v38 = vcvt.s32.f32 %v2205_v35 }
 0xa67   :  { %v10442_v5 = vcvt.s32.f32 %v2332_v54  ;;  %v2179_v54 = vcvt.s32.f32 %v2177_v23 }
 0xa69   :  { %2335 = vmin.xlane.f32.xlu1 %v10442_v5 }
 0xa8b   :  { %v10447_v58 = vpop.xlane.xlu0 %2153 }
 0xa8c   :  { %vm2155_vm1 = vcmp.eq.f32.partialorder %v10316_v11, %v10447_v58 }
 0xa8d   :  { %v2156_v15 = vsel %vm2155_vm1, %v2151_v21, inf }
 0xa8e   :  { %2157 = vmin.xlane.f32.xlu0 %v2156_v15  ;;  %v2191_v15 = vand.u32 65535, %v10361_v63 }
 0xa8f   :  { %v10452_v61 = vpop.xlane.xlu0 %2181 }
 0xa90   :  { %vm2183_vm5 = vcmp.eq.f32.partialorder %v10324_v49, %v10452_v61  ;;  %v2163_v49 = vand.u32 65535, %v10353_v18  ;;  %v2193_v18 = vcvt.s32.f32 %v2191_v15 }
 0xa91   :  { %v2184_v0 = vsel %vm2183_vm5, %v2179_v54, inf }
 0xa92   :  { %2185 = vmin.xlane.f32.xlu0 %v2184_v0  ;;  %v2135_v0 = vand.u32 65535, %v10346_v32  ;;  %v2165_v1 = vcvt.s32.f32 %v2163_v49 }
 0xa93   :  { %v10457_v62 = vpop.xlane.xlu0 %2209 }
 0xa94   :  { %vm2211_vm6 = vcmp.eq.f32.partialorder %v10332_v16, %v10457_v62  ;;  %v2137_v35 = vcvt.s32.f32 %v2135_v0  ;;  %v2317_v0 = vand.u32 65535, %v10391_v56  ;;  %v2219_v56 = vand.u32 65535, %v10396_v45 }
 0xa95   :  { %v2212_v11 = vsel %vm2211_vm6, %v2207_v38, inf  ;;  %v2275_v45 = vand.u32 65535, %v10419_v46 }
 0xa96   :  { %2213 = vmin.xlane.f32.xlu0 %v2212_v11 }
 0xa97   :  { %v10461_v21 = vpop.xlane.xlu0 %2237 }
 0xa98   :  { %vm2239_vm12 = vcmp.eq.f32.partialorder %v10339_v41, %v10461_v21 }
 0xa99   :  { %v2240_v23 = vsel %vm2239_vm12, %v2235_v7, inf }
 0xa9a   :  { %2241 = vmin.xlane.f32.xlu0 %v2240_v23  ;;  %v2289_v23 = vand.u32 65535, %v10383_v42 }
 0xa9f   :  { %v10481_v11 = vpop.permute.xlu0 %4593 }
 0xaa0   :  { %14340 = vst [vmem:[#allocation25_spill] sm:$0xff] %v10481_v11 }
 0xaa4   :  { %v10467_v27 = vpop.xlane.xlu1 %2139 }
 0xaa5   :  { %vm2141_vm9 = vcmp.eq.f32.partialorder %v10350_v48, %v10467_v27  ;;  %v2261_v48 = vand.u32 65535, %v10375_v29  ;;  %v2146_v6 = vcvt.f32.s32 %v10467_v27  ;;  %v14419_v27 = vld [vmem:[#allocation32_spill] sm:$0xff] }
 0xaa6   :  { %v2142_v16 = vsel %vm2141_vm9, %v2137_v35, inf }
 0xaa7   :  { %2143 = vmin.xlane.f32.xlu1 %v2142_v16  ;;  %v2263_v7 = vcvt.s32.f32 %v2261_v48  ;;  %v2345_v16 = vand.u32 65535, %v10403_v13  ;;  %v2247_v13 = vand.u32 65535, %v10409_v55  ;;  %v2221_v48 = vcvt.s32.f32 %v2219_v56 }
 0xaa8   :  { %v10472_v54 = vpop.xlane.xlu1 %2167  ;;  %v2303_v55 = vand.u32 65535, %v10427_v17  ;;  %v14343_v17 = vld [vmem:[#allocation26_spill] sm:$0xff] }
 0xaa9   :  { %vm2169_vm1 = vcmp.eq.f32.partialorder %v10358_v50, %v10472_v54 }
 0xaaa   :  { %v2170_v41 = vsel %vm2169_vm1, %v2165_v1, inf  ;;  %v2305_v46 = vcvt.s32.f32 %v2303_v55 }
 0xaab   :  { %2171 = vmin.xlane.f32.xlu1 %v2170_v41 }
 0xaac   :  { %v10476_v32 = vpop.xlane.xlu1 %2195 }
 0xaad   :  { %vm2197_vm5 = vcmp.eq.f32.partialorder %v10365_v31, %v10476_v32  ;;  %v2291_v31 = vcvt.s32.f32 %v2289_v23 }
 0xaae   :  { %v2198_v38 = vsel %vm2197_vm5, %v2193_v18, inf  ;;  %v2347_v18 = vcvt.s32.f32 %v2345_v16 }
 0xaaf   :  { %2199 = vmin.xlane.f32.xlu1 %v2198_v38 }
 0xab0   :  { %v10491_v35 = vpop.permute.xlu1 %4601 }
 0xab1   :  { %14341 = vst [vmem:[#allocation63_spill] sm:$0xff] %v10491_v35 }
 0xab4   :  { %v10501_v1 = vpop.permute.xlu1 %4605 }
 0xab5   :  { %14342 = vst [vmem:[#allocation64_spill] sm:$0xff] %v10501_v1 }
 0xacc   :  { %v10483_v63 = vpop.xlane.xlu0 %2265 }
 0xacd   :  { %vm2267_vm6 = vcmp.eq.f32.partialorder %v10378_v22, %v10483_v63  ;;  %v2319_v22 = vcvt.s32.f32 %v2317_v0  ;;  %v2277_v0 = vcvt.s32.f32 %v2275_v45 }
 0xace   :  { %v2268_v50 = vsel %vm2267_vm6, %v2263_v7, inf }
 0xacf   :  { %2269 = vmin.xlane.f32.xlu0 %v2268_v50  ;;  %v2249_v50 = vcvt.s32.f32 %v2247_v13  ;;  %v2216_v13 = vcvt.f32.s32 %v10457_v62 }
 0xada   :  { %v10489_v49 = vpop.xlane.xlu0 %2293 }
 0xadb   :  { %vm2295_vm12 = vcmp.eq.f32.partialorder %v10387_v19, %v10489_v49  ;;  %v2300_v2 = vcvt.f32.s32 %v10489_v49  ;;  %v14366_v49 = vmov 0 }
 0xadc   :  { %v2296_v29 = vsel %vm2295_vm12, %v2291_v31, inf }
 0xadd   :  { %2297 = vmin.xlane.f32.xlu0 %v2296_v29 }
 0xade   :  { %v10496_v15 = vpop.xlane.xlu0 %2321 }
 0xadf   :  { %vm2323_vm9 = vcmp.eq.f32.partialorder %v10399_v52, %v10496_v15 }
 0xae0   :  { %v2324_v42 = vsel %vm2323_vm9, %v2319_v22, inf }
 0xae1   :  { %2325 = vmin.xlane.f32.xlu0 %v2324_v42  ;;  %v2188_v42 = vcvt.f32.s32 %v10452_v61 }
 0xae2   :  { %v10503_v41 = vpop.xlane.xlu0 %2349 }
 0xae3   :  { %vm2351_vm1 = vcmp.eq.f32.partialorder %v10411_v39, %v10503_v41 }
 0xae4   :  { %v2352_v19 = vsel %vm2351_vm1, %v2347_v18, inf }
 0xae5   :  { %v10508_v38 = vpop.xlane.xlu1 %2223  ;;  %2353 = vmin.xlane.f32.xlu0 %v2352_v19  ;;  %v2189_v19 = vshll.u32 %v2188_v42, 16 }
 0xae6   :  { %vm2225_vm5 = vcmp.eq.f32.partialorder %v10416_v3, %v10508_v38 }
 0xae7   :  { %v2226_v52 = vsel %vm2225_vm5, %v2221_v48, inf }
 0xae8   :  { %2227 = vmin.xlane.f32.xlu1 %v2226_v52 }
 0xae9   :  { %v10513_v7 = vpop.xlane.xlu1 %2251 }
 0xaea   :  { %vm2253_vm6 = vcmp.eq.f32.partialorder %v10424_v4, %v10513_v7  ;;  %v13993_v4 = vmov 5  }
 0xaeb   :  { %v2254_v39 = vsel %vm2253_vm6, %v2249_v50, inf  ;;  %v2217_v50 = vshll.u32 %v2216_v13, 16  ;;  %v2202_v13 = vcvt.f32.s32 %v10476_v32 }
 0xaec   :  { %2255 = vmin.xlane.f32.xlu1 %v2254_v39  ;;  %v2244_v39 = vcvt.f32.s32 %v10461_v21 }
 0xaed   :  { %v10518_v23 = vpop.xlane.xlu1 %2279 }
 0xaee   :  { %vm2281_vm12 = vcmp.eq.f32.partialorder %v10431_v33, %v10518_v23  ;;  %v2160_v33 = vcvt.f32.s32 %v10447_v58 }
 0xaef   :  { %v2282_v3 = vsel %vm2281_vm12, %v2277_v0, inf  ;;  %v2331_v0 = vand.u32 65535, %v10438_v36 }
 0xaf0   :  { %2283 = vmin.xlane.f32.xlu1 %v2282_v3  ;;  %v2161_v22 = vshll.u32 %v2160_v33, 16 }
 0xaf1   :  { %v10522_v31 = vpop.xlane.xlu1 %2307  ;;  %v2333_v36 = vcvt.s32.f32 %v2331_v0 }
 0xaf2   :  { %vm2309_vm9 = vcmp.eq.f32.partialorder %v10434_v34, %v10522_v31 }
 0xaf3   :  { %v2310_v29 = vsel %vm2309_vm9, %v2305_v46, inf  ;;  %v2245_v46 = vshll.u32 %v2244_v39, 16 }
 0xaf4   :  { %2311 = vmin.xlane.f32.xlu1 %v2310_v29 }
 0xaf6   :  { %v10558_v3 = vpop.xlane.xlu1 %2335 }
 0xaf7   :  { %vm2337_vm9 = vcmp.eq.f32.partialorder %v10442_v5, %v10558_v3  ;;  %v2147_v5 = vshll.u32 %v2146_v6, 16 }
 0xafb   :  { %4609 = vperm.xlu0 %7968, %v14238_v14  }
 0xaff   :  { %7971 = vset.pattern.permute.xlu0 %v13993_v4 }
 0xb05   :  { %4613 = vperm.xlu1 %7969, %v14236_v30  }
 0xb09   :  { %7970 = vset.pattern.permute.xlu1 %v13993_v4 }
 0xb0a   :  { %4918 = vperm.xlu1 %7970, %v14343_v17  }
 0xb1b   :  { %v2158_v16 = vpop.xlane.xlu0 %2157 }
 0xb1c   :  { %v2159_v34 = vcvt.f32.s32 %v2158_v16  ;;  %v2338_v16 = vsel %vm2337_vm9, %v2333_v36, inf }
 0xb1e   :  { %v2162_v56 = vadd.s32 %v2161_v22, %v2159_v34  ;;  %v2174_v34 = vcvt.f32.s32 %v10472_v54 }
 0xb1f   :  { %v2186_v18 = vpop.xlane.xlu0 %2185 }
 0xb20   :  { %v2187_v48 = vcvt.f32.s32 %v2186_v18  ;;  %vm2360_vm1 = vcmp.eq.s32.totalorder %v8719_v43, %v2162_v56 }
 0xb21   :  { %v10536_v52 = vsel %vm2360_vm1, -1e+30, %v10049_v25  ;;  %vm10540_vm5 = vmor %vm10051_vm14, %vm2360_vm1 }
 0xb22   :  { %v2190_v45 = vadd.s32 %v2189_v19, %v2187_v48  ;;  %2409 = vmax.xlane.f32.xlu0 %v10536_v52 }
 0xb23   :  { %v2214_v61 = vpop.xlane.xlu0 %2213 }
 0xb24   :  { %v2215_v62 = vcvt.f32.s32 %v2214_v61  ;;  %vm2362_vm6 = vcmp.eq.s32.totalorder %v8719_v43, %v2190_v45  ;;  %v2203_v61 = vshll.u32 %v2202_v13, 16 }
 0xb25   :  { %v10548_v55 = vsel %vm2362_vm6, -1e+30, %v10065_v51  ;;  %vm10552_vm12 = vmor %vm10067_vm4, %vm2362_vm6 }
 0xb26   :  { %v2218_v37 = vadd.s32 %v2217_v50, %v2215_v62  ;;  %2413 = vmax.xlane.f32.xlu0 %v10548_v55 }
 0xb27   :  { %v2242_v21 = vpop.xlane.xlu0 %2241 }
 0xb28   :  { %v2243_v29 = vcvt.f32.s32 %v2242_v21  ;;  %vm2364_vm14 = vcmp.eq.s32.totalorder %v8719_v43, %v2218_v37 }
 0xb29   :  { %v10562_v51 = vsel %vm2364_vm14, -1e+30, %v10081_v10  ;;  %vm10566_vm4 = vmor %vm10083_vm2, %vm2364_vm14  ;;  %v14351_v10 = vmov 0 }
 0xb2a   :  { %v2246_v33 = vadd.s32 %v2245_v46, %v2243_v29  ;;  %2417 = vmax.xlane.f32.xlu0 %v10562_v51  ;;  %v2301_v29 = vshll.u32 %v2300_v2, 16 }
 0xb2c   :  { %vm2366_vm1 = vcmp.eq.s32.totalorder %v8719_v43, %v2246_v33  ;;  %v2328_v33 = vcvt.f32.s32 %v10496_v15  ;;  %v2230_v15 = vcvt.f32.s32 %v10508_v38  ;;  %v2258_v38 = vcvt.f32.s32 %v10513_v7 }
 0xb2d   :  { %v10575_v22 = vsel %vm2366_vm1, -1e+30, %v10096_v12  ;;  %vm10579_vm6 = vmor %vm10098_vm11, %vm2366_vm1  ;;  %v2175_v12 = vshll.u32 %v2174_v34, 16 }
 0xb2e   :  { %14350 = vst [vmem:[#allocation2_spill] sm:$0xff] %v10575_v22  ;;  %v14352_v10 = vsel %vm10579_vm6, 4294967295, %v14351_v10  ;;  %2339 = vmin.xlane.f32.xlu1 %v2338_v16  ;;  %2421 = vmax.xlane.f32.xlu0 %v10575_v22  ;;  %v2231_v13 = vshll.u32 %v2230_v15, 16 }
 0xb2f   :  { %14353 = vst [vmem:[#allocation65_spill] sm:$0xff] %v14352_v10 }
 0xb34   :  { %v2144_v42 = vpop.xlane.xlu1 %2143 }
 0xb35   :  { %v2145_v56 = vcvt.f32.s32 %v2144_v42  ;;  %v2329_v42 = vshll.u32 %v2328_v33, 16  ;;  %v2314_v33 = vcvt.f32.s32 %v10522_v31  ;;  %v14389_v31 = vld [vmem:[#allocation14_spill] sm:$0xff] }
 0xb37   :  { %v2148_v18 = vadd.s32 %v2147_v5, %v2145_v56 }
 0xb38   :  { %v2172_v19 = vpop.xlane.xlu1 %2171 }
 0xb39   :  { %v2173_v9 = vcvt.f32.s32 %v2172_v19  ;;  %vm2359_vm2 = vcmp.eq.s32.totalorder %v8719_v43, %v2148_v18 }
 0xb3a   :  { %v10589_v48 = vsel %vm2359_vm2, -1e+30, %v10133_v57  ;;  %vm10593_vm11 = vmor %vm10135_vm13, %vm2359_vm2 }
 0xb3b   :  { %v2176_v45 = vadd.s32 %v2175_v12, %v2173_v9  ;;  %2407 = vmax.xlane.f32.xlu1 %v10589_v48 }
 0xb3c   :  { %v2200_v54 = vpop.xlane.xlu1 %2199 }
 0xb3d   :  { %v2201_v50 = vcvt.f32.s32 %v2200_v54  ;;  %vm2361_vm14 = vcmp.eq.s32.totalorder %v8719_v43, %v2176_v45  ;;  %v14373_v54 = vld [vmem:[#allocation22_spill] sm:$0xff] }
 0xb3e   :  { %v10600_v32 = vsel %vm2361_vm14, -1e+30, %v10149_v59  ;;  %vm10604_vm9 = vmor %vm10151_vm15, %vm2361_vm14  ;;  %v2272_v59 = vcvt.f32.s32 %v10483_v63 }
 0xb3f   :  { %v2204_v8 = vadd.s32 %v2203_v61, %v2201_v50  ;;  %2411 = vmax.xlane.f32.xlu1 %v10600_v32 }
 0xb40   :  { %v2273_v37 = vshll.u32 %v2272_v59, 16  ;;  %v2286_v59 = vcvt.f32.s32 %v10518_v23 }
 0xb41   :  { %vm2363_vm13 = vcmp.eq.s32.totalorder %v8719_v43, %v2204_v8  ;;  %v2259_v8 = vshll.u32 %v2258_v38, 16  ;;  %v14395_v38 = vld [vmem:[#allocation20_spill] sm:$0xff] }
 0xb42   :  { %v10611_v39 = vsel %vm2363_vm13, -1e+30, %v10165_v20  ;;  %vm10615_vm1 = vmor %vm10167_vm8, %vm2363_vm13  ;;  %v14361_v20 = vmov 0  ;;  %vm14365_vm8 = vnez %v14307_v44 }
 0xb43   :  { %2415 = vmax.xlane.f32.xlu1 %v10611_v39 }
 0xb5c   :  { %v2270_v60 = vpop.xlane.xlu0 %2269 }
 0xb5d   :  { %v2271_v0 = vcvt.f32.s32 %v2270_v60  ;;  %v14379_v60 = vld [vmem:[#allocation15_spill] sm:$0xff] }
 0xb5f   :  { %v2274_v21 = vadd.s32 %v2273_v37, %v2271_v0  ;;  %v14380_v0 = vld [vmem:[#allocation17_spill] sm:$0xff] }
 0xb61   :  { %vm2368_vm15 = vcmp.eq.s32.totalorder %v8719_v43, %v2274_v21 }
 0xb62   :  { %v10623_v46 = vsel %vm2368_vm15, -1e+30, %v10239_v47  ;;  %vm10627_vm2 = vmor %vm10119_vm0, %vm2368_vm15  ;;  %v2356_v47 = vcvt.f32.s32 %v10503_v41 }
 0xb63   :  { %14360 = vst [vmem:[#allocation66_spill] sm:$0xff] %v10623_v46  ;;  %v14362_v20 = vsel %vm10627_vm2, 4294967295, %v14361_v20  ;;  %2425 = vmax.xlane.f32.xlu0 %v10623_v46 }
 0xb64   :  { %14363 = vst [vmem:[#allocation3_spill] sm:$0xff] %v14362_v20  ;;  %v2357_v18 = vshll.u32 %v2356_v47, 16 }
 0xb6a   :  { %v2298_v63 = vpop.xlane.xlu0 %2297 }
 0xb6b   :  { %v2299_v36 = vcvt.f32.s32 %v2298_v63 }
 0xb6d   :  { %v2302_v16 = vadd.s32 %v2301_v29, %v2299_v36  ;;  %v2287_v29 = vshll.u32 %v2286_v59, 16  ;;  %v14384_v36 = vld [vmem:[#allocation19_spill] sm:$0xff] }
 0xb6e   :  { %v2326_v6 = vpop.xlane.xlu0 %2325 }
 0xb6f   :  { %v2327_v5 = vcvt.f32.s32 %v2326_v6  ;;  %vm2370_vm0 = vcmp.eq.s32.totalorder %v8719_v43, %v2302_v16  ;;  %v14385_v6 = vld [vmem:[#allocation21_spill] sm:$0xff] }
 0xb70   :  { %v10637_v40 = vsel %vm2370_vm0, -1e+30, %v10253_v28  ;;  %vm10641_vm14 = vmor %vm14365_vm8, %vm2370_vm0  ;;  %v14370_v28 = vmov 0 }
 0xb71   :  { %14364 = vst [vmem:[#allocation67_spill] sm:$0xff] %v10637_v40  ;;  %v14367_v49 = vsel %vm10641_vm14, 4294967295, %v14366_v49  ;;  %v2330_v34 = vadd.s32 %v2329_v42, %v2327_v5  ;;  %2429 = vmax.xlane.f32.xlu0 %v10637_v40  ;;  %v14436_v42 = vmov 0 }
 0xb72   :  { %14368 = vst [vmem:[#allocation70_spill] sm:$0xff] %v14367_v49  ;;  %v2354_v56 = vpop.xlane.xlu0 %2353 }
 0xb73   :  { %v2355_v41 = vcvt.f32.s32 %v2354_v56  ;;  %vm2372_vm13 = vcmp.eq.s32.totalorder %v8719_v43, %v2330_v34  ;;  %v2315_v34 = vshll.u32 %v2314_v33, 16  ;;  %v14402_v33 = vld [vmem:[#allocation59_spill] sm:$0xff] }
 0xb74   :  { %v10649_v19 = vsel %vm2372_vm13, -1e+30, %v10268_v24  ;;  %vm10653_vm15 = vmor %vm10270_vm7, %vm2372_vm13  ;;  %vm14381_vm13 = vnez %v14380_v0 }
 0xb75   :  { %14369 = vst [vmem:[#allocation4_spill] sm:$0xff] %v10649_v19  ;;  %v14371_v28 = vsel %vm10653_vm15, 4294967295, %v14370_v28  ;;  %v2358_v44 = vadd.s32 %v2357_v18, %v2355_v41  ;;  %v2228_v12 = vpop.xlane.xlu1 %2227  ;;  %2433 = vmax.xlane.f32.xlu0 %v10649_v19  ;;  %v14390_v18 = vld [vmem:[#allocation16_spill] sm:$0xff]  ;;  %v14440_v41 = vmov 0 }
 0xb76   :  { %14372 = vst [vmem:[#allocation6_spill] sm:$0xff] %v14371_v28  ;;  %v2229_v9 = vcvt.f32.s32 %v2228_v12  ;;  %v14394_v12 = vld [vmem:[#allocation18_spill] sm:$0xff] }
 0xb77   :  { %vm2374_vm0 = vcmp.eq.s32.totalorder %v8719_v43, %v2358_v44 }
 0xb78   :  { %v2232_v45 = vadd.s32 %v2231_v13, %v2229_v9  ;;  %v10661_v24 = vsel %vm2374_vm0, -1e+30, %v14373_v54  ;;  %vm10665_vm7 = vmor %vm10285_vm3, %vm2374_vm0  ;;  %vm14386_vm0 = vnez %v14385_v6  ;;  %v14405_v6 = vmov 0 }
 0xb79   :  { %14374 = vst [vmem:[#allocation26_spill] sm:$0xff] %v10661_v24  ;;  %v14377_v26 = vsel %vm10665_vm7, 4294967295, %v14376_v26  ;;  %v2256_v50 = vpop.xlane.xlu1 %2255  ;;  %2437 = vmax.xlane.f32.xlu0 %v10661_v24 }
 0xb7a   :  { %14378 = vst [vmem:[#allocation22_spill] sm:$0xff] %v14377_v26  ;;  %v2257_v7 = vcvt.f32.s32 %v2256_v50  ;;  %vm2365_vm8 = vcmp.eq.s32.totalorder %v8719_v43, %v2232_v45  ;;  %v10716_v45 = vpop.permute.xlu0 %4609 }
 0xb7b   :  { %v10673_v37 = vsel %vm2365_vm8, -1e+30, %v14379_v60  ;;  %vm10677_vm15 = vmor %vm14381_vm13, %vm2365_vm8  ;;  %vm14391_vm13 = vnez %v14390_v18  ;;  %14399 = vst [vmem:[#allocation23_spill] sm:$0xff] %v10716_v45  ;;  %v2342_v60 = vcvt.f32.s32 %v10558_v3 }
 0xb7c   :  { %v2260_v2 = vadd.s32 %v2259_v8, %v2257_v7  ;;  %2419 = vmax.xlane.f32.xlu1 %v10673_v37 }
 0xb7d   :  { %v2284_v63 = vpop.xlane.xlu1 %2283 }
 0xb7e   :  { %v2285_v23 = vcvt.f32.s32 %v2284_v63  ;;  %vm2367_vm3 = vcmp.eq.s32.totalorder %v8719_v43, %v2260_v2  ;;  %v2343_v2 = vshll.u32 %v2342_v60, 16 }
 0xb7f   :  { %v10685_v16 = vsel %vm2367_vm3, -1e+30, %v14384_v36  ;;  %vm10689_vm7 = vmor %vm14386_vm0, %vm2367_vm3  ;;  %vm14396_vm0 = vnez %v14395_v38 }
 0xb80   :  { %v2288_v47 = vadd.s32 %v2287_v29, %v2285_v23  ;;  %2423 = vmax.xlane.f32.xlu1 %v10685_v16 }
 0xb81   :  { %v2312_v5 = vpop.xlane.xlu1 %2311 }
 0xb82   :  { %v2313_v15 = vcvt.f32.s32 %v2312_v5  ;;  %vm2369_vm8 = vcmp.eq.s32.totalorder %v8719_v43, %v2288_v47 }
 0xb83   :  { %v10696_v56 = vsel %vm2369_vm8, -1e+30, %v14389_v31  ;;  %vm10700_vm14 = vmor %vm14391_vm13, %vm2369_vm8 }
 0xb84   :  { %v2316_v44 = vadd.s32 %v2315_v34, %v2313_v15  ;;  %2427 = vmax.xlane.f32.xlu1 %v10696_v56  ;;  %v14408_v15 = vld [vmem:[#allocation28_spill] sm:$0xff] }
 0xb85   :  { %v10719_v61 = vpop.permute.xlu1 %4613 }
 0xb86   :  { %vm2371_vm3 = vcmp.eq.s32.totalorder %v8719_v43, %v2316_v44  ;;  %14400 = vst [vmem:[#allocation15_spill] sm:$0xff] %v10719_v61 }
 0xb87   :  { %v10707_v13 = vsel %vm2371_vm3, -1e+30, %v14394_v12  ;;  %vm10711_vm2 = vmor %vm14396_vm0, %vm2371_vm3 }
 0xb88   :  { %2431 = vmax.xlane.f32.xlu1 %v10707_v13 }
 0xb89   :  { %v10728_v7 = vpop.permute.xlu1 %4918 }
 0xb8a   :  { %14401 = vst [vmem:[#allocation17_spill] sm:$0xff] %v10728_v7 }
 0xbaf   :  { %v2410_v54 = vpop.xlane.xlu0 %2409 }
 0xbb0   :  { %vm2440_vm8 = vcmp.eq.f32.partialorder %v10536_v52, %v2410_v54 }
 0xbb1   :  { %v10722_v50 = vsel %vm2440_vm8, %v8719_v43, 128 }
 0xbb2   :  { %v2486_v8 = vshra.s32 %v10722_v50, 16 }
 0xbb4   :  { %v10725_v59 = vcvt.s32.f32 %v2486_v8 }
 0xbb6   :  { %2489 = vmin.xlane.f32.xlu0 %v10725_v59 }
 0xbbb   :  { %v2340_v0 = vpop.xlane.xlu1 %2339 }
 0xbbc   :  { %v2341_v63 = vcvt.f32.s32 %v2340_v0  ;;  %v2414_v0 = vpop.xlane.xlu0 %2413 }
 0xbbe   :  { %v2344_v29 = vadd.s32 %v2343_v2, %v2341_v63 }
 0xbc0   :  { %vm2373_vm13 = vcmp.eq.s32.totalorder %v8719_v43, %v2344_v29  ;;  %v2418_v2 = vpop.xlane.xlu0 %2417 }
 0xbc1   :  { %v10733_v23 = vsel %vm2373_vm13, -1e+30, %v14402_v33  ;;  %vm10737_vm3 = vmor %vm10301_vm10, %vm2373_vm13  ;;  %vm2442_vm13 = vcmp.eq.f32.partialorder %v10548_v55, %v2414_v0 }
 0xbc2   :  { %14403 = vst [vmem:[#allocation19_spill] sm:$0xff] %v10733_v23  ;;  %v14406_v6 = vsel %vm10737_vm3, 4294967295, %v14405_v6  ;;  %2435 = vmax.xlane.f32.xlu1 %v10733_v23  ;;  %v10769_v63 = vsel %vm2442_vm13, %v8719_v43, 128 }
 0xbc3   :  { %14407 = vst [vmem:[#allocation21_spill] sm:$0xff] %v14406_v6  ;;  %v2514_v33 = vshra.s32 %v10769_v63, 16 }
 0xbc4   :  { %v2422_v29 = vpop.xlane.xlu0 %2421 }
 0xbc8   :  { %v2408_v47 = vpop.xlane.xlu1 %2407 }
 0xbc9   :  { %vm2439_vm0 = vcmp.eq.f32.partialorder %v10589_v48, %v2408_v47 }
 0xbca   :  { %v10744_v3 = vsel %vm2439_vm0, %v8719_v43, 128  ;;  %vm2444_vm0 = vcmp.eq.f32.partialorder %v10562_v51, %v2418_v2 }
 0xbcb   :  { %v2472_v5 = vshra.s32 %v10744_v3, 16  ;;  %v10774_v36 = vsel %vm2444_vm0, %v8719_v43, 128 }
 0xbcc   :  { %v2412_v34 = vpop.xlane.xlu1 %2411  ;;  %4922 = vperm.xlu0 %7971, %v14408_v15   ;;  %v2542_v47 = vshra.s32 %v10774_v36, 16 }
 0xbcd   :  { %vm2441_vm8 = vcmp.eq.f32.partialorder %v10600_v32, %v2412_v34  ;;  %v10749_v31 = vcvt.s32.f32 %v2472_v5  ;;  %v10778_v5 = vcvt.s32.f32 %v2514_v33 }
 0xbce   :  { %v10752_v18 = vsel %vm2441_vm8, %v8719_v43, 128  ;;  %vm2446_vm8 = vcmp.eq.f32.partialorder %v10575_v22, %v2422_v29  ;;  %v14009_v22 = vmov 7  }
 0xbcf   :  { %v2500_v44 = vshra.s32 %v10752_v18, 16  ;;  %2475 = vmin.xlane.f32.xlu1 %v10749_v31  ;;  %v10781_v34 = vsel %vm2446_vm8, %v8719_v43, 128 }
 0xbd0   :  { %v2416_v12 = vpop.xlane.xlu1 %2415 }
 0xbd1   :  { %vm2443_vm10 = vcmp.eq.f32.partialorder %v10611_v39, %v2416_v12  ;;  %v10757_v38 = vcvt.s32.f32 %v2500_v44  ;;  %v2570_v44 = vshra.s32 %v10781_v34, 16  ;;  %v10785_v12 = vcvt.s32.f32 %v2542_v47 }
 0xbd2   :  { %v10760_v54 = vsel %vm2443_vm10, %v8719_v43, 128 }
 0xbd3   :  { %v2528_v8 = vshra.s32 %v10760_v54, 16  ;;  %2503 = vmin.xlane.f32.xlu1 %v10757_v38  ;;  %v10789_v0 = vcvt.s32.f32 %v2570_v44 }
 0xbd5   :  { %v10764_v60 = vcvt.s32.f32 %v2528_v8 }
 0xbd7   :  { %2531 = vmin.xlane.f32.xlu1 %v10764_v60 }
 0xbeb   :  { %2517 = vmin.xlane.f32.xlu0 %v10778_v5 }
 0xbef   :  { %2545 = vmin.xlane.f32.xlu0 %v10785_v12 }
 0xbf0   :  { %v2426_v8 = vpop.xlane.xlu0 %2425 }
 0xbf1   :  { %vm2448_vm10 = vcmp.eq.f32.partialorder %v10623_v46, %v2426_v8 }
 0xbf2   :  { %v10792_v2 = vsel %vm2448_vm10, %v8719_v43, 128 }
 0xbf3   :  { %v2598_v29 = vshra.s32 %v10792_v2, 16  ;;  %2573 = vmin.xlane.f32.xlu0 %v10789_v0 }
 0xbf5   :  { %v10796_v33 = vcvt.s32.f32 %v2598_v29 }
 0xbf7   :  { %2601 = vmin.xlane.f32.xlu0 %v10796_v33 }
 0xbfe   :  { %v2430_v47 = vpop.xlane.xlu0 %2429 }
 0xbff   :  { %vm2450_vm13 = vcmp.eq.f32.partialorder %v10637_v40, %v2430_v47 }
 0xc00   :  { %v10801_v4 = vsel %vm2450_vm13, %v8719_v43, 128 }
 0xc01   :  { %v2626_v44 = vshra.s32 %v10801_v4, 16 }
 0xc02   :  { %v2434_v8 = vpop.xlane.xlu0 %2433 }
 0xc03   :  { %vm2452_vm0 = vcmp.eq.f32.partialorder %v10649_v19, %v2434_v8  ;;  %v10805_v45 = vcvt.s32.f32 %v2626_v44 }
 0xc04   :  { %v10808_v61 = vsel %vm2452_vm0, %v8719_v43, 128 }
 0xc05   :  { %v2654_v29 = vshra.s32 %v10808_v61, 16  ;;  %2629 = vmin.xlane.f32.xlu0 %v10805_v45 }
 0xc06   :  { %v2438_v35 = vpop.xlane.xlu0 %2437 }
 0xc07   :  { %vm2454_vm8 = vcmp.eq.f32.partialorder %v10661_v24, %v2438_v35  ;;  %v10813_v47 = vcvt.s32.f32 %v2654_v29 }
 0xc08   :  { %v10816_v1 = vsel %vm2454_vm8, %v8719_v43, 128 }
 0xc09   :  { %v2682_v11 = vshra.s32 %v10816_v1, 16  ;;  %v2420_v8 = vpop.xlane.xlu1 %2419  ;;  %2657 = vmin.xlane.f32.xlu0 %v10813_v47 }
 0xc0a   :  { %vm2445_vm10 = vcmp.eq.f32.partialorder %v10673_v37, %v2420_v8 }
 0xc0b   :  { %v10822_v44 = vsel %vm2445_vm10, %v8719_v43, 128  ;;  %v10824_v7 = vcvt.s32.f32 %v2682_v11 }
 0xc0c   :  { %v2556_v14 = vshra.s32 %v10822_v44, 16 }
 0xc0d   :  { %v2424_v35 = vpop.xlane.xlu1 %2423  ;;  %2685 = vmin.xlane.f32.xlu0 %v10824_v7 }
 0xc0e   :  { %vm2447_vm13 = vcmp.eq.f32.partialorder %v10685_v16, %v2424_v35  ;;  %v10829_v29 = vcvt.s32.f32 %v2556_v14 }
 0xc0f   :  { %v10832_v30 = vsel %vm2447_vm13, %v8719_v43, 128 }
 0xc10   :  { %v2584_v6 = vshra.s32 %v10832_v30, 16  ;;  %2559 = vmin.xlane.f32.xlu1 %v10829_v29 }
 0xc11   :  { %v2428_v8 = vpop.xlane.xlu1 %2427 }
 0xc12   :  { %vm2449_vm0 = vcmp.eq.f32.partialorder %v10696_v56, %v2428_v8  ;;  %v10837_v11 = vcvt.s32.f32 %v2584_v6  ;;  %v2485_v8 = vand.u32 65535, %v10722_v50  ;;  %v2471_v50 = vand.u32 65535, %v10744_v3 }
 0xc13   :  { %v10840_v26 = vsel %vm2449_vm0, %v8719_v43, 128  ;;  %v2513_v3 = vand.u32 65535, %v10769_v63 }
 0xc14   :  { %v2612_v24 = vshra.s32 %v10840_v26, 16  ;;  %2587 = vmin.xlane.f32.xlu1 %v10837_v11  ;;  %v2487_v40 = vcvt.s32.f32 %v2485_v8  ;;  %v2499_v8 = vand.u32 65535, %v10752_v18  ;;  %v14410_v18 = vld [vmem:[#allocation27_spill] sm:$0xff] }
 0xc15   :  { %v2432_v14 = vpop.xlane.xlu1 %2431 }
 0xc16   :  { %vm2451_vm8 = vcmp.eq.f32.partialorder %v10707_v13, %v2432_v14  ;;  %v10845_v35 = vcvt.s32.f32 %v2612_v24 }
 0xc17   :  { %v10848_v28 = vsel %vm2451_vm8, %v8719_v43, 128 }
 0xc18   :  { %v2640_v19 = vshra.s32 %v10848_v28, 16  ;;  %2615 = vmin.xlane.f32.xlu1 %v10845_v35 }
 0xc1a   :  { %v10852_v6 = vcvt.s32.f32 %v2640_v19 }
 0xc1c   :  { %2643 = vmin.xlane.f32.xlu1 %v10852_v6 }
 0xc43   :  { %v10856_v49 = vpop.xlane.xlu0 %2489 }
 0xc44   :  { %vm2491_vm10 = vcmp.eq.f32.partialorder %v10725_v59, %v10856_v49 }
 0xc45   :  { %v2492_v24 = vsel %vm2491_vm10, %v2487_v40, inf  ;;  %v2473_v40 = vcvt.s32.f32 %v2471_v50  ;;  %v2541_v50 = vand.u32 65535, %v10774_v36 }
 0xc46   :  { %2493 = vmin.xlane.f32.xlu0 %v2492_v24 }
 0xc4f   :  { %v2436_v14 = vpop.xlane.xlu1 %2435 }
 0xc50   :  { %vm2453_vm13 = vcmp.eq.f32.partialorder %v10733_v23, %v2436_v14  ;;  %v2501_v14 = vcvt.s32.f32 %v2499_v8  ;;  %v10879_v23 = vpop.permute.xlu0 %4922  ;;  %v2543_v8 = vcvt.s32.f32 %v2541_v50 }
 0xc51   :  { %v10862_v20 = vsel %vm2453_vm13, %v8719_v43, 128  ;;  %14409 = vst [vmem:[#allocation14_spill] sm:$0xff] %v10879_v23 }
 0xc52   :  { %v2668_v19 = vshra.s32 %v10862_v20, 16 }
 0xc54   :  { %v10865_v46 = vcvt.s32.f32 %v2668_v19 }
 0xc56   :  { %2671 = vmin.xlane.f32.xlu1 %v10865_v46 }
 0xc5c   :  { %v10870_v10 = vpop.xlane.xlu1 %2475 }
 0xc5d   :  { %vm2477_vm0 = vcmp.eq.f32.partialorder %v10749_v31, %v10870_v10 }
 0xc5e   :  { %v2478_v59 = vsel %vm2477_vm0, %v2473_v40, inf  ;;  %v2515_v40 = vcvt.s32.f32 %v2513_v3 }
 0xc5f   :  { %2479 = vmin.xlane.f32.xlu1 %v2478_v59  ;;  %v14411_v59 = vmov 5  }
 0xc60   :  { %v10874_v24 = vpop.xlane.xlu1 %2503 }
 0xc61   :  { %vm2505_vm8 = vcmp.eq.f32.partialorder %v10757_v38, %v10874_v24 }
 0xc62   :  { %v2506_v19 = vsel %vm2505_vm8, %v2501_v14, inf  ;;  %v14412_v14 = vld [vmem:[#allocation5_spill] sm:$0xff] }
 0xc63   :  { %2507 = vmin.xlane.f32.xlu1 %v2506_v19 }
 0xc74   :  { %4930 = vperm.xlu1 %7970, %v14410_v18  }
 0xc78   :  { %7972 = vset.pattern.permute.xlu1 %v14009_v22  ;;  %v10884_v31 = vpop.xlane.xlu0 %2517 }
 0xc79   :  { %5283 = vperm.xlu1 %7972, %v14343_v17   ;;  %vm2519_vm10 = vcmp.eq.f32.partialorder %v10778_v5, %v10884_v31  ;;  %v10896_v17 = vpop.xlane.xlu1 %2531  ;;  %v2527_v5 = vand.u32 65535, %v10760_v54 }
 0xc7a   :  { %v2520_v38 = vsel %vm2519_vm10, %v2515_v40, inf  ;;  %vm2533_vm0 = vcmp.eq.f32.partialorder %v10764_v60, %v10896_v17  ;;  %v2583_v40 = vand.u32 65535, %v10832_v30  ;;  %v2611_v60 = vand.u32 65535, %v10840_v26 }
 0xc7b   :  { %2521 = vmin.xlane.f32.xlu0 %v2520_v38  ;;  %v2529_v3 = vcvt.s32.f32 %v2527_v5  ;;  %v2639_v30 = vand.u32 65535, %v10848_v28 }
 0xc7c   :  { %v10889_v63 = vpop.xlane.xlu0 %2545 }
 0xc7d   :  { %5287 = vperm.xlu1 %7972, %v14408_v15   ;;  %vm2547_vm13 = vcmp.eq.f32.partialorder %v10785_v12, %v10889_v63  ;;  %v2555_v15 = vand.u32 65535, %v10822_v44  ;;  %v2534_v50 = vsel %vm2533_vm0, %v2529_v3, inf  ;;  %v2585_v44 = vcvt.s32.f32 %v2583_v40 }
 0xc7e   :  { %v2548_v36 = vsel %vm2547_vm13, %v2543_v8, inf  ;;  %v2641_v26 = vcvt.s32.f32 %v2639_v30 }
 0xc7f   :  { %2549 = vmin.xlane.f32.xlu0 %v2548_v36  ;;  %v2557_v38 = vcvt.s32.f32 %v2555_v15  ;;  %v2613_v15 = vcvt.s32.f32 %v2611_v60 }
 0xc80   :  { %v10914_v36 = vpop.xlane.xlu0 %2573 }
 0xc81   :  { %7973 = vset.pattern.permute.xlu1 %v14411_v59 }
 0xc95   :  { %4926 = vperm.xlu0 %7971, %v14412_v14  }
 0xc9d   :  { %v10899_v19 = vpop.xlane.xlu1 %2559 }
 0xc9e   :  { %vm2561_vm8 = vcmp.eq.f32.partialorder %v10829_v29, %v10899_v19 }
 0xc9f   :  { %v2562_v8 = vsel %vm2561_vm8, %v2557_v38, inf  ;;  %v10922_v38 = vpop.xlane.xlu0 %2601  ;;  %vm2575_vm8 = vcmp.eq.f32.partialorder %v10789_v0, %v10914_v36  ;;  %v2653_v0 = vand.u32 65535, %v10808_v61  ;;  %v2496_v61 = vcvt.f32.s32 %v10856_v49 }
 0xca1   :  { %2535 = vmin.xlane.f32.xlu1 %v2534_v50  ;;  %v10904_v12 = vpop.xlane.xlu1 %2587  ;;  %v2569_v50 = vand.u32 65535, %v10781_v34  ;;  %v2625_v34 = vand.u32 65535, %v10801_v4  ;;  %v2655_v4 = vcvt.s32.f32 %v2653_v0 }
 0xca2   :  { %vm2589_vm10 = vcmp.eq.f32.partialorder %v10837_v11, %v10904_v12 }
 0xca3   :  { %v2590_v5 = vsel %vm2589_vm10, %v2585_v44, inf  ;;  %v10929_v28 = vpop.xlane.xlu0 %2629  ;;  %v2571_v40 = vcvt.s32.f32 %v2569_v50  ;;  %vm2603_vm10 = vcmp.eq.f32.partialorder %v10796_v33, %v10922_v38  ;;  %v2681_v33 = vand.u32 65535, %v10816_v1 }
 0xca5   :  { %2563 = vmin.xlane.f32.xlu1 %v2562_v8  ;;  %v10909_v54 = vpop.xlane.xlu1 %2615  ;;  %v2576_v8 = vsel %vm2575_vm8, %v2571_v40, inf }
 0xca6   :  { %vm2617_vm13 = vcmp.eq.f32.partialorder %v10845_v35, %v10909_v54  ;;  %v2597_v35 = vand.u32 65535, %v10792_v2  ;;  %v2627_v2 = vcvt.s32.f32 %v2625_v34 }
 0xca7   :  { %v2618_v3 = vsel %vm2617_vm13, %v2613_v15, inf  ;;  %vm2631_vm13 = vcmp.eq.f32.partialorder %v10805_v45, %v10929_v28 }
 0xca8   :  { %v2599_v60 = vcvt.s32.f32 %v2597_v35 }
 0xca9   :  { %2591 = vmin.xlane.f32.xlu1 %v2590_v5  ;;  %v10919_v29 = vpop.xlane.xlu1 %2643  ;;  %v2632_v5 = vsel %vm2631_vm13, %v2627_v2, inf }
 0xcaa   :  { %vm2645_vm0 = vcmp.eq.f32.partialorder %v10852_v6, %v10919_v29  ;;  %v10934_v6 = vpop.xlane.xlu0 %2657  ;;  %v2604_v44 = vsel %vm2603_vm10, %v2599_v60, inf  ;;  %v2510_v60 = vcvt.f32.s32 %v10874_v24 }
 0xcab   :  { %v2646_v11 = vsel %vm2645_vm0, %v2641_v26, inf  ;;  %vm2659_vm0 = vcmp.eq.f32.partialorder %v10813_v47, %v10934_v6  ;;  %v2497_v26 = vshll.u32 %v2496_v61, 16 }
 0xcac   :  { %v2660_v15 = vsel %vm2659_vm0, %v2655_v4, inf }
 0xcad   :  { %2619 = vmin.xlane.f32.xlu1 %v2618_v3  ;;  %v2683_v3 = vcvt.s32.f32 %v2681_v33 }
 0xcae   :  { %v10942_v30 = vpop.xlane.xlu0 %2685 }
 0xcaf   :  { %vm2687_vm8 = vcmp.eq.f32.partialorder %v10824_v7, %v10942_v30  ;;  %v2667_v7 = vand.u32 65535, %v10862_v20 }
 0xcb0   :  { %v2688_v45 = vsel %vm2687_vm8, %v2683_v3, inf }
 0xcb1   :  { %2647 = vmin.xlane.f32.xlu1 %v2646_v11  ;;  %v2669_v40 = vcvt.s32.f32 %v2667_v7 }
 0xcb4   :  { %2577 = vmin.xlane.f32.xlu0 %v2576_v8 }
 0xcb8   :  { %2605 = vmin.xlane.f32.xlu0 %v2604_v44 }
 0xcbc   :  { %2633 = vmin.xlane.f32.xlu0 %v2632_v5  ;;  %v2511_v5 = vshll.u32 %v2510_v60, 16 }
 0xcc0   :  { %2661 = vmin.xlane.f32.xlu0 %v2660_v15 }
 0xcc4   :  { %2689 = vmin.xlane.f32.xlu0 %v2688_v45  ;;  %v2552_v45 = vcvt.f32.s32 %v10889_v63 }
 0xcc6   :  { %v2553_v57 = vshll.u32 %v2552_v45, 16  ;;  %v2650_v45 = vcvt.f32.s32 %v10919_v29 }
 0xcd3   :  { %v2494_v50 = vpop.xlane.xlu0 %2493 }
 0xcd4   :  { %v2495_v11 = vcvt.f32.s32 %v2494_v50 }
 0xcd6   :  { %v2498_v35 = vadd.s32 %v2497_v26, %v2495_v11 }
 0xcd8   :  { %vm2696_vm10 = vcmp.eq.s32.totalorder %v8719_v43, %v2498_v35 }
 0xcd9   :  { %v10949_v1 = vsel %vm2696_vm10, -1e+30, %v10536_v52  ;;  %vm10953_vm13 = vmor %vm10540_vm5, %vm2696_vm10  ;;  %v2482_v52 = vcvt.f32.s32 %v10870_v10 }
 0xcda   :  { %2745 = vmax.xlane.f32.xlu0 %v10949_v1 }
 0xcdb   :  { %v2483_v58 = vshll.u32 %v2482_v52, 16 }
 0xce3   :  { %v10959_v49 = vpop.xlane.xlu1 %2671 }
 0xce4   :  { %vm2673_vm0 = vcmp.eq.f32.partialorder %v10865_v46, %v10959_v49 }
 0xce5   :  { %v2674_v8 = vsel %vm2673_vm0, %v2669_v40, inf }
 0xce6   :  { %2675 = vmin.xlane.f32.xlu1 %v2674_v8  ;;  %v2566_v8 = vcvt.f32.s32 %v10899_v19 }
 0xce8   :  { %v2567_v60 = vshll.u32 %v2566_v8, 16 }
 0xcec   :  { %v2480_v34 = vpop.xlane.xlu1 %2479 }
 0xced   :  { %v2481_v44 = vcvt.f32.s32 %v2480_v34 }
 0xcef   :  { %v2484_v0 = vadd.s32 %v2483_v58, %v2481_v44  ;;  %v2594_v44 = vcvt.f32.s32 %v10904_v12 }
 0xcf0   :  { %v2508_v2 = vpop.xlane.xlu1 %2507 }
 0xcf1   :  { %v2509_v33 = vcvt.f32.s32 %v2508_v2  ;;  %vm2695_vm5 = vcmp.eq.s32.totalorder %v8719_v43, %v2484_v0 }
 0xcf2   :  { %v10967_v20 = vsel %vm2695_vm5, -1e+30, %v10589_v48  ;;  %vm10971_vm8 = vmor %vm10593_vm11, %vm2695_vm5  ;;  %v2524_v48 = vcvt.f32.s32 %v10884_v31 }
 0xcf3   :  { %v2512_v10 = vadd.s32 %v2511_v5, %v2509_v33  ;;  %2743 = vmax.xlane.f32.xlu1 %v10967_v20  ;;  %v2595_v33 = vshll.u32 %v2594_v44, 16 }
 0xcf4   :  { %v2525_v3 = vshll.u32 %v2524_v48, 16  ;;  %v11016_v25 = vpop.permute.xlu1 %4930 }
 0xcf5   :  { %vm2697_vm10 = vcmp.eq.s32.totalorder %v8719_v43, %v2512_v10  ;;  %14424 = vst [vmem:[#allocation16_spill] sm:$0xff] %v11016_v25  ;;  %v2622_v10 = vcvt.f32.s32 %v10909_v54 }
 0xcf6   :  { %v10978_v24 = vsel %vm2697_vm10, -1e+30, %v10600_v32  ;;  %vm10982_vm0 = vmor %vm10604_vm9, %vm2697_vm10 }
 0xcf7   :  { %2747 = vmax.xlane.f32.xlu1 %v10978_v24 }
 0xcf8   :  { %v11018_v35 = vpop.permute.xlu1 %5283 }
 0xcf9   :  { %14425 = vst [vmem:[#allocation18_spill] sm:$0xff] %v11018_v35 }
 0xcfc   :  { %v11021_v7 = vpop.permute.xlu1 %5287 }
 0xcfd   :  { %14427 = vst [vmem:[#allocation20_spill] sm:$0xff] %v11021_v7 }
 0xd08   :  { %4938 = vperm.xlu1 %7973, %v14419_v27   ;;  %v2522_v15 = vpop.xlane.xlu0 %2521 }
 0xd09   :  { %v2523_v61 = vcvt.f32.s32 %v2522_v15 }
 0xd0b   :  { %v2526_v50 = vadd.s32 %v2525_v3, %v2523_v61  ;;  %v2623_v3 = vshll.u32 %v2622_v10, 16  ;;  %v14447_v10 = vld [vmem:[#allocation66_spill] sm:$0xff] }
 0xd0c   :  { %7974 = vset.pattern.permute.xlu1 %v14009_v22  ;;  %v2550_v32 = vpop.xlane.xlu0 %2549 }
 0xd0d   :  { %v2551_v26 = vcvt.f32.s32 %v2550_v32  ;;  %5291 = vperm.xlu1 %7974, %v14412_v14   ;;  %vm2698_vm11 = vcmp.eq.s32.totalorder %v8719_v43, %v2526_v50  ;;  %v2580_v32 = vcvt.f32.s32 %v10914_v36  ;;  %v2608_v36 = vcvt.f32.s32 %v10922_v38 }
 0xd0e   :  { %v10994_v11 = vsel %vm2698_vm11, -1e+30, %v10548_v55  ;;  %vm10998_vm9 = vmor %vm10552_vm12, %vm2698_vm11 }
 0xd0f   :  { %v2554_v63 = vadd.s32 %v2553_v57, %v2551_v26  ;;  %2749 = vmax.xlane.f32.xlu0 %v10994_v11  ;;  %v2651_v57 = vshll.u32 %v2650_v45, 16 }
 0xd11   :  { %5295 = vperm.xlu1 %7974, %v14410_v18   ;;  %vm2700_vm5 = vcmp.eq.s32.totalorder %v8719_v43, %v2554_v63  ;;  %v14426_v18 = vld [vmem:[#allocation30_spill] sm:$0xff] }
 0xd12   :  { %v11006_v14 = vsel %vm2700_vm5, -1e+30, %v10562_v51  ;;  %vm11010_vm10 = vmor %vm10566_vm4, %vm2700_vm5  ;;  %v2538_v51 = vcvt.f32.s32 %v10896_v17 }
 0xd13   :  { %2753 = vmax.xlane.f32.xlu0 %v11006_v14 }
 0xd14   :  { %v2539_v53 = vshll.u32 %v2538_v51, 16  ;;  %v11060_v21 = vpop.permute.xlu0 %4926 }
 0xd15   :  { %7975 = vset.pattern.permute.xlu1 %v14411_v59  ;;  %14434 = vst [vmem:[#allocation59_spill] sm:$0xff] %v11060_v21 }
 0xd29   :  { %4934 = vperm.xlu0 %7971, %v14426_v18  }
 0xd2e   :  { %v2536_v40 = vpop.xlane.xlu1 %2535 }
 0xd2f   :  { %v2537_v52 = vcvt.f32.s32 %v2536_v40  ;;  %v2581_v40 = vshll.u32 %v2580_v32, 16  ;;  %v14453_v32 = vld [vmem:[#allocation67_spill] sm:$0xff] }
 0xd31   :  { %v2540_v34 = vadd.s32 %v2539_v53, %v2537_v52 }
 0xd32   :  { %v2564_v58 = vpop.xlane.xlu1 %2563 }
 0xd33   :  { %v2565_v0 = vcvt.f32.s32 %v2564_v58  ;;  %vm2699_vm12 = vcmp.eq.s32.totalorder %v8719_v43, %v2540_v34  ;;  %v2609_v34 = vshll.u32 %v2608_v36, 16  ;;  %v2636_v58 = vcvt.f32.s32 %v10929_v28 }
 0xd34   :  { %v11028_v2 = vsel %vm2699_vm12, -1e+30, %v10611_v39  ;;  %vm11032_vm4 = vmor %vm10615_vm1, %vm2699_vm12 }
 0xd35   :  { %v2568_v5 = vadd.s32 %v2567_v60, %v2565_v0  ;;  %2751 = vmax.xlane.f32.xlu1 %v11028_v2  ;;  %v14443_v60 = vld [vmem:[#allocation2_spill] sm:$0xff] }
 0xd36   :  { %v2592_v19 = vpop.xlane.xlu1 %2591 }
 0xd37   :  { %v2593_v12 = vcvt.f32.s32 %v2592_v19  ;;  %vm2701_vm11 = vcmp.eq.s32.totalorder %v8719_v43, %v2568_v5  ;;  %v2637_v19 = vshll.u32 %v2636_v58, 16  ;;  %v14467_v58 = vld [vmem:[#allocation26_spill] sm:$0xff] }
 0xd38   :  { %v11040_v48 = vsel %vm2701_vm11, -1e+30, %v10673_v37  ;;  %vm11044_vm5 = vmor %vm10677_vm15, %vm2701_vm11 }
 0xd39   :  { %v2596_v62 = vadd.s32 %v2595_v33, %v2593_v12  ;;  %2755 = vmax.xlane.f32.xlu1 %v11040_v48  ;;  %v2664_v33 = vcvt.f32.s32 %v10934_v6 }
 0xd3a   :  { %v2620_v15 = vpop.xlane.xlu1 %2619 }
 0xd3b   :  { %v2621_v54 = vcvt.f32.s32 %v2620_v15  ;;  %vm2703_vm1 = vcmp.eq.s32.totalorder %v8719_v43, %v2596_v62  ;;  %v14448_v62 = vld [vmem:[#allocation3_spill] sm:$0xff]  ;;  %v14450_v15 = vmov 0 }
 0xd3c   :  { %v11052_v61 = vsel %vm2703_vm1, -1e+30, %v10685_v16  ;;  %vm11056_vm12 = vmor %vm10689_vm7, %vm2703_vm1 }
 0xd3d   :  { %v2624_v50 = vadd.s32 %v2623_v3, %v2621_v54  ;;  %2759 = vmax.xlane.f32.xlu1 %v11052_v61  ;;  %v2665_v54 = vshll.u32 %v2664_v33, 16 }
 0xd3e   :  { %v2648_v29 = vpop.xlane.xlu1 %2647 }
 0xd3f   :  { %v2649_v26 = vcvt.f32.s32 %v2648_v29  ;;  %vm2705_vm15 = vcmp.eq.s32.totalorder %v8719_v43, %v2624_v50  ;;  %v2692_v50 = vcvt.f32.s32 %v10942_v30  ;;  %v14460_v30 = vld [vmem:[#allocation4_spill] sm:$0xff] }
 0xd40   :  { %v11066_v16 = vsel %vm2705_vm15, -1e+30, %v10696_v56  ;;  %vm11070_vm7 = vmor %vm10700_vm14, %vm2705_vm15 }
 0xd41   :  { %14435 = vst [vmem:[#allocation60_spill] sm:$0xff] %v11066_v16  ;;  %v14437_v42 = vsel %vm11070_vm7, 4294967295, %v14436_v42  ;;  %v2652_v63 = vadd.s32 %v2651_v57, %v2649_v26  ;;  %2763 = vmax.xlane.f32.xlu1 %v11066_v16  ;;  %v2578_v51 = vpop.xlane.xlu0 %2577  ;;  %v14455_v57 = vld [vmem:[#allocation70_spill] sm:$0xff]  ;;  %v14457_v26 = vmov 0 }
 0xd42   :  { %14438 = vst [vmem:[#allocation28_spill] sm:$0xff] %v14437_v42  ;;  %v2579_v53 = vcvt.f32.s32 %v2578_v51 }
 0xd43   :  { %vm2707_vm11 = vcmp.eq.s32.totalorder %v8719_v43, %v2652_v63 }
 0xd44   :  { %v2582_v8 = vadd.s32 %v2581_v40, %v2579_v53  ;;  %v11078_v56 = vsel %vm2707_vm11, -1e+30, %v10707_v13  ;;  %vm11082_vm14 = vmor %vm10711_vm2, %vm2707_vm11  ;;  %vm14449_vm11 = vnez %v14448_v62  ;;  %v2693_v40 = vshll.u32 %v2692_v50, 16 }
 0xd45   :  { %14439 = vst [vmem:[#allocation27_spill] sm:$0xff] %v11078_v56  ;;  %v14441_v41 = vsel %vm11082_vm14, 4294967295, %v14440_v41  ;;  %2767 = vmax.xlane.f32.xlu1 %v11078_v56  ;;  %v2606_v52 = vpop.xlane.xlu0 %2605  ;;  %v14471_v13 = vmov 0 }
 0xd46   :  { %14442 = vst [vmem:[#allocation5_spill] sm:$0xff] %v14441_v41  ;;  %v2607_v38 = vcvt.f32.s32 %v2606_v52  ;;  %vm2702_vm1 = vcmp.eq.s32.totalorder %v8719_v43, %v2582_v8  ;;  %v14462_v8 = vld [vmem:[#allocation6_spill] sm:$0xff]  ;;  %v14464_v52 = vmov 0 }
 0xd47   :  { %v11090_v44 = vsel %vm2702_vm1, -1e+30, %v14443_v60  ;;  %vm11094_vm15 = vmor %vm10579_vm6, %vm2702_vm1  ;;  %vm14456_vm1 = vnez %v14455_v57  ;;  %v14469_v60 = vld [vmem:[#allocation22_spill] sm:$0xff] }
 0xd48   :  { %v2610_v0 = vadd.s32 %v2609_v34, %v2607_v38  ;;  %2757 = vmax.xlane.f32.xlu0 %v11090_v44 }
 0xd49   :  { %v2634_v5 = vpop.xlane.xlu0 %2633 }
 0xd4a   :  { %v2635_v28 = vcvt.f32.s32 %v2634_v5  ;;  %vm2704_vm2 = vcmp.eq.s32.totalorder %v8719_v43, %v2610_v0 }
 0xd4b   :  { %v11102_v12 = vsel %vm2704_vm2, -1e+30, %v14447_v10  ;;  %vm11106_vm14 = vmor %vm14449_vm11, %vm2704_vm2  ;;  %vm14463_vm11 = vnez %v14462_v8 }
 0xd4c   :  { %v14451_v15 = vsel %vm11106_vm14, 4294967295, %v14450_v15  ;;  %v2638_v3 = vadd.s32 %v2637_v19, %v2635_v28  ;;  %2761 = vmax.xlane.f32.xlu0 %v11102_v12  ;;  %v2678_v28 = vcvt.f32.s32 %v10959_v49 }
 0xd4d   :  { %14452 = vst [vmem:[#allocation32_spill] sm:$0xff] %v14451_v15  ;;  %v2662_v45 = vpop.xlane.xlu0 %2661 }
 0xd4e   :  { %v2663_v6 = vcvt.f32.s32 %v2662_v45  ;;  %vm2706_vm6 = vcmp.eq.s32.totalorder %v8719_v43, %v2638_v3  ;;  %v2679_v62 = vshll.u32 %v2678_v28, 16 }
 0xd4f   :  { %v11114_v29 = vsel %vm2706_vm6, -1e+30, %v14453_v32  ;;  %vm11118_vm7 = vmor %vm14456_vm1, %vm2706_vm6  ;;  %vm14470_vm1 = vnez %v14469_v60  ;;  %v14477_v32 = vmov 0 }
 0xd50   :  { %14454 = vst [vmem:[#allocation30_spill] sm:$0xff] %v11114_v29  ;;  %v14458_v26 = vsel %vm11118_vm7, 4294967295, %v14457_v26  ;;  %v2666_v63 = vadd.s32 %v2665_v54, %v2663_v6  ;;  %2765 = vmax.xlane.f32.xlu0 %v11114_v29  ;;  %v14474_v54 = vld [vmem:[#allocation19_spill] sm:$0xff] }
 0xd51   :  { %14459 = vst [vmem:[#allocation2_spill] sm:$0xff] %v14458_v26  ;;  %v2690_v51 = vpop.xlane.xlu0 %2689 }
 0xd52   :  { %v2691_v36 = vcvt.f32.s32 %v2690_v51  ;;  %vm2708_vm2 = vcmp.eq.s32.totalorder %v8719_v43, %v2666_v63 }
 0xd53   :  { %v11125_v53 = vsel %vm2708_vm2, -1e+30, %v14460_v30  ;;  %vm11129_vm14 = vmor %vm14463_vm11, %vm2708_vm2 }
 0xd54   :  { %14461 = vst [vmem:[#allocation65_spill] sm:$0xff] %v11125_v53  ;;  %v14465_v52 = vsel %vm11129_vm14, 4294967295, %v14464_v52  ;;  %v2694_v34 = vadd.s32 %v2693_v40, %v2691_v36  ;;  %2769 = vmax.xlane.f32.xlu0 %v11125_v53  ;;  %v14518_v37 = vld [vmem:[#allocation32_spill] sm:$0xff] }
 0xd55   :  { %14466 = vst [vmem:[#allocation66_spill] sm:$0xff] %v14465_v52 }
 0xd56   :  { %vm2710_vm6 = vcmp.eq.s32.totalorder %v8719_v43, %v2694_v34 }
 0xd57   :  { %v11136_v38 = vsel %vm2710_vm6, -1e+30, %v14467_v58  ;;  %vm11140_vm7 = vmor %vm14470_vm1, %vm2710_vm6 }
 0xd58   :  { %14468 = vst [vmem:[#allocation3_spill] sm:$0xff] %v11136_v38  ;;  %v14472_v13 = vsel %vm11140_vm7, 4294967295, %v14471_v13  ;;  %2773 = vmax.xlane.f32.xlu0 %v11136_v38 }
 0xd59   :  { %14473 = vst [vmem:[#allocation67_spill] sm:$0xff] %v14472_v13 }
 0xd67   :  { %v2746_v0 = vpop.xlane.xlu0 %2745 }
 0xd68   :  { %vm2776_vm2 = vcmp.eq.f32.partialorder %v10949_v1, %v2746_v0 }
 0xd69   :  { %v11147_v5 = vsel %vm2776_vm2, %v8719_v43, 128 }
 0xd6a   :  { %v2822_v19 = vshra.s32 %v11147_v5, 16  ;;  %v2821_v26 = vand.u32 65535, %v11147_v5 }
 0xd6c   :  { %v11150_v33 = vcvt.s32.f32 %v2822_v19 }
 0xd6e   :  { %2825 = vmin.xlane.f32.xlu0 %v11150_v33 }
 0xd73   :  { %v2676_v10 = vpop.xlane.xlu1 %2675 }
 0xd74   :  { %v2677_v3 = vcvt.f32.s32 %v2676_v10 }
 0xd76   :  { %v2680_v45 = vadd.s32 %v2679_v62, %v2677_v3 }
 0xd78   :  { %vm2709_vm11 = vcmp.eq.s32.totalorder %v8719_v43, %v2680_v45 }
 0xd79   :  { %v11156_v50 = vsel %vm2709_vm11, -1e+30, %v14474_v54  ;;  %vm11160_vm6 = vmor %vm10737_vm3, %vm2709_vm11 }
 0xd7a   :  { %14475 = vst [vmem:[#allocation70_spill] sm:$0xff] %v11156_v50  ;;  %v14478_v32 = vsel %vm11160_vm6, 4294967295, %v14477_v32  ;;  %2771 = vmax.xlane.f32.xlu1 %v11156_v50 }
 0xd7b   :  { %14479 = vst [vmem:[#allocation4_spill] sm:$0xff] %v14478_v32 }
 0xd80   :  { %v2744_v57 = vpop.xlane.xlu1 %2743 }
 0xd81   :  { %vm2775_vm1 = vcmp.eq.f32.partialorder %v10967_v20, %v2744_v57 }
 0xd82   :  { %v11167_v49 = vsel %vm2775_vm1, %v8719_v43, 128 }
 0xd83   :  { %v2808_v63 = vshra.s32 %v11167_v49, 16 }
 0xd84   :  { %v2748_v51 = vpop.xlane.xlu1 %2747 }
 0xd85   :  { %vm2777_vm2 = vcmp.eq.f32.partialorder %v10978_v24, %v2748_v51  ;;  %v11171_v40 = vcvt.s32.f32 %v2808_v63 }
 0xd86   :  { %v11174_v36 = vsel %vm2777_vm2, %v8719_v43, 128 }
 0xd87   :  { %v2836_v30 = vshra.s32 %v11174_v36, 16  ;;  %2811 = vmin.xlane.f32.xlu1 %v11171_v40 }
 0xd88   :  { %v11197_v3 = vpop.permute.xlu1 %4938 }
 0xd89   :  { %v11178_v8 = vcvt.s32.f32 %v2836_v30  ;;  %14480 = vst [vmem:[#allocation6_spill] sm:$0xff] %v11197_v3 }
 0xd8b   :  { %2839 = vmin.xlane.f32.xlu1 %v11178_v8 }
 0xd8c   :  { %v11199_v45 = vpop.permute.xlu1 %5291 }
 0xd8d   :  { %14481 = vst [vmem:[#allocation26_spill] sm:$0xff] %v11199_v45 }
 0xd90   :  { %v11201_v54 = vpop.permute.xlu1 %5295 }
 0xd91   :  { %14482 = vst [vmem:[#allocation22_spill] sm:$0xff] %v11201_v54 }
 0xd9c   :  { %v2750_v34 = vpop.xlane.xlu0 %2749 }
 0xd9d   :  { %vm2778_vm3 = vcmp.eq.f32.partialorder %v10994_v11, %v2750_v34 }
 0xd9e   :  { %v11183_v58 = vsel %vm2778_vm3, %v8719_v43, 128 }
 0xd9f   :  { %v2850_v60 = vshra.s32 %v11183_v58, 16  ;;  %v2849_v5 = vand.u32 65535, %v11183_v58 }
 0xda0   :  { %v2754_v0 = vpop.xlane.xlu0 %2753 }
 0xda1   :  { %vm2780_vm11 = vcmp.eq.f32.partialorder %v11006_v14, %v2754_v0  ;;  %v11187_v19 = vcvt.s32.f32 %v2850_v60 }
 0xda2   :  { %v11190_v28 = vsel %vm2780_vm11, %v8719_v43, 128 }
 0xda3   :  { %v2878_v10 = vshra.s32 %v11190_v28, 16  ;;  %2853 = vmin.xlane.f32.xlu0 %v11187_v19 }
 0xda5   :  { %v11194_v62 = vcvt.s32.f32 %v2878_v10  ;;  %v14484_v10 = vld [vmem:[#allocation31_spill] sm:$0xff] }
 0xda7   :  { %2881 = vmin.xlane.f32.xlu0 %v11194_v62 }
 0xda8   :  { %v11211_v30 = vpop.permute.xlu0 %4934 }
 0xda9   :  { %14483 = vst [vmem:[#allocation19_spill] sm:$0xff] %v11211_v30 }
 0xdc2   :  { %v2752_v6 = vpop.xlane.xlu1 %2751 }
 0xdc3   :  { %vm2779_vm1 = vcmp.eq.f32.partialorder %v11028_v2, %v2752_v6 }
 0xdc4   :  { %v11205_v57 = vsel %vm2779_vm1, %v8719_v43, 128 }
 0xdc5   :  { %v2864_v63 = vshra.s32 %v11205_v57, 16  ;;  %v2863_v58 = vand.u32 65535, %v11205_v57 }
 0xdc7   :  { %v11208_v51 = vcvt.s32.f32 %v2864_v63  ;;  %v2756_v63 = vpop.xlane.xlu1 %2755 }
 0xdc8   :  { %vm2781_vm3 = vcmp.eq.f32.partialorder %v11040_v48, %v2756_v63 }
 0xdc9   :  { %2867 = vmin.xlane.f32.xlu1 %v11208_v51 }
 0xdcb   :  { %v2760_v30 = vpop.xlane.xlu1 %2759 }
 0xdcc   :  { %vm2783_vm11 = vcmp.eq.f32.partialorder %v11052_v61, %v2760_v30 }
 0xdcf   :  { %v2764_v21 = vpop.xlane.xlu1 %2763 }
 0xdd0   :  { %vm2785_vm1 = vcmp.eq.f32.partialorder %v11066_v16, %v2764_v21 }
 0xdd1   :  { %v11242_v25 = vsel %vm2785_vm1, %v8719_v43, 128 }
 0xdd2   :  { %v2948_v21 = vshra.s32 %v11242_v25, 16 }
 0xdd3   :  { %v2768_v54 = vpop.xlane.xlu1 %2767 }
 0xdd4   :  { %v11264_v32 = vcvt.s32.f32 %v2948_v21 }
 0xdd5   :  { %v2758_v34 = vpop.xlane.xlu0 %2757 }
 0xdd6   :  { %vm2782_vm2 = vcmp.eq.f32.partialorder %v11090_v44, %v2758_v34  ;;  %v14485_v34 = vld [vmem:[#allocation29_spill] sm:$0xff] }
 0xdd7   :  { %v11215_v60 = vsel %vm2782_vm2, %v8719_v43, 128 }
 0xdd8   :  { %v2906_v0 = vshra.s32 %v11215_v60, 16 }
 0xdd9   :  { %v2762_v3 = vpop.xlane.xlu0 %2761 }
 0xdda   :  { %4946 = vperm.xlu1 %7975, %v14484_v10   ;;  %v11219_v6 = vcvt.s32.f32 %v2906_v0  ;;  %v11229_v0 = vsel %vm2781_vm3, %v8719_v43, 128  ;;  %vm2784_vm2 = vcmp.eq.f32.partialorder %v11102_v12, %v2762_v3  ;;  %vm2787_vm3 = vcmp.eq.f32.partialorder %v11078_v56, %v2768_v54 }
 0xddb   :  { %v11247_v30 = vsel %vm2784_vm2, %v8719_v43, 128 }
 0xddc   :  { %2909 = vmin.xlane.f32.xlu0 %v11219_v6  ;;  %v2934_v3 = vshra.s32 %v11247_v30, 16 }
 0xdde   :  { %7976 = vset.pattern.permute.xlu1 %v14009_v22  ;;  %v2892_v22 = vshra.s32 %v11229_v0, 16 }
 0xddf   :  { %5299 = vperm.xlu1 %7976, %v14426_v18   ;;  %v11234_v18 = vsel %vm2783_vm11, %v8719_v43, 128 }
 0xde0   :  { %v2920_v45 = vshra.s32 %v11234_v18, 16  ;;  %v11239_v63 = vcvt.s32.f32 %v2892_v22  ;;  %v11254_v22 = vsel %vm2787_vm3, %v8719_v43, 128 }
 0xde1   :  { %v2976_v56 = vshra.s32 %v11254_v22, 16  ;;  %v2975_v31 = vand.u32 65535, %v11254_v22 }
 0xde2   :  { %v11251_v23 = vcvt.s32.f32 %v2920_v45 }
 0xde3   :  { %5303 = vperm.xlu1 %7976, %v14419_v27   ;;  %v2766_v27 = vpop.xlane.xlu0 %2765 }
 0xde4   :  { %vm2786_vm11 = vcmp.eq.f32.partialorder %v11114_v29, %v2766_v27 }
 0xde5   :  { %v11260_v54 = vsel %vm2786_vm11, %v8719_v43, 128 }
 0xde6   :  { %v2962_v13 = vshra.s32 %v11260_v54, 16 }
 0xde7   :  { %7977 = vset.pattern.permute.xlu1 %v14411_v59  ;;  %v2770_v35 = vpop.xlane.xlu0 %2769 }
 0xde8   :  { %vm2788_vm2 = vcmp.eq.f32.partialorder %v11125_v53, %v2770_v35  ;;  %v11279_v35 = vcvt.s32.f32 %v2976_v56  ;;  %v11283_v52 = vcvt.s32.f32 %v2962_v13  ;;  %v2835_v13 = vand.u32 65535, %v11174_v36 }
 0xde9   :  { %v2823_v36 = vcvt.s32.f32 %v2821_v26 }
 0xdeb   :  { %v2774_v45 = vpop.xlane.xlu0 %2773 }
 0xdec   :  { %vm2790_vm3 = vcmp.eq.f32.partialorder %v11136_v38, %v2774_v45 }
 0xded   :  { %v11287_v53 = vsel %vm2790_vm3, %v8719_v43, 128 }
 0xdee   :  { %v3018_v56 = vshra.s32 %v11287_v53, 16 }
 0xdf0   :  { %v11307_v15 = vcvt.s32.f32 %v3018_v56  ;;  %v2851_v56 = vcvt.s32.f32 %v2849_v5 }
 0xdf2   :  { %4942 = vperm.xlu0 %7971, %v14485_v34  }
 0xe07   :  { %2895 = vmin.xlane.f32.xlu1 %v11239_v63  ;;  %v2772_v7 = vpop.xlane.xlu1 %2771 }
 0xe08   :  { %vm2789_vm1 = vcmp.eq.f32.partialorder %v11156_v50, %v2772_v7  ;;  %v11271_v7 = vcvt.s32.f32 %v2934_v3  ;;  %v11274_v50 = vsel %vm2788_vm2, %v8719_v43, 128  ;;  %v2807_v3 = vand.u32 65535, %v11167_v49 }
 0xe09   :  { %v11267_v27 = vsel %vm2789_vm1, %v8719_v43, 128  ;;  %v2990_v21 = vshra.s32 %v11274_v50, 16 }
 0xe0a   :  { %v3004_v41 = vshra.s32 %v11267_v27, 16  ;;  %v2809_v16 = vcvt.s32.f32 %v2807_v3 }
 0xe0b   :  { %2923 = vmin.xlane.f32.xlu1 %v11251_v23  ;;  %v11296_v38 = vcvt.s32.f32 %v2990_v21  ;;  %v2837_v21 = vcvt.s32.f32 %v2835_v13 }
 0xe0c   :  { %v11292_v45 = vcvt.s32.f32 %v3004_v41  ;;  %v11305_v41 = vpop.xlane.xlu0 %2825 }
 0xe0d   :  { %vm2827_vm2 = vcmp.eq.f32.partialorder %v11150_v33, %v11305_v41 }
 0xe0e   :  { %v2828_v3 = vsel %vm2827_vm2, %v2823_v36, inf }
 0xe0f   :  { %2951 = vmin.xlane.f32.xlu1 %v11264_v32 }
 0xe11   :  { %2937 = vmin.xlane.f32.xlu0 %v11271_v7 }
 0xe13   :  { %2979 = vmin.xlane.f32.xlu1 %v11279_v35 }
 0xe14   :  { %v11289_v42 = vpop.xlane.xlu1 %2811 }
 0xe15   :  { %2965 = vmin.xlane.f32.xlu0 %v11283_v52  ;;  %vm2813_vm11 = vcmp.eq.f32.partialorder %v11171_v40, %v11289_v42 }
 0xe16   :  { %v2814_v29 = vsel %vm2813_vm11, %v2809_v16, inf  ;;  %v2877_v16 = vand.u32 65535, %v11190_v28  ;;  %v2865_v28 = vcvt.s32.f32 %v2863_v58 }
 0xe17   :  { %3007 = vmin.xlane.f32.xlu1 %v11292_v45 }
 0xe18   :  { %v11301_v49 = vpop.xlane.xlu1 %2839  ;;  %v2879_v33 = vcvt.s32.f32 %v2877_v16  ;;  %v2891_v16 = vand.u32 65535, %v11229_v0  ;;  %v2933_v0 = vand.u32 65535, %v11247_v30 }
 0xe19   :  { %2993 = vmin.xlane.f32.xlu0 %v11296_v38  ;;  %vm2841_vm1 = vcmp.eq.f32.partialorder %v11178_v8, %v11301_v49 }
 0xe1a   :  { %v2842_v40 = vsel %vm2841_vm1, %v2837_v21, inf }
 0xe1b   :  { %2815 = vmin.xlane.f32.xlu1 %v2814_v29 }
 0xe1d   :  { %3021 = vmin.xlane.f32.xlu0 %v11307_v15 }
 0xe1f   :  { %2843 = vmin.xlane.f32.xlu1 %v2842_v40 }
 0xe21   :  { %2829 = vmin.xlane.f32.xlu0 %v2828_v3 }
 0xe30   :  { %v11316_v29 = vpop.xlane.xlu0 %2853 }
 0xe31   :  { %vm2855_vm3 = vcmp.eq.f32.partialorder %v11187_v19, %v11316_v29  ;;  %v2905_v19 = vand.u32 65535, %v11215_v60  ;;  %v2893_v60 = vcvt.s32.f32 %v2891_v16  ;;  %v2860_v4 = vcvt.f32.s32 %v11316_v29 }
 0xe32   :  { %v2856_v8 = vsel %vm2855_vm3, %v2851_v56, inf }
 0xe33   :  { %2857 = vmin.xlane.f32.xlu0 %v2856_v8  ;;  %v2907_v3 = vcvt.s32.f32 %v2905_v19 }
 0xe34   :  { %v11320_v13 = vpop.xlane.xlu0 %2881 }
 0xe35   :  { %vm2883_vm11 = vcmp.eq.f32.partialorder %v11194_v62, %v11320_v13 }
 0xe36   :  { %v2884_v26 = vsel %vm2883_vm11, %v2879_v33, inf }
 0xe37   :  { %2885 = vmin.xlane.f32.xlu0 %v2884_v26 }
 0xe56   :  { %v11325_v21 = vpop.xlane.xlu1 %2867 }
 0xe57   :  { %vm2869_vm1 = vcmp.eq.f32.partialorder %v11208_v51, %v11325_v21  ;;  %v2919_v51 = vand.u32 65535, %v11234_v18 }
 0xe58   :  { %v2870_v40 = vsel %vm2869_vm1, %v2865_v28, inf }
 0xe59   :  { %2871 = vmin.xlane.f32.xlu1 %v2870_v40  ;;  %v2921_v26 = vcvt.s32.f32 %v2919_v51  ;;  %v2961_v40 = vand.u32 65535, %v11260_v54  ;;  %v2818_v54 = vcvt.f32.s32 %v11289_v42 }
 0xe5a   :  { %v11334_v5 = vpop.permute.xlu1 %4946 }
 0xe5b   :  { %14486 = vst [vmem:[#allocation21_spill] sm:$0xff] %v11334_v5  ;;  %v2963_v30 = vcvt.s32.f32 %v2961_v40  ;;  %v2832_v40 = vcvt.f32.s32 %v11305_v41 }
 0xe5d   :  { %v2833_v41 = vshll.u32 %v2832_v40, 16  ;;  %v2888_v40 = vcvt.f32.s32 %v11320_v13  ;;  %v14501_v13 = vmov 0 }
 0xe5e   :  { %v11336_v57 = vpop.permute.xlu1 %5299 }
 0xe5f   :  { %14487 = vst [vmem:[#allocation31_spill] sm:$0xff] %v11336_v57  ;;  %v2889_v47 = vshll.u32 %v2888_v40, 16 }
 0xe62   :  { %v11339_v56 = vpop.permute.xlu1 %5303 }
 0xe63   :  { %14488 = vst [vmem:[#allocation29_spill] sm:$0xff] %v11339_v56 }
 0xe69   :  { %v11330_v36 = vpop.xlane.xlu0 %2909 }
 0xe6a   :  { %vm2911_vm2 = vcmp.eq.f32.partialorder %v11219_v6, %v11330_v36 }
 0xe6b   :  { %v2912_v62 = vsel %vm2911_vm2, %v2907_v3, inf }
 0xe6c   :  { %2913 = vmin.xlane.f32.xlu0 %v2912_v62 }
 0xe71   :  { %v11351_v58 = vpop.permute.xlu0 %4942 }
 0xe72   :  { %14489 = vst [vmem:[#allocation75_spill] sm:$0xff] %v11351_v58 }
 0xe94   :  { %v11342_v8 = vpop.xlane.xlu1 %2895 }
 0xe95   :  { %vm2897_vm3 = vcmp.eq.f32.partialorder %v11239_v63, %v11342_v8  ;;  %v2935_v63 = vcvt.s32.f32 %v2933_v0  ;;  %v2902_v17 = vcvt.f32.s32 %v11342_v8 }
 0xe96   :  { %v2898_v33 = vsel %vm2897_vm3, %v2893_v60, inf }
 0xe97   :  { %2899 = vmin.xlane.f32.xlu1 %v2898_v33 }
 0xe98   :  { %v11346_v6 = vpop.xlane.xlu1 %2923 }
 0xe99   :  { %vm2925_vm11 = vcmp.eq.f32.partialorder %v11251_v23, %v11346_v6 }
 0xe9a   :  { %v2926_v28 = vsel %vm2925_vm11, %v2921_v26, inf  ;;  %v2846_v26 = vcvt.f32.s32 %v11301_v49 }
 0xe9b   :  { %2927 = vmin.xlane.f32.xlu1 %v2926_v28 }
 0xe9c   :  { %v11353_v18 = vpop.xlane.xlu1 %2951 }
 0xe9e   :  { %v11356_v19 = vpop.xlane.xlu0 %2937 }
 0xe9f   :  { %vm2939_vm1 = vcmp.eq.f32.partialorder %v11271_v7, %v11356_v19  ;;  %v2819_v7 = vshll.u32 %v2818_v54, 16  ;;  %v2944_v8 = vcvt.f32.s32 %v11356_v19 }
 0xea0   :  { %v11360_v3 = vpop.xlane.xlu1 %2979  ;;  %v2940_v62 = vsel %vm2939_vm1, %v2935_v63, inf }
 0xea1   :  { %2941 = vmin.xlane.f32.xlu0 %v2940_v62  ;;  %v2945_v39 = vshll.u32 %v2944_v8, 16 }
 0xea2   :  { %v11362_v23 = vpop.xlane.xlu0 %2965 }
 0xea3   :  { %vm2967_vm2 = vcmp.eq.f32.partialorder %v11283_v52, %v11362_v23  ;;  %v14490_v52 = vld [vmem:[#allocation36_spill] sm:$0xff] }
 0xea4   :  { %v11366_v16 = vpop.xlane.xlu1 %3007  ;;  %v2968_v51 = vsel %vm2967_vm2, %v2963_v30, inf  ;;  %v2847_v30 = vshll.u32 %v2846_v26, 16 }
 0xea5   :  { %2969 = vmin.xlane.f32.xlu0 %v2968_v51 }
 0xea6   :  { %v11369_v60 = vpop.xlane.xlu0 %2993 }
 0xea8   :  { %v2816_v33 = vpop.xlane.xlu1 %2815 }
 0xea9   :  { %v2817_v0 = vcvt.f32.s32 %v2816_v33  ;;  %v14493_v33 = vmov 7  }
 0xeaa   :  { %v11372_v28 = vpop.xlane.xlu0 %3021 }
 0xeab   :  { %v11375_v63 = vadd.s32 %v2819_v7, %v2817_v0  ;;  %v2861_v0 = vshll.u32 %v2860_v4, 16  ;;  %v2989_v4 = vand.u32 65535, %v11274_v50  ;;  %v2977_v50 = vcvt.s32.f32 %v2975_v31 }
 0xeac   :  { %4954 = vperm.xlu1 %7977, %v14490_v52   ;;  %v2844_v62 = vpop.xlane.xlu1 %2843  ;;  %v2930_v31 = vcvt.f32.s32 %v11346_v6 }
 0xead   :  { %v2845_v58 = vcvt.f32.s32 %v2844_v62  ;;  %vm14024_vm3 = vcmp.eq.s32.totalorder %v8719_v43, %v11375_v63  ;;  %v2991_v55 = vcvt.s32.f32 %v2989_v4  ;;  %v2903_v4 = vshll.u32 %v2902_v17, 16 }
 0xeae   :  { %v2830_v42 = vpop.xlane.xlu0 %2829  ;;  %vm11385_vm11 = vmor %vm10971_vm8, %vm14024_vm3 }
 0xeaf   :  { %v2848_v51 = vadd.s32 %v2847_v30, %v2845_v58  ;;  %v2831_v54 = vcvt.f32.s32 %v2830_v42 }
 0xeb0   :  { %7978 = vset.pattern.permute.xlu1 %v14493_v33 }
 0xeb1   :  { %v2834_v7 = vadd.s32 %v2833_v41, %v2831_v54  ;;  %5307 = vperm.xlu1 %7978, %v14485_v34   ;;  %vm14025_vm1 = vcmp.eq.s32.totalorder %v8719_v43, %v2848_v51  ;;  %v14498_v34 = vld [vmem:[#allocation34_spill] sm:$0xff]  ;;  %v2947_v54 = vand.u32 65535, %v11242_v25  ;;  %v3003_v25 = vand.u32 65535, %v11267_v27 }
 0xeb2   :  { %vm11396_vm2 = vmor %vm10982_vm0, %vm14025_vm1 }
 0xeb3   :  { %vm14026_vm8 = vcmp.eq.s32.totalorder %v8719_v43, %v2834_v7 }
 0xeb4   :  { %vm11405_vm3 = vmor %vm10953_vm13, %vm14026_vm8 }
 0xeb5   :  { %5311 = vperm.xlu1 %7978, %v14484_v10  }
 0xeb9   :  { %7979 = vset.pattern.permute.xlu1 %v14411_v59 }
 0xebb   :  { %4950 = vperm.xlu0 %7971, %v14498_v34  }
 0xec0   :  { %v2858_v26 = vpop.xlane.xlu0 %2857 }
 0xec1   :  { %v2859_v62 = vcvt.f32.s32 %v2858_v26  ;;  %v2949_v26 = vcvt.s32.f32 %v2947_v54 }
 0xec3   :  { %v2862_v30 = vadd.s32 %v2861_v0, %v2859_v62  ;;  %v3017_v0 = vand.u32 65535, %v11287_v53  ;;  %v3005_v53 = vcvt.s32.f32 %v3003_v25 }
 0xec4   :  { %v2886_v42 = vpop.xlane.xlu0 %2885 }
 0xec5   :  { %v2887_v41 = vcvt.f32.s32 %v2886_v42  ;;  %vm14027_vm13 = vcmp.eq.s32.totalorder %v8719_v43, %v2862_v30 }
 0xec6   :  { %vm11419_vm0 = vmor %vm10998_vm9, %vm14027_vm13  ;;  %vm2953_vm9 = vcmp.eq.f32.partialorder %v11264_v32, %v11353_v18  ;;  %vm2995_vm13 = vcmp.eq.f32.partialorder %v11296_v38, %v11369_v60  ;;  %v3019_v32 = vcvt.s32.f32 %v3017_v0 }
 0xec7   :  { %v2890_v29 = vadd.s32 %v2889_v47, %v2887_v41  ;;  %v2954_v40 = vsel %vm2953_vm9, %v2949_v26, inf  ;;  %v2996_v62 = vsel %vm2995_vm13, %v2991_v55, inf  ;;  %vm14503_vm13 = vcmp.eq.s32.totalorder %v8719_v43, %v2834_v7 }
 0xec8   :  { %v11450_v27 = vsel %vm14503_vm13, -1e+30, %v10949_v1  ;;  %vm14506_vm9 = vcmp.eq.s32.totalorder %v8719_v43, %v2848_v51  ;;  %v2916_v51 = vcvt.f32.s32 %v11330_v36 }
 0xec9   :  { %vm14028_vm1 = vcmp.eq.s32.totalorder %v8719_v43, %v2890_v29 }
 0xeca   :  { %vm11428_vm8 = vmor %vm11010_vm10, %vm14028_vm1  ;;  %vm2981_vm10 = vcmp.eq.f32.partialorder %v11279_v35, %v11360_v3  ;;  %vm3023_vm1 = vcmp.eq.f32.partialorder %v11307_v15, %v11372_v28  ;;  %v2874_v15 = vcvt.f32.s32 %v11325_v21  ;;  %v11470_v21 = vsel %vm14506_vm9, -1e+30, %v10978_v24 }
 0xecb   :  { %v14502_v13 = vsel %vm11428_vm8, 4294967295, %v14501_v13  ;;  %v2982_v22 = vsel %vm2981_vm10, %v2977_v50, inf  ;;  %v3024_v38 = vsel %vm3023_vm1, %v3019_v32, inf  ;;  %vm3009_vm8 = vcmp.eq.f32.partialorder %v11292_v45, %v11366_v16 }
 0xecc   :  { %v3010_v42 = vsel %vm3009_vm8, %v3005_v53, inf  ;;  %vm14504_vm1 = vcmp.eq.s32.totalorder %v8719_v43, %v11375_v63  ;;  %vm14505_vm8 = vcmp.eq.s32.totalorder %v8719_v43, %v2862_v30  ;;  %v2875_v1 = vshll.u32 %v2874_v15, 16 }
 0xecd   :  { %v11458_v35 = vsel %vm14504_vm1, -1e+30, %v10967_v20  ;;  %v11464_v45 = vsel %vm14505_vm8, -1e+30, %v10994_v11  ;;  %vm14507_vm10 = vcmp.eq.s32.totalorder %v8719_v43, %v2890_v29  ;;  %v2972_v32 = vcvt.f32.s32 %v11362_v23  ;;  %v14522_v23 = vld [vmem:[#allocation30_spill] sm:$0xff] }
 0xece   :  { %v11476_v20 = vsel %vm14507_vm10, -1e+30, %v11006_v14  ;;  %v2917_v14 = vshll.u32 %v2916_v51, 16  ;;  %v14520_v15 = vmov 0  ;;  %v14585_v24 = vmov 0 }
 0xecf   :  { %v2973_v53 = vshll.u32 %v2972_v32, 16 }
 0xed9   :  { %2955 = vmin.xlane.f32.xlu1 %v2954_v40  ;;  %v2931_v40 = vshll.u32 %v2930_v31, 16 }
 0xeda   :  { %2997 = vmin.xlane.f32.xlu0 %v2996_v62 }
 0xedd   :  { %2983 = vmin.xlane.f32.xlu1 %v2982_v22 }
 0xede   :  { %3025 = vmin.xlane.f32.xlu0 %v3024_v38 }
 0xee1   :  { %3011 = vmin.xlane.f32.xlu1 %v3010_v42 }
 0xee2   :  { %3081 = vmax.xlane.f32.xlu0 %v11450_v27 }
 0xee5   :  { %3079 = vmax.xlane.f32.xlu1 %v11458_v35 }
 0xee6   :  { %v2872_v7 = vpop.xlane.xlu1 %2871  ;;  %3085 = vmax.xlane.f32.xlu0 %v11464_v45 }
 0xee7   :  { %v2873_v47 = vcvt.f32.s32 %v2872_v7 }
 0xee9   :  { %v2876_v63 = vadd.s32 %v2875_v1, %v2873_v47  ;;  %3083 = vmax.xlane.f32.xlu1 %v11470_v21  ;;  %v14523_v47 = vld [vmem:[#allocation2_spill] sm:$0xff] }
 0xeea   :  { %3089 = vmax.xlane.f32.xlu0 %v11476_v20 }
 0xeeb   :  { %vm3035_vm13 = vcmp.eq.s32.totalorder %v8719_v43, %v2876_v63  ;;  %v14525_v63 = vmov 0 }
 0xeec   :  { %v11481_v11 = vsel %vm3035_vm13, -1e+30, %v11028_v2  ;;  %vm11485_vm1 = vmor %vm11032_vm4, %vm3035_vm13 }
 0xeed   :  { %3087 = vmax.xlane.f32.xlu1 %v11481_v11 }
 0xef9   :  { %v2914_v30 = vpop.xlane.xlu0 %2913 }
 0xefa   :  { %v2915_v41 = vcvt.f32.s32 %v2914_v30 }
 0xefc   :  { %v2918_v29 = vadd.s32 %v2917_v14, %v2915_v41  ;;  %v2958_v14 = vcvt.f32.s32 %v11353_v18  ;;  %v3014_v18 = vcvt.f32.s32 %v11366_v16  ;;  %v14537_v16 = vld [vmem:[#allocation65_spill] sm:$0xff] }
 0xefe   :  { %vm3038_vm8 = vcmp.eq.s32.totalorder %v8719_v43, %v2918_v29  ;;  %v3000_v29 = vcvt.f32.s32 %v11369_v60 }
 0xeff   :  { %v11493_v54 = vsel %vm3038_vm8, -1e+30, %v11090_v44  ;;  %vm11497_vm9 = vmor %vm11094_vm15, %vm3038_vm8 }
 0xf00   :  { %3093 = vmax.xlane.f32.xlu0 %v11493_v54 }
 0xf24   :  { %v2900_v36 = vpop.xlane.xlu1 %2899 }
 0xf25   :  { %v2901_v26 = vcvt.f32.s32 %v2900_v36  ;;  %v2959_v36 = vshll.u32 %v2958_v14, 16  ;;  %v3015_v14 = vshll.u32 %v3014_v18, 16 }
 0xf27   :  { %v2904_v0 = vadd.s32 %v2903_v4, %v2901_v26  ;;  %v2986_v4 = vcvt.f32.s32 %v11360_v3 }
 0xf28   :  { %v2928_v55 = vpop.xlane.xlu1 %2927 }
 0xf29   :  { %v2929_v44 = vcvt.f32.s32 %v2928_v55  ;;  %vm3037_vm4 = vcmp.eq.s32.totalorder %v8719_v43, %v2904_v0  ;;  %v3001_v0 = vshll.u32 %v3000_v29, 16  ;;  %v3028_v55 = vcvt.f32.s32 %v11372_v28 }
 0xf2a   :  { %v11506_v9 = vsel %vm3037_vm4, -1e+30, %v11040_v48  ;;  %vm11510_vm15 = vmor %vm11044_vm5, %vm3037_vm4  ;;  %v14515_v48 = vmov 0  ;;  %v14535_v28 = vmov 0 }
 0xf2b   :  { %v2932_v25 = vadd.s32 %v2931_v40, %v2929_v44  ;;  %3091 = vmax.xlane.f32.xlu1 %v11506_v9  ;;  %v3029_v60 = vshll.u32 %v3028_v55, 16  ;;  %v14553_v55 = vmov 0 }
 0xf2d   :  { %vm3039_vm10 = vcmp.eq.s32.totalorder %v8719_v43, %v2932_v25 }
 0xf2e   :  { %v2942_v6 = vpop.xlane.xlu0 %2941  ;;  %v11518_v50 = vsel %vm3039_vm10, -1e+30, %v11052_v61  ;;  %vm11522_vm13 = vmor %vm11056_vm12, %vm3039_vm10  ;;  %vm14519_vm12 = vnez %v14518_v37  ;;  %vm14524_vm10 = vnez %v14523_v47 }
 0xf2f   :  { %14514 = vst [vmem:[#allocation36_spill] sm:$0xff] %v11518_v50  ;;  %v14516_v48 = vsel %vm11522_vm13, 4294967295, %v14515_v48  ;;  %v2943_v22 = vcvt.f32.s32 %v2942_v6  ;;  %3095 = vmax.xlane.f32.xlu1 %v11518_v50  ;;  %v2987_v6 = vshll.u32 %v2986_v4, 16 }
 0xf31   :  { %v2946_v19 = vadd.s32 %v2945_v39, %v2943_v22 }
 0xf32   :  { %v2970_v38 = vpop.xlane.xlu0 %2969 }
 0xf33   :  { %v2971_v42 = vcvt.f32.s32 %v2970_v38  ;;  %vm3040_vm5 = vcmp.eq.s32.totalorder %v8719_v43, %v2946_v19  ;;  %v14531_v19 = vld [vmem:[#allocation60_spill] sm:$0xff] }
 0xf34   :  { %v11530_v61 = vsel %vm3040_vm5, -1e+30, %v11102_v12  ;;  %vm11534_vm8 = vmor %vm14519_vm12, %vm3040_vm5  ;;  %v11550_v12 = vpop.permute.xlu1 %4954  ;;  %v14533_v38 = vld [vmem:[#allocation28_spill] sm:$0xff] }
 0xf35   :  { %14517 = vst [vmem:[#allocation34_spill] sm:$0xff] %v11530_v61  ;;  %v14521_v15 = vsel %vm11534_vm8, 4294967295, %v14520_v15  ;;  %v2974_v7 = vadd.s32 %v2973_v53, %v2971_v42  ;;  %3097 = vmax.xlane.f32.xlu0 %v11530_v61  ;;  %14527 = vst [vmem:[#allocation32_spill] sm:$0xff] %v11550_v12  ;;  %vm14534_vm12 = vnez %v14533_v38 }
 0xf37   :  { %vm3042_vm4 = vcmp.eq.s32.totalorder %v8719_v43, %v2974_v7  ;;  %v14540_v7 = vmov 0 }
 0xf38   :  { %v11541_v1 = vsel %vm3042_vm4, -1e+30, %v14522_v23  ;;  %vm11545_vm13 = vmor %vm14524_vm10, %vm3042_vm4  ;;  %v11552_v51 = vpop.permute.xlu1 %5307 }
 0xf39   :  { %v14526_v63 = vsel %vm11545_vm13, 4294967295, %v14525_v63  ;;  %3101 = vmax.xlane.f32.xlu0 %v11541_v1  ;;  %14528 = vst [vmem:[#allocation30_spill] sm:$0xff] %v11552_v51 }
 0xf3a   :  { %v11557_v41 = vpop.permute.xlu0 %4950 }
 0xf3b   :  { %14530 = vst [vmem:[#allocation76_spill] sm:$0xff] %v11557_v41 }
 0xf3c   :  { %v11554_v30 = vpop.permute.xlu1 %5311 }
 0xf3d   :  { %14529 = vst [vmem:[#allocation2_spill] sm:$0xff] %v11554_v30 }
 0xf66   :  { %v2956_v17 = vpop.xlane.xlu1 %2955 }
 0xf67   :  { %v2957_v31 = vcvt.f32.s32 %v2956_v17  ;;  %v2998_v26 = vpop.xlane.xlu0 %2997  ;;  %v14543_v17 = vld [vmem:[#allocation5_spill] sm:$0xff] }
 0xf68   :  { %v2999_v40 = vcvt.f32.s32 %v2998_v26  ;;  %v14549_v26 = vmov 0 }
 0xf69   :  { %v2960_v44 = vadd.s32 %v2959_v36, %v2957_v31  ;;  %v14545_v36 = vmov 0 }
 0xf6a   :  { %v3002_v8 = vadd.s32 %v3001_v0, %v2999_v40  ;;  %v2984_v25 = vpop.xlane.xlu1 %2983  ;;  %v14556_v40 = vld [vmem:[#allocation35_spill] sm:$0xff] }
 0xf6b   :  { %v2985_v39 = vcvt.f32.s32 %v2984_v25  ;;  %v3026_v32 = vpop.xlane.xlu0 %3025  ;;  %vm3041_vm5 = vcmp.eq.s32.totalorder %v8719_v43, %v2960_v44  ;;  %v14557_v44 = vld [vmem:[#allocation33_spill] sm:$0xff] }
 0xf6c   :  { %v3027_v22 = vcvt.f32.s32 %v3026_v32  ;;  %v11565_v3 = vsel %vm3041_vm5, -1e+30, %v14531_v19  ;;  %vm11569_vm4 = vmor %vm14534_vm12, %vm3041_vm5  ;;  %vm3044_vm10 = vcmp.eq.s32.totalorder %v8719_v43, %v3002_v8 }
 0xf6d   :  { %14532 = vst [vmem:[#allocation60_spill] sm:$0xff] %v11565_v3  ;;  %v14536_v28 = vsel %vm11569_vm4, 4294967295, %v14535_v28  ;;  %v2988_v53 = vadd.s32 %v2987_v6, %v2985_v39  ;;  %3099 = vmax.xlane.f32.xlu1 %v11565_v3  ;;  %v11576_v42 = vsel %vm3044_vm10, -1e+30, %v14537_v16  ;;  %vm11580_vm13 = vmor %vm11129_vm14, %vm3044_vm10  ;;  %vm14544_vm4 = vnez %v14543_v17  ;;  %v14560_v17 = vld [vmem:[#allocation27_spill] sm:$0xff] }
 0xf6e   :  { %14538 = vst [vmem:[#allocation28_spill] sm:$0xff] %v11576_v42  ;;  %v14541_v7 = vsel %vm11580_vm13, 4294967295, %v14540_v7  ;;  %v3030_v23 = vadd.s32 %v3029_v60, %v3027_v22  ;;  %v3012_v47 = vpop.xlane.xlu1 %3011  ;;  %3105 = vmax.xlane.f32.xlu0 %v11576_v42  ;;  %v14558_v60 = vld [vmem:[#allocation3_spill] sm:$0xff] }
 0xf6f   :  { %14542 = vst [vmem:[#allocation65_spill] sm:$0xff] %v14541_v7  ;;  %v3013_v29 = vcvt.f32.s32 %v3012_v47  ;;  %vm3043_vm5 = vcmp.eq.s32.totalorder %v8719_v43, %v2988_v53  ;;  %v3082_v8 = vpop.xlane.xlu0 %3081 }
 0xf70   :  { %vm3046_vm12 = vcmp.eq.s32.totalorder %v8719_v43, %v3030_v23  ;;  %vm11591_vm8 = vmor %vm14544_vm4, %vm3043_vm5  ;;  %v11655_v31 = vsel %vm3043_vm5, -1e+30, %v14560_v17 }
 0xf71   :  { %v14546_v36 = vsel %vm11591_vm8, 4294967295, %v14545_v36  ;;  %v3016_v4 = vadd.s32 %v3015_v14, %v3013_v29  ;;  %vm11599_vm14 = vmor %vm11140_vm7, %vm3046_vm12  ;;  %vm3112_vm7 = vcmp.eq.f32.partialorder %v11450_v27, %v3082_v8  ;;  %14561 = vst [vmem:[#allocation35_spill] sm:$0xff] %v11655_v31 }
 0xf72   :  { %14547 = vst [vmem:[#allocation66_spill] sm:$0xff] %v14546_v36  ;;  %v14550_v26 = vsel %vm11599_vm14, 4294967295, %v14549_v26  ;;  %v11620_v6 = vsel %vm3112_vm7, %v8719_v43, 128  ;;  %v3080_v18 = vpop.xlane.xlu1 %3079 }
 0xf73   :  { %14551 = vst [vmem:[#allocation5_spill] sm:$0xff] %v14550_v26  ;;  %vm3045_vm10 = vcmp.eq.s32.totalorder %v8719_v43, %v3016_v4  ;;  %v3086_v25 = vpop.xlane.xlu0 %3085  ;;  %v3158_v32 = vshra.s32 %v11620_v6, 16  ;;  %vm3111_vm7 = vcmp.eq.f32.partialorder %v11458_v35, %v3080_v18 }
 0xf74   :  { %vm11608_vm13 = vmor %vm11160_vm6, %vm3045_vm10  ;;  %vm3114_vm6 = vcmp.eq.f32.partialorder %v11464_v45, %v3086_v25  ;;  %v11647_v14 = vsel %vm3111_vm7, %v8719_v43, 128 }
 0xf75   :  { %v14554_v55 = vsel %vm11608_vm13, 4294967295, %v14553_v55  ;;  %v11635_v38 = vcvt.s32.f32 %v3158_v32  ;;  %v3144_v8 = vshra.s32 %v11647_v14, 16  ;;  %v14562_v32 = vld [vmem:[#allocation70_spill] sm:$0xff] }
 0xf76   :  { %14555 = vst [vmem:[#allocation67_spill] sm:$0xff] %v14554_v55  ;;  %v3084_v16 = vpop.xlane.xlu1 %3083  ;;  %v11670_v53 = vsel %vm3045_vm10, -1e+30, %v14562_v32 }
 0xf77   :  { %v3090_v39 = vpop.xlane.xlu0 %3089  ;;  %14563 = vst [vmem:[#allocation33_spill] sm:$0xff] %v11670_v53 }
 0xf78   :  { %vm3116_vm4 = vcmp.eq.f32.partialorder %v11476_v20, %v3090_v39 }
 0xf79   :  { %v11638_v37 = vsel %vm3116_vm4, %v8719_v43, 128 }
 0xf7a   :  { %v3214_v23 = vshra.s32 %v11638_v37, 16  ;;  %v3088_v0 = vpop.xlane.xlu1 %3087 }
 0xf7b   :  { %vm3115_vm5 = vcmp.eq.f32.partialorder %v11481_v11, %v3088_v0 }
 0xf7c   :  { %v11662_v18 = vcvt.s32.f32 %v3214_v23 }
 0xf7e   :  { %4962 = vperm.xlu1 %7979, %v14556_v40  }
 0xf82   :  { %7980 = vset.pattern.permute.xlu1 %v14493_v33 }
 0xf83   :  { %5315 = vperm.xlu1 %7980, %v14498_v34   ;;  %v11625_v34 = vsel %vm3114_vm6, %v8719_v43, 128 }
 0xf84   :  { %4958 = vperm.xlu0 %7971, %v14557_v44   ;;  %v3186_v19 = vshra.s32 %v11625_v34, 16 }
 0xf86   :  { %v11644_v47 = vcvt.s32.f32 %v3186_v19 }
 0xf87   :  { %5319 = vperm.xlu1 %7980, %v14490_v52   ;;  %v11630_v52 = vsel %vm3046_vm12, -1e+30, %v14558_v60  ;;  %vm3113_vm12 = vcmp.eq.f32.partialorder %v11470_v21, %v3084_v16  ;;  %v11681_v16 = vsel %vm3115_vm5, %v8719_v43, 128 }
 0xf88   :  { %14559 = vst [vmem:[#allocation4_spill] sm:$0xff] %v11630_v52  ;;  %v11665_v39 = vsel %vm3113_vm12, %v8719_v43, 128  ;;  %v3200_v4 = vshra.s32 %v11681_v16, 16 }
 0xf89   :  { %v3172_v60 = vshra.s32 %v11665_v39, 16 }
 0xf8a   :  { %v11690_v0 = vcvt.s32.f32 %v3200_v4 }
 0xf8b   :  { %7981 = vset.pattern.permute.xlu1 %v14411_v59  ;;  %v11686_v23 = vcvt.s32.f32 %v3172_v60 }
 0xf8d   :  { %v3094_v22 = vpop.xlane.xlu0 %3093 }
 0xf8e   :  { %vm3118_vm6 = vcmp.eq.f32.partialorder %v11493_v54, %v3094_v22  ;;  %v11676_v22 = vcvt.s32.f32 %v3144_v8 }
 0xf8f   :  { %v11650_v29 = vsel %vm3118_vm6, %v8719_v43, 128 }
 0xf90   :  { %v3242_v25 = vshra.s32 %v11650_v29, 16 }
 0xf92   :  { %v11678_v19 = vcvt.s32.f32 %v3242_v25 }
 0xfa3   :  { %3109 = vmax.xlane.f32.xlu0 %v11630_v52 }
 0xfa7   :  { %3161 = vmin.xlane.f32.xlu0 %v11635_v38 }
 0xfab   :  { %3103 = vmax.xlane.f32.xlu1 %v11655_v31  ;;  %3189 = vmin.xlane.f32.xlu0 %v11644_v47 }
 0xfaf   :  { %3107 = vmax.xlane.f32.xlu1 %v11670_v53  ;;  %3217 = vmin.xlane.f32.xlu0 %v11662_v18 }
 0xfb3   :  { %3147 = vmin.xlane.f32.xlu1 %v11676_v22  ;;  %3245 = vmin.xlane.f32.xlu0 %v11678_v19 }
 0xfb7   :  { %3175 = vmin.xlane.f32.xlu1 %v11686_v23 }
 0xfb8   :  { %v3092_v17 = vpop.xlane.xlu1 %3091 }
 0xfb9   :  { %vm3117_vm10 = vcmp.eq.f32.partialorder %v11506_v9, %v3092_v17 }
 0xfba   :  { %v11693_v8 = vsel %vm3117_vm10, %v8719_v43, 128 }
 0xfbb   :  { %v3228_v25 = vshra.s32 %v11693_v8, 16  ;;  %3203 = vmin.xlane.f32.xlu1 %v11690_v0 }
 0xfbc   :  { %v3096_v32 = vpop.xlane.xlu1 %3095 }
 0xfbd   :  { %vm3119_vm4 = vcmp.eq.f32.partialorder %v11518_v50, %v3096_v32  ;;  %v11698_v41 = vcvt.s32.f32 %v3228_v25  ;;  %v3157_v50 = vand.u32 65535, %v11620_v6 }
 0xfbe   :  { %v11701_v60 = vsel %vm3119_vm4, %v8719_v43, 128 }
 0xfbf   :  { %v3256_v30 = vshra.s32 %v11701_v60, 16  ;;  %3231 = vmin.xlane.f32.xlu1 %v11698_v41 }
 0xfc1   :  { %v11705_v4 = vcvt.s32.f32 %v3256_v30 }
 0xfc2   :  { %v3098_v17 = vpop.xlane.xlu0 %3097 }
 0xfc3   :  { %vm3120_vm7 = vcmp.eq.f32.partialorder %v11530_v61, %v3098_v17  ;;  %3259 = vmin.xlane.f32.xlu1 %v11705_v4 }
 0xfc4   :  { %v11710_v51 = vsel %vm3120_vm7, %v8719_v43, 128 }
 0xfc5   :  { %v3270_v25 = vshra.s32 %v11710_v51, 16 }
 0xfc6   :  { %v3102_v32 = vpop.xlane.xlu0 %3101 }
 0xfc7   :  { %vm3122_vm6 = vcmp.eq.f32.partialorder %v11541_v1, %v3102_v32  ;;  %v11714_v12 = vcvt.s32.f32 %v3270_v25 }
 0xfc8   :  { %v11717_v5 = vsel %vm3122_vm6, %v8719_v43, 128 }
 0xfc9   :  { %v3298_v30 = vshra.s32 %v11717_v5, 16  ;;  %3273 = vmin.xlane.f32.xlu0 %v11714_v12 }
 0xfcb   :  { %v11721_v17 = vcvt.s32.f32 %v3298_v30 }
 0xfcd   :  { %3301 = vmin.xlane.f32.xlu0 %v11721_v17 }
 0xffa   :  { %v3100_v56 = vpop.xlane.xlu1 %3099 }
 0xffb   :  { %vm3121_vm12 = vcmp.eq.f32.partialorder %v11565_v3, %v3100_v56  ;;  %v3106_v57 = vpop.xlane.xlu0 %3105  ;;  %v14564_v56 = vld [vmem:[#allocation40_spill] sm:$0xff] }
 0xffc   :  { %v11726_v55 = vsel %vm3121_vm12, %v8719_v43, 128  ;;  %vm3124_vm5 = vcmp.eq.f32.partialorder %v11576_v42, %v3106_v57  ;;  %v14565_v57 = vld [vmem:[#allocation38_spill] sm:$0xff] }
 0xffd   :  { %v3284_v25 = vshra.s32 %v11726_v55, 16  ;;  %v11731_v32 = vsel %vm3124_vm5, %v8719_v43, 128 }
 0xffe   :  { %v3326_v36 = vshra.s32 %v11731_v32, 16 }
 0xfff   :  { %v11734_v30 = vcvt.s32.f32 %v3284_v25  ;;  %v11746_v25 = vpop.permute.xlu1 %4962 }
0x1000   :  { %v11736_v26 = vcvt.s32.f32 %v3326_v36  ;;  %14566 = vst [vmem:[#allocation3_spill] sm:$0xff] %v11746_v25 }
0x1001   :  { %3287 = vmin.xlane.f32.xlu1 %v11734_v30 }
0x1002   :  { %3329 = vmin.xlane.f32.xlu0 %v11736_v26 }
0x1003   :  { %v11748_v36 = vpop.permute.xlu0 %4958  ;;  %v11750_v42 = vpop.permute.xlu1 %5315 }
0x1004   :  { %14567 = vst [vmem:[#allocation27_spill] sm:$0xff] %v11748_v36  ;;  %14568 = vst [vmem:[#allocation70_spill] sm:$0xff] %v11750_v42 }
0x1007   :  { %v11758_v7 = vpop.permute.xlu1 %5319 }
0x1008   :  { %14569 = vst [vmem:[#allocation38_spill] sm:$0xff] %v11758_v7  ;;  %v3143_v7 = vand.u32 65535, %v11647_v14 }
0x1012   :  { %4970 = vperm.xlu1 %7981, %v14564_v56  }
0x1016   :  { %7982 = vset.pattern.permute.xlu1 %v14493_v33 }
0x1017   :  { %5323 = vperm.xlu1 %7982, %v14557_v44  }
0x1018   :  { %4966 = vperm.xlu0 %7971, %v14565_v57  }
0x101b   :  { %5327 = vperm.xlu1 %7982, %v14556_v40  }
0x101f   :  { %7983 = vset.pattern.permute.xlu1 %v14411_v59 }
0x1030   :  { %v3110_v3 = vpop.xlane.xlu0 %3109 }
0x1031   :  { %vm3126_vm10 = vcmp.eq.f32.partialorder %v11630_v52, %v3110_v3  ;;  %v3159_v3 = vcvt.s32.f32 %v3157_v50 }
0x1032   :  { %v11754_v56 = vsel %vm3126_vm10, %v8719_v43, 128 }
0x1033   :  { %v3354_v44 = vshra.s32 %v11754_v56, 16 }
0x1034   :  { %v11760_v40 = vpop.xlane.xlu0 %3161 }
0x1035   :  { %v11762_v59 = vcvt.s32.f32 %v3354_v44  ;;  %vm3163_vm4 = vcmp.eq.f32.partialorder %v11635_v38, %v11760_v40 }
0x1036   :  { %v3164_v25 = vsel %vm3163_vm4, %v3159_v3, inf }
0x1037   :  { %3357 = vmin.xlane.f32.xlu0 %v11762_v59 }
0x1038   :  { %v3104_v42 = vpop.xlane.xlu1 %3103  ;;  %v11782_v3 = vpop.xlane.xlu0 %3189 }
0x1039   :  { %vm3123_vm7 = vcmp.eq.f32.partialorder %v11655_v31, %v3104_v42  ;;  %v3185_v42 = vand.u32 65535, %v11625_v34  ;;  %vm3191_vm5 = vcmp.eq.f32.partialorder %v11644_v47, %v11782_v3  ;;  %v3199_v47 = vand.u32 65535, %v11681_v16 }
0x103a   :  { %v11769_v36 = vsel %vm3123_vm7, %v8719_v43, 128 }
0x103b   :  { %v3312_v6 = vshra.s32 %v11769_v36, 16  ;;  %3165 = vmin.xlane.f32.xlu0 %v3164_v25  ;;  %v3145_v25 = vcvt.s32.f32 %v3143_v7  ;;  %v3213_v7 = vand.u32 65535, %v11638_v37 }
0x103c   :  { %v3108_v44 = vpop.xlane.xlu1 %3107 }
0x103d   :  { %vm3125_vm6 = vcmp.eq.f32.partialorder %v11670_v53, %v3108_v44  ;;  %v11774_v52 = vcvt.s32.f32 %v3312_v6  ;;  %v3171_v44 = vand.u32 65535, %v11665_v39  ;;  %v3187_v53 = vcvt.s32.f32 %v3185_v42 }
0x103e   :  { %v11777_v38 = vsel %vm3125_vm6, %v8719_v43, 128  ;;  %v3215_v42 = vcvt.s32.f32 %v3213_v7 }
0x103f   :  { %v3340_v50 = vshra.s32 %v11777_v38, 16  ;;  %3315 = vmin.xlane.f32.xlu1 %v11774_v52  ;;  %v3192_v61 = vsel %vm3191_vm5, %v3187_v53, inf }
0x1040   :  { %v11784_v31 = vpop.xlane.xlu1 %3147 }
0x1041   :  { %v11786_v14 = vcvt.s32.f32 %v3340_v50  ;;  %vm3149_vm12 = vcmp.eq.f32.partialorder %v11676_v22, %v11784_v31  ;;  %v11799_v22 = vpop.xlane.xlu0 %3217  ;;  %v3173_v50 = vcvt.s32.f32 %v3171_v44  ;;  %v14570_v44 = vld [vmem:[#allocation39_spill] sm:$0xff] }
0x1042   :  { %v3150_v6 = vsel %vm3149_vm12, %v3145_v25, inf  ;;  %vm3219_vm4 = vcmp.eq.f32.partialorder %v11662_v18, %v11799_v22  ;;  %v3227_v18 = vand.u32 65535, %v11693_v8  ;;  %v3255_v8 = vand.u32 65535, %v11701_v60 }
0x1043   :  { %3343 = vmin.xlane.f32.xlu1 %v11786_v14  ;;  %3151 = vmin.xlane.f32.xlu0 %v3150_v6  ;;  %v3220_v53 = vsel %vm3219_vm4, %v3215_v42, inf }
0x1044   :  { %v11794_v34 = vpop.xlane.xlu1 %3175 }
0x1045   :  { %vm3177_vm10 = vcmp.eq.f32.partialorder %v11686_v23, %v11794_v34  ;;  %v11809_v37 = vpop.xlane.xlu0 %3245  ;;  %v3201_v23 = vcvt.s32.f32 %v3199_v47 }
0x1046   :  { %v3178_v25 = vsel %vm3177_vm10, %v3173_v50, inf  ;;  %vm3247_vm6 = vcmp.eq.f32.partialorder %v11678_v19, %v11809_v37 }
0x1047   :  { %3193 = vmin.xlane.f32.xlu0 %v3192_v61  ;;  %v3241_v61 = vand.u32 65535, %v11650_v29  ;;  %v3269_v29 = vand.u32 65535, %v11710_v51  ;;  %v3297_v51 = vand.u32 65535, %v11717_v5 }
0x1048   :  { %v11804_v39 = vpop.xlane.xlu1 %3203 }
0x1049   :  { %vm3205_vm7 = vcmp.eq.f32.partialorder %v11690_v0, %v11804_v39  ;;  %v3243_v7 = vcvt.s32.f32 %v3241_v61  ;;  %v3271_v42 = vcvt.s32.f32 %v3269_v29  ;;  %v3257_v61 = vcvt.s32.f32 %v3255_v8 }
0x104a   :  { %v3206_v6 = vsel %vm3205_vm7, %v3201_v23, inf }
0x104b   :  { %3179 = vmin.xlane.f32.xlu0 %v3178_v25  ;;  %v3248_v50 = vsel %vm3247_vm6, %v3243_v7, inf  ;;  %v3229_v25 = vcvt.s32.f32 %v3227_v18  ;;  %v3325_v18 = vand.u32 65535, %v11731_v32 }
0x104c   :  { %v11814_v16 = vpop.xlane.xlu1 %3231 }
0x104d   :  { %vm3233_vm12 = vcmp.eq.f32.partialorder %v11698_v41, %v11814_v16 }
0x104e   :  { %v3234_v19 = vsel %vm3233_vm12, %v3229_v25, inf }
0x104f   :  { %3221 = vmin.xlane.f32.xlu0 %v3220_v53 }
0x1050   :  { %v11826_v47 = vpop.xlane.xlu1 %3259 }
0x1051   :  { %vm3261_vm10 = vcmp.eq.f32.partialorder %v11705_v4, %v11826_v47 }
0x1052   :  { %v3262_v23 = vsel %vm3261_vm10, %v3257_v61, inf }
0x1053   :  { %3207 = vmin.xlane.f32.xlu0 %v3206_v6  ;;  %v3283_v6 = vand.u32 65535, %v11726_v55  ;;  %v3353_v55 = vand.u32 65535, %v11754_v56 }
0x1054   :  { %4978 = vperm.xlu1 %7983, %v14570_v44  }
0x1055   :  { %v3285_v4 = vcvt.s32.f32 %v3283_v6 }
0x1056   :  { %v11820_v0 = vpop.xlane.xlu0 %3273 }
0x1057   :  { %3249 = vmin.xlane.f32.xlu0 %v3248_v50  ;;  %vm3275_vm5 = vcmp.eq.f32.partialorder %v11714_v12, %v11820_v0  ;;  %v3299_v12 = vcvt.s32.f32 %v3297_v51 }
0x1058   :  { %7984 = vset.pattern.permute.xlu1 %v14493_v33  ;;  %v3276_v53 = vsel %vm3275_vm5, %v3271_v42, inf  ;;  %v3355_v42 = vcvt.s32.f32 %v3353_v55 }
0x105a   :  { %v11831_v41 = vpop.xlane.xlu0 %3301 }
0x105b   :  { %3235 = vmin.xlane.f32.xlu0 %v3234_v19  ;;  %vm3303_vm4 = vcmp.eq.f32.partialorder %v11721_v17, %v11831_v41  ;;  %v3327_v17 = vcvt.s32.f32 %v3325_v18 }
0x105c   :  { %v3304_v60 = vsel %vm3303_vm4, %v3299_v12, inf }
0x105f   :  { %3277 = vmin.xlane.f32.xlu0 %v3276_v53  ;;  %v3311_v53 = vand.u32 65535, %v11769_v36 }
0x1061   :  { %v3313_v18 = vcvt.s32.f32 %v3311_v53 }
0x1063   :  { %3263 = vmin.xlane.f32.xlu0 %v3262_v23 }
0x1067   :  { %3305 = vmin.xlane.f32.xlu0 %v3304_v60  ;;  %v3339_v60 = vand.u32 65535, %v11777_v38 }
0x108e   :  { %v11837_v7 = vpop.xlane.xlu1 %3287 }
0x108f   :  { %v11839_v50 = vpop.xlane.xlu0 %3329  ;;  %vm3289_vm7 = vcmp.eq.f32.partialorder %v11734_v30, %v11837_v7  ;;  %v3168_v30 = vcvt.f32.s32 %v11760_v40  ;;  %v3154_v40 = vcvt.f32.s32 %v11784_v31 }
0x1090   :  { %v3290_v5 = vsel %vm3289_vm7, %v3285_v4, inf  ;;  %vm3331_vm6 = vcmp.eq.f32.partialorder %v11736_v26, %v11839_v50  ;;  %v3341_v4 = vcvt.s32.f32 %v3339_v60 }
0x1091   :  { %3291 = vmin.xlane.f32.xlu0 %v3290_v5  ;;  %v3332_v29 = vsel %vm3331_vm6, %v3327_v17, inf  ;;  %v3169_v56 = vshll.u32 %v3168_v30, 16  ;;  %v3155_v5 = vshll.u32 %v3154_v40, 16  ;;  %v3182_v30 = vcvt.f32.s32 %v11794_v34 }
0x1092   :  { %v11845_v25 = vpop.permute.xlu1 %4970 }
0x1095   :  { %3333 = vmin.xlane.f32.xlu0 %v3332_v29 }
0x1096   :  { %v11850_v19 = vpop.permute.xlu1 %5323 }
0x1097   :  { %v11848_v32 = vpop.permute.xlu0 %4966 }
0x109a   :  { %v11858_v51 = vpop.permute.xlu1 %5327 }
0x10c4   :  { %v11852_v8 = vpop.xlane.xlu0 %3357 }
0x10c5   :  { %vm3359_vm12 = vcmp.eq.f32.partialorder %v11762_v59, %v11852_v8 }
0x10c6   :  { %v3360_v26 = vsel %vm3359_vm12, %v3355_v42, inf }
0x10c7   :  { %3361 = vmin.xlane.f32.xlu1 %v3360_v26 }
0x10c8   :  { %v3166_v61 = vpop.xlane.xlu0 %3165 }
0x10c9   :  { %v3167_v23 = vcvt.f32.s32 %v3166_v61  ;;  %v3224_v61 = vcvt.f32.s32 %v11799_v22  ;;  %v3210_v22 = vcvt.f32.s32 %v11804_v39 }
0x10cb   :  { %v11860_v12 = vadd.s32 %v3169_v56, %v3167_v23  ;;  %v3183_v56 = vshll.u32 %v3182_v30, 16 }
0x10cc   :  { %v11863_v6 = vpop.xlane.xlu1 %3315 }
0x10cd   :  { %vm3317_vm5 = vcmp.eq.f32.partialorder %v11774_v52, %v11863_v6  ;;  %vm14046_vm10 = vcmp.eq.s32.totalorder %v8719_v43, %v11860_v12  ;;  %v3196_v52 = vcvt.f32.s32 %v11782_v3  ;;  %v14657_v3 = vld [vmem:[#allocation18_spill] sm:$0xff] }
0x10ce   :  { %v3318_v36 = vsel %vm3317_vm5, %v3313_v18, inf  ;;  %vm11875_vm4 = vmor %vm11405_vm3, %vm14046_vm10  ;;  %v3225_v18 = vshll.u32 %v3224_v61, 16 }
0x10cf   :  { %3319 = vmin.xlane.f32.xlu0 %v3318_v36  ;;  %v3197_v42 = vshll.u32 %v3196_v52, 16  ;;  %v3211_v52 = vshll.u32 %v3210_v22, 16 }
0x10d0   :  { %v11879_v38 = vpop.xlane.xlu1 %3343  ;;  %v3152_v31 = vpop.xlane.xlu0 %3151 }
0x10d1   :  { %v3153_v17 = vcvt.f32.s32 %v3152_v31  ;;  %vm3345_vm7 = vcmp.eq.f32.partialorder %v11786_v14, %v11879_v38 }
0x10d2   :  { %v3346_v29 = vsel %vm3345_vm7, %v3341_v4, inf  ;;  %v3252_v4 = vcvt.f32.s32 %v11809_v37 }
0x10d3   :  { %v11884_v55 = vadd.s32 %v3155_v5, %v3153_v17  ;;  %3347 = vmin.xlane.f32.xlu1 %v3346_v29 }
0x10d4   :  { %v3194_v58 = vpop.xlane.xlu0 %3193  ;;  %v3253_v29 = vshll.u32 %v3252_v4, 16 }
0x10d5   :  { %v3195_v26 = vcvt.f32.s32 %v3194_v58  ;;  %vm14041_vm3 = vcmp.eq.s32.totalorder %v8719_v43, %v11884_v55  ;;  %v3238_v58 = vcvt.f32.s32 %v11814_v16 }
0x10d6   :  { %vm11894_vm6 = vmor %vm11385_vm11, %vm14041_vm3 }
0x10d7   :  { %v11898_v14 = vadd.s32 %v3197_v42, %v3195_v26  ;;  %v14582_v42 = vld [vmem:[#allocation37_spill] sm:$0xff] }
0x10d8   :  { %v3180_v53 = vpop.xlane.xlu0 %3179 }
0x10d9   :  { %v3181_v34 = vcvt.f32.s32 %v3180_v53  ;;  %vm14040_vm12 = vcmp.eq.s32.totalorder %v8719_v43, %v11898_v14  ;;  %v3280_v53 = vcvt.f32.s32 %v11820_v0 }
0x10da   :  { %vm11908_vm5 = vmor %vm11419_vm0, %vm14040_vm12  ;;  %vm14579_vm12 = vnez %v14502_v13 }
0x10db   :  { %v11912_v23 = vadd.s32 %v3183_v56, %v3181_v34  ;;  %v3266_v34 = vcvt.f32.s32 %v11826_v47  ;;  %v14590_v47 = vmov 0 }
0x10dc   :  { %v3222_v60 = vpop.xlane.xlu0 %3221 }
0x10dd   :  { %v3223_v40 = vcvt.f32.s32 %v3222_v60  ;;  %vm14043_vm11 = vcmp.eq.s32.totalorder %v8719_v43, %v11912_v23  ;;  %v3281_v60 = vshll.u32 %v3280_v53, 16  ;;  %v3267_v22 = vshll.u32 %v3266_v34, 16  ;;  %v14617_v53 = vld [vmem:[#allocation60_spill] sm:$0xff]  ;;  %v12087_v34 = vpop.permute.xlu1 %4978 }
0x10de   :  { %vm11922_vm7 = vmor %vm11396_vm2, %vm14043_vm11  ;;  %14619 = vst [vmem:[#allocation39_spill] sm:$0xff] %v12087_v34 }
0x10df   :  { %v3226_v36 = vadd.s32 %v3225_v18, %v3223_v40  ;;  %v3308_v40 = vcvt.f32.s32 %v11831_v41  ;;  %v14593_v41 = vmov 0 }
0x10e0   :  { %v3208_v31 = vpop.xlane.xlu0 %3207 }
0x10e1   :  { %v3209_v5 = vcvt.f32.s32 %v3208_v31  ;;  %vm14042_vm0 = vcmp.eq.s32.totalorder %v8719_v43, %v3226_v36 }
0x10e2   :  { %vm11932_vm3 = vmor %vm14579_vm12, %vm14042_vm0 }
0x10e3   :  { %v3212_v46 = vadd.s32 %v3211_v52, %v3209_v5  ;;  %v3309_v52 = vshll.u32 %v3308_v40, 16  ;;  %v3322_v40 = vcvt.f32.s32 %v11863_v6 }
0x10e4   :  { %5331 = vperm.xlu1 %7984, %v14565_v57   ;;  %v3250_v17 = vpop.xlane.xlu0 %3249  ;;  %v3239_v57 = vshll.u32 %v3238_v58, 16 }
0x10e5   :  { %v3251_v37 = vcvt.f32.s32 %v3250_v17  ;;  %4974 = vperm.xlu0 %7971, %v14582_v42   ;;  %vm14044_vm2 = vcmp.eq.s32.totalorder %v8719_v43, %v3212_v46 }
0x10e6   :  { %vm11944_vm12 = vmor %vm11485_vm1, %vm14044_vm2 }
0x10e7   :  { %v3254_v30 = vadd.s32 %v3253_v29, %v3251_v37  ;;  %v14609_v37 = vld [vmem:[#allocation34_spill] sm:$0xff] }
0x10e8   :  { %v3236_v26 = vpop.xlane.xlu0 %3235 }
0x10e9   :  { %v3237_v61 = vcvt.f32.s32 %v3236_v26  ;;  %vm14045_vm0 = vcmp.eq.s32.totalorder %v8719_v43, %v3254_v30  ;;  %7985 = vset.pattern.permute.xlu0 %v14493_v33  ;;  %v14587_v33 = vmov 0 }
0x10ea   :  { %vm11955_vm11 = vmor %vm11497_vm9, %vm14045_vm0  ;;  %vm14589_vm0 = vnez %v14521_v15  ;;  %v14596_v15 = vmov 0 }
0x10eb   :  { %v14586_v24 = vsel %vm11955_vm11, 4294967295, %v14585_v24  ;;  %v3240_v16 = vadd.s32 %v3239_v57, %v3237_v61 }
0x10ec   :  { %v3278_v56 = vpop.xlane.xlu0 %3277 }
0x10ed   :  { %v3279_v18 = vcvt.f32.s32 %v3278_v56  ;;  %vm14047_vm1 = vcmp.eq.s32.totalorder %v8719_v43, %v3240_v16 }
0x10ee   :  { %vm11965_vm2 = vmor %vm11510_vm15, %vm14047_vm1  ;;  %vm14592_vm1 = vnez %v14516_v48 }
0x10ef   :  { %v14588_v33 = vsel %vm11965_vm2, 4294967295, %v14587_v33  ;;  %v3282_v2 = vadd.s32 %v3281_v60, %v3279_v18  ;;  %v3364_v60 = vcvt.f32.s32 %v11852_v8 }
0x10f0   :  { %v3264_v0 = vpop.xlane.xlu0 %3263 }
0x10f1   :  { %v3265_v31 = vcvt.f32.s32 %v3264_v0  ;;  %vm14048_vm9 = vcmp.eq.s32.totalorder %v8719_v43, %v3282_v2 }
0x10f2   :  { %vm11975_vm10 = vmor %vm14589_vm0, %vm14048_vm9  ;;  %vm14595_vm9 = vnez %v14526_v63 }
0x10f3   :  { %v14591_v47 = vsel %vm11975_vm10, 4294967295, %v14590_v47  ;;  %v3268_v62 = vadd.s32 %v3267_v22, %v3265_v31 }
0x10f4   :  { %v3306_v4 = vpop.xlane.xlu0 %3305 }
0x10f5   :  { %v3307_v5 = vcvt.f32.s32 %v3306_v4  ;;  %vm14049_vm15 = vcmp.eq.s32.totalorder %v8719_v43, %v3268_v62  ;;  %v14623_v4 = vld [vmem:[#allocation4_spill] sm:$0xff] }
0x10f6   :  { %vm11984_vm2 = vmor %vm14592_vm1, %vm14049_vm15  ;;  %vm14598_vm1 = vcmp.eq.s32.totalorder %v8719_v43, %v11860_v12  ;;  %vm14606_vm15 = vnez %v14536_v28  ;;  %v14615_v28 = vld [vmem:[#allocation36_spill] sm:$0xff] }
0x10f7   :  { %v14594_v41 = vsel %vm11984_vm2, 4294967295, %v14593_v41  ;;  %v3310_v17 = vadd.s32 %v3309_v52, %v3307_v5  ;;  %v12003_v48 = vsel %vm14598_vm1, -1e+30, %v11450_v27  ;;  %vm14601_vm1 = vcmp.eq.s32.totalorder %v8719_v43, %v11912_v23 }
0x10f8   :  { %v12024_v27 = vsel %vm14601_vm1, -1e+30, %v11470_v21  ;;  %vm14604_vm1 = vcmp.eq.s32.totalorder %v8719_v43, %v3254_v30  ;;  %v3323_v5 = vshll.u32 %v3322_v40, 16 }
0x10f9   :  { %vm3378_vm0 = vcmp.eq.s32.totalorder %v8719_v43, %v3310_v17  ;;  %v3350_v17 = vcvt.f32.s32 %v11879_v38 }
0x10fa   :  { %vm11991_vm10 = vmor %vm14595_vm9, %vm3378_vm0  ;;  %v11996_v29 = vsel %vm3378_vm0, -1e+30, %v11541_v1  ;;  %vm14599_vm9 = vcmp.eq.s32.totalorder %v8719_v43, %v11884_v55  ;;  %vm14600_vm0 = vcmp.eq.s32.totalorder %v8719_v43, %v11898_v14  ;;  %v3336_v14 = vcvt.f32.s32 %v11839_v50 }
0x10fb   :  { %v14597_v15 = vsel %vm11991_vm10, 4294967295, %v14596_v15  ;;  %v12010_v63 = vsel %vm14599_vm9, -1e+30, %v11458_v35  ;;  %v12017_v1 = vsel %vm14600_vm0, -1e+30, %v11464_v45  ;;  %vm14602_vm9 = vcmp.eq.s32.totalorder %v8719_v43, %v3226_v36 }
0x10fc   :  { %v12030_v35 = vsel %vm14602_vm9, -1e+30, %v11476_v20  ;;  %v3294_v45 = vcvt.f32.s32 %v11837_v7  ;;  %vm14603_vm0 = vcmp.eq.s32.totalorder %v8719_v43, %v3212_v46  ;;  %v12044_v20 = vsel %vm14604_vm1, -1e+30, %v11493_v54 }
0x10fd   :  { %v12037_v12 = vsel %vm14603_vm0, -1e+30, %v11481_v11  ;;  %v3337_v58 = vshll.u32 %v3336_v14, 16  ;;  %vm14605_vm9 = vcmp.eq.s32.totalorder %v8719_v43, %v3240_v16  ;;  %vm14610_vm1 = vcmp.eq.s32.totalorder %v8719_v43, %v3282_v2  ;;  %v14618_v16 = vld [vmem:[#allocation28_spill] sm:$0xff] }
0x10fe   :  { %v3295_v55 = vshll.u32 %v3294_v45, 16  ;;  %v12050_v11 = vsel %vm14605_vm9, -1e+30, %v11506_v9  ;;  %v12063_v30 = vsel %vm14610_vm1, -1e+30, %v14609_v37  ;;  %v14611_v9 = vld [vmem:[#allocation65_spill] sm:$0xff] }
0x10ff   :  { %vm14612_vm9 = vnez %v14611_v9  ;;  %v3365_v2 = vshll.u32 %v3364_v60, 16  ;;  %v14631_v37 = vld [vmem:[#allocation33_spill] sm:$0xff] }
0x1104   :  { %3437 = vmax.xlane.f32.xlu0 %v11996_v29 }
0x1108   :  { %3417 = vmax.xlane.f32.xlu1 %v12003_v48 }
0x110c   :  { %3415 = vmax.xlane.f32.xlu1 %v12010_v63 }
0x1110   :  { %3421 = vmax.xlane.f32.xlu1 %v12017_v1 }
0x1114   :  { %3419 = vmax.xlane.f32.xlu1 %v12024_v27 }
0x1118   :  { %3425 = vmax.xlane.f32.xlu1 %v12030_v35 }
0x111c   :  { %3423 = vmax.xlane.f32.xlu1 %v12037_v12 }
0x111e   :  { %v3292_v21 = vpop.xlane.xlu0 %3291 }
0x111f   :  { %v3293_v23 = vcvt.f32.s32 %v3292_v21 }
0x1120   :  { %3429 = vmax.xlane.f32.xlu1 %v12044_v20 }
0x1121   :  { %v3296_v7 = vadd.s32 %v3295_v55, %v3293_v23  ;;  %v3351_v55 = vshll.u32 %v3350_v17, 16  ;;  %v14624_v23 = vld [vmem:[#allocation35_spill] sm:$0xff] }
0x1122   :  { %v3334_v36 = vpop.xlane.xlu0 %3333 }
0x1123   :  { %v3335_v46 = vcvt.f32.s32 %v3334_v36  ;;  %vm3377_vm0 = vcmp.eq.s32.totalorder %v8719_v43, %v3296_v7 }
0x1124   :  { %3427 = vmax.xlane.f32.xlu1 %v12050_v11  ;;  %vm12056_vm2 = vmor %vm14606_vm15, %vm3377_vm0  ;;  %vm14616_vm15 = vcmp.eq.s32.totalorder %v8719_v43, %v3268_v62  ;;  %v12080_v61 = vsel %vm3377_vm0, -1e+30, %v14617_v53 }
0x1125   :  { %v3338_v50 = vadd.s32 %v3337_v58, %v3335_v46  ;;  %v12076_v57 = vsel %vm14616_vm15, -1e+30, %v14615_v28 }
0x1127   :  { %vm3380_vm10 = vcmp.eq.s32.totalorder %v8719_v43, %v3338_v50 }
0x1128   :  { %3433 = vmax.xlane.f32.xlu1 %v12063_v30  ;;  %vm12069_vm11 = vmor %vm14612_vm9, %vm3380_vm10  ;;  %v12084_v56 = vsel %vm3380_vm10, -1e+30, %v14618_v16 }
0x112c   :  { %3431 = vmax.xlane.f32.xlu1 %v12076_v57 }
0x1130   :  { %3435 = vmax.xlane.f32.xlu1 %v12080_v61 }
0x1134   :  { %3441 = vmax.xlane.f32.xlu1 %v12084_v56 }
0x1154   :  { %v3362_v18 = vpop.xlane.xlu1 %3361 }
0x1155   :  { %v3363_v0 = vcvt.f32.s32 %v3362_v18 }
0x1157   :  { %v3366_v22 = vadd.s32 %v3365_v2, %v3363_v0 }
0x1159   :  { %vm3382_vm0 = vcmp.eq.s32.totalorder %v8719_v43, %v3366_v22 }
0x115a   :  { %vm12094_vm1 = vmor %vm11599_vm14, %vm3382_vm0  ;;  %v12099_v52 = vsel %vm3382_vm0, -1e+30, %v14623_v4 }
0x115b   :  { %3445 = vmax.xlane.f32.xlu0 %v12099_v52 }
0x115c   :  { %v3320_v8 = vpop.xlane.xlu0 %3319 }
0x115d   :  { %v3321_v45 = vcvt.f32.s32 %v3320_v8 }
0x115f   :  { %v3324_v21 = vadd.s32 %v3323_v5, %v3321_v45 }
0x1160   :  { %v3348_v6 = vpop.xlane.xlu1 %3347 }
0x1161   :  { %v3349_v14 = vcvt.f32.s32 %v3348_v6  ;;  %vm3379_vm10 = vcmp.eq.s32.totalorder %v8719_v43, %v3324_v21 }
0x1162   :  { %v12105_v7 = vsel %vm3379_vm10, -1e+30, %v14624_v23  ;;  %vm12109_vm14 = vmor %vm11591_vm8, %vm3379_vm10 }
0x1163   :  { %v3352_v46 = vadd.s32 %v3351_v55, %v3349_v14  ;;  %3439 = vmax.xlane.f32.xlu1 %v12105_v7 }
0x1164   :  { %v12125_v28 = vpop.permute.xlu1 %5331 }
0x1165   :  { %vm3381_vm9 = vcmp.eq.s32.totalorder %v8719_v43, %v3352_v46  ;;  %14632 = vst [vmem:[#allocation37_spill] sm:$0xff] %v12125_v28 }
0x1166   :  { %vm12117_vm15 = vmor %vm11608_vm13, %vm3381_vm9  ;;  %v12122_v9 = vsel %vm3381_vm9, -1e+30, %v14631_v37 }
0x1167   :  { %3443 = vmax.xlane.f32.xlu1 %v12122_v9 }
0x1195   :  { %v3418_v53 = vpop.xlane.xlu1 %3417 }
0x1196   :  { %vm3448_vm8 = vcmp.eq.f32.partialorder %v12003_v48, %v3418_v53 }
0x1197   :  { %v12129_v16 = vsel %vm3448_vm8, %v8719_v43, 128 }
0x1198   :  { %v3494_v60 = vshra.s32 %v12129_v16, 16 }
0x1199   :  { %v3416_v18 = vpop.xlane.xlu1 %3415 }
0x119a   :  { %vm3447_vm13 = vcmp.eq.f32.partialorder %v12010_v63, %v3416_v18  ;;  %v12133_v2 = vcvt.s32.f32 %v3494_v60 }
0x119b   :  { %v12136_v0 = vsel %vm3447_vm13, %v8719_v43, 128 }
0x119c   :  { %v3480_v22 = vshra.s32 %v12136_v0, 16  ;;  %3497 = vmin.xlane.f32.xlu0 %v12133_v2 }
0x119d   :  { %v3422_v40 = vpop.xlane.xlu1 %3421 }
0x119e   :  { %vm3450_vm0 = vcmp.eq.f32.partialorder %v12017_v1, %v3422_v40  ;;  %v12141_v48 = vcvt.s32.f32 %v3480_v22 }
0x119f   :  { %v12144_v31 = vsel %vm3450_vm0, %v8719_v43, 128 }
0x11a0   :  { %v3522_v4 = vshra.s32 %v12144_v31, 16  ;;  %3483 = vmin.xlane.f32.xlu1 %v12141_v48 }
0x11a1   :  { %v3420_v63 = vpop.xlane.xlu1 %3419 }
0x11a2   :  { %vm3449_vm10 = vcmp.eq.f32.partialorder %v12024_v27, %v3420_v63  ;;  %v12149_v8 = vcvt.s32.f32 %v3522_v4 }
0x11a3   :  { %v12152_v5 = vsel %vm3449_vm10, %v8719_v43, 128 }
0x11a4   :  { %v3508_v17 = vshra.s32 %v12152_v5, 16  ;;  %3525 = vmin.xlane.f32.xlu0 %v12149_v8 }
0x11a5   :  { %v3426_v1 = vpop.xlane.xlu1 %3425 }
0x11a6   :  { %vm3452_vm9 = vcmp.eq.f32.partialorder %v12030_v35, %v3426_v1  ;;  %v12157_v45 = vcvt.s32.f32 %v3508_v17  ;;  %v12172_v35 = vpop.permute.xlu0 %4974 }
0x11a7   :  { %v12160_v21 = vsel %vm3452_vm9, %v8719_v43, 128  ;;  %14633 = vst [vmem:[#allocation34_spill] sm:$0xff] %v12172_v35 }
0x11a8   :  { %v3550_v6 = vshra.s32 %v12160_v21, 16  ;;  %3511 = vmin.xlane.f32.xlu1 %v12157_v45 }
0x11a9   :  { %v3424_v27 = vpop.xlane.xlu1 %3423 }
0x11aa   :  { %vm3451_vm8 = vcmp.eq.f32.partialorder %v12037_v12, %v3424_v27  ;;  %v12165_v55 = vcvt.s32.f32 %v3550_v6  ;;  %v3438_v37 = vpop.xlane.xlu0 %3437  ;;  %v14634_v6 = vld [vmem:[#allocation40_spill] sm:$0xff] }
0x11ab   :  { %v12168_v14 = vsel %vm3451_vm8, %v8719_v43, 128  ;;  %vm3458_vm0 = vcmp.eq.f32.partialorder %v11996_v29, %v3438_v37 }
0x11ac   :  { %v3536_v23 = vshra.s32 %v12168_v14, 16  ;;  %3553 = vmin.xlane.f32.xlu0 %v12165_v55 }
0x11ad   :  { %v3430_v36 = vpop.xlane.xlu1 %3429 }
0x11ae   :  { %vm3454_vm13 = vcmp.eq.f32.partialorder %v12044_v20, %v3430_v36  ;;  %v12175_v46 = vcvt.s32.f32 %v3536_v23  ;;  %v12188_v20 = vsel %vm3458_vm0, %v8719_v43, 128 }
0x11af   :  { %v12178_v38 = vsel %vm3454_vm13, %v8719_v43, 128  ;;  %v3634_v63 = vshra.s32 %v12188_v20, 16 }
0x11b0   :  { %v3578_v12 = vshra.s32 %v12178_v38, 16  ;;  %3539 = vmin.xlane.f32.xlu1 %v12175_v46 }
0x11b1   :  { %v3428_v53 = vpop.xlane.xlu1 %3427  ;;  %v12198_v1 = vcvt.s32.f32 %v3634_v63 }
0x11b2   :  { %v12182_v60 = vcvt.s32.f32 %v3578_v12  ;;  %vm3453_vm8 = vcmp.eq.f32.partialorder %v12050_v11, %v3428_v53 }
0x11b3   :  { %v12212_v12 = vsel %vm3453_vm8, %v8719_v43, 128 }
0x11b4   :  { %3581 = vmin.xlane.f32.xlu0 %v12182_v60  ;;  %v3564_v37 = vshra.s32 %v12212_v12, 16 }
0x11b5   :  { %v3434_v18 = vpop.xlane.xlu1 %3433 }
0x11b6   :  { %vm3456_vm10 = vcmp.eq.f32.partialorder %v12063_v30, %v3434_v18 }
0x11b7   :  { %v12191_v22 = vsel %vm3456_vm10, %v8719_v43, 128 }
0x11b8   :  { %v3606_v40 = vshra.s32 %v12191_v22, 16 }
0x11b9   :  { %v3432_v4 = vpop.xlane.xlu1 %3431 }
0x11ba   :  { %v12195_v17 = vcvt.s32.f32 %v3606_v40  ;;  %vm3455_vm13 = vcmp.eq.f32.partialorder %v12076_v57, %v3432_v4  ;;  %v12221_v40 = vcvt.s32.f32 %v3564_v37 }
0x11bc   :  { %3609 = vmin.xlane.f32.xlu0 %v12195_v17 }
0x11bd   :  { %v3436_v29 = vpop.xlane.xlu1 %3435 }
0x11be   :  { %vm3457_vm0 = vcmp.eq.f32.partialorder %v12080_v61, %v3436_v29 }
0x11bf   :  { %v12224_v63 = vsel %vm3457_vm0, %v8719_v43, 128 }
0x11c0   :  { %3637 = vmin.xlane.f32.xlu0 %v12198_v1  ;;  %v3620_v11 = vshra.s32 %v12224_v63, 16 }
0x11c1   :  { %v3442_v30 = vpop.xlane.xlu1 %3441  ;;  %5335 = vperm.xlu1 %7984, %v14634_v6  }
0x11c2   :  { %vm3460_vm9 = vcmp.eq.f32.partialorder %v12084_v56, %v3442_v30  ;;  %v12217_v56 = vsel %vm3455_vm13, %v8719_v43, 128  ;;  %v12236_v29 = vcvt.s32.f32 %v3620_v11 }
0x11c3   :  { %v12204_v27 = vsel %vm3460_vm9, %v8719_v43, 128  ;;  %v3592_v18 = vshra.s32 %v12217_v56, 16 }
0x11c4   :  { %v3662_v23 = vshra.s32 %v12204_v27, 16 }
0x11c5   :  { %v12228_v53 = vcvt.s32.f32 %v3592_v18 }
0x11c6   :  { %v12207_v36 = vcvt.s32.f32 %v3662_v23 }
0x11c8   :  { %3665 = vmin.xlane.f32.xlu0 %v12207_v36 }
0x11e5   :  { %3567 = vmin.xlane.f32.xlu1 %v12221_v40 }
0x11e8   :  { %v3446_v57 = vpop.xlane.xlu0 %3445 }
0x11e9   :  { %vm3462_vm10 = vcmp.eq.f32.partialorder %v12099_v52, %v3446_v57  ;;  %3595 = vmin.xlane.f32.xlu1 %v12228_v53 }
0x11ea   :  { %v12233_v61 = vsel %vm3462_vm10, %v8719_v43, 128 }
0x11eb   :  { %v3690_v4 = vshra.s32 %v12233_v61, 16 }
0x11ed   :  { %3623 = vmin.xlane.f32.xlu1 %v12236_v29  ;;  %v12239_v30 = vcvt.s32.f32 %v3690_v4 }
0x11ef   :  { %3693 = vmin.xlane.f32.xlu0 %v12239_v30 }
0x11f0   :  { %v3440_v6 = vpop.xlane.xlu1 %3439 }
0x11f1   :  { %vm3459_vm9 = vcmp.eq.f32.partialorder %v12105_v7, %v3440_v6  ;;  %v14635_v7 = vmov 0   ;;  %v3493_v6 = vand.u32 65535, %v12129_v16  ;;  %v3507_v16 = vand.u32 65535, %v12152_v5 }
0x11f2   :  { %v12244_v52 = vsel %vm3459_vm9, %v8719_v43, 128 }
0x11f3   :  { %v3648_v23 = vshra.s32 %v12244_v52, 16 }
0x11f4   :  { %v3444_v37 = vpop.xlane.xlu1 %3443 }
0x11f5   :  { %vm3461_vm8 = vcmp.eq.f32.partialorder %v12122_v9, %v3444_v37  ;;  %v12248_v18 = vcvt.s32.f32 %v3648_v23  ;;  %v3479_v9 = vand.u32 65535, %v12136_v0  ;;  %v3495_v37 = vcvt.s32.f32 %v3493_v6 }
0x11f6   :  { %v12251_v11 = vsel %vm3461_vm8, %v8719_v43, 128 }
0x11f7   :  { %v3676_v57 = vshra.s32 %v12251_v11, 16  ;;  %3651 = vmin.xlane.f32.xlu1 %v12248_v18  ;;  %v3481_v34 = vcvt.s32.f32 %v3479_v9  ;;  %v3509_v9 = vcvt.s32.f32 %v3507_v16 }
0x11f9   :  { %v12255_v4 = vcvt.s32.f32 %v3676_v57  ;;  %v3521_v57 = vand.u32 65535, %v12144_v31  ;;  %v3549_v31 = vand.u32 65535, %v12160_v21  ;;  %v3577_v21 = vand.u32 65535, %v12178_v38 }
0x11fb   :  { %3679 = vmin.xlane.f32.xlu1 %v12255_v4  ;;  %v3523_v6 = vcvt.s32.f32 %v3521_v57 }
0x1205   :  { %5339 = vperm.xlu0 %7985, %v14582_v42  }
0x1209   :  { %7986 = vset.pattern.permute.xlu0 %v14635_v7 }
0x1229   :  { %v12262_v23 = vpop.xlane.xlu0 %3497 }
0x122a   :  { %vm3499_vm13 = vcmp.eq.f32.partialorder %v12133_v2, %v12262_v23 }
0x122b   :  { %v3500_v35 = vsel %vm3499_vm13, %v3495_v37, inf  ;;  %v3551_v37 = vcvt.s32.f32 %v3549_v31  ;;  %v3605_v31 = vand.u32 65535, %v12191_v22 }
0x122c   :  { %3501 = vmin.xlane.f32.xlu0 %v3500_v35 }
0x122d   :  { %v12267_v28 = vpop.xlane.xlu1 %3483 }
0x122e   :  { %vm3485_vm0 = vcmp.eq.f32.partialorder %v12141_v48, %v12267_v28  ;;  %v3535_v48 = vand.u32 65535, %v12168_v14  ;;  %v3579_v14 = vcvt.s32.f32 %v3577_v21 }
0x122f   :  { %v3486_v42 = vsel %vm3485_vm0, %v3481_v34, inf }
0x1230   :  { %3487 = vmin.xlane.f32.xlu1 %v3486_v42  ;;  %v3537_v42 = vcvt.s32.f32 %v3535_v48 }
0x1231   :  { %v12272_v0 = vpop.xlane.xlu0 %3525 }
0x1232   :  { %vm3527_vm10 = vcmp.eq.f32.partialorder %v12149_v8, %v12272_v0 }
0x1233   :  { %v3528_v2 = vsel %vm3527_vm10, %v3523_v6, inf }
0x1234   :  { %3529 = vmin.xlane.f32.xlu0 %v3528_v2 }
0x1235   :  { %v12277_v35 = vpop.xlane.xlu1 %3511 }
0x1236   :  { %vm3513_vm9 = vcmp.eq.f32.partialorder %v12157_v45, %v12277_v35 }
0x1237   :  { %v3514_v34 = vsel %vm3513_vm9, %v3509_v9, inf }
0x1238   :  { %3515 = vmin.xlane.f32.xlu1 %v3514_v34 }
0x1239   :  { %v12282_v5 = vpop.xlane.xlu0 %3553 }
0x123a   :  { %vm3555_vm8 = vcmp.eq.f32.partialorder %v12165_v55, %v12282_v5  ;;  %v3563_v55 = vand.u32 65535, %v12212_v12  ;;  %v3619_v12 = vand.u32 65535, %v12224_v63  ;;  %v3560_v49 = vcvt.f32.s32 %v12282_v5 }
0x123b   :  { %v3556_v8 = vsel %vm3555_vm8, %v3551_v37, inf }
0x123c   :  { %3557 = vmin.xlane.f32.xlu0 %v3556_v8  ;;  %v3565_v34 = vcvt.s32.f32 %v3563_v55  ;;  %v3607_v8 = vcvt.s32.f32 %v3605_v31 }
0x123d   :  { %v12287_v57 = vpop.xlane.xlu1 %3539 }
0x123e   :  { %vm3541_vm13 = vcmp.eq.f32.partialorder %v12175_v46, %v12287_v57  ;;  %v3591_v46 = vand.u32 65535, %v12217_v56 }
0x123f   :  { %v3542_v45 = vsel %vm3541_vm13, %v3537_v42, inf  ;;  %v3621_v42 = vcvt.s32.f32 %v3619_v12 }
0x1240   :  { %3543 = vmin.xlane.f32.xlu1 %v3542_v45  ;;  %v3593_v56 = vcvt.s32.f32 %v3591_v46 }
0x1241   :  { %v12291_v16 = vpop.xlane.xlu0 %3581  ;;  %v12296_v2 = vpop.permute.xlu1 %5335 }
0x1242   :  { %vm3583_vm0 = vcmp.eq.f32.partialorder %v12182_v60, %v12291_v16  ;;  %v3633_v60 = vand.u32 65535, %v12188_v20  ;;  %v3661_v20 = vand.u32 65535, %v12204_v27  ;;  %v3675_v27 = vand.u32 65535, %v12251_v11 }
0x1243   :  { %v3584_v6 = vsel %vm3583_vm0, %v3579_v14, inf }
0x1244   :  { %3585 = vmin.xlane.f32.xlu1 %v3584_v6  ;;  %v3635_v45 = vcvt.s32.f32 %v3633_v60  ;;  %v3663_v6 = vcvt.s32.f32 %v3661_v20  ;;  %v3677_v46 = vcvt.s32.f32 %v3675_v27  ;;  %v3689_v60 = vand.u32 65535, %v12233_v61  ;;  %v14639_v20 = vld [vmem:[#allocation45_spill] sm:$0xff] }
0x1249   :  { %v12298_v38 = vpop.xlane.xlu0 %3609 }
0x124a   :  { %vm3611_vm9 = vcmp.eq.f32.partialorder %v12195_v17, %v12298_v38 }
0x124d   :  { %v12310_v37 = vpop.xlane.xlu0 %3637 }
0x124e   :  { %vm3639_vm13 = vcmp.eq.f32.partialorder %v12198_v1, %v12310_v37 }
0x1255   :  { %v12319_v17 = vpop.xlane.xlu0 %3665 }
0x1272   :  { %v12302_v9 = vpop.xlane.xlu1 %3567 }
0x1273   :  { %vm3569_vm10 = vcmp.eq.f32.partialorder %v12221_v40, %v12302_v9  ;;  %v3612_v40 = vsel %vm3611_vm9, %v3607_v8, inf }
0x1274   :  { %v3570_v48 = vsel %vm3569_vm10, %v3565_v34, inf  ;;  %vm3667_vm10 = vcmp.eq.f32.partialorder %v12207_v36, %v12319_v17  ;;  %v14636_v36 = vlaneseq }
0x1275   :  { %3571 = vmin.xlane.f32.xlu1 %v3570_v48  ;;  %v3668_v1 = vsel %vm3667_vm10, %v3663_v6, inf  ;;  %v3647_v48 = vand.u32 65535, %v12244_v52  ;;  %v14638_v52 = vld [vmem:[#allocation41_spill] sm:$0xff] }
0x1276   :  { %v12312_v22 = vpop.xlane.xlu1 %3595  ;;  %v12337_v34 = vshrl.u32 %v14636_v36, 7 }
0x1277   :  { %vm3597_vm8 = vcmp.eq.f32.partialorder %v12228_v53, %v12312_v22  ;;  %v3640_v53 = vsel %vm3639_vm13, %v3635_v45, inf }
0x1278   :  { %v3598_v21 = vsel %vm3597_vm8, %v3593_v56, inf  ;;  %14637 = vst [vmem:[#allocation65_spill] sm:$0xff] %v12337_v34  ;;  %v14050_v11 = vsub.s32 0, %v12337_v34  ;;  %v4983_v56 = vsub.s32 4, %v12337_v34 }
0x1279   :  { %3599 = vmin.xlane.f32.xlu0 %v3598_v21  ;;  %3613 = vmin.xlane.f32.xlu1 %v3612_v40  ;;  %v4618_v21 = vsub.s32 2, %v12337_v34  ;;  %v5348_v40 = vsub.s32 6, %v12337_v34 }
0x127a   :  { %v12321_v63 = vpop.xlane.xlu1 %3623  ;;  %v12352_v8 = vrot.slane %v14638_v52, %v14050_v11  ;;  %v12356_v61 = vrot.slane %v14638_v52, %v4983_v56 }
0x127b   :  { %vm3625_vm0 = vcmp.eq.f32.partialorder %v12236_v29, %v12321_v63  ;;  %v12370_v27 = vrot.slane %v14638_v52, %v5348_v40  ;;  %v14644_v40 = vld [vmem:[#allocation44_spill] sm:$0xff] }
0x127c   :  { %v3626_v14 = vsel %vm3625_vm0, %v3621_v42, inf  ;;  %v12344_v12 = vpop.xlane.xlu0 %3693  ;;  %v4256_v42 = vadd.f32 %v12352_v8, %v14639_v20 }
0x127d   :  { %3627 = vmin.xlane.f32.xlu1 %v3626_v14  ;;  %3641 = vmin.xlane.f32.xlu0 %v3640_v53  ;;  %vm3695_vm13 = vcmp.eq.f32.partialorder %v12239_v30, %v12344_v12  ;;  %v3504_v30 = vcvt.f32.s32 %v12262_v23  ;;  %v14640_v53 = vld [vmem:[#allocation14_spill] sm:$0xff] }
0x127e   :  { %v4986_v6 = vadd.f32 %v12356_v61, %v14640_v53  ;;  %vm4272_vm0 = vcmp.ge.f32.partialorder %v4256_v42, 0.0 }
0x127f   :  { %v3505_v36 = vshll.u32 %v3504_v30, 16 }
0x1280   :  { %v5018_v56 = vmul.f32 0.2, %v4986_v6  ;;  %vm5002_vm10 = vcmp.ge.f32.partialorder %v4986_v6, 0.0 }
0x1281   :  { %3669 = vmin.xlane.f32.xlu0 %v3668_v1  ;;  %v12367_v1 = vrot.slane %v14638_v52, %v4618_v21  ;;  %v14643_v21 = vld [vmem:[#allocation43_spill] sm:$0xff] }
0x1282   :  { %v4255_v52 = vadd.f32 %v12352_v8, %v14643_v21  ;;  %v14649_v21 = vld [vmem:[#allocation48_spill] sm:$0xff] }
0x1284   :  { %v12328_v55 = vpop.xlane.xlu1 %3651  ;;  %v12361_v45 = vpop.permute.xlu0 %5339 }
0x1285   :  { %vm3653_vm8 = vcmp.eq.f32.partialorder %v12248_v18, %v12328_v55  ;;  %v3691_v18 = vcvt.s32.f32 %v3689_v60 }
0x1287   :  { %v3696_v14 = vsel %vm3695_vm13, %v3691_v18, inf }
0x1288   :  { %v12330_v31 = vpop.xlane.xlu1 %3679 }
0x1289   :  { %vm3681_vm9 = vcmp.eq.f32.partialorder %v12255_v4, %v12330_v31  ;;  %v3649_v4 = vcvt.s32.f32 %v3647_v48  ;;  %v3490_v48 = vcvt.f32.s32 %v12267_v28 }
0x128a   :  { %v3682_v29 = vsel %vm3681_vm9, %v3677_v46, inf  ;;  %v4288_v46 = vmul.f32 0.2, %v4256_v42 }
0x128b   :  { %3683 = vmin.xlane.f32.xlu0 %v3682_v29  ;;  %v3491_v28 = vshll.u32 %v3490_v48, 16 }
0x128c   :  { %v4304_v53 = vsel %vm4272_vm0, %v4256_v42, %v4288_v46  ;;  %v4287_v46 = vmul.f32 0.2, %v4255_v52 }
0x128e   :  { %5343 = vperm.xlu1 %7984, %v14570_v44   ;;  %v3654_v44 = vsel %vm3653_vm8, %v3649_v4, inf  ;;  %v14641_v4 = vld [vmem:[#allocation61_spill] sm:$0xff] }
0x128f   :  { %v4621_v23 = vadd.f32 %v12367_v1, %v14641_v4 }
0x1291   :  { %v4653_v11 = vmul.f32 0.2, %v4621_v23  ;;  %vm4637_vm13 = vcmp.ge.f32.partialorder %v4621_v23, 0.0 }
0x1292   :  { %7987 = vset.pattern.permute.xlu1 %v14635_v7 }
0x12b2   :  { %3655 = vmin.xlane.f32.xlu1 %v3654_v44  ;;  %v14642_v44 = vld [vmem:[#allocation20_spill] sm:$0xff] }
0x12b3   :  { %v5351_v18 = vadd.f32 %v12370_v27, %v14642_v44 }
0x12b5   :  { %v5383_v34 = vmul.f32 0.2, %v5351_v18  ;;  %vm5367_vm0 = vcmp.ge.f32.partialorder %v5351_v18, 0.0 }
0x12b6   :  { %3697 = vmin.xlane.f32.xlu1 %v3696_v14  ;;  %v4620_v14 = vadd.f32 %v12367_v1, %v14644_v40  ;;  %v4623_v40 = vadd.f32 %v12367_v1, %v14649_v21 }
0x12b8   :  { %v4652_v48 = vmul.f32 0.2, %v4620_v14 }
0x12b9   :  { %v3502_v29 = vpop.xlane.xlu0 %3501 }
0x12ba   :  { %v3503_v60 = vcvt.f32.s32 %v3502_v29  ;;  %v3532_v29 = vcvt.f32.s32 %v12272_v0 }
0x12bc   :  { %v3506_v20 = vadd.s32 %v3505_v36, %v3503_v60  ;;  %v14645_v36 = vmov 0  ;;  %v5034_v60 = vsel %vm5002_vm10, %v4986_v6, %v5018_v56  ;;  %v3533_v6 = vshll.u32 %v3532_v29, 16  ;;  %v14652_v29 = vld [vmem:[#allocation42_spill] sm:$0xff] }
0x12bd   :  { %v3488_v30 = vpop.xlane.xlu1 %3487  ;;  %v3518_v56 = vcvt.f32.s32 %v12277_v35 }
0x12be   :  { %vm3704_vm9 = vcmp.eq.s32.totalorder %v8719_v43, %v3506_v20  ;;  %v3489_v4 = vcvt.f32.s32 %v3488_v30  ;;  %v14650_v30 = vld [vmem:[#allocation17_spill] sm:$0xff] }
0x12bf   :  { %vm12385_vm8 = vmor %vm11875_vm4, %vm3704_vm9  ;;  %vm4271_vm4 = vcmp.ge.f32.partialorder %v4255_v52, 0.0 }
0x12c0   :  { %v14646_v36 = vsel %vm12385_vm8, 4294967295, %v14645_v36  ;;  %v3492_v44 = vadd.s32 %v3491_v28, %v3489_v4  ;;  %v12391_v42 = vsel %vm12385_vm8, %v5034_v60, -1e+30  ;;  %v12395_v0 = vsel %vm12385_vm8, %v4304_v53, -1e+30 }
0x12c1   :  { %14647 = vst [vmem:[#allocation36_spill] sm:$0xff] %v14646_v36  ;;  %14648 = vst [vmem:[#allocation60_spill] sm:$0xff] %v12391_v42  ;;  %5067 = vmax.xlane.f32.xlu1 %v12391_v42  ;;  %4337 = vmax.xlane.f32.xlu0 %v12395_v0  ;;  %v3530_v59 = vpop.xlane.xlu0 %3529  ;;  %v4985_v53 = vadd.f32 %v12356_v61, %v14650_v30  ;;  %v5399_v28 = vsel %vm5367_vm0, %v5351_v18, %v5383_v34  ;;  %vm14656_vm0 = vcmp.ge.f32.partialorder %v4620_v14, 0.0 }
0x12c2   :  { %vm3703_vm9 = vcmp.eq.s32.totalorder %v8719_v43, %v3492_v44  ;;  %v3531_v20 = vcvt.f32.s32 %v3530_v59  ;;  %v4669_v4 = vsel %vm4637_vm13, %v4621_v23, %v4653_v11  ;;  %v12408_v7 = vsel %vm12385_vm8, %v5399_v28, -1e+30 }
0x12c3   :  { %14651 = vst [vmem:[#allocation28_spill] sm:$0xff] %v12408_v7  ;;  %v12412_v35 = vsel %vm12385_vm8, %v4669_v4, -1e+30  ;;  %v4257_v44 = vadd.f32 %v12352_v8, %v14652_v29  ;;  %vm12418_vm10 = vmor %vm11894_vm6, %vm3703_vm9  ;;  %v14653_v59 = vmov 0  ;;  %v4303_v11 = vsel %vm4271_vm4, %v4255_v52, %v4287_v46  ;;  %v14658_v46 = vld [vmem:[#allocation46_spill] sm:$0xff] }
0x12c4   :  { %v3534_v60 = vadd.s32 %v3533_v6, %v3531_v20  ;;  %v14654_v59 = vsel %vm12418_vm10, 4294967295, %v14653_v59  ;;  %v3519_v23 = vshll.u32 %v3518_v56, 16  ;;  %v4668_v6 = vsel %vm14656_vm0, %v4620_v14, %v4652_v48 }
0x12c5   :  { %14655 = vst [vmem:[#allocation5_spill] sm:$0xff] %v14654_v59  ;;  %v3516_v34 = vpop.xlane.xlu1 %3515  ;;  %5432 = vmax.xlane.f32.xlu1 %v12408_v7  ;;  %4702 = vmax.xlane.f32.xlu0 %v12412_v35  ;;  %v4655_v20 = vmul.f32 0.2, %v4623_v40  ;;  %v5017_v21 = vmul.f32 0.2, %v4985_v53  ;;  %v5350_v30 = vadd.f32 %v12370_v27, %v14657_v3  ;;  %vm4639_vm6 = vcmp.ge.f32.partialorder %v4623_v40, 0.0 }
0x12c6   :  { %vm3706_vm13 = vcmp.eq.s32.totalorder %v8719_v43, %v3534_v60  ;;  %v3517_v18 = vcvt.f32.s32 %v3516_v34  ;;  %v12431_v4 = vsel %vm12418_vm10, %v4303_v11, -1e+30  ;;  %v12435_v52 = vsel %vm12418_vm10, %v4668_v6, -1e+30  ;;  %v14662_v60 = vld [vmem:[#allocation62_spill] sm:$0xff] }
0x12c7   :  { %vm5001_vm4 = vcmp.ge.f32.partialorder %v4985_v53, 0.0  ;;  %v4258_v56 = vadd.f32 %v12352_v8, %v14658_v46  ;;  %vm12441_vm9 = vmor %vm11908_vm5, %vm3706_vm13  ;;  %v14659_v14 = vmov 0  ;;  %v4289_v48 = vmul.f32 0.2, %v4257_v44  ;;  %v14671_v59 = vld [vmem:[#allocation22_spill] sm:$0xff] }
0x12c8   :  { %v3520_v28 = vadd.s32 %v3519_v23, %v3517_v18  ;;  %v14660_v14 = vsel %vm12441_vm9, 4294967295, %v14659_v14  ;;  %v4622_v29 = vadd.f32 %v12367_v1, %v14662_v60  ;;  %v5382_v34 = vmul.f32 0.2, %v5350_v30  ;;  %v14668_v60 = vld [vmem:[#allocation26_spill] sm:$0xff] }
0x12c9   :  { %14661 = vst [vmem:[#allocation4_spill] sm:$0xff] %v14660_v14  ;;  %4335 = vmax.xlane.f32.xlu1 %v12431_v4  ;;  %4700 = vmax.xlane.f32.xlu0 %v12435_v52  ;;  %v3558_v11 = vpop.xlane.xlu0 %3557  ;;  %v5033_v23 = vsel %vm5001_vm4, %v4985_v53, %v5017_v21  ;;  %v4671_v18 = vsel %vm4639_vm6, %v4623_v40, %v4655_v20  ;;  %vm4273_vm8 = vcmp.ge.f32.partialorder %v4257_v44, 0.0  ;;  %vm5366_vm5 = vcmp.ge.f32.partialorder %v5350_v30, 0.0  ;;  %v14667_v20 = vld [vmem:[#allocation16_spill] sm:$0xff] }
0x12ca   :  { %vm3705_vm0 = vcmp.eq.s32.totalorder %v8719_v43, %v3520_v28  ;;  %v12453_v6 = vsel %vm12418_vm10, %v5033_v23, -1e+30  ;;  %v12457_v3 = vsel %vm12441_vm9, %v4671_v18, -1e+30  ;;  %v4290_v46 = vmul.f32 0.2, %v4258_v56 }
0x12cb   :  { %14663 = vst [vmem:[#allocation35_spill] sm:$0xff] %v12453_v6  ;;  %vm12461_vm13 = vmor %vm11922_vm7, %vm3705_vm0  ;;  %v14664_v28 = vmov 0  ;;  %v4654_v5 = vmul.f32 0.2, %v4622_v29  ;;  %v3559_v40 = vcvt.f32.s32 %v3558_v11  ;;  %v4305_v53 = vsel %vm4273_vm8, %v4257_v44, %v4289_v48  ;;  %v14670_v11 = vld [vmem:[#allocation53_spill] sm:$0xff] }
0x12cc   :  { %v14665_v28 = vsel %vm12461_vm13, 4294967295, %v14664_v28  ;;  %vm4274_vm6 = vcmp.ge.f32.partialorder %v4258_v56, 0.0  ;;  %v4988_v21 = vadd.f32 %v12356_v61, %v14667_v20  ;;  %v5352_v23 = vadd.f32 %v12370_v27, %v14668_v60 }
0x12cd   :  { %14666 = vst [vmem:[#allocation66_spill] sm:$0xff] %v14665_v28  ;;  %5065 = vmax.xlane.f32.xlu1 %v12453_v6  ;;  %4706 = vmax.xlane.f32.xlu0 %v12457_v3  ;;  %v3544_v18 = vpop.xlane.xlu1 %3543  ;;  %v5398_v10 = vsel %vm5366_vm5, %v5350_v30, %v5382_v34  ;;  %vm4638_vm7 = vcmp.ge.f32.partialorder %v4622_v29, 0.0  ;;  %v3561_v36 = vshll.u32 %v3560_v49, 16  ;;  %v3546_v7 = vcvt.f32.s32 %v12287_v57 }
0x12ce   :  { %v12474_v6 = vsel %vm12418_vm10, %v5398_v10, -1e+30  ;;  %v12478_v44 = vsel %vm12461_vm13, %v4305_v53, -1e+30  ;;  %v4306_v48 = vsel %vm4274_vm6, %v4258_v56, %v4290_v46  ;;  %v4625_v30 = vadd.f32 %v12367_v1, %v14670_v11 }
0x12cf   :  { %14669 = vst [vmem:[#allocation67_spill] sm:$0xff] %v12474_v6  ;;  %v3562_v34 = vadd.s32 %v3561_v36, %v3559_v40  ;;  %v3545_v49 = vcvt.f32.s32 %v3544_v18  ;;  %v4670_v20 = vsel %vm4638_vm7, %v4622_v29, %v4654_v5  ;;  %v5020_v57 = vmul.f32 0.2, %v4988_v21  ;;  %v14672_v36 = vld [vmem:[#allocation50_spill] sm:$0xff] }
0x12d0   :  { %v5384_v60 = vmul.f32 0.2, %v5352_v23  ;;  %v5353_v10 = vadd.f32 %v12370_v27, %v14671_v59  ;;  %vm5004_vm8 = vcmp.ge.f32.partialorder %v4988_v21, 0.0  ;;  %v3547_v42 = vshll.u32 %v3546_v7, 16  ;;  %v14673_v59 = vld [vmem:[#allocation59_spill] sm:$0xff] }
0x12d1   :  { %5430 = vmax.xlane.f32.xlu1 %v12474_v6  ;;  %4339 = vmax.xlane.f32.xlu0 %v12478_v44  ;;  %v12488_v53 = vsel %vm12461_vm13, %v4670_v20, -1e+30  ;;  %v12492_v56 = vsel %vm12441_vm9, %v4306_v48, -1e+30  ;;  %vm5368_vm4 = vcmp.ge.f32.partialorder %v5352_v23, 0.0  ;;  %v4259_v29 = vadd.f32 %v12352_v8, %v14672_v36 }
0x12d2   :  { %v4657_v46 = vmul.f32 0.2, %v4625_v30  ;;  %vm3708_vm0 = vcmp.eq.s32.totalorder %v8719_v43, %v3562_v34  ;;  %v3548_v7 = vadd.s32 %v3547_v42, %v3545_v49  ;;  %v4987_v5 = vadd.f32 %v12356_v61, %v14673_v59  ;;  %v14680_v34 = vld [vmem:[#allocation51_spill] sm:$0xff] }
0x12d3   :  { %v5385_v40 = vmul.f32 0.2, %v5353_v10  ;;  %v5400_v18 = vsel %vm5368_vm4, %v5352_v23, %v5384_v60  ;;  %v5036_v11 = vsel %vm5004_vm8, %v4988_v21, %v5020_v57  ;;  %vm5369_vm5 = vcmp.ge.f32.partialorder %v5353_v10, 0.0  ;;  %vm12511_vm7 = vmor %vm11932_vm3, %vm3708_vm0  ;;  %v14679_v21 = vld [vmem:[#allocation49_spill] sm:$0xff] }
0x12d4   :  { %v12503_v48 = vsel %vm12461_vm13, %v5400_v18, -1e+30  ;;  %v12507_v20 = vsel %vm12441_vm9, %v5036_v11, -1e+30  ;;  %vm4641_vm6 = vcmp.ge.f32.partialorder %v4625_v30, 0.0  ;;  %v14676_v42 = vmov 0 }
0x12d5   :  { %4704 = vmax.xlane.f32.xlu0 %v12488_v53  ;;  %4341 = vmax.xlane.f32.xlu1 %v12492_v56  ;;  %14674 = vst [vmem:[#allocation33_spill] sm:$0xff] %v12503_v48  ;;  %14675 = vst [vmem:[#allocation40_spill] sm:$0xff] %v12507_v20  ;;  %v14677_v42 = vsel %vm12511_vm7, 4294967295, %v14676_v42  ;;  %v4260_v23 = vadd.f32 %v12352_v8, %v14679_v21  ;;  %v4624_v49 = vadd.f32 %v12367_v1, %v14680_v34  ;;  %v14682_v11 = vmov 0  ;;  %v3586_v34 = vpop.xlane.xlu1 %3585 }
0x12d6   :  { %14678 = vst [vmem:[#allocation41_spill] sm:$0xff] %v14677_v42  ;;  %vm3707_vm8 = vcmp.eq.s32.totalorder %v8719_v43, %v3548_v7  ;;  %v4291_v57 = vmul.f32 0.2, %v4259_v29  ;;  %v5019_v60 = vmul.f32 0.2, %v4987_v5  ;;  %v5401_v36 = vsel %vm5369_vm5, %v5353_v10, %v5385_v40  ;;  %v14686_v40 = vld [vmem:[#allocation19_spill] sm:$0xff] }
0x12d7   :  { %v4673_v39 = vsel %vm4641_vm6, %v4625_v30, %v4657_v46  ;;  %v12524_v59 = vsel %vm12441_vm9, %v5401_v36, -1e+30  ;;  %vm5003_vm3 = vcmp.ge.f32.partialorder %v4987_v5, 0.0  ;;  %vm4275_vm4 = vcmp.ge.f32.partialorder %v4259_v29, 0.0  ;;  %vm12532_vm0 = vmor %vm11944_vm12, %vm3707_vm8  ;;  %v14685_v46 = vld [vmem:[#allocation6_spill] sm:$0xff] }
0x12d8   :  { %14681 = vst [vmem:[#allocation45_spill] sm:$0xff] %v12524_v59  ;;  %v12528_v18 = vsel %vm12511_vm7, %v4673_v39, -1e+30  ;;  %v14683_v11 = vsel %vm12532_vm0, 4294967295, %v14682_v11  ;;  %v4292_v30 = vmul.f32 0.2, %v4260_v23  ;;  %v4990_v7 = vadd.f32 %v12356_v61, %v14685_v46 }
0x12d9   :  { %5434 = vmax.xlane.f32.xlu0 %v12503_v48  ;;  %5071 = vmax.xlane.f32.xlu1 %v12507_v20  ;;  %14684 = vst [vmem:[#allocation14_spill] sm:$0xff] %v14683_v11  ;;  %v4656_v10 = vmul.f32 0.2, %v4624_v49  ;;  %vm4276_vm5 = vcmp.ge.f32.partialorder %v4260_v23, 0.0  ;;  %v4989_v21 = vadd.f32 %v12356_v61, %v14686_v40  ;;  %v5035_v36 = vsel %vm5003_vm3, %v4987_v5, %v5019_v60  ;;  %v14689_v60 = vld [vmem:[#allocation29_spill] sm:$0xff] }
0x12da   :  { %v4307_v13 = vsel %vm4275_vm4, %v4259_v29, %v4291_v57  ;;  %vm4640_vm12 = vcmp.ge.f32.partialorder %v4624_v49, 0.0  ;;  %v3588_v39 = vcvt.f32.s32 %v12291_v16  ;;  %v12545_v14 = vsel %vm12461_vm13, %v5035_v36, -1e+30  ;;  %v14688_v57 = vld [vmem:[#allocation31_spill] sm:$0xff] }
0x12db   :  { %14687 = vst [vmem:[#allocation61_spill] sm:$0xff] %v12545_v14  ;;  %v12549_v48 = vsel %vm12532_vm0, %v4307_v13, -1e+30  ;;  %v5022_v46 = vmul.f32 0.2, %v4990_v7  ;;  %v3587_v40 = vcvt.f32.s32 %v3586_v34  ;;  %v4308_v5 = vsel %vm4276_vm5, %v4260_v23, %v4292_v30  ;;  %v14690_v23 = vld [vmem:[#allocation52_spill] sm:$0xff] }
0x12dc   :  { %v5021_v29 = vmul.f32 0.2, %v4989_v21  ;;  %v5354_v16 = vadd.f32 %v12370_v27, %v14688_v57  ;;  %v5355_v36 = vadd.f32 %v12370_v27, %v14689_v60  ;;  %vm5006_vm6 = vcmp.ge.f32.partialorder %v4990_v7, 0.0  ;;  %v14691_v30 = vld [vmem:[#allocation56_spill] sm:$0xff] }
0x12dd   :  { %5436 = vmax.xlane.f32.xlu1 %v12524_v59  ;;  %4710 = vmax.xlane.f32.xlu0 %v12528_v18  ;;  %v4672_v59 = vsel %vm4640_vm12, %v4624_v49, %v4656_v10  ;;  %v3589_v28 = vshll.u32 %v3588_v39, 16  ;;  %v12563_v6 = vsel %vm12511_vm7, %v4308_v5, -1e+30  ;;  %vm5005_vm8 = vcmp.ge.f32.partialorder %v4989_v21, 0.0 }
0x12de   :  { %v12559_v13 = vsel %vm12532_vm0, %v4672_v59, -1e+30  ;;  %v4262_v49 = vadd.f32 %v12352_v8, %v14690_v23  ;;  %v4627_v10 = vadd.f32 %v12367_v1, %v14691_v30  ;;  %v5386_v39 = vmul.f32 0.2, %v5354_v16 }
0x12df   :  { %v3590_v34 = vadd.s32 %v3589_v28, %v3587_v40  ;;  %v5387_v57 = vmul.f32 0.2, %v5355_v36  ;;  %v5037_v59 = vsel %vm5005_vm8, %v4989_v21, %v5021_v29  ;;  %v5038_v60 = vsel %vm5006_vm6, %v4990_v7, %v5022_v46  ;;  %v14694_v21 = vld [vmem:[#allocation21_spill] sm:$0xff] }
0x12e0   :  { %v12573_v5 = vsel %vm12532_vm0, %v5037_v59, -1e+30  ;;  %vm5370_vm3 = vcmp.ge.f32.partialorder %v5354_v16, 0.0  ;;  %vm5371_vm4 = vcmp.ge.f32.partialorder %v5355_v36, 0.0  ;;  %v4294_v23 = vmul.f32 0.2, %v4262_v49 }
0x12e1   :  { %5069 = vmax.xlane.f32.xlu1 %v12545_v14  ;;  %4343 = vmax.xlane.f32.xlu0 %v12549_v48  ;;  %14692 = vst [vmem:[#allocation20_spill] sm:$0xff] %v12573_v5  ;;  %v12577_v14 = vsel %vm12511_vm7, %v5038_v60, -1e+30  ;;  %vm3710_vm5 = vcmp.eq.s32.totalorder %v8719_v43, %v3590_v34  ;;  %v4659_v28 = vmul.f32 0.2, %v4627_v10  ;;  %v4992_v7 = vadd.f32 %v12356_v61, %v14694_v21 }
0x12e2   :  { %14693 = vst [vmem:[#allocation43_spill] sm:$0xff] %v12577_v14  ;;  %v5402_v46 = vsel %vm5370_vm3, %v5354_v16, %v5386_v39  ;;  %v5403_v40 = vsel %vm5371_vm4, %v5355_v36, %v5387_v57  ;;  %vm4643_vm12 = vcmp.ge.f32.partialorder %v4627_v10, 0.0  ;;  %vm4278_vm6 = vcmp.ge.f32.partialorder %v4262_v49, 0.0 }
0x12e3   :  { %v12586_v29 = vsel %vm12532_vm0, %v5402_v46, -1e+30  ;;  %v12590_v30 = vsel %vm12511_vm7, %v5403_v40, -1e+30  ;;  %vm14697_vm8 = vnez %v14586_v24  ;;  %v14698_v34 = vmov 0  ;;  %v14704_v46 = vld [vmem:[#allocation57_spill] sm:$0xff] }
0x12e4   :  { %14695 = vst [vmem:[#allocation44_spill] sm:$0xff] %v12586_v29  ;;  %14696 = vst [vmem:[#allocation48_spill] sm:$0xff] %v12590_v30  ;;  %v5024_v16 = vmul.f32 0.2, %v4992_v7  ;;  %v4675_v36 = vsel %vm4643_vm12, %v4627_v10, %v4659_v28  ;;  %v4310_v39 = vsel %vm4278_vm6, %v4262_v49, %v4294_v23  ;;  %vm5008_vm3 = vcmp.ge.f32.partialorder %v4992_v7, 0.0  ;;  %v14702_v10 = vld [vmem:[#allocation47_spill] sm:$0xff] }
0x12e5   :  { %4708 = vmax.xlane.f32.xlu0 %v12559_v13  ;;  %4345 = vmax.xlane.f32.xlu1 %v12563_v6  ;;  %vm12594_vm9 = vmor %vm14697_vm8, %vm3710_vm5  ;;  %v3574_v49 = vcvt.f32.s32 %v12302_v9  ;;  %v4261_v23 = vadd.f32 %v12352_v8, %v14702_v10  ;;  %v14703_v28 = vld [vmem:[#allocation55_spill] sm:$0xff]  ;;  %v4264_v40 = vadd.f32 %v12352_v8, %v14704_v46  ;;  %v3644_v46 = vcvt.f32.s32 %v12310_v37 }
0x12e6   :  { %v14699_v34 = vsel %vm12594_vm9, 4294967295, %v14698_v34  ;;  %v12602_v57 = vsel %vm12594_vm9, %v4675_v36, -1e+30  ;;  %v12606_v59 = vsel %vm12594_vm9, %v4310_v39, -1e+30  ;;  %v5040_v24 = vsel %vm5008_vm3, %v4992_v7, %v5024_v16  ;;  %v14705_v9 = vld [vmem:[#allocation75_spill] sm:$0xff] }
0x12e7   :  { %14700 = vst [vmem:[#allocation17_spill] sm:$0xff] %v14699_v34  ;;  %v12612_v60 = vsel %vm12594_vm9, %v5040_v24, -1e+30  ;;  %v4626_v21 = vadd.f32 %v12367_v1, %v14703_v28  ;;  %v3616_v7 = vcvt.f32.s32 %v12298_v38  ;;  %v3575_v16 = vshll.u32 %v3574_v49, 16  ;;  %v14706_v49 = vld [vmem:[#allocation32_spill] sm:$0xff] }
0x12e8   :  { %14701 = vst [vmem:[#allocation42_spill] sm:$0xff] %v12612_v60  ;;  %v4293_v24 = vmul.f32 0.2, %v4261_v23  ;;  %vm4277_vm4 = vcmp.ge.f32.partialorder %v4261_v23, 0.0  ;;  %vm4280_vm12 = vcmp.ge.f32.partialorder %v4264_v40, 0.0  ;;  %vm14707_vm8 = vnez %v14588_v33 }
0x12e9   :  { %5073 = vmax.xlane.f32.xlu0 %v12573_v5  ;;  %5075 = vmax.xlane.f32.xlu1 %v12577_v14  ;;  %v4658_v42 = vmul.f32 0.2, %v4626_v21  ;;  %vm4642_vm5 = vcmp.ge.f32.partialorder %v4626_v21, 0.0  ;;  %v3617_v28 = vshll.u32 %v3616_v7, 16  ;;  %v14711_v7 = vld [vmem:[#allocation68_spill] sm:$0xff]  ;;  %v3645_v33 = vshll.u32 %v3644_v46, 16 }
0x12ea   :  { %v4266_v37 = vadd.f32 %v12352_v8, %v14711_v7 }
0x12ec   :  { %v4298_v46 = vmul.f32 0.2, %v4266_v37 }
0x12ed   :  { %5438 = vmax.xlane.f32.xlu0 %v12586_v29  ;;  %5440 = vmax.xlane.f32.xlu1 %v12590_v30  ;;  %v4296_v29 = vmul.f32 0.2, %v4264_v40  ;;  %v4991_v30 = vadd.f32 %v12356_v61, %v14705_v9 }
0x12ef   :  { %v4312_v14 = vsel %vm4280_vm12, %v4264_v40, %v4296_v29 }
0x12f1   :  { %4714 = vmax.xlane.f32.xlu0 %v12602_v57  ;;  %4349 = vmax.xlane.f32.xlu1 %v12606_v59 }
0x12f5   :  { %5079 = vmax.xlane.f32.xlu1 %v12612_v60 }
0x1302   :  { %v3572_v36 = vpop.xlane.xlu1 %3571 }
0x1303   :  { %v3573_v39 = vcvt.f32.s32 %v3572_v36  ;;  %v4994_v36 = vadd.f32 %v12356_v61, %v14706_v49  ;;  %v4674_v49 = vsel %vm4642_vm5, %v4626_v21, %v4658_v42  ;;  %v3672_v42 = vcvt.f32.s32 %v12319_v17 }
0x1304   :  { %vm4282_vm5 = vcmp.ge.f32.partialorder %v4266_v37, 0.0 }
0x1305   :  { %v3576_v11 = vadd.s32 %v3575_v16, %v3573_v39  ;;  %v14708_v16 = vmov 0  ;;  %v4309_v39 = vsel %vm4277_vm4, %v4261_v23, %v4293_v24  ;;  %v5026_v23 = vmul.f32 0.2, %v4994_v36  ;;  %v14712_v24 = vld [vmem:[#allocation30_spill] sm:$0xff] }
0x1306   :  { %v3614_v10 = vpop.xlane.xlu1 %3613  ;;  %v3600_v60 = vpop.xlane.xlu0 %3599  ;;  %vm14713_vm4 = vnez %v14591_v47  ;;  %vm5010_vm0 = vcmp.ge.f32.partialorder %v4994_v36, 0.0 }
0x1307   :  { %vm3709_vm6 = vcmp.eq.s32.totalorder %v8719_v43, %v3576_v11  ;;  %v3615_v38 = vcvt.f32.s32 %v3614_v10  ;;  %v5023_v11 = vmul.f32 0.2, %v4991_v30 }
0x1308   :  { %vm12631_vm3 = vmor %vm14707_vm8, %vm3709_vm6  ;;  %vm5007_vm8 = vcmp.ge.f32.partialorder %v4991_v30, 0.0 }
0x1309   :  { %v14709_v16 = vsel %vm12631_vm3, 4294967295, %v14708_v16  ;;  %v3618_v9 = vadd.s32 %v3617_v28, %v3615_v38  ;;  %v12637_v5 = vsel %vm12631_vm3, %v4309_v39, -1e+30  ;;  %v5356_v28 = vadd.f32 %v12370_v27, %v14712_v24 }
0x130a   :  { %14710 = vst [vmem:[#allocation18_spill] sm:$0xff] %v14709_v16  ;;  %4347 = vmax.xlane.f32.xlu0 %v12637_v5  ;;  %v3642_v10 = vpop.xlane.xlu0 %3641  ;;  %v3602_v38 = vcvt.f32.s32 %v12312_v22  ;;  %v14714_v39 = vmov 0  ;;  %v12655_v21 = vsel %vm12631_vm3, %v4674_v49, -1e+30  ;;  %v3601_v22 = vcvt.f32.s32 %v3600_v60  ;;  %v14719_v49 = vld [vmem:[#allocation2_spill] sm:$0xff] }
0x130b   :  { %vm3712_vm6 = vcmp.eq.s32.totalorder %v8719_v43, %v3618_v9  ;;  %v3643_v20 = vcvt.f32.s32 %v3642_v10  ;;  %14717 = vst [vmem:[#allocation62_spill] sm:$0xff] %v12655_v21  ;;  %v14718_v9 = vld [vmem:[#allocation72_spill] sm:$0xff]  ;;  %v5039_v7 = vsel %vm5007_vm8, %v4991_v30, %v5023_v11  ;;  %v5388_v10 = vmul.f32 0.2, %v5356_v28 }
0x130c   :  { %vm12648_vm7 = vmor %vm14713_vm4, %vm3712_vm6  ;;  %v4629_v17 = vadd.f32 %v12367_v1, %v14718_v9  ;;  %v5042_v60 = vsel %vm5010_vm0, %v4994_v36, %v5026_v23  ;;  %v3673_v24 = vshll.u32 %v3672_v42, 16  ;;  %vm5372_vm6 = vcmp.ge.f32.partialorder %v5356_v28, 0.0  ;;  %v14726_v36 = vld [vmem:[#allocation54_spill] sm:$0xff] }
0x130d   :  { %v14715_v39 = vsel %vm12648_vm7, 4294967295, %v14714_v39  ;;  %v3646_v29 = vadd.s32 %v3645_v33, %v3643_v20  ;;  %v12659_v40 = vsel %vm12648_vm7, %v4312_v14, -1e+30  ;;  %v5357_v14 = vadd.f32 %v12370_v27, %v14719_v49 }
0x130e   :  { %14716 = vst [vmem:[#allocation46_spill] sm:$0xff] %v14715_v39  ;;  %4712 = vmax.xlane.f32.xlu0 %v12655_v21  ;;  %4353 = vmax.xlane.f32.xlu1 %v12659_v40  ;;  %v3670_v47 = vpop.xlane.xlu0 %3669  ;;  %v3603_v33 = vshll.u32 %v3602_v38, 16  ;;  %v12672_v21 = vsel %vm12631_vm3, %v5039_v7, -1e+30  ;;  %v12676_v9 = vsel %vm12648_vm7, %v5042_v60, -1e+30  ;;  %vm14722_vm8 = vnez %v14597_v15 }
0x130f   :  { %vm3714_vm12 = vcmp.eq.s32.totalorder %v8719_v43, %v3646_v29  ;;  %v3671_v20 = vcvt.f32.s32 %v3670_v47  ;;  %14720 = vst [vmem:[#allocation16_spill] sm:$0xff] %v12672_v21  ;;  %14721 = vst [vmem:[#allocation26_spill] sm:$0xff] %v12676_v9  ;;  %v14723_v30 = vmov 0  ;;  %v4263_v11 = vadd.f32 %v12352_v8, %v14726_v36  ;;  %v14727_v47 = vld [vmem:[#allocation74_spill] sm:$0xff] }
0x1310   :  { %v3604_v29 = vadd.s32 %v3603_v33, %v3601_v22  ;;  %vm12680_vm4 = vmor %vm14722_vm8, %vm3714_vm12  ;;  %v4314_v38 = vsel %vm4282_vm5, %v4266_v37, %v4298_v46  ;;  %v4661_v42 = vmul.f32 0.2, %v4629_v17  ;;  %v4268_v22 = vadd.f32 %v12352_v8, %v14727_v47 }
0x1311   :  { %v14724_v30 = vsel %vm12680_vm4, 4294967295, %v14723_v30  ;;  %v3674_v23 = vadd.s32 %v3673_v24, %v3671_v20  ;;  %v5389_v7 = vmul.f32 0.2, %v5357_v14  ;;  %v5404_v15 = vsel %vm5372_vm6, %v5356_v28, %v5388_v10  ;;  %v14729_v28 = vld [vmem:[#allocation69_spill] sm:$0xff] }
0x1312   :  { %14725 = vst [vmem:[#allocation53_spill] sm:$0xff] %v14724_v30  ;;  %5077 = vmax.xlane.f32.xlu0 %v12672_v21  ;;  %5083 = vmax.xlane.f32.xlu1 %v12676_v9  ;;  %v12693_v49 = vsel %vm12631_vm3, %v5404_v15, -1e+30  ;;  %v12697_v33 = vsel %vm12680_vm4, %v4314_v38, -1e+30  ;;  %vm4645_vm0 = vcmp.ge.f32.partialorder %v4629_v17, 0.0  ;;  %vm3711_vm8 = vcmp.eq.s32.totalorder %v8719_v43, %v3604_v29  ;;  %v3628_v38 = vpop.xlane.xlu1 %3627 }
0x1313   :  { %14728 = vst [vmem:[#allocation22_spill] sm:$0xff] %v12693_v49  ;;  %vm5373_vm12 = vcmp.ge.f32.partialorder %v5357_v14, 0.0  ;;  %v4295_v37 = vmul.f32 0.2, %v4263_v11  ;;  %vm3716_vm5 = vcmp.eq.s32.totalorder %v8719_v43, %v3674_v23  ;;  %v4628_v46 = vadd.f32 %v12367_v1, %v14729_v28 }
0x1314   :  { %v4300_v20 = vmul.f32 0.2, %v4268_v22  ;;  %v4677_v10 = vsel %vm4645_vm0, %v4629_v17, %v4661_v42  ;;  %v5405_v60 = vsel %vm5373_vm12, %v5357_v14, %v5389_v7  ;;  %vm14730_vm6 = vnez %v14594_v41  ;;  %vm12721_vm0 = vmor %vm12069_vm11, %vm3716_vm5  ;;  %v14738_v14 = vld [vmem:[#allocation76_spill] sm:$0xff] }
0x1315   :  { %vm12707_vm3 = vmor %vm14730_vm6, %vm3711_vm8  ;;  %v14731_v24 = vmov 0  ;;  %v12713_v29 = vsel %vm12648_vm7, %v4677_v10, -1e+30  ;;  %v12717_v36 = vsel %vm12594_vm9, %v5405_v60, -1e+30  ;;  %vm4279_vm13 = vcmp.ge.f32.partialorder %v4263_v11, 0.0 }
0x1316   :  { %5442 = vmax.xlane.f32.xlu0 %v12693_v49  ;;  %4357 = vmax.xlane.f32.xlu1 %v12697_v33  ;;  %v14732_v24 = vsel %vm12707_vm3, 4294967295, %v14731_v24  ;;  %14734 = vst [vmem:[#allocation59_spill] sm:$0xff] %v12717_v36  ;;  %vm4284_vm10 = vcmp.ge.f32.partialorder %v4268_v22, 0.0  ;;  %v14735_v17 = vmov 0  ;;  %v4660_v41 = vmul.f32 0.2, %v4628_v46 }
0x1317   :  { %14733 = vst [vmem:[#allocation50_spill] sm:$0xff] %v14732_v24  ;;  %v14736_v17 = vsel %vm12721_vm0, 4294967295, %v14735_v17  ;;  %v4993_v23 = vadd.f32 %v12356_v61, %v14738_v14  ;;  %v4311_v42 = vsel %vm4279_vm13, %v4263_v11, %v4295_v37  ;;  %v4316_v47 = vsel %vm4284_vm10, %v4268_v22, %v4300_v20  ;;  %v14739_v10 = vld [vmem:[#allocation13_spill] sm:$0xff]  ;;  %v14740_v14 = vld [vmem:[#allocation71_spill] sm:$0xff] }
0x1318   :  { %14737 = vst [vmem:[#allocation49_spill] sm:$0xff] %v14736_v17  ;;  %v3630_v7 = vcvt.f32.s32 %v12321_v63  ;;  %v12732_v26 = vsel %vm12707_vm3, %v4311_v42, -1e+30  ;;  %v12736_v15 = vsel %vm12721_vm0, %v4316_v47, -1e+30  ;;  %vm4644_vm11 = vcmp.ge.f32.partialorder %v4628_v46, 0.0 }
0x1319   :  { %v3629_v28 = vcvt.f32.s32 %v3628_v38  ;;  %v4631_v11 = vadd.f32 %v12367_v1, %v14739_v10  ;;  %v5025_v22 = vmul.f32 0.2, %v4993_v23  ;;  %v4676_v37 = vsel %vm4644_vm11, %v4628_v46, %v4660_v41  ;;  %v14742_v41 = vld [vmem:[#allocation25_spill] sm:$0xff] }
0x131a   :  { %4718 = vmax.xlane.f32.xlu0 %v12713_v29  ;;  %5444 = vmax.xlane.f32.xlu1 %v12717_v36  ;;  %v3631_v63 = vshll.u32 %v3630_v7, 16  ;;  %v12744_v20 = vsel %vm12707_vm3, %v4676_v37, -1e+30  ;;  %vm5009_vm10 = vcmp.ge.f32.partialorder %v4993_v23, 0.0  ;;  %v4265_v42 = vadd.f32 %v12352_v8, %v14740_v14  ;;  %v3684_v36 = vpop.xlane.xlu0 %3683 }
0x131b   :  { %v4663_v47 = vmul.f32 0.2, %v4631_v11  ;;  %v5041_v34 = vsel %vm5009_vm10, %v4993_v23, %v5025_v22  ;;  %vm4647_vm13 = vcmp.ge.f32.partialorder %v4631_v11, 0.0  ;;  %v4630_v7 = vadd.f32 %v12367_v1, %v14742_v41  ;;  %v14747_v22 = vld [vmem:[#allocation64_spill] sm:$0xff] }
0x131c   :  { %v3632_v60 = vadd.s32 %v3631_v63, %v3629_v28  ;;  %v12751_v38 = vsel %vm12707_vm3, %v5041_v34, -1e+30  ;;  %v4297_v46 = vmul.f32 0.2, %v4265_v42  ;;  %vm4281_vm8 = vcmp.ge.f32.partialorder %v4265_v42, 0.0 }
0x131d   :  { %14741 = vst [vmem:[#allocation51_spill] sm:$0xff] %v12751_v38  ;;  %v4679_v10 = vsel %vm4647_vm13, %v4631_v11, %v4663_v47  ;;  %v14744_v34 = vmov 0  ;;  %v4662_v23 = vmul.f32 0.2, %v4630_v7  ;;  %v4633_v37 = vadd.f32 %v12367_v1, %v14747_v22  ;;  %v14752_v22 = vld [vmem:[#allocation24_spill] sm:$0xff] }
0x131e   :  { %4351 = vmax.xlane.f32.xlu0 %v12732_v26  ;;  %4361 = vmax.xlane.f32.xlu1 %v12736_v15  ;;  %vm3713_vm12 = vcmp.eq.s32.totalorder %v8719_v43, %v3632_v60  ;;  %v12759_v28 = vsel %vm12680_vm4, %v4679_v10, -1e+30  ;;  %v4313_v63 = vsel %vm4281_vm8, %v4265_v42, %v4297_v46  ;;  %vm4646_vm6 = vcmp.ge.f32.partialorder %v4630_v7, 0.0  ;;  %v14751_v46 = vld [vmem:[#allocation73_spill] sm:$0xff]  ;;  %v12787_v10 = vpop.permute.xlu1 %5343 }
0x131f   :  { %14743 = vst [vmem:[#allocation6_spill] sm:$0xff] %v12759_v28  ;;  %vm12763_vm5 = vmor %vm12056_vm2, %vm3713_vm12  ;;  %v4665_v60 = vmul.f32 0.2, %v4633_v37  ;;  %v4678_v54 = vsel %vm4646_vm6, %v4630_v7, %v4662_v23  ;;  %vm4649_vm2 = vcmp.ge.f32.partialorder %v4633_v37, 0.0  ;;  %v4267_v41 = vadd.f32 %v12352_v8, %v14751_v46 }
0x1320   :  { %v14745_v34 = vsel %vm12763_vm5, 4294967295, %v14744_v34  ;;  %v12772_v11 = vsel %vm12763_vm5, %v4313_v63, -1e+30  ;;  %v12777_v14 = vsel %vm12763_vm5, %v4678_v54, -1e+30  ;;  %v3658_v7 = vcvt.f32.s32 %v12328_v55 }
0x1321   :  { %14746 = vst [vmem:[#allocation19_spill] sm:$0xff] %v14745_v34  ;;  %14748 = vst [vmem:[#allocation31_spill] sm:$0xff] %v12772_v11  ;;  %v4681_v47 = vsel %vm4649_vm2, %v4633_v37, %v4665_v60  ;;  %v4299_v23 = vmul.f32 0.2, %v4267_v41  ;;  %v4270_v63 = vadd.f32 %v12352_v8, %v14752_v22  ;;  %v3700_v37 = vcvt.f32.s32 %v12344_v12  ;;  %v14754_v12 = vld [vmem:[#allocation15_spill] sm:$0xff] }
0x1322   :  { %4716 = vmax.xlane.f32.xlu0 %v12744_v20  ;;  %14749 = vst [vmem:[#allocation29_spill] sm:$0xff] %v12777_v14  ;;  %v12782_v42 = vsel %vm12721_vm0, %v4681_v47, -1e+30  ;;  %v3659_v60 = vshll.u32 %v3658_v7, 16  ;;  %vm4283_vm11 = vcmp.ge.f32.partialorder %v4267_v41, 0.0  ;;  %v14753_v47 = vld [vmem:[#allocation63_spill] sm:$0xff]  ;;  %v3686_v46 = vcvt.f32.s32 %v12330_v31 }
0x1323   :  { %14750 = vst [vmem:[#allocation52_spill] sm:$0xff] %v12782_v42  ;;  %v4302_v21 = vmul.f32 0.2, %v4270_v63  ;;  %v4315_v55 = vsel %vm4283_vm11, %v4267_v41, %v4299_v23  ;;  %v4635_v7 = vadd.f32 %v12367_v1, %v14754_v12  ;;  %v14756_v31 = vmov 0 }
0x1324   :  { %vm4286_vm12 = vcmp.ge.f32.partialorder %v4270_v63, 0.0 }
0x1325   :  { %v4318_v58 = vsel %vm4286_vm12, %v4270_v63, %v4302_v21  ;;  %vm4651_vm2 = vcmp.ge.f32.partialorder %v4635_v7, 0.0  ;;  %v14764_v21 = vld [vmem:[#allocation23_spill] sm:$0xff] }
0x1326   :  { %5081 = vmax.xlane.f32.xlu0 %v12751_v38  ;;  %v4632_v38 = vadd.f32 %v12367_v1, %v14753_v47  ;;  %v14760_v47 = vld [vmem:[#allocation38_spill] sm:$0xff] }
0x1328   :  { %vm4648_vm8 = vcmp.ge.f32.partialorder %v4632_v38, 0.0 }
0x132a   :  { %4722 = vmax.xlane.f32.xlu0 %v12759_v28 }
0x132e   :  { %4355 = vmax.xlane.f32.xlu0 %v12772_v11  ;;  %v4664_v11 = vmul.f32 0.2, %v4632_v38 }
0x1332   :  { %4720 = vmax.xlane.f32.xlu0 %v12777_v14  ;;  %v3685_v14 = vcvt.f32.s32 %v3684_v36 }
0x1336   :  { %4726 = vmax.xlane.f32.xlu0 %v12782_v42  ;;  %v3701_v42 = vshll.u32 %v3700_v37, 16  ;;  %v4667_v37 = vmul.f32 0.2, %v4635_v7 }
0x1338   :  { %v4683_v12 = vsel %vm4651_vm2, %v4635_v7, %v4667_v37  ;;  %v14770_v7 = vld [vmem:[#allocation70_spill] sm:$0xff] }
0x133f   :  { %v3656_v54 = vpop.xlane.xlu1 %3655 }
0x1340   :  { %v3657_v16 = vcvt.f32.s32 %v3656_v54  ;;  %v14755_v54 = vld [vmem:[#allocation3_spill] sm:$0xff] }
0x1341   :  { %v4996_v28 = vadd.f32 %v12356_v61, %v14755_v54 }
0x1342   :  { %v3660_v49 = vadd.s32 %v3659_v60, %v3657_v16  ;;  %v3687_v16 = vshll.u32 %v3686_v46, 16  ;;  %v5359_v46 = vadd.f32 %v12370_v27, %v14760_v47 }
0x1343   :  { %v3698_v9 = vpop.xlane.xlu1 %3697  ;;  %v5028_v60 = vmul.f32 0.2, %v4996_v28  ;;  %vm5012_vm11 = vcmp.ge.f32.partialorder %v4996_v28, 0.0 }
0x1344   :  { %vm3715_vm10 = vcmp.eq.s32.totalorder %v8719_v43, %v3660_v49  ;;  %v3699_v22 = vcvt.f32.s32 %v3698_v9  ;;  %v14759_v9 = vld [vmem:[#allocation58_spill] sm:$0xff]  ;;  %v3688_v23 = vadd.s32 %v3687_v16, %v3685_v14  ;;  %v4634_v14 = vadd.f32 %v12367_v1, %v14764_v21 }
0x1345   :  { %vm12803_vm13 = vmor %vm12109_vm14, %vm3715_vm10  ;;  %v4269_v36 = vadd.f32 %v12352_v8, %v14759_v9  ;;  %v5391_v63 = vmul.f32 0.2, %v5359_v46  ;;  %v5044_v54 = vsel %vm5012_vm11, %v4996_v28, %v5028_v60  ;;  %vm5375_vm12 = vcmp.ge.f32.partialorder %v5359_v46, 0.0 }
0x1346   :  { %v14757_v31 = vsel %vm12803_vm13, 4294967295, %v14756_v31  ;;  %v3702_v41 = vadd.s32 %v3701_v42, %v3699_v22  ;;  %v12809_v49 = vsel %vm12803_vm13, %v4315_v55, -1e+30  ;;  %v14761_v42 = vmov 0 }
0x1347   :  { %14758 = vst [vmem:[#allocation56_spill] sm:$0xff] %v14757_v31  ;;  %4359 = vmax.xlane.f32.xlu0 %v12809_v49  ;;  %v4680_v55 = vsel %vm4648_vm8, %v4632_v38, %v4664_v11  ;;  %v4301_v62 = vmul.f32 0.2, %v4269_v36  ;;  %vm4285_vm10 = vcmp.ge.f32.partialorder %v4269_v36, 0.0  ;;  %v14765_v38 = vld [vmem:[#allocation27_spill] sm:$0xff]  ;;  %v4998_v60 = vadd.f32 %v12356_v61, %v11845_v25 }
0x1348   :  { %vm3718_vm6 = vcmp.eq.s32.totalorder %v8719_v43, %v3702_v41  ;;  %v12825_v22 = vsel %vm12803_vm13, %v4680_v55, -1e+30  ;;  %v4995_v11 = vadd.f32 %v12356_v61, %v14765_v38  ;;  %v12848_v1 = vsel %vm12680_vm4, %v5044_v54, -1e+30 }
0x1349   :  { %vm12819_vm14 = vmor %vm12094_vm1, %vm3718_vm6  ;;  %vm3717_vm1 = vcmp.eq.s32.totalorder %v8719_v43, %v3688_v23  ;;  %14766 = vst [vmem:[#allocation47_spill] sm:$0xff] %v12848_v1  ;;  %v14767_v43 = vmov 0  ;;  %v4666_v28 = vmul.f32 0.2, %v4634_v14  ;;  %v5358_v23 = vadd.f32 %v12370_v27, %v14770_v7 }
0x134a   :  { %v14762_v42 = vsel %vm12819_vm14, 4294967295, %v14761_v42  ;;  %v12829_v8 = vsel %vm12819_vm14, %v4318_v58, -1e+30  ;;  %v12844_v9 = vsel %vm12819_vm14, %v4683_v12, -1e+30  ;;  %vm12852_vm8 = vmor %vm12117_vm15, %vm3717_vm1  ;;  %v4317_v58 = vsel %vm4285_vm10, %v4269_v36, %v4301_v62 }
0x134b   :  { %14763 = vst [vmem:[#allocation21_spill] sm:$0xff] %v14762_v42  ;;  %4724 = vmax.xlane.f32.xlu0 %v12825_v22  ;;  %4365 = vmax.xlane.f32.xlu1 %v12829_v8  ;;  %v14768_v43 = vsel %vm12852_vm8, 4294967295, %v14767_v43  ;;  %v5027_v37 = vmul.f32 0.2, %v4995_v11  ;;  %v5407_v47 = vsel %vm5375_vm12, %v5359_v46, %v5391_v63  ;;  %vm4650_vm6 = vcmp.ge.f32.partialorder %v4634_v14, 0.0 }
0x134c   :  { %14769 = vst [vmem:[#allocation55_spill] sm:$0xff] %v14768_v43  ;;  %v12868_v21 = vsel %vm12648_vm7, %v5407_v47, -1e+30  ;;  %v12872_v38 = vsel %vm12852_vm8, %v4317_v58, -1e+30  ;;  %vm5011_vm15 = vcmp.ge.f32.partialorder %v4995_v11, 0.0  ;;  %v4997_v36 = vadd.f32 %v12356_v61, %v11848_v32 }
0x134d   :  { %14771 = vst [vmem:[#allocation57_spill] sm:$0xff] %v12868_v21  ;;  %v5390_v25 = vmul.f32 0.2, %v5358_v23  ;;  %v4682_v46 = vsel %vm4650_vm6, %v4634_v14, %v4666_v28  ;;  %v5030_v62 = vmul.f32 0.2, %v4998_v60  ;;  %v5361_v63 = vadd.f32 %v12370_v27, %v11858_v51  ;;  %v14773_v28 = vld [vmem:[#allocation39_spill] sm:$0xff] }
0x134e   :  { %v12838_v16 = vpop.xlane.xlu1 %5067  ;;  %v12840_v41 = vpop.xlane.xlu0 %4337  ;;  %v5043_v12 = vsel %vm5011_vm15, %v4995_v11, %v5027_v37  ;;  %vm5374_vm2 = vcmp.ge.f32.partialorder %v5358_v23, 0.0  ;;  %v12884_v58 = vsel %vm12852_vm8, %v4682_v46, -1e+30  ;;  %vm5014_vm11 = vcmp.ge.f32.partialorder %v4998_v60, 0.0 }
0x134f   :  { %4730 = vmax.xlane.f32.xlu0 %v12844_v9  ;;  %5087 = vmax.xlane.f32.xlu1 %v12848_v1  ;;  %v12888_v47 = vsel %vm12763_vm5, %v5043_v12, -1e+30  ;;  %v5360_v32 = vadd.f32 %v12370_v27, %v11850_v19  ;;  %v5029_v51 = vmul.f32 0.2, %v4997_v36  ;;  %v5406_v14 = vsel %vm5374_vm2, %v5358_v23, %v5390_v25 }
0x1350   :  { %14772 = vst [vmem:[#allocation75_spill] sm:$0xff] %v12888_v47  ;;  %v5393_v11 = vmul.f32 0.2, %v5361_v63  ;;  %v5000_v37 = vadd.f32 %v12356_v61, %v14773_v28  ;;  %v5046_v46 = vsel %vm5014_vm11, %v4998_v60, %v5030_v62  ;;  %vm5013_vm1 = vcmp.ge.f32.partialorder %v4997_v36, 0.0  ;;  %v14776_v62 = vld [vmem:[#allocation37_spill] sm:$0xff] }
0x1351   :  { %vm5377_vm10 = vcmp.ge.f32.partialorder %v5361_v63, 0.0  ;;  %v5392_v19 = vmul.f32 0.2, %v5360_v32  ;;  %v4368_v23 = vsub.f32 %v12395_v0, %v12840_v41  ;;  %v5045_v60 = vsel %vm5013_vm1, %v4997_v36, %v5029_v51 }
0x1352   :  { %v12862_v50 = vpop.xlane.xlu1 %5432  ;;  %v12864_v55 = vpop.xlane.xlu0 %4702  ;;  %vm5376_vm12 = vcmp.ge.f32.partialorder %v5360_v32, 0.0  ;;  %v5032_v25 = vmul.f32 0.2, %v5000_v37  ;;  %v5362_v28 = vadd.f32 %v12370_v27, %v14776_v62  ;;  %v12924_v0 = vsel %vm12803_vm13, %v5045_v60, -1e+30 }
0x1353   :  { %5448 = vmax.xlane.f32.xlu1 %v12868_v21  ;;  %4363 = vmax.xlane.f32.xlu0 %v12872_v38  ;;  %v12902_v21 = vsel %vm12721_vm0, %v5046_v46, -1e+30  ;;  %v5363_v46 = vadd.f32 %v12370_v27, %v12296_v2  ;;  %vm5016_vm6 = vcmp.ge.f32.partialorder %v5000_v37, 0.0  ;;  %v4733_v41 = vsub.f32 %v12412_v35, %v12864_v55  ;;  %v14777_v2 = vld [vmem:[#allocation34_spill] sm:$0xff] }
0x1354   :  { %14774 = vst [vmem:[#allocation32_spill] sm:$0xff] %v12902_v21  ;;  %v4999_v36 = vadd.f32 %v12356_v61, %v14777_v2  ;;  %v5394_v62 = vmul.f32 0.2, %v5362_v28  ;;  %v5365_v60 = vadd.f32 %v12370_v27, %v12787_v10  ;;  %v5048_v30 = vsel %vm5016_vm6, %v5000_v37, %v5032_v25 }
0x1355   :  { %v12938_v55 = vsel %vm12819_vm14, %v5048_v30, -1e+30  ;;  %vm5379_vm15 = vcmp.ge.f32.partialorder %v5363_v46, 0.0  ;;  %vm5378_vm2 = vcmp.ge.f32.partialorder %v5362_v28, 0.0  ;;  %v5364_v37 = vadd.f32 %v12370_v27, %v12361_v45 }
0x1356   :  { %v4336_v54 = vpop.xlane.xlu1 %4335  ;;  %v12880_v7 = vpop.xlane.xlu0 %4700  ;;  %v5031_v10 = vmul.f32 0.2, %v4999_v36  ;;  %v5410_v25 = vsel %vm5378_vm2, %v5362_v28, %v5394_v62  ;;  %vm5381_vm11 = vcmp.ge.f32.partialorder %v5365_v60, 0.0  ;;  %vm5015_vm1 = vcmp.ge.f32.partialorder %v4999_v36, 0.0 }
0x1357   :  { %4728 = vmax.xlane.f32.xlu1 %v12884_v58  ;;  %5085 = vmax.xlane.f32.xlu0 %v12888_v47  ;;  %v12906_v47 = vsel %vm12707_vm3, %v5406_v14, -1e+30  ;;  %v5409_v14 = vsel %vm5377_vm10, %v5361_v63, %v5393_v11  ;;  %v4385_v63 = vmul.f32 1.442695, %v4368_v23  ;;  %v4367_v51 = vsub.f32 %v12431_v4, %v4336_v54 }
0x1358   :  { %14775 = vst [vmem:[#allocation68_spill] sm:$0xff] %v12906_v47  ;;  %v5408_v11 = vsel %vm5376_vm12, %v5360_v32, %v5392_v19  ;;  %v4750_v4 = vmul.f32 1.442695, %v4733_v41  ;;  %v4732_v54 = vsub.f32 %v12435_v52, %v12880_v7  ;;  %v5397_v19 = vmul.f32 0.2, %v5365_v60 }
0x1359   :  { %v12942_v61 = vsel %vm12763_vm5, %v5408_v11, -1e+30  ;;  %8046 = vpow2.f32 %v4385_v63  ;;  %v4383_v32 = vmul.f32 1.442695, %v4367_v51  ;;  %v12961_v7 = vsel %vm12803_vm13, %v5410_v25, -1e+30 }
0x135a   :  { %v12896_v39 = vpop.xlane.xlu1 %5065  ;;  %v12898_v12 = vpop.xlane.xlu0 %4706  ;;  %8048 = vpow2.f32 %v4750_v4  ;;  %v5396_v28 = vmul.f32 0.2, %v5364_v37  ;;  %v5047_v63 = vsel %vm5015_vm1, %v4999_v36, %v5031_v10  ;;  %vm5380_vm10 = vcmp.ge.f32.partialorder %v5364_v37, 0.0 }
0x135b   :  { %5091 = vmax.xlane.f32.xlu1 %v12902_v21  ;;  %5446 = vmax.xlane.f32.xlu0 %v12906_v47  ;;  %v12920_v47 = vsel %vm12680_vm4, %v5409_v14, -1e+30  ;;  %v5395_v14 = vmul.f32 0.2, %v5363_v46  ;;  %v4735_v45 = vsub.f32 %v12457_v3, %v12898_v12  ;;  %8050 = vpow2.f32 %v4383_v32 }
0x135c   :  { %v12976_v3 = vsel %vm12852_vm8, %v5047_v63, -1e+30  ;;  %v5412_v36 = vsel %vm5380_vm10, %v5364_v37, %v5396_v28 }
0x135d   :  { %v5411_v23 = vsel %vm5379_vm15, %v5363_v46, %v5395_v14  ;;  %v5413_v46 = vsel %vm5381_vm11, %v5365_v60, %v5397_v19  ;;  %v4754_v12 = vmul.f32 1.442695, %v4735_v45 }
0x135e   :  { %v12916_v24 = vpop.xlane.xlu1 %5430  ;;  %v4340_v1 = vpop.xlane.xlu0 %4339  ;;  %v12957_v52 = vsel %vm12721_vm0, %v5411_v23, -1e+30  ;;  %v12972_v62 = vsel %vm12819_vm14, %v5413_v46, -1e+30 }
0x135f   :  { %5452 = vmax.xlane.f32.xlu1 %v12920_v47  ;;  %5089 = vmax.xlane.f32.xlu0 %v12924_v0  ;;  %v4369_v27 = vsub.f32 %v12478_v44, %v4340_v1 }
0x1361   :  { %v4387_v44 = vmul.f32 1.442695, %v4369_v27 }
0x1362   :  { %v4342_v21 = vpop.xlane.xlu1 %4341  ;;  %v4705_v35 = vpop.xlane.xlu0 %4704 }
0x1363   :  { %5095 = vmax.xlane.f32.xlu1 %v12938_v55  ;;  %5450 = vmax.xlane.f32.xlu0 %v12942_v61  ;;  %v4370_v30 = vsub.f32 %v12492_v56, %v4342_v21  ;;  %v4748_v56 = vmul.f32 1.442695, %v4732_v54  ;;  %v4734_v1 = vsub.f32 %v12488_v53, %v4705_v35  ;;  %v12981_v14 = vpop.eup %8046  ;;  %v12987_v54 = vsel %vm12852_vm8, %v5412_v36, -1e+30 }
0x1364   :  { %v12992_v53 = vpop.eup %8048 }
0x1365   :  { %v4389_v21 = vmul.f32 1.442695, %v4370_v30  ;;  %8052 = vpow2.f32 %v4748_v56  ;;  %v4752_v10 = vmul.f32 1.442695, %v4734_v1  ;;  %v12994_v35 = vpop.eup %8050 }
0x1366   :  { %v12951_v2 = vpop.xlane.xlu1 %5071  ;;  %v12953_v41 = vpop.xlane.xlu0 %5434 }
0x1367   :  { %5456 = vmax.xlane.f32.xlu1 %v12957_v52  ;;  %5454 = vmax.xlane.f32.xlu0 %v12961_v7  ;;  %8054 = vpow2.f32 %v4389_v21 }
0x1368   :  { %8056 = vpow2.f32 %v4754_v12 }
0x1369   :  { %8058 = vpow2.f32 %v4387_v44 }
0x136a   :  { %v12968_v51 = vpop.xlane.xlu1 %5436  ;;  %v4711_v11 = vpop.xlane.xlu0 %4710  ;;  %8060 = vpow2.f32 %v4752_v10 }
0x136b   :  { %5460 = vmax.xlane.f32.xlu1 %v12972_v62  ;;  %5093 = vmax.xlane.f32.xlu0 %v12976_v3  ;;  %v4737_v19 = vsub.f32 %v12528_v18, %v4711_v11 }
0x136d   :  { %v4758_v18 = vmul.f32 1.442695, %v4737_v19 }
0x136e   :  { %v12983_v60 = vpop.xlane.xlu1 %5069  ;;  %v4344_v4 = vpop.xlane.xlu0 %4343 }
0x136f   :  { %5458 = vmax.xlane.f32.xlu0 %v12987_v54  ;;  %4417 = vadd.xlane.f32.xlu1 %v12981_v14  ;;  %v4371_v32 = vsub.f32 %v12549_v48, %v4344_v4  ;;  %v13001_v45 = vpop.eup %8052 }
0x1371   :  { %v4391_v25 = vmul.f32 1.442695, %v4371_v32  ;;  %v13003_v27 = vpop.eup %8054 }
0x1372   :  { %v4346_v30 = vpop.xlane.xlu1 %4345  ;;  %v4709_v37 = vpop.xlane.xlu0 %4708 }
0x1373   :  { %v4372_v23 = vsub.f32 %v12563_v6, %v4346_v30  ;;  %4415 = vadd.xlane.f32.xlu0 %v12994_v35  ;;  %4782 = vadd.xlane.f32.xlu1 %v12992_v53  ;;  %v4736_v56 = vsub.f32 %v12559_v13, %v4709_v37  ;;  %v13011_v46 = vpop.eup %8056 }
0x1374   :  { %v13013_v13 = vpop.eup %8058 }
0x1375   :  { %v4393_v48 = vmul.f32 1.442695, %v4372_v23  ;;  %v4756_v6 = vmul.f32 1.442695, %v4736_v56  ;;  %v13021_v12 = vpop.eup %8060 }
0x1376   :  { %v13005_v21 = vpop.xlane.xlu1 %5075  ;;  %v13007_v28 = vpop.xlane.xlu0 %5073 }
0x1377   :  { %8062 = vpow2.f32 %v4393_v48  ;;  %4421 = vadd.xlane.f32.xlu1 %v13003_v27  ;;  %4780 = vadd.xlane.f32.xlu0 %v13001_v45 }
0x1378   :  { %8064 = vpow2.f32 %v4391_v25 }
0x1379   :  { %8066 = vpow2.f32 %v4758_v18 }
0x137a   :  { %v13015_v63 = vpop.xlane.xlu1 %5440  ;;  %v13017_v11 = vpop.xlane.xlu0 %5438  ;;  %8068 = vpow2.f32 %v4756_v6 }
0x137b   :  { %4786 = vadd.xlane.f32.xlu1 %v13011_v46  ;;  %4419 = vadd.xlane.f32.xlu0 %v13013_v13 }
0x137e   :  { %v4350_v44 = vpop.xlane.xlu1 %4349  ;;  %v4715_v1 = vpop.xlane.xlu0 %4714 }
0x137f   :  { %v4374_v36 = vsub.f32 %v12606_v59, %v4350_v44  ;;  %v4739_v4 = vsub.f32 %v12602_v57, %v4715_v1  ;;  %4784 = vadd.xlane.f32.xlu0 %v13021_v12 }
0x1381   :  { %v13026_v10 = vpop.eup %8062  ;;  %v4397_v32 = vmul.f32 1.442695, %v4374_v36  ;;  %v4762_v37 = vmul.f32 1.442695, %v4739_v4  ;;  %v14778_v36 = vld [vmem:[#allocation62_spill] sm:$0xff] }
0x1382   :  { %v13028_v30 = vpop.eup %8064  ;;  %4425 = vadd.xlane.f32.xlu1 %v13026_v10  ;;  %v13044_v25 = vpop.xlane.xlu1 %5079 }
0x1383   :  { %8070 = vpow2.f32 %v4397_v32  ;;  %4423 = vadd.xlane.f32.xlu0 %v13028_v30  ;;  %v13032_v19 = vpop.eup %8066 }
0x1384   :  { %v13034_v23 = vpop.eup %8068  ;;  %8072 = vpow2.f32 %v4762_v37 }
0x1386   :  { %4790 = vadd.xlane.f32.xlu1 %v13032_v19 }
0x1387   :  { %4788 = vadd.xlane.f32.xlu0 %v13034_v23 }
0x138d   :  { %v13038_v57 = vpop.eup %8070 }
0x138e   :  { %4429 = vadd.xlane.f32.xlu1 %v13038_v57  ;;  %v13041_v59 = vpop.eup %8072 }
0x1392   :  { %4794 = vadd.xlane.f32.xlu1 %v13041_v59 }
0x1397   :  { %v4348_v56 = vpop.xlane.xlu0 %4347 }
0x1398   :  { %v4373_v48 = vsub.f32 %v12637_v5, %v4348_v56 }
0x139a   :  { %v4395_v18 = vmul.f32 1.442695, %v4373_v48 }
0x139b   :  { %v4354_v6 = vpop.xlane.xlu1 %4353  ;;  %v4713_v44 = vpop.xlane.xlu0 %4712 }
0x139c   :  { %8074 = vpow2.f32 %v4395_v18  ;;  %v4376_v1 = vsub.f32 %v12659_v40, %v4354_v6  ;;  %v4738_v4 = vsub.f32 %v14778_v36, %v4713_v44 }
0x139e   :  { %v4401_v32 = vmul.f32 1.442695, %v4376_v1  ;;  %v4760_v37 = vmul.f32 1.442695, %v4738_v4 }
0x139f   :  { %v13049_v42 = vpop.xlane.xlu1 %5083  ;;  %v13051_v17 = vpop.xlane.xlu0 %5077 }
0x13a0   :  { %8076 = vpow2.f32 %v4401_v32 }
0x13a1   :  { %8078 = vpow2.f32 %v4760_v37 }
0x13a3   :  { %v13053_v43 = vpop.xlane.xlu0 %5442  ;;  %v4358_v31 = vpop.xlane.xlu1 %4357 }
0x13a4   :  { %v4378_v40 = vsub.f32 %v12697_v33, %v4358_v31 }
0x13a6   :  { %v13055_v5 = vpop.eup %8074  ;;  %v4405_v36 = vmul.f32 1.442695, %v4378_v40 }
0x13a7   :  { %4427 = vadd.xlane.f32.xlu0 %v13055_v5  ;;  %v4719_v56 = vpop.xlane.xlu0 %4718  ;;  %v13067_v32 = vpop.xlane.xlu1 %5444 }
0x13a8   :  { %v4741_v48 = vsub.f32 %v12713_v29, %v4719_v56 }
0x13aa   :  { %v13060_v18 = vpop.eup %8076  ;;  %v4766_v6 = vmul.f32 1.442695, %v4741_v48 }
0x13ab   :  { %14779 = vst [vmem:[#allocation30_spill] sm:$0xff] %v13060_v18  ;;  %v13062_v44 = vpop.eup %8078  ;;  %4433 = vadd.xlane.f32.xlu1 %v13060_v18  ;;  %v4352_v1 = vpop.xlane.xlu0 %4351 }
0x13ac   :  { %4792 = vadd.xlane.f32.xlu0 %v13062_v44  ;;  %v4375_v4 = vsub.f32 %v12732_v26, %v4352_v1  ;;  %8080 = vpow2.f32 %v4766_v6  ;;  %v4362_v48 = vpop.xlane.xlu1 %4361  ;;  %v14781_v26 = vld [vmem:[#allocation6_spill] sm:$0xff] }
0x13ad   :  { %8082 = vpow2.f32 %v4405_v36  ;;  %v4380_v40 = vsub.f32 %v12736_v15, %v4362_v48 }
0x13ae   :  { %v4399_v37 = vmul.f32 1.442695, %v4375_v4 }
0x13af   :  { %v4717_v33 = vpop.xlane.xlu0 %4716 }
0x13b0   :  { %v4740_v29 = vsub.f32 %v12744_v20, %v4717_v33  ;;  %8084 = vpow2.f32 %v4399_v37  ;;  %v4409_v20 = vmul.f32 1.442695, %v4380_v40  ;;  %v14784_v33 = vld [vmem:[#allocation31_spill] sm:$0xff] }
0x13b2   :  { %v4764_v31 = vmul.f32 1.442695, %v4740_v29 }
0x13b3   :  { %v13070_v56 = vpop.xlane.xlu0 %5081 }
0x13b4   :  { %8086 = vpow2.f32 %v4764_v31 }
0x13b6   :  { %v13072_v34 = vpop.eup %8080 }
0x13b7   :  { %14780 = vst [vmem:[#allocation72_spill] sm:$0xff] %v13072_v34  ;;  %v4723_v18 = vpop.xlane.xlu0 %4722  ;;  %4798 = vadd.xlane.f32.xlu1 %v13072_v34  ;;  %v13077_v1 = vpop.eup %8082 }
0x13b8   :  { %v4743_v6 = vsub.f32 %v14781_v26, %v4723_v18  ;;  %14782 = vst [vmem:[#allocation2_spill] sm:$0xff] %v13077_v1  ;;  %v14785_v18 = vld [vmem:[#allocation29_spill] sm:$0xff] }
0x13ba   :  { %v4770_v36 = vmul.f32 1.442695, %v4743_v6  ;;  %v13079_v4 = vpop.eup %8084 }
0x13bb   :  { %14783 = vst [vmem:[#allocation54_spill] sm:$0xff] %v13079_v4  ;;  %v4356_v37 = vpop.xlane.xlu0 %4355  ;;  %4437 = vadd.xlane.f32.xlu1 %v13077_v1  ;;  %4431 = vadd.xlane.f32.xlu0 %v13079_v4 }
0x13bc   :  { %8088 = vpow2.f32 %v4770_v36  ;;  %v4377_v29 = vsub.f32 %v14784_v33, %v4356_v37  ;;  %v14786_v36 = vld [vmem:[#allocation52_spill] sm:$0xff] }
0x13bd   :  { %8090 = vpow2.f32 %v4409_v20 }
0x13be   :  { %v13084_v15 = vpop.eup %8086  ;;  %v4403_v31 = vmul.f32 1.442695, %v4377_v29 }
0x13bf   :  { %v4721_v48 = vpop.xlane.xlu0 %4720  ;;  %4796 = vadd.xlane.f32.xlu0 %v13084_v15 }
0x13c0   :  { %8092 = vpow2.f32 %v4403_v31  ;;  %v4742_v26 = vsub.f32 %v14785_v18, %v4721_v48 }
0x13c2   :  { %v4768_v6 = vmul.f32 1.442695, %v4742_v26 }
0x13c3   :  { %v4727_v40 = vpop.xlane.xlu0 %4726 }
0x13c4   :  { %8094 = vpow2.f32 %v4768_v6  ;;  %v4745_v34 = vsub.f32 %v14786_v36, %v4727_v40 }
0x13c6   :  { %v13089_v1 = vpop.eup %8088  ;;  %v4774_v4 = vmul.f32 1.442695, %v4745_v34 }
0x13c7   :  { %14787 = vst [vmem:[#allocation74_spill] sm:$0xff] %v13089_v1  ;;  %4802 = vadd.xlane.f32.xlu1 %v13089_v1  ;;  %v13092_v37 = vpop.eup %8090 }
0x13c8   :  { %8096 = vpow2.f32 %v4774_v4  ;;  %14788 = vst [vmem:[#allocation69_spill] sm:$0xff] %v13092_v37 }
0x13ca   :  { %v13094_v20 = vpop.eup %8092 }
0x13cb   :  { %14789 = vst [vmem:[#allocation76_spill] sm:$0xff] %v13094_v20  ;;  %4441 = vadd.xlane.f32.xlu1 %v13092_v37  ;;  %4435 = vadd.xlane.f32.xlu0 %v13094_v20 }
0x13ce   :  { %v13098_v33 = vpop.eup %8094 }
0x13cf   :  { %14790 = vst [vmem:[#allocation13_spill] sm:$0xff] %v13098_v33  ;;  %4800 = vadd.xlane.f32.xlu0 %v13098_v33  ;;  %v14792_v33 = vld [vmem:[#allocation60_spill] sm:$0xff] }
0x13d0   :  { %v5098_v20 = vsub.f32 %v14792_v33, %v12838_v16 }
0x13d2   :  { %v13101_v29 = vpop.eup %8096 }
0x13d3   :  { %14791 = vst [vmem:[#allocation71_spill] sm:$0xff] %v13101_v29  ;;  %4806 = vadd.xlane.f32.xlu1 %v13101_v29 }
0x13d4   :  { %v4360_v34 = vpop.xlane.xlu0 %4359 }
0x13d5   :  { %v4379_v31 = vsub.f32 %v12809_v49, %v4360_v34 }
0x13d7   :  { %v4407_v4 = vmul.f32 1.442695, %v4379_v31 }
0x13d8   :  { %v4366_v48 = vpop.xlane.xlu1 %4365  ;;  %v4725_v18 = vpop.xlane.xlu0 %4724 }
0x13d9   :  { %8098 = vpow2.f32 %v4407_v4  ;;  %v4382_v26 = vsub.f32 %v12829_v8, %v4366_v48  ;;  %v4744_v6 = vsub.f32 %v12825_v22, %v4725_v18  ;;  %v5115_v4 = vmul.f32 1.442695, %v5098_v20  ;;  %v14793_v8 = vld [vmem:[#allocation35_spill] sm:$0xff]  ;;  %v14794_v18 = vld [vmem:[#allocation40_spill] sm:$0xff] }
0x13da   :  { %v5097_v22 = vsub.f32 %v14793_v8, %v12896_v39 }
0x13db   :  { %v4413_v40 = vmul.f32 1.442695, %v4382_v26  ;;  %v4772_v36 = vmul.f32 1.442695, %v4744_v6  ;;  %v5100_v26 = vsub.f32 %v14794_v18, %v12951_v2 }
0x13dc   :  { %v13107_v37 = vpop.xlane.xlu1 %5087  ;;  %v4731_v1 = vpop.xlane.xlu0 %4730 }
0x13dd   :  { %8100 = vpow2.f32 %v4413_v40  ;;  %v4747_v29 = vsub.f32 %v12844_v9, %v4731_v1  ;;  %v14795_v1 = vld [vmem:[#allocation28_spill] sm:$0xff]  ;;  %v5119_v39 = vmul.f32 1.442695, %v5100_v26 }
0x13de   :  { %8102 = vpow2.f32 %v4772_v36  ;;  %v5463_v20 = vsub.f32 %v14795_v1, %v12862_v50 }
0x13df   :  { %v4778_v49 = vmul.f32 1.442695, %v4747_v29  ;;  %v5113_v29 = vmul.f32 1.442695, %v5097_v22 }
0x13e0   :  { %v13112_v34 = vpop.xlane.xlu1 %5448  ;;  %v4364_v31 = vpop.xlane.xlu0 %4363 }
0x13e1   :  { %v4381_v48 = vsub.f32 %v12872_v38, %v4364_v31  ;;  %8104 = vpow2.f32 %v4778_v49  ;;  %v5480_v31 = vmul.f32 1.442695, %v5463_v20 }
0x13e2   :  { %8106 = vpow2.f32 %v5115_v4  ;;  %v14797_v4 = vld [vmem:[#allocation61_spill] sm:$0xff] }
0x13e3   :  { %v13119_v6 = vpop.eup %8098  ;;  %v4411_v16 = vmul.f32 1.442695, %v4381_v48  ;;  %v5099_v50 = vsub.f32 %v14797_v4, %v12983_v60  ;;  %v14801_v60 = vld [vmem:[#allocation45_spill] sm:$0xff] }
0x13e4   :  { %v4729_v33 = vpop.xlane.xlu1 %4728  ;;  %4439 = vadd.xlane.f32.xlu0 %v13119_v6  ;;  %v13122_v9 = vpop.xlane.xlu0 %5085  ;;  %v5465_v20 = vsub.f32 %v14801_v60, %v12968_v51 }
0x13e5   :  { %8108 = vpow2.f32 %v4411_v16  ;;  %v4746_v38 = vsub.f32 %v12884_v58, %v4729_v33  ;;  %v14798_v58 = vld [vmem:[#allocation43_spill] sm:$0xff]  ;;  %v5117_v1 = vmul.f32 1.442695, %v5099_v50 }
0x13e6   :  { %8110 = vpow2.f32 %v5113_v29  ;;  %v5102_v8 = vsub.f32 %v14798_v58, %v13005_v21  ;;  %v14800_v16 = vld [vmem:[#allocation67_spill] sm:$0xff]  ;;  %v5484_v51 = vmul.f32 1.442695, %v5465_v20  ;;  %v14804_v58 = vld [vmem:[#allocation42_spill] sm:$0xff] }
0x13e7   :  { %v13127_v40 = vpop.eup %8100  ;;  %8112 = vpow2.f32 %v5119_v39  ;;  %v4776_v22 = vmul.f32 1.442695, %v4746_v38  ;;  %v5462_v33 = vsub.f32 %v14800_v16, %v12916_v24  ;;  %v14803_v24 = vld [vmem:[#allocation20_spill] sm:$0xff] }
0x13e8   :  { %14796 = vst [vmem:[#allocation25_spill] sm:$0xff] %v13127_v40  ;;  %v13129_v2 = vpop.eup %8102  ;;  %v13131_v36 = vpop.xlane.xlu1 %5091  ;;  %4445 = vadd.xlane.f32.xlu1 %v13127_v40  ;;  %8114 = vpow2.f32 %v5480_v31  ;;  %v5123_v29 = vmul.f32 1.442695, %v5102_v8  ;;  %v5101_v50 = vsub.f32 %v14803_v24, %v13007_v28  ;;  %v5104_v8 = vsub.f32 %v14804_v58, %v13044_v25  ;;  %v14807_v28 = vld [vmem:[#allocation33_spill] sm:$0xff]  ;;  %v14808_v25 = vld [vmem:[#allocation48_spill] sm:$0xff] }
0x13e9   :  { %v13134_v49 = vpop.xlane.xlu0 %5446  ;;  %4804 = vadd.xlane.f32.xlu0 %v13129_v2  ;;  %8116 = vpow2.f32 %v4776_v22  ;;  %v5478_v31 = vmul.f32 1.442695, %v5462_v33  ;;  %v5467_v20 = vsub.f32 %v14808_v25, %v13015_v63 }
0x13ea   :  { %8118 = vpow2.f32 %v5117_v1  ;;  %v5464_v1 = vsub.f32 %v14807_v28, %v12953_v41  ;;  %v5121_v24 = vmul.f32 1.442695, %v5101_v50 }
0x13eb   :  { %v13141_v48 = vpop.eup %8104  ;;  %8120 = vpow2.f32 %v5123_v29  ;;  %v5127_v29 = vmul.f32 1.442695, %v5104_v8  ;;  %v5488_v8 = vmul.f32 1.442695, %v5467_v20 }
0x13ec   :  { %14799 = vst [vmem:[#allocation64_spill] sm:$0xff] %v13141_v48  ;;  %v13143_v18 = vpop.xlane.xlu1 %5452  ;;  %4810 = vadd.xlane.f32.xlu1 %v13141_v48  ;;  %v13152_v21 = vpop.eup %8106  ;;  %8122 = vpow2.f32 %v5478_v31  ;;  %v14810_v48 = vld [vmem:[#allocation44_spill] sm:$0xff]  ;;  %v14811_v31 = vld [vmem:[#allocation26_spill] sm:$0xff] }
0x13ed   :  { %v13145_v26 = vpop.xlane.xlu0 %5089  ;;  %14802 = vst [vmem:[#allocation73_spill] sm:$0xff] %v13152_v21  ;;  %8124 = vpow2.f32 %v5484_v51  ;;  %v5106_v41 = vsub.f32 %v14811_v31, %v13049_v42  ;;  %v14812_v51 = vld [vmem:[#allocation16_spill] sm:$0xff]  ;;  %v14813_v42 = vld [vmem:[#allocation22_spill] sm:$0xff] }
0x13ee   :  { %8126 = vpow2.f32 %v5121_v24  ;;  %v5103_v63 = vsub.f32 %v14812_v51, %v13051_v17  ;;  %v5468_v25 = vsub.f32 %v14813_v42, %v13053_v43  ;;  %v14815_v51 = vld [vmem:[#allocation59_spill] sm:$0xff] }
0x13ef   :  { %v13154_v39 = vpop.eup %8108  ;;  %8128 = vpow2.f32 %v5127_v29  ;;  %v14816_v29 = vld [vmem:[#allocation51_spill] sm:$0xff] }
0x13f0   :  { %v13156_v38 = vpop.xlane.xlu1 %5095  ;;  %5147 = vadd.xlane.f32.xlu1 %v13152_v21  ;;  %4443 = vadd.xlane.f32.xlu0 %v13154_v39  ;;  %v13166_v22 = vpop.eup %8110  ;;  %v5466_v21 = vsub.f32 %v14810_v48, %v13017_v11  ;;  %v5125_v17 = vmul.f32 1.442695, %v5103_v63  ;;  %v5490_v43 = vmul.f32 1.442695, %v5468_v25 }
0x13f1   :  { %v13158_v4 = vpop.xlane.xlu0 %5450  ;;  %14805 = vst [vmem:[#allocation24_spill] sm:$0xff] %v13166_v22  ;;  %v13168_v16 = vpop.eup %8112 }
0x13f2   :  { %14806 = vst [vmem:[#allocation63_spill] sm:$0xff] %v13168_v16  ;;  %v13180_v58 = vpop.eup %8114  ;;  %v5486_v48 = vmul.f32 1.442695, %v5466_v21 }
0x13f3   :  { %14809 = vst [vmem:[#allocation15_spill] sm:$0xff] %v13180_v58  ;;  %v13184_v40 = vpop.eup %8116 }
0x13f4   :  { %v13170_v60 = vpop.xlane.xlu1 %5456  ;;  %5151 = vadd.xlane.f32.xlu1 %v13168_v16  ;;  %5145 = vadd.xlane.f32.xlu0 %v13166_v22  ;;  %v5482_v16 = vmul.f32 1.442695, %v5464_v1  ;;  %v13196_v11 = vpop.eup %8118  ;;  %v5131_v22 = vmul.f32 1.442695, %v5106_v41  ;;  %v5105_v41 = vsub.f32 %v14816_v29, %v13070_v56 }
0x13f5   :  { %v13172_v33 = vpop.xlane.xlu0 %5454  ;;  %v13200_v31 = vpop.eup %8120 }
0x13f6   :  { %14814 = vst [vmem:[#allocation3_spill] sm:$0xff] %v13200_v31  ;;  %8130 = vpow2.f32 %v5482_v16  ;;  %v13208_v20 = vpop.eup %8122  ;;  %v5129_v56 = vmul.f32 1.442695, %v5105_v41 }
0x13f7   :  { %8132 = vpow2.f32 %v5488_v8  ;;  %v13212_v42 = vpop.eup %8124 }
0x13f8   :  { %v13188_v50 = vpop.xlane.xlu1 %5460  ;;  %5512 = vadd.xlane.f32.xlu1 %v13180_v58  ;;  %4808 = vadd.xlane.f32.xlu0 %v13184_v40  ;;  %v5469_v58 = vsub.f32 %v14815_v51, %v13067_v32  ;;  %8134 = vpow2.f32 %v5486_v48  ;;  %v14817_v51 = vld [vmem:[#allocation47_spill] sm:$0xff]  ;;  %v13218_v25 = vpop.eup %8126 }
0x13f9   :  { %v13190_v28 = vpop.xlane.xlu0 %5093  ;;  %8136 = vpow2.f32 %v5131_v22  ;;  %v14818_v22 = vld [vmem:[#allocation57_spill] sm:$0xff]  ;;  %v13222_v29 = vpop.eup %8128 }
0x13fa   :  { %8138 = vpow2.f32 %v5125_v17  ;;  %v5492_v32 = vmul.f32 1.442695, %v5469_v58  ;;  %14819 = vst [vmem:[#allocation58_spill] sm:$0xff] %v13222_v29 }
0x13fc   :  { %v4418_v1 = vpop.xlane.xlu1 %4417  ;;  %5155 = vadd.xlane.f32.xlu1 %v13200_v31  ;;  %5149 = vadd.xlane.f32.xlu0 %v13196_v11  ;;  %v5108_v31 = vsub.f32 %v14817_v51, %v13107_v37 }
0x13fd   :  { %v13202_v24 = vpop.xlane.xlu0 %5458  ;;  %v4448_v21 = vadd.f32 1e-16, %v4418_v1  ;;  %v5471_v1 = vsub.f32 %v14818_v22, %v13112_v34 }
0x13fe   :  { %v5135_v37 = vmul.f32 1.442695, %v5108_v31 }
0x13ff   :  { %8140 = vrcp.f32 %v4448_v21  ;;  %v5496_v34 = vmul.f32 1.442695, %v5471_v1 }
0x1400   :  { %v4783_v16 = vpop.xlane.xlu1 %4782  ;;  %5516 = vadd.xlane.f32.xlu1 %v13212_v42  ;;  %5510 = vadd.xlane.f32.xlu0 %v13208_v20  ;;  %8142 = vpow2.f32 %v5490_v43  ;;  %v13228_v41 = vpop.eup %8130 }
0x1401   :  { %v4416_v63 = vpop.xlane.xlu0 %4415  ;;  %v4813_v48 = vadd.f32 1e-16, %v4783_v16  ;;  %v14820_v16 = vld [vmem:[#allocation75_spill] sm:$0xff]  ;;  %v13230_v51 = vpop.eup %8132 }
0x1402   :  { %v4447_v8 = vadd.f32 1e-16, %v4416_v63  ;;  %v5107_v63 = vsub.f32 %v14820_v16, %v13122_v9 }
0x1404   :  { %8144 = vrcp.f32 %v4447_v8  ;;  %v4422_v58 = vpop.xlane.xlu1 %4421  ;;  %5159 = vadd.xlane.f32.xlu1 %v13222_v29  ;;  %5153 = vadd.xlane.f32.xlu0 %v13218_v25  ;;  %v14821_v8 = vld [vmem:[#allocation32_spill] sm:$0xff]  ;;  %v13234_v29 = vpop.eup %8134 }
0x1405   :  { %v4781_v17 = vpop.xlane.xlu0 %4780  ;;  %8146 = vpow2.f32 %v5492_v32  ;;  %v4450_v43 = vadd.f32 1e-16, %v4422_v58  ;;  %v5110_v32 = vsub.f32 %v14821_v8, %v13131_v36  ;;  %v13240_v1 = vpop.eup %8136  ;;  %v5133_v58 = vmul.f32 1.442695, %v5107_v63 }
0x1406   :  { %v4812_v21 = vadd.f32 1e-16, %v4781_v17  ;;  %8148 = vrcp.f32 %v4813_v48  ;;  %v14822_v17 = vld [vmem:[#allocation68_spill] sm:$0xff]  ;;  %14823 = vst [vmem:[#allocation38_spill] sm:$0xff] %v13240_v1  ;;  %v13242_v36 = vpop.eup %8138 }
0x1407   :  { %8150 = vpow2.f32 %v5129_v56  ;;  %v5470_v9 = vsub.f32 %v14822_v17, %v13134_v49  ;;  %v5139_v16 = vmul.f32 1.442695, %v5110_v32 }
0x1408   :  { %8152 = vrcp.f32 %v4812_v21  ;;  %v4787_v31 = vpop.xlane.xlu1 %4786  ;;  %5520 = vadd.xlane.f32.xlu1 %v13230_v51  ;;  %5514 = vadd.xlane.f32.xlu0 %v13228_v41 }
0x1409   :  { %v4420_v22 = vpop.xlane.xlu0 %4419  ;;  %8154 = vpow2.f32 %v5135_v37  ;;  %v4815_v48 = vadd.f32 1e-16, %v4787_v31  ;;  %v8141_v21 = vpop.eup %8140  ;;  %v5473_v37 = vsub.f32 %v12920_v47, %v13143_v18  ;;  %v5494_v31 = vmul.f32 1.442695, %v5470_v9 }
0x140a   :  { %v4449_v56 = vadd.f32 1e-16, %v4420_v22  ;;  %8156 = vrcp.f32 %v4450_v43  ;;  %v13246_v8 = vpop.eup %8142  ;;  %v4480_v47 = vmul.f32 %v8141_v21, %v12981_v14  ;;  %v5109_v9 = vsub.f32 %v12924_v0, %v13145_v26 }
0x140b   :  { %8158 = vpow2.f32 %v5496_v34  ;;  %v5500_v17 = vmul.f32 1.442695, %v5473_v37 }
0x140c   :  { %8160 = vrcp.f32 %v4449_v56  ;;  %5163 = vadd.xlane.f32.xlu1 %v13240_v1  ;;  %5157 = vadd.xlane.f32.xlu0 %v13242_v36 }
0x140d   :  { %v4785_v49 = vpop.xlane.xlu0 %4784  ;;  %8162 = vrcp.f32 %v4815_v48 }
0x140e   :  { %v4814_v63 = vadd.f32 1e-16, %v4785_v49  ;;  %v8145_v43 = vpop.eup %8144  ;;  %8164 = vpow2.f32 %v5133_v58  ;;  %v5112_v58 = vsub.f32 %v12938_v55, %v13156_v38  ;;  %v5137_v55 = vmul.f32 1.442695, %v5109_v9 }
0x140f   :  { %v13250_v22 = vpop.eup %8146  ;;  %v4426_v34 = vpop.xlane.xlu1 %4425  ;;  %v4479_v32 = vmul.f32 %v8145_v43, %v12994_v35 }
0x1410   :  { %8166 = vrcp.f32 %v4814_v63  ;;  %v8149_v18 = vpop.eup %8148  ;;  %v4452_v48 = vadd.f32 1e-16, %v4426_v34  ;;  %5524 = vadd.xlane.f32.xlu1 %v13250_v22  ;;  %5518 = vadd.xlane.f32.xlu0 %v13234_v29  ;;  %v5143_v43 = vmul.f32 1.442695, %v5112_v58  ;;  %v5472_v34 = vsub.f32 %v12942_v61, %v13158_v4 }
0x1411   :  { %8168 = vpow2.f32 %v5139_v16  ;;  %v4424_v56 = vpop.xlane.xlu0 %4423  ;;  %v13256_v1 = vpop.eup %8150  ;;  %v4495_v14 = vpack.c.bf16 %v4480_v47, %v4479_v32  ;;  %v4845_v37 = vmul.f32 %v8149_v18, %v12992_v53  ;;  %v5475_v53 = vsub.f32 %v12957_v52, %v13170_v60 }
0x1412   :  { %8170 = vpow2.f32 %v5494_v31  ;;  %v4451_v35 = vadd.f32 1e-16, %v4424_v56  ;;  %v8153_v21 = vpop.eup %8152  ;;  %v5498_v4 = vmul.f32 1.442695, %v5472_v34  ;;  %v5477_v56 = vsub.f32 %v12972_v62, %v13188_v50 }
0x1413   :  { %8172 = vrcp.f32 %v4452_v48  ;;  %v13262_v16 = vpop.eup %8154  ;;  %7718 = vmatprep.subr.bf16.mxu0 %v4495_v14  ;;  %v4791_v0 = vpop.xlane.xlu1 %4790  ;;  %v4844_v26 = vmul.f32 %v8153_v21, %v13001_v45 }
0x1414   :  { %8174 = vrcp.f32 %v4451_v35  ;;  %v8157_v49 = vpop.eup %8156  ;;  %v4817_v38 = vadd.f32 1e-16, %v4791_v0  ;;  %7719 = vmatpush3.bf16.xpose.msra.mxu0 %v4495_v14  ;;  %5167 = vadd.xlane.f32.xlu1 %v13262_v16  ;;  %v5508_v0 = vmul.f32 1.442695, %v5477_v56 }
0x1415   :  { %8176 = vpow2.f32 %v5500_v17  ;;  %v4789_v31 = vpop.xlane.xlu0 %4788  ;;  %v13266_v63 = vpop.eup %8158  ;;  %5161 = vadd.xlane.f32.xlu0 %v13256_v1  ;;  %v4860_v45 = vpack.c.bf16 %v4845_v37, %v4844_v26  ;;  %v4482_v9 = vmul.f32 %v8157_v49, %v13003_v27  ;;  %v5111_v27 = vsub.f32 %v12976_v3, %v13190_v28 }
0x1416   :  { %v4816_v32 = vadd.f32 1e-16, %v4789_v31  ;;  %v8161_v47 = vpop.eup %8160  ;;  %8178 = vrcp.f32 %v4817_v38 }
0x1417   :  { %v8163_v18 = vpop.eup %8162  ;;  %7738 = vmatprep.subr.bf16.mxu1 %v4860_v45  ;;  %v4481_v17 = vmul.f32 %v8161_v47, %v13013_v13  ;;  %v5504_v13 = vmul.f32 1.442695, %v5475_v53 }
0x1418   :  { %8180 = vrcp.f32 %v4816_v32  ;;  %v13276_v48 = vpop.eup %8164  ;;  %7739 = vmatpush3.bf16.xpose.msra.mxu1 %v4860_v45  ;;  %5528 = vadd.xlane.f32.xlu1 %v13266_v63  ;;  %v4847_v35 = vmul.f32 %v8163_v18, %v13011_v46  ;;  %v5474_v46 = vsub.f32 %v12961_v7, %v13172_v33  ;;  %v5476_v7 = vsub.f32 %v12987_v54, %v13202_v24 }
0x1419   :  { %8182 = vpow2.f32 %v5137_v55  ;;  %5522 = vadd.xlane.f32.xlu0 %v13246_v8  ;;  %v4496_v52 = vpack.c.bf16 %v4482_v9, %v4481_v17 }
0x141a   :  { %v8167_v61 = vpop.eup %8166  ;;  %8184 = vpow2.f32 %v5143_v43  ;;  %v5502_v31 = vmul.f32 1.442695, %v5474_v46 }
0x141b   :  { %v13282_v60 = vpop.eup %8168  ;;  %v4846_v58 = vmul.f32 %v8167_v61, %v13021_v12  ;;  %7720 = vmatprep.subr.bf16.mxu0 %v4496_v52  ;;  %8186 = vpow2.f32 %v5498_v4  ;;  %v5141_v12 = vmul.f32 1.442695, %v5111_v27  ;;  %v4430_v24 = vpop.xlane.xlu1 %4429 }
0x141c   :  { %v13288_v14 = vpop.eup %8170  ;;  %7721 = vmatpush3.bf16.xpose.msra.mxu0 %v4496_v52  ;;  %5171 = vadd.xlane.f32.xlu1 %v13282_v60  ;;  %8188 = vpow2.f32 %v5504_v13  ;;  %v4454_v47 = vadd.f32 1e-16, %v4430_v24 }
0x141d   :  { %v8173_v21 = vpop.eup %8172  ;;  %v4861_v62 = vpack.c.bf16 %v4847_v35, %v4846_v58  ;;  %5165 = vadd.xlane.f32.xlu0 %v13276_v48  ;;  %8190 = vpow2.f32 %v5508_v0 }
0x141e   :  { %v8175_v50 = vpop.eup %8174  ;;  %v4484_v26 = vmul.f32 %v8173_v21, %v13026_v10  ;;  %8192 = vpow2.f32 %v5141_v12 }
0x141f   :  { %v13293_v3 = vpop.eup %8176  ;;  %7740 = vmatprep.subr.bf16.mxu1 %v4861_v62  ;;  %v4483_v28 = vmul.f32 %v8175_v50, %v13028_v30  ;;  %8194 = vpow2.f32 %v5502_v31  ;;  %v4795_v53 = vpop.xlane.xlu1 %4794 }
0x1420   :  { %v8179_v37 = vpop.eup %8178  ;;  %7741 = vmatpush3.bf16.xpose.msra.mxu1 %v4861_v62  ;;  %5532 = vadd.xlane.f32.xlu1 %v13293_v3  ;;  %v4819_v61 = vadd.f32 1e-16, %v4795_v53 }
0x1421   :  { %v4497_v49 = vpack.c.bf16 %v4484_v26, %v4483_v28  ;;  %5526 = vadd.xlane.f32.xlu0 %v13288_v14  ;;  %v4849_v10 = vmul.f32 %v8179_v37, %v13032_v19  ;;  %v5506_v19 = vmul.f32 1.442695, %v5476_v7 }
0x1422   :  { %v8181_v55 = vpop.eup %8180 }
0x1423   :  { %v13301_v38 = vpop.eup %8182  ;;  %7722 = vmatprep.subr.bf16.mxu0 %v4497_v49  ;;  %v4848_v30 = vmul.f32 %v8181_v55, %v13034_v23  ;;  %8196 = vpow2.f32 %v5506_v19 }
0x1424   :  { %v13306_v33 = vpop.eup %8184  ;;  %7723 = vmatpush3.bf16.xpose.msra.mxu0 %v4497_v49  ;;  %8198 = vrcp.f32 %v4454_v47  ;;  %v14825_v47 = vld [vmem:[#allocation30_spill] sm:$0xff] }
0x1425   :  { %v4862_v43 = vpack.c.bf16 %v4849_v10, %v4848_v30  ;;  %5175 = vadd.xlane.f32.xlu1 %v13306_v33  ;;  %5169 = vadd.xlane.f32.xlu0 %v13301_v38  ;;  %v13310_v34 = vpop.eup %8186 }
0x1426   :  { %v13312_v32 = vpop.eup %8188 }
0x1427   :  { %7742 = vmatprep.subr.bf16.mxu1 %v4862_v43  ;;  %v13316_v54 = vpop.eup %8190 }
0x1428   :  { %7743 = vmatpush3.bf16.xpose.msra.mxu1 %v4862_v43  ;;  %v13318_v23 = vpop.eup %8192 }
0x1429   :  { %5536 = vadd.xlane.f32.xlu1 %v13312_v32  ;;  %5530 = vadd.xlane.f32.xlu0 %v13310_v34  ;;  %v13322_v45 = vpop.eup %8194 }
0x142d   :  { %5540 = vadd.xlane.f32.xlu1 %v13316_v54  ;;  %5173 = vadd.xlane.f32.xlu0 %v13318_v23  ;;  %v13325_v18 = vpop.eup %8196 }
0x142e   :  { %v8199_v52 = vpop.eup %8198 }
0x142f   :  { %v4486_v58 = vmul.f32 %v8199_v52, %v13038_v57  ;;  %v14826_v52 = vld [vmem:[#allocation72_spill] sm:$0xff] }
0x1431   :  { %5534 = vadd.xlane.f32.xlu0 %v13322_v45 }
0x1434   :  { %v4428_v17 = vpop.xlane.xlu0 %4427 }
0x1435   :  { %5538 = vadd.xlane.f32.xlu0 %v13325_v18  ;;  %v4453_v9 = vadd.f32 1e-16, %v4428_v17 }
0x1437   :  { %8200 = vrcp.f32 %v4453_v9 }
0x1438   :  { %8202 = vrcp.f32 %v4819_v61  ;;  %v4434_v35 = vpop.xlane.xlu1 %4433 }
0x1439   :  { %v4793_v4 = vpop.xlane.xlu0 %4792  ;;  %v4456_v0 = vadd.f32 1e-16, %v4434_v35 }
0x143a   :  { %v4818_v56 = vadd.f32 1e-16, %v4793_v4 }
0x143c   :  { %8204 = vrcp.f32 %v4818_v56 }
0x143d   :  { %8206 = vrcp.f32 %v4456_v0 }
0x1441   :  { %v8201_v13 = vpop.eup %8200 }
0x1442   :  { %v4485_v27 = vmul.f32 %v8201_v13, %v13055_v5  ;;  %v8203_v21 = vpop.eup %8202 }
0x1443   :  { %v4851_v12 = vmul.f32 %v8203_v21, %v13041_v59  ;;  %v14824_v59 = vld [vmem:[#allocation54_spill] sm:$0xff] }
0x1444   :  { %v4498_v62 = vpack.c.bf16 %v4486_v58, %v4485_v27  ;;  %v4799_v26 = vpop.xlane.xlu1 %4798  ;;  %v3768_v27 = vld [vmem:[%s14827_s7 + $0x8] sm:$0xff] }
0x1445   :  { %v4821_v49 = vadd.f32 1e-16, %v4799_v26  ;;  %5654 = vperm.xlu1 %7987, %v3768_v27   ;;  %v3776_v26 = vld [vmem:[%s14827_s7 + $0x48] sm:$0xff] }
0x1446   :  { %v8205_v50 = vpop.eup %8204  ;;  %7724 = vmatprep.subr.bf16.mxu0 %v4498_v62 }
0x1447   :  { %7725 = vmatpush3.bf16.xpose.msra.mxu0 %v4498_v62  ;;  %v4850_v46 = vmul.f32 %v8205_v50, %v13062_v44  ;;  %v8207_v31 = vpop.eup %8206  ;;  %v3767_v62 = vld [vmem:[%s14827_s7] sm:$0xff]  ;;  %v3770_v50 = vld [vmem:[%s14827_s7 + $0x18] sm:$0xff] }
0x1448   :  { %v4432_v28 = vpop.xlane.xlu0 %4431  ;;  %v4438_v10 = vpop.xlane.xlu1 %4437  ;;  %v4488_v53 = vmul.f32 %v8207_v31, %v14825_v47  ;;  %v3780_v47 = vld [vmem:[%s14827_s7 + $0x68] sm:$0xff] }
0x1449   :  { %v4863_v37 = vpack.c.bf16 %v4851_v12, %v4850_v46  ;;  %v4455_v55 = vadd.f32 1e-16, %v4432_v28  ;;  %v4458_v7 = vadd.f32 1e-16, %v4438_v10  ;;  %v14828_v28 = vld [vmem:[#allocation76_spill] sm:$0xff] }
0x144b   :  { %7744 = vmatprep.subr.bf16.mxu1 %v4863_v37  ;;  %8208 = vrcp.f32 %v4455_v55  ;;  %5649 = vperm.xlu0 %7986, %v3767_v62   ;;  %v3777_v62 = vld [vmem:[%s14827_s7 + $0x50] sm:$0xff] }
0x144c   :  { %7745 = vmatpush3.bf16.xpose.msra.mxu1 %v4863_v37  ;;  %v4797_v57 = vpop.xlane.xlu0 %4796  ;;  %8210 = vrcp.f32 %v4821_v49  ;;  %v14829_v49 = vld [vmem:[#allocation2_spill] sm:$0xff] }
0x144d   :  { %v4820_v5 = vadd.f32 1e-16, %v4797_v57  ;;  %v3771_v57 = vld [vmem:[%s14827_s7 + $0x20] sm:$0xff] }
0x144f   :  { %8212 = vrcp.f32 %v4820_v5  ;;  %5694 = vperm.xlu0 %7986, %v3776_v26   ;;  %v3778_v5 = vld [vmem:[%s14827_s7 + $0x58] sm:$0xff] }
0x1450   :  { %8214 = vrcp.f32 %v4458_v7  ;;  %v14830_v7 = vld [vmem:[#allocation13_spill] sm:$0xff] }
0x1453   :  { %5704 = vperm.xlu0 %7986, %v3778_v5  }
0x1454   :  { %v4803_v30 = vpop.xlane.xlu1 %4802 }
0x1455   :  { %v8209_v43 = vpop.eup %8208  ;;  %v4823_v17 = vadd.f32 1e-16, %v4803_v30 }
0x1456   :  { %v8211_v44 = vpop.eup %8210  ;;  %v4487_v24 = vmul.f32 %v8209_v43, %v14824_v59  ;;  %v14831_v43 = vld [vmem:[#allocation74_spill] sm:$0xff]  ;;  %v3772_v59 = vld [vmem:[%s14827_s7 + $0x28] sm:$0xff] }
0x1457   :  { %v4853_v13 = vmul.f32 %v8211_v44, %v14826_v52  ;;  %5714 = vperm.xlu0 %7986, %v3780_v47  }
0x1458   :  { %v4436_v19 = vpop.xlane.xlu0 %4435  ;;  %v4499_v4 = vpack.c.bf16 %v4488_v53, %v4487_v24 }
0x1459   :  { %v4457_v9 = vadd.f32 1e-16, %v4436_v19  ;;  %v8213_v61 = vpop.eup %8212  ;;  %v4442_v19 = vpop.xlane.xlu1 %4441 }
0x145a   :  { %v4852_v56 = vmul.f32 %v8213_v61, %v13084_v15  ;;  %7726 = vmatprep.subr.bf16.mxu0 %v4499_v4  ;;  %v3769_v15 = vld [vmem:[%s14827_s7 + $0x10] sm:$0xff]  ;;  %v8215_v0 = vpop.eup %8214  ;;  %v4460_v53 = vadd.f32 1e-16, %v4442_v19  ;;  %v3782_v61 = vld [vmem:[%s14827_s7 + $0x78] sm:$0xff] }
0x145b   :  { %8216 = vrcp.f32 %v4457_v9  ;;  %7727 = vmatpush3.bf16.xpose.msra.mxu0 %v4499_v4  ;;  %5659 = vperm.xlu1 %7987, %v3769_v15   ;;  %v4490_v55 = vmul.f32 %v8215_v0, %v14829_v49  ;;  %v14832_v49 = vld [vmem:[#allocation69_spill] sm:$0xff] }
0x145c   :  { %v4801_v58 = vpop.xlane.xlu0 %4800  ;;  %8218 = vrcp.f32 %v4823_v17  ;;  %v4864_v21 = vpack.c.bf16 %v4853_v13, %v4852_v56  ;;  %v3773_v17 = vld [vmem:[%s14827_s7 + $0x30] sm:$0xff]  ;;  %v3774_v13 = vld [vmem:[%s14827_s7 + $0x38] sm:$0xff]  ;;  %5724 = vperm.xlu0 %7986, %v3782_v61  }
0x145d   :  { %v4822_v35 = vadd.f32 1e-16, %v4801_v58 }
0x145e   :  { %7746 = vmatprep.subr.bf16.mxu1 %v4864_v21 }
0x145f   :  { %8220 = vrcp.f32 %v4822_v35  ;;  %7747 = vmatpush3.bf16.xpose.msra.mxu1 %v4864_v21  ;;  %5664 = vperm.xlu1 %7987, %v3770_v50   ;;  %v3775_v21 = vld [vmem:[%s14827_s7 + $0x40] sm:$0xff] }
0x1460   :  { %v4807_v9 = vpop.xlane.xlu1 %4806  ;;  %8222 = vrcp.f32 %v4460_v53 }
0x1461   :  { %v4825_v52 = vadd.f32 1e-16, %v4807_v9 }
0x1463   :  { %5669 = vperm.xlu1 %7987, %v3771_v57   ;;  %v3779_v57 = vld [vmem:[%s14827_s7 + $0x60] sm:$0xff] }
0x1465   :  { %v8217_v46 = vpop.eup %8216 }
0x1466   :  { %v8219_v12 = vpop.eup %8218  ;;  %v4489_v37 = vmul.f32 %v8217_v46, %v14828_v28 }
0x1467   :  { %v4855_v44 = vmul.f32 %v8219_v12, %v14831_v43  ;;  %5674 = vperm.xlu1 %7987, %v3772_v59  }
0x1468   :  { %v4500_v31 = vpack.c.bf16 %v4490_v55, %v4489_v37 }
0x1469   :  { %v8221_v10 = vpop.eup %8220 }
0x146a   :  { %v4854_v30 = vmul.f32 %v8221_v10, %v14830_v7  ;;  %7728 = vmatprep.subr.bf16.mxu0 %v4500_v31  ;;  %v8223_v50 = vpop.eup %8222 }
0x146b   :  { %7729 = vmatpush3.bf16.xpose.msra.mxu0 %v4500_v31  ;;  %5679 = vperm.xlu1 %7987, %v3773_v17   ;;  %v4492_v55 = vmul.f32 %v8223_v50, %v14832_v49 }
0x146c   :  { %v4865_v24 = vpack.c.bf16 %v4855_v44, %v4854_v30 }
0x146e   :  { %7748 = vmatprep.subr.bf16.mxu1 %v4865_v24 }
0x146f   :  { %7749 = vmatpush3.bf16.xpose.msra.mxu1 %v4865_v24  ;;  %5684 = vperm.xlu1 %7987, %v3774_v13   ;;  %v14833_v24 = vld [vmem:[#allocation71_spill] sm:$0xff] }
0x1471   :  { %v4440_v4 = vpop.xlane.xlu0 %4439 }
0x1472   :  { %v4459_v56 = vadd.f32 1e-16, %v4440_v4 }
0x1473   :  { %5689 = vperm.xlu1 %7987, %v3775_v21   ;;  %v14834_v21 = vld [vmem:[#allocation25_spill] sm:$0xff] }
0x1474   :  { %8224 = vrcp.f32 %v4459_v56 }
0x1475   :  { %v4446_v27 = vpop.xlane.xlu1 %4445  ;;  %8226 = vrcp.f32 %v4825_v52 }
0x1476   :  { %v4805_v58 = vpop.xlane.xlu0 %4804  ;;  %v4462_v0 = vadd.f32 1e-16, %v4446_v27 }
0x1477   :  { %v4824_v35 = vadd.f32 1e-16, %v4805_v58  ;;  %5699 = vperm.xlu1 %7987, %v3777_v62  }
0x1479   :  { %8228 = vrcp.f32 %v4824_v35  ;;  %v4811_v15 = vpop.xlane.xlu1 %4810 }
0x147a   :  { %8230 = vrcp.f32 %v4462_v0  ;;  %v4827_v19 = vadd.f32 1e-16, %v4811_v15 }
0x147b   :  { %5709 = vperm.xlu1 %7987, %v3779_v57  }
0x147d   :  { %v5148_v46 = vpop.xlane.xlu1 %5147  ;;  %v4444_v12 = vpop.xlane.xlu0 %4443 }
0x147e   :  { %v8225_v26 = vpop.eup %8224  ;;  %v4461_v28 = vadd.f32 1e-16, %v4444_v12  ;;  %v5178_v5 = vadd.f32 1e-16, %v5148_v46 }
0x147f   :  { %v4491_v37 = vmul.f32 %v8225_v26, %v13119_v6  ;;  %v8227_v10 = vpop.eup %8226  ;;  %v3781_v6 = vld [vmem:[%s14827_s7 + $0x70] sm:$0xff] }
0x1480   :  { %8232 = vrcp.f32 %v4461_v28  ;;  %v4857_v47 = vmul.f32 %v8227_v10, %v14833_v24  ;;  %5719 = vperm.xlu1 %7987, %v3781_v6   ;;  %v14837_v6 = vld [vmem:[#allocation64_spill] sm:$0xff] }
0x1481   :  { %v4501_v31 = vpack.c.bf16 %v4492_v55, %v4491_v37  ;;  %v5152_v7 = vpop.xlane.xlu1 %5151  ;;  %v5146_v30 = vpop.xlane.xlu0 %5145  ;;  %8234 = vrcp.f32 %v5178_v5  ;;  %v14835_v37 = vld [vmem:[#allocation24_spill] sm:$0xff]  ;;  %v14836_v55 = vld [vmem:[#allocation73_spill] sm:$0xff] }
0x1482   :  { %v5177_v44 = vadd.f32 1e-16, %v5146_v30  ;;  %v5180_v4 = vadd.f32 1e-16, %v5152_v7 }
0x1483   :  { %v8229_v43 = vpop.eup %8228  ;;  %7730 = vmatprep.subr.bf16.mxu0 %v4501_v31 }
0x1484   :  { %7731 = vmatpush3.bf16.xpose.msra.mxu0 %v4501_v31  ;;  %v4856_v59 = vmul.f32 %v8229_v43, %v13129_v2  ;;  %8236 = vrcp.f32 %v5177_v44  ;;  %v8231_v56 = vpop.eup %8230 }
0x1485   :  { %v5513_v53 = vpop.xlane.xlu1 %5512  ;;  %v4809_v17 = vpop.xlane.xlu0 %4808  ;;  %8238 = vrcp.f32 %v4827_v19  ;;  %v4494_v15 = vmul.f32 %v8231_v56, %v14834_v21 }
0x1486   :  { %v4866_v9 = vpack.c.bf16 %v4857_v47, %v4856_v59  ;;  %v4826_v61 = vadd.f32 1e-16, %v4809_v17  ;;  %v5543_v2 = vadd.f32 1e-16, %v5513_v53 }
0x1488   :  { %7750 = vmatprep.subr.bf16.mxu1 %v4866_v9  ;;  %8240 = vrcp.f32 %v4826_v61 }
0x1489   :  { %7751 = vmatpush3.bf16.xpose.msra.mxu1 %v4866_v9  ;;  %v5156_v52 = vpop.xlane.xlu1 %5155  ;;  %v5150_v13 = vpop.xlane.xlu0 %5149  ;;  %8242 = vrcp.f32 %v5180_v4  ;;  %v14838_v4 = vld [vmem:[#allocation7_spill] sm:$0xff] }
0x148a   :  { %v5179_v27 = vadd.f32 1e-16, %v5150_v13  ;;  %v8233_v58 = vpop.eup %8232  ;;  %v5182_v28 = vadd.f32 1e-16, %v5156_v52  ;;  %v14839_v52 = vld [vmem:[#allocation63_spill] sm:$0xff] }
0x148b   :  { %v4493_v35 = vmul.f32 %v8233_v58, %v13154_v39  ;;  %v8235_v62 = vpop.eup %8234 }
0x148c   :  { %8244 = vrcp.f32 %v5179_v27  ;;  %v5210_v57 = vmul.f32 %v8235_v62, %v14836_v55 }
0x148d   :  { %v5517_v50 = vpop.xlane.xlu1 %5516  ;;  %v5511_v0 = vpop.xlane.xlu0 %5510  ;;  %v4502_v46 = vpack.c.bf16 %v4494_v15, %v4493_v35  ;;  %8246 = vrcp.f32 %v5543_v2  ;;  %v14840_v2 = vld [vmem:[#allocation10_spill] sm:$0xff] }
0x148e   :  { %v5542_v26 = vadd.f32 1e-16, %v5511_v0  ;;  %v8237_v12 = vpop.eup %8236  ;;  %v5545_v43 = vadd.f32 1e-16, %v5517_v50  ;;  %v14841_v0 = vld [vmem:[#allocation15_spill] sm:$0xff] }
0x148f   :  { %7732 = vmatprep.subr.bf16.mxu0 %v4502_v46  ;;  %v5209_v49 = vmul.f32 %v8237_v12, %v14835_v37  ;;  %v8239_v5 = vpop.eup %8238 }
0x1490   :  { %8248 = vrcp.f32 %v5542_v26  ;;  %7733 = vmatpush3.bf16.xpose.msra.mxu0 %v4502_v46  ;;  %v4859_v19 = vmul.f32 %v8239_v5, %v14837_v6 }
0x1491   :  { %v5160_v39 = vpop.xlane.xlu1 %5159  ;;  %v5154_v10 = vpop.xlane.xlu0 %5153  ;;  %v5225_v7 = vpack.c.bf16 %v5210_v57, %v5209_v49  ;;  %8250 = vrcp.f32 %v5182_v28  ;;  %v14842_v57 = vld [vmem:[#allocation8_spill] sm:$0xff] }
0x1492   :  { %v5181_v31 = vadd.f32 1e-16, %v5154_v10  ;;  %v8241_v30 = vpop.eup %8240  ;;  %v5184_v61 = vadd.f32 1e-16, %v5160_v39  ;;  %v14843_v39 = vld [vmem:[#allocation3_spill] sm:$0xff] }
0x1493   :  { %7758 = vmatprep.subr.bf16.mxu0 %v5225_v7  ;;  %v4858_v44 = vmul.f32 %v8241_v30, %v13184_v40  ;;  %v8243_v59 = vpop.eup %8242  ;;  %v14844_v30 = vld [vmem:[#allocation12_spill] sm:$0xff] }
0x1494   :  { %8252 = vrcp.f32 %v5181_v31  ;;  %v5212_v13 = vmul.f32 %v8243_v59, %v14839_v52  ;;  %v14845_v52 = vld [vmem:[#allocation58_spill] sm:$0xff] }
0x1495   :  { %v5521_v24 = vpop.xlane.xlu1 %5520  ;;  %v5515_v47 = vpop.xlane.xlu0 %5514  ;;  %v4867_v17 = vpack.c.bf16 %v4859_v19, %v4858_v44  ;;  %8254 = vrcp.f32 %v5545_v43 }
0x1496   :  { %v5544_v53 = vadd.f32 1e-16, %v5515_v47  ;;  %v8245_v9 = vpop.eup %8244  ;;  %v5547_v62 = vadd.f32 1e-16, %v5521_v24 }
0x1497   :  { %7735 = vmatmul.mubr.bf16.vlgmr.msra.gmra.mrb[44].mxu0 %v14838_v4  ;;  %7752 = vmatprep.subr.bf16.mxu1 %v4867_v17  ;;  %v5211_v56 = vmul.f32 %v8245_v9, %v13196_v11  ;;  %v8247_v27 = vpop.eup %8246 }
0x1498   :  { %8256 = vrcp.f32 %v5544_v53  ;;  %7753 = vmatpush3.bf16.xpose.msra.mxu1 %v4867_v17  ;;  %7759 = vmatpush3.bf16.xpose.msra.mxu0 %v5225_v7  ;;  %v5575_v11 = vmul.f32 %v8247_v27, %v14841_v0 }
0x1499   :  { %v5164_v40 = vpop.xlane.xlu1 %5163  ;;  %v5158_v58 = vpop.xlane.xlu0 %5157  ;;  %7774 = vmatprep.mubr.bf16.mxu0 %v14840_v2  ;;  %v5226_v21 = vpack.c.bf16 %v5212_v13, %v5211_v56  ;;  %8258 = vrcp.f32 %v5184_v61 }
0x149a   :  { %v5183_v35 = vadd.f32 1e-16, %v5158_v58  ;;  %v8249_v15 = vpop.eup %8248  ;;  %v5186_v55 = vadd.f32 1e-16, %v5164_v40 }
0x149b   :  { %7760 = vmatprep.subr.bf16.mxu0 %v5226_v21  ;;  %v5574_v50 = vmul.f32 %v8249_v15, %v13208_v20  ;;  %v8251_v26 = vpop.eup %8250 }
0x149c   :  { %8260 = vrcp.f32 %v5183_v35  ;;  %v5214_v10 = vmul.f32 %v8251_v26, %v14843_v39 }
0x149d   :  { %v5525_v46 = vpop.xlane.xlu1 %5524  ;;  %v5519_v12 = vpop.xlane.xlu0 %5518  ;;  %v5590_v37 = vpack.c.bf16 %v5575_v11, %v5574_v50  ;;  %8262 = vrcp.f32 %v5547_v62 }
0x149e   :  { %v5546_v28 = vadd.f32 1e-16, %v5519_v12  ;;  %v8253_v49 = vpop.eup %8252  ;;  %v5549_v19 = vadd.f32 1e-16, %v5525_v46 }
0x149f   :  { %7755 = vmatmul.mubr.bf16.vlgmr.msra.gmra.mrb[32].mxu1 %v14842_v57  ;;  %7778 = vmatprep.subr.bf16.mxu1 %v5590_v37  ;;  %v5213_v5 = vmul.f32 %v8253_v49, %v13218_v25  ;;  %v8255_v31 = vpop.eup %8254 }
0x14a0   :  { %8264 = vrcp.f32 %v5546_v28  ;;  %7761 = vmatpush3.bf16.xpose.msra.mxu0 %v5226_v21  ;;  %7779 = vmatpush3.bf16.xpose.msra.mxu1 %v5590_v37  ;;  %v5577_v25 = vmul.f32 %v8255_v31, %v13212_v42  ;;  %v14846_v28 = vld [vmem:[#allocation38_spill] sm:$0xff] }
0x14a1   :  { %v5168_v20 = vpop.xlane.xlu1 %5167  ;;  %7794 = vmatprep.mubr.bf16.mxu1 %v14844_v30  ;;  %v5227_v44 = vpack.c.bf16 %v5214_v10, %v5213_v5  ;;  %8266 = vrcp.f32 %v5186_v55 }
0x14a2   :  { %v5162_v7 = vpop.xlane.xlu0 %5161  ;;  %v8257_v6 = vpop.eup %8256  ;;  %v5188_v4 = vadd.f32 1e-16, %v5168_v20 }
0x14a3   :  { %v5185_v43 = vadd.f32 1e-16, %v5162_v7  ;;  %7762 = vmatprep.subr.bf16.mxu0 %v5227_v44  ;;  %v5576_v59 = vmul.f32 %v8257_v6, %v13228_v41  ;;  %v8259_v24 = vpop.eup %8258 }
0x14a4   :  { %v5216_v13 = vmul.f32 %v8259_v24, %v14845_v52 }
0x14a5   :  { %8268 = vrcp.f32 %v5185_v43  ;;  %v5529_v47 = vpop.xlane.xlu1 %5528  ;;  %v5591_v9 = vpack.c.bf16 %v5577_v25, %v5576_v59 }
0x14a6   :  { %v5523_v53 = vpop.xlane.xlu0 %5522  ;;  %v8261_v61 = vpop.eup %8260  ;;  %8270 = vrcp.f32 %v5549_v19  ;;  %v5551_v35 = vadd.f32 1e-16, %v5529_v47 }
0x14a7   :  { %v5548_v17 = vadd.f32 1e-16, %v5523_v53  ;;  %7780 = vmatprep.subr.bf16.mxu1 %v5591_v9  ;;  %v5215_v56 = vmul.f32 %v8261_v61, %v13242_v36  ;;  %v8263_v27 = vpop.eup %8262 }
0x14a8   :  { %7763 = vmatpush3.bf16.xpose.msra.mxu0 %v5227_v44  ;;  %7781 = vmatpush3.bf16.xpose.msra.mxu1 %v5591_v9  ;;  %v5579_v15 = vmul.f32 %v8263_v27, %v13230_v51 }
0x14a9   :  { %8272 = vrcp.f32 %v5548_v17  ;;  %v5172_v41 = vpop.xlane.xlu1 %5171  ;;  %v5228_v58 = vpack.c.bf16 %v5216_v13, %v5215_v56 }
0x14aa   :  { %v5166_v42 = vpop.xlane.xlu0 %5165  ;;  %v8265_v2 = vpop.eup %8264  ;;  %8274 = vrcp.f32 %v5188_v4  ;;  %v5190_v46 = vadd.f32 1e-16, %v5172_v41 }
0x14ab   :  { %v5187_v40 = vadd.f32 1e-16, %v5166_v42  ;;  %7764 = vmatprep.subr.bf16.mxu0 %v5228_v58  ;;  %v5578_v21 = vmul.f32 %v8265_v2, %v13234_v29  ;;  %v8267_v62 = vpop.eup %8266 }
0x14ac   :  { %v5218_v37 = vmul.f32 %v8267_v62, %v14846_v28 }
0x14ad   :  { %8276 = vrcp.f32 %v5187_v40  ;;  %v5533_v36 = vpop.xlane.xlu1 %5532  ;;  %v5592_v11 = vpack.c.bf16 %v5579_v15, %v5578_v21 }
0x14ae   :  { %v5527_v50 = vpop.xlane.xlu0 %5526  ;;  %8278 = vrcp.f32 %v5551_v35  ;;  %v5553_v39 = vadd.f32 1e-16, %v5533_v36 }
0x14af   :  { %v5550_v0 = vadd.f32 1e-16, %v5527_v50  ;;  %v8269_v26 = vpop.eup %8268  ;;  %7782 = vmatprep.subr.bf16.mxu1 %v5592_v11 }
0x14b0   :  { %v5217_v12 = vmul.f32 %v8269_v26, %v13256_v1  ;;  %v8271_v49 = vpop.eup %8270  ;;  %7765 = vmatpush3.bf16.xpose.msra.mxu0 %v5228_v58  ;;  %7783 = vmatpush3.bf16.xpose.msra.mxu1 %v5592_v11 }
0x14b1   :  { %8280 = vrcp.f32 %v5550_v0  ;;  %v5581_v31 = vmul.f32 %v8271_v49, %v13250_v22 }
0x14b2   :  { %v5176_v29 = vpop.xlane.xlu1 %5175  ;;  %v5170_v51 = vpop.xlane.xlu0 %5169  ;;  %v5229_v57 = vpack.c.bf16 %v5218_v37, %v5217_v12  ;;  %8282 = vrcp.f32 %v5190_v46  ;;  %v14848_v37 = vld [vmem:[#allocation11_spill] sm:$0xff] }
0x14b3   :  { %v5189_v55 = vadd.f32 1e-16, %v5170_v51  ;;  %v8273_v5 = vpop.eup %8272  ;;  %v5192_v6 = vadd.f32 1e-16, %v5176_v29 }
0x14b4   :  { %7766 = vmatprep.subr.bf16.mxu0 %v5229_v57  ;;  %v5580_v10 = vmul.f32 %v8273_v5, %v13246_v8  ;;  %v8275_v20 = vpop.eup %8274 }
0x14b5   :  { %8284 = vrcp.f32 %v5189_v55  ;;  %v5220_v59 = vmul.f32 %v8275_v20, %v13262_v16 }
0x14b6   :  { %v5537_v1 = vpop.xlane.xlu1 %5536  ;;  %v5531_v7 = vpop.xlane.xlu0 %5530  ;;  %v5593_v43 = vpack.c.bf16 %v5581_v31, %v5580_v10  ;;  %8286 = vrcp.f32 %v5553_v39 }
0x14b7   :  { %v5552_v30 = vadd.f32 1e-16, %v5531_v7  ;;  %v8277_v44 = vpop.eup %8276  ;;  %v5555_v22 = vadd.f32 1e-16, %v5537_v1 }
0x14b8   :  { %7784 = vmatprep.subr.bf16.mxu1 %v5593_v43  ;;  %v5219_v19 = vmul.f32 %v8277_v44, %v13276_v48  ;;  %v8279_v25 = vpop.eup %8278  ;;  %7767 = vmatpush3.bf16.xpose.msra.mxu0 %v5229_v57 }
0x14b9   :  { %8288 = vrcp.f32 %v5552_v30  ;;  %7785 = vmatpush3.bf16.xpose.msra.mxu1 %v5593_v43  ;;  %v5583_v61 = vmul.f32 %v8279_v25, %v13266_v63 }
0x14ba   :  { %v5174_v8 = vpop.xlane.xlu0 %5173  ;;  %v5230_v47 = vpack.c.bf16 %v5220_v59, %v5219_v19  ;;  %8290 = vrcp.f32 %v5192_v6  ;;  %v5541_v17 = vpop.xlane.xlu1 %5540 }
0x14bb   :  { %v5191_v24 = vadd.f32 1e-16, %v5174_v8  ;;  %v8281_v53 = vpop.eup %8280  ;;  %v5557_v16 = vadd.f32 1e-16, %v5541_v17 }
0x14bc   :  { %7768 = vmatprep.subr.bf16.mxu0 %v5230_v47  ;;  %v5582_v9 = vmul.f32 %v8281_v53, %v13288_v14  ;;  %v8283_v4 = vpop.eup %8282 }
0x14bd   :  { %8292 = vrcp.f32 %v5191_v24  ;;  %v5222_v41 = vmul.f32 %v8283_v4, %v13282_v60 }
0x14be   :  { %v5535_v48 = vpop.xlane.xlu0 %5534  ;;  %8294 = vrcp.f32 %v5555_v22  ;;  %v5594_v52 = vpack.c.bf16 %v5583_v61, %v5582_v9 }
0x14bf   :  { %v5554_v56 = vadd.f32 1e-16, %v5535_v48  ;;  %v8285_v13 = vpop.eup %8284 }
0x14c0   :  { %7786 = vmatprep.subr.bf16.mxu1 %v5594_v52  ;;  %v5221_v27 = vmul.f32 %v8285_v13, %v13301_v38  ;;  %v8287_v42 = vpop.eup %8286  ;;  %7769 = vmatpush3.bf16.xpose.msra.mxu0 %v5230_v47 }
0x14c1   :  { %8296 = vrcp.f32 %v5554_v56  ;;  %7787 = vmatpush3.bf16.xpose.msra.mxu1 %v5594_v52  ;;  %v5585_v35 = vmul.f32 %v8287_v42, %v13293_v3 }
0x14c2   :  { %v5539_v14 = vpop.xlane.xlu0 %5538  ;;  %8298 = vrcp.f32 %v5557_v16  ;;  %v5231_v40 = vpack.c.bf16 %v5222_v41, %v5221_v27 }
0x14c3   :  { %v5556_v63 = vadd.f32 1e-16, %v5539_v14  ;;  %v8289_v58 = vpop.eup %8288 }
0x14c4   :  { %7770 = vmatprep.subr.bf16.mxu0 %v5231_v40  ;;  %v5584_v2 = vmul.f32 %v8289_v58, %v13310_v34  ;;  %v8291_v21 = vpop.eup %8290 }
0x14c5   :  { %8300 = vrcp.f32 %v5556_v63  ;;  %v5224_v36 = vmul.f32 %v8291_v21, %v13306_v33 }
0x14c6   :  { %v5595_v15 = vpack.c.bf16 %v5585_v35, %v5584_v2 }
0x14c7   :  { %v8293_v62 = vpop.eup %8292 }
0x14c8   :  { %v8295_v38 = vpop.eup %8294  ;;  %7788 = vmatprep.subr.bf16.mxu1 %v5595_v15  ;;  %v5223_v60 = vmul.f32 %v8293_v62, %v13318_v23  ;;  %7771 = vmatpush3.bf16.xpose.msra.mxu0 %v5231_v40  ;;  %v14847_v23 = vld [vmem:[#allocation9_spill] sm:$0xff] }
0x14c9   :  { %7789 = vmatpush3.bf16.xpose.msra.mxu1 %v5595_v15  ;;  %v5587_v26 = vmul.f32 %v8295_v38, %v13312_v32  ;;  %v8020_v32 = vld [vmem:[%s13851_s12] sm:$0xff]  }
0x14ca   :  { %v5232_v0 = vpack.c.bf16 %v5224_v36, %v5223_v60 }
0x14cb   :  { %v8297_v50 = vpop.eup %8296 }
0x14cc   :  { %v5586_v11 = vmul.f32 %v8297_v50, %v13322_v45  ;;  %v8299_v34 = vpop.eup %8298  ;;  %7772 = vmatprep.subr.bf16.mxu0 %v5232_v0  ;;  %v5655_v45 = vpop.permute.xlu1 %5654 }
0x14cd   :  { %v5589_v28 = vmul.f32 %v8299_v34, %v13316_v54  ;;  %v5650_v54 = vpop.permute.xlu0 %5649 }
0x14ce   :  { %v5596_v3 = vpack.c.bf16 %v5587_v26, %v5586_v11 }
0x14cf   :  { %v8301_v46 = vpop.eup %8300 }
0x14d0   :  { %7790 = vmatprep.subr.bf16.mxu1 %v5596_v3  ;;  %v5588_v12 = vmul.f32 %v8301_v46, %v13325_v18  ;;  %7773 = vmatpush3.bf16.xpose.msra.mxu0 %v5232_v0 }
0x14d1   :  { %7791 = vmatpush3.bf16.xpose.msra.mxu1 %v5596_v3 }
0x14d2   :  { %v5597_v33 = vpack.c.bf16 %v5589_v28, %v5588_v12 }
0x14d4   :  { %7792 = vmatprep.subr.bf16.mxu1 %v5597_v33 }
0x14d7   :  { %7775 = vmatmul.mubr.bf16.vlgmr.msra.gmra.mrb[48].mxu0 %v14847_v23 }
0x14d8   :  { %7814 = vmatprep.mubr.bf16.mxu0 %v8020_v32 }
0x14d9   :  { %7793 = vmatpush3.bf16.xpose.msra.mxu1 %v5597_v33 }
0x14da   :  { %v5660_v49 = vpop.permute.xlu1 %5659 }
0x14de   :  { %v5665_v29 = vpop.permute.xlu1 %5664 }
0x14e0   :  { %7795 = vmatmul.mubr.bf16.vlgmr.msra.gmra.mrb[36].mxu1 %v14848_v37 }
0x14e2   :  { %v5670_v18 = vpop.permute.xlu1 %5669 }
0x14e6   :  { %v5675_v51 = vpop.permute.xlu1 %5674 }
0x14ea   :  { %v5680_v31 = vpop.permute.xlu1 %5679 }
0x14ee   :  { %v5685_v24 = vpop.permute.xlu1 %5684 }
0x156a   :  { %v7736_v55 = vpop.f32.mrb[44].mxu0 }
0x156b   :  { %v5729_v57 = vadd.f32 %v7736_v55, %v5660_v49  ;;  %v4537_v5 = vpop.f32.mrb[45].mxu0 }
0x156c   :  { %v5727_v39 = vadd.f32 %v5650_v54, %v4537_v5  ;;  %v7737_v10 = vpop.f32.mrb[46].mxu0  ;;  %v5695_v54 = vpop.permute.xlu0 %5694 }
0x156d   :  { %v5761_v20 = vmin.f32 %v5729_v57, 0.0  ;;  %v5730_v1 = vadd.f32 %v7737_v10, %v5665_v29  ;;  %v4540_v7 = vpop.f32.mrb[47].mxu0  ;;  %vm5745_vm12 = vcmp.gt.f32.partialorder %v5729_v57, 0.0 }
0x156e   :  { %v5759_v30 = vmin.f32 %v5727_v39, 0.0  ;;  %v5728_v43 = vadd.f32 %v5655_v45, %v4540_v7  ;;  %vm5743_vm15 = vcmp.gt.f32.partialorder %v5727_v39, 0.0 }
0x156f   :  { %v5779_v44 = vmul.f32 1.442695, %v5761_v20  ;;  %v5762_v6 = vmin.f32 %v5730_v1, 0.0  ;;  %vm5746_vm6 = vcmp.gt.f32.partialorder %v5730_v1, 0.0 }
0x1570   :  { %v5775_v19 = vmul.f32 1.442695, %v5759_v30  ;;  %v5760_v59 = vmin.f32 %v5728_v43, 0.0  ;;  %vm5744_vm2 = vcmp.gt.f32.partialorder %v5728_v43, 0.0 }
0x1571   :  { %8302 = vpow2.f32 %v5779_v44  ;;  %v5781_v25 = vmul.f32 1.442695, %v5762_v6 }
0x1572   :  { %8304 = vpow2.f32 %v5775_v19  ;;  %v5777_v8 = vmul.f32 1.442695, %v5760_v59  ;;  %v7756_v22 = vpop.f32.mrb[32].mxu1 }
0x1573   :  { %8306 = vpow2.f32 %v5781_v25  ;;  %v5733_v47 = vadd.f32 %v7756_v22, %v5680_v31  ;;  %v4902_v53 = vpop.f32.mrb[33].mxu1 }
0x1574   :  { %8308 = vpow2.f32 %v5777_v8  ;;  %v5731_v17 = vadd.f32 %v5670_v18, %v4902_v53  ;;  %v7757_v9 = vpop.f32.mrb[34].mxu1 }
0x1575   :  { %v5765_v61 = vmin.f32 %v5733_v47, 0.0  ;;  %v5734_v4 = vadd.f32 %v7757_v9, %v5685_v24  ;;  %v4905_v48 = vpop.f32.mrb[35].mxu1  ;;  %vm5749_vm11 = vcmp.gt.f32.partialorder %v5733_v47, 0.0 }
0x1576   :  { %v5763_v16 = vmin.f32 %v5731_v17, 0.0  ;;  %v5732_v56 = vadd.f32 %v5675_v51, %v4905_v48  ;;  %vm5747_vm10 = vcmp.gt.f32.partialorder %v5731_v17, 0.0  ;;  %v5690_v51 = vpop.permute.xlu1 %5689 }
0x1577   :  { %v5787_v52 = vmul.f32 1.442695, %v5765_v61  ;;  %v5766_v13 = vmin.f32 %v5734_v4, 0.0  ;;  %vm5750_vm1 = vcmp.gt.f32.partialorder %v5734_v4, 0.0 }
0x1578   :  { %v5783_v27 = vmul.f32 1.442695, %v5763_v16  ;;  %v5764_v41 = vmin.f32 %v5732_v56, 0.0 }
0x1579   :  { %8310 = vpow2.f32 %v5787_v52  ;;  %v5789_v42 = vmul.f32 1.442695, %v5766_v13 }
0x157a   :  { %8312 = vpow2.f32 %v5783_v27  ;;  %v5785_v14 = vmul.f32 1.442695, %v5764_v41  ;;  %v5700_v55 = vpop.permute.xlu1 %5699 }
0x157b   :  { %v8303_v63 = vpop.eup %8302  ;;  %8314 = vpow2.f32 %v5789_v42 }
0x157c   :  { %v8305_v40 = vpop.eup %8304  ;;  %v7331_v58 = vadd.f32 -1.0, %v8303_v63  ;;  %8316 = vpow2.f32 %v5785_v14 }
0x157d   :  { %v8307_v2 = vpop.eup %8306  ;;  %v7329_v35 = vadd.f32 -1.0, %v8305_v40 }
0x157e   :  { %v8309_v21 = vpop.eup %8308  ;;  %v7332_v15 = vadd.f32 -1.0, %v8307_v2  ;;  %v5825_v38 = vsel %vm5745_vm12, %v5729_v57, %v7331_v58  ;;  %vm5748_vm12 = vcmp.gt.f32.partialorder %v5732_v56, 0.0  ;;  %v5705_v57 = vpop.permute.xlu0 %5704 }
0x157f   :  { %v7330_v62 = vadd.f32 -1.0, %v8309_v21  ;;  %v5823_v36 = vsel %vm5743_vm15, %v5727_v39, %v7329_v35  ;;  %v5710_v31 = vpop.permute.xlu1 %5709 }
0x1580   :  { %v5826_v60 = vsel %vm5746_vm6, %v5730_v1, %v7332_v15 }
0x1581   :  { %v5824_v50 = vsel %vm5744_vm2, %v5728_v43, %v7330_v62  ;;  %v5852_v0 = vpack.c.bf16 %v5826_v60, %v5825_v38 }
0x1582   :  { %v5851_v11 = vpack.c.bf16 %v5824_v50, %v5823_v36  ;;  %v5715_v44 = vpop.permute.xlu0 %5714 }
0x1583   :  { %v8311_v26 = vpop.eup %8310 }
0x1584   :  { %v8313_v34 = vpop.eup %8312  ;;  %v7335_v3 = vadd.f32 -1.0, %v8311_v26  ;;  %7798 = vmatprep.subr.bf16.mxu0 %v5851_v11 }
0x1585   :  { %v8315_v46 = vpop.eup %8314  ;;  %v7333_v12 = vadd.f32 -1.0, %v8313_v34  ;;  %7799 = vmatpush3.bf16.msra.mxu0 %v5851_v11 }
0x1586   :  { %v8317_v28 = vpop.eup %8316  ;;  %v7336_v33 = vadd.f32 -1.0, %v8315_v46  ;;  %7800 = vmatprep.subr.bf16.mxu0 %v5852_v0  ;;  %v5829_v37 = vsel %vm5749_vm11, %v5733_v47, %v7335_v3  ;;  %v5720_v47 = vpop.permute.xlu1 %5719 }
0x1587   :  { %v7334_v23 = vadd.f32 -1.0, %v8317_v28  ;;  %v5827_v32 = vsel %vm5747_vm10, %v5731_v17, %v7333_v12 }
0x1588   :  { %v5830_v45 = vsel %vm5750_vm1, %v5734_v4, %v7336_v33  ;;  %v5725_v4 = vpop.permute.xlu0 %5724 }
0x1589   :  { %7801 = vmatpush3.bf16.msra.mxu0 %v5852_v0  ;;  %v5828_v49 = vsel %vm5748_vm12, %v5732_v56, %v7334_v23  ;;  %v5854_v29 = vpack.c.bf16 %v5830_v45, %v5829_v37 }
0x158a   :  { %v5853_v18 = vpack.c.bf16 %v5828_v49, %v5827_v32 }
0x158c   :  { %7802 = vmatprep.subr.bf16.mxu0 %v5853_v18 }
0x158d   :  { %7803 = vmatpush3.bf16.msra.mxu0 %v5853_v18 }
0x158e   :  { %7804 = vmatprep.subr.bf16.mxu0 %v5854_v29 }
0x1591   :  { %7805 = vmatpush3.bf16.msra.mxu0 %v5854_v29 }
0x15aa   :  { %v7776_v5 = vpop.f32.mrb[48].mxu0 }
0x15ab   :  { %v5737_v39 = vadd.f32 %v7776_v5, %v5700_v55  ;;  %v5267_v10 = vpop.f32.mrb[49].mxu0  ;;  %v8021_v5 = vld [vmem:[%s13851_s12 + $0x8] sm:$0xff]  }
0x15ac   :  { %v5735_v20 = vadd.f32 %v5690_v51, %v5267_v10  ;;  %v7777_v1 = vpop.f32.mrb[50].mxu0  ;;  %v8022_v10 = vld [vmem:[%s13852_s13] sm:$0xff]  }
0x15ad   :  { %v5769_v7 = vmin.f32 %v5737_v39, 0.0  ;;  %v5738_v30 = vadd.f32 %v7777_v1, %v5705_v57  ;;  %v5270_v43 = vpop.f32.mrb[51].mxu0  ;;  %vm5753_vm6 = vcmp.gt.f32.partialorder %v5737_v39, 0.0  ;;  %7818 = vmatprep.subr.bf16.mxu1 %v8022_v10  ;;  %6071 = vxpose.xlu0.c.b16.start [1/2] (short) (narrow) %v8022_v10, 16 }
0x15ae   :  { %v5767_v6 = vmin.f32 %v5735_v20, 0.0  ;;  %v5736_v19 = vadd.f32 %v5695_v54, %v5270_v43  ;;  %vm5751_vm2 = vcmp.gt.f32.partialorder %v5735_v20, 0.0  ;;  %7819 = vmatpush3.bf16.msra.mxu1 %v8022_v10 }
0x15af   :  { %v5795_v59 = vmul.f32 1.442695, %v5769_v7  ;;  %v5770_v25 = vmin.f32 %v5738_v30, 0.0  ;;  %vm5754_vm15 = vcmp.gt.f32.partialorder %v5738_v30, 0.0 }
0x15b0   :  { %v5791_v8 = vmul.f32 1.442695, %v5767_v6  ;;  %v5768_v22 = vmin.f32 %v5736_v19, 0.0  ;;  %vm5752_vm11 = vcmp.gt.f32.partialorder %v5736_v19, 0.0 }
0x15b1   :  { %8318 = vpow2.f32 %v5795_v59  ;;  %v5797_v24 = vmul.f32 1.442695, %v5770_v25 }
0x15b2   :  { %8320 = vpow2.f32 %v5791_v8  ;;  %v5793_v53 = vmul.f32 1.442695, %v5768_v22 }
0x15b3   :  { %v7796_v17 = vpop.f32.mrb[36].mxu1  ;;  %8322 = vpow2.f32 %v5797_v24 }
0x15b4   :  { %v5741_v9 = vadd.f32 %v7796_v17, %v5720_v47  ;;  %v5632_v61 = vpop.f32.mrb[37].mxu1  ;;  %8324 = vpow2.f32 %v5793_v53 }
0x15b5   :  { %v5739_v48 = vadd.f32 %v5710_v31, %v5632_v61  ;;  %v7797_v16 = vpop.f32.mrb[38].mxu1  ;;  %v8023_v31 = vld [vmem:[%s13852_s13 + $0x8] sm:$0xff]  }
0x15b6   :  { %v5773_v56 = vmin.f32 %v5741_v9, 0.0  ;;  %v5742_v52 = vadd.f32 %v7797_v16, %v5725_v4  ;;  %v5635_v13 = vpop.f32.mrb[39].mxu1  ;;  %vm5757_vm1 = vcmp.gt.f32.partialorder %v5741_v9, 0.0  ;;  %7820 = vmatprep.subr.bf16.mxu1 %v8023_v31  ;;  %6072 = vxpose.xlu0.c.b16.end [2/2] (short) (narrow) %v8023_v31, 16 }
0x15b7   :  { %v5771_v27 = vmin.f32 %v5739_v48, 0.0  ;;  %v5740_v41 = vadd.f32 %v5715_v44, %v5635_v13  ;;  %vm5755_vm12 = vcmp.gt.f32.partialorder %v5739_v48, 0.0  ;;  %7821 = vmatpush3.bf16.msra.mxu1 %v8023_v31 }
0x15b8   :  { %v5803_v42 = vmul.f32 1.442695, %v5773_v56  ;;  %v5774_v14 = vmin.f32 %v5742_v52, 0.0  ;;  %vm5758_vm10 = vcmp.gt.f32.partialorder %v5742_v52, 0.0 }
0x15b9   :  { %v5799_v63 = vmul.f32 1.442695, %v5771_v27  ;;  %v5772_v40 = vmin.f32 %v5740_v41, 0.0 }
0x15ba   :  { %8326 = vpow2.f32 %v5803_v42  ;;  %v5805_v58 = vmul.f32 1.442695, %v5774_v14 }
0x15bb   :  { %8328 = vpow2.f32 %v5799_v63  ;;  %v5801_v2 = vmul.f32 1.442695, %v5772_v40  ;;  %v8319_v35 = vpop.eup %8318 }
0x15bc   :  { %8330 = vpow2.f32 %v5805_v58  ;;  %v8321_v21 = vpop.eup %8320  ;;  %v7339_v15 = vadd.f32 -1.0, %v8319_v35 }
0x15bd   :  { %8332 = vpow2.f32 %v5801_v2  ;;  %v8323_v62 = vpop.eup %8322  ;;  %v7337_v38 = vadd.f32 -1.0, %v8321_v21 }
0x15be   :  { %v8325_v60 = vpop.eup %8324  ;;  %v7340_v36 = vadd.f32 -1.0, %v8323_v62  ;;  %v5833_v0 = vsel %vm5753_vm6, %v5737_v39, %v7339_v15  ;;  %vm5756_vm6 = vcmp.gt.f32.partialorder %v5740_v41, 0.0  ;;  %v14849_v39 = vmov 0.0  }
0x15bf   :  { %v7338_v50 = vadd.f32 -1.0, %v8325_v60  ;;  %v5831_v26 = vsel %vm5751_vm2, %v5735_v20, %v7337_v38  ;;  %v14851_v20 = vmov 1   ;;  %vm14852_vm2 = vcmask 261120   ;;  %v14862_v60 = vld [vmem:[#allocation65_spill] sm:$0xff] }
0x15c0   :  { %v5834_v11 = vsel %vm5754_vm15, %v5738_v30, %v7340_v36  ;;  %vm14850_vm15 = vmmov 0   ;;  %7988 = vset.pattern.permute.xlu0 %v14851_v20  ;;  %v14861_v38 = vmov 0   ;;  %v14863_v36 = vsub.s32 0, %v14862_v60 }
0x15c1   :  { %v5832_v34 = vsel %vm5752_vm11, %v5736_v19, %v7338_v50  ;;  %v5856_v3 = vpack.c.bf16 %v5834_v11, %v5833_v0  ;;  %vm14853_vm11 = vmmov %vm14852_vm2 }
0x15c2   :  { %v5855_v46 = vpack.c.bf16 %v5832_v34, %v5831_v26 }
0x15c4   :  { %v8327_v12 = vpop.eup %8326  ;;  %7806 = vmatprep.subr.bf16.mxu0 %v5855_v46 }
0x15c5   :  { %v8329_v28 = vpop.eup %8328  ;;  %v7343_v33 = vadd.f32 -1.0, %v8327_v12  ;;  %7807 = vmatpush3.bf16.msra.mxu0 %v5855_v46 }
0x15c6   :  { %v8331_v23 = vpop.eup %8330  ;;  %v7341_v37 = vadd.f32 -1.0, %v8329_v28  ;;  %7808 = vmatprep.subr.bf16.mxu0 %v5856_v3 }
0x15c7   :  { %v8333_v45 = vpop.eup %8332  ;;  %v7344_v32 = vadd.f32 -1.0, %v8331_v23  ;;  %v5837_v29 = vsel %vm5757_vm1, %v5741_v9, %v7343_v33  ;;  %vm14854_vm1 = vmmov %vm14852_vm2  ;;  %v14864_v23 = vld [vmem:[#allocation5_spill] sm:$0xff] }
0x15c8   :  { %v7342_v49 = vadd.f32 -1.0, %v8333_v45  ;;  %v5835_v51 = vsel %vm5755_vm12, %v5739_v48, %v7341_v37  ;;  %vm14856_vm12 = vmmov %vm14854_vm1 }
0x15c9   :  { %v5838_v18 = vsel %vm5758_vm10, %v5742_v52, %v7344_v32  ;;  %7809 = vmatpush3.bf16.msra.mxu0 %v5856_v3  ;;  %vm14855_vm10 = vmmov %vm14854_vm1 }
0x15ca   :  { %v5836_v54 = vsel %vm5756_vm6, %v5740_v41, %v7342_v49  ;;  %v5858_v55 = vpack.c.bf16 %v5838_v18, %v5837_v29  ;;  %vm14857_vm6 = vmmov %vm14854_vm1  ;;  %v14866_v29 = vld [vmem:[#allocation36_spill] sm:$0xff] }
0x15cb   :  { %v5857_v57 = vpack.c.bf16 %v5836_v54, %v5835_v51 }
0x15cd   :  { %7810 = vmatprep.subr.bf16.mxu0 %v5857_v57 }
0x15ce   :  { %7811 = vmatpush3.bf16.msra.mxu0 %v5857_v57 }
0x15cf   :  { %7812 = vmatprep.subr.bf16.mxu0 %v5858_v55 }
0x15d2   :  { %7813 = vmatpush3.bf16.msra.mxu0 %v5858_v55 }
0x15d3   :  { %7838 = vmatprep.subr.bf16.mxu0 %v14849_v39 }
0x15d5   :  { %7815 = vmatmul.mubr.bf16.vlgmr.msra.gmra.mrb[52].mxu0 %v8021_v5  ;;  %v14868_v5 = vld [vmem:[#allocation66_spill] sm:$0xff] }
0x15d6   :  { %7842 = vmatprep.mubr.msk.bf16.mxu0 %vm14850_vm15, %v14849_v39  ;;  %vm14858_vm15 = vmmov %vm14854_vm1 }
0x1618   :  { %v6079_v19 = vpop.trf.xlu0 }
0x16a8   :  { %v7816_v1 = vpop.f32.mrb[52].mxu0 }
0x16a9   :  { %v5905_v7 = vpop.f32.mrb[53].mxu0 }
0x16aa   :  { %v7817_v30 = vpop.f32.mrb[54].mxu0 }
0x16ab   :  { %v13450_v43 = vpack.c.bf16 %v7817_v30, %v7816_v1  ;;  %v5908_v44 = vpop.f32.mrb[55].mxu0 }
0x16ac   :  { %v5920_v6 = vpack.c.bf16 %v5908_v44, %v5905_v7  ;;  %v14870_v7 = vld [vmem:[#allocation4_spill] sm:$0xff] }
0x16ae   :  { %5922 = vxpose.xlu1.c.b16.start [1/2] (short) %v5920_v6, 128  ;;  %7839 = vmatpush3.bf16.msra.mxu0 %v5920_v6 }
0x16af   :  { %7840 = vmatprep.subr.bf16.mxu0 %v14849_v39 }
0x16b2   :  { %5923 = vxpose.xlu1.c.b16.end [2/2] (short) %v13450_v43, 128  ;;  %7841 = vmatpush3.bf16.msra.mxu0 %v13450_v43 }
0x16b5   :  { %7843 = vmatmul.mubr.msk.bf16.vlgmr.msra.gmra.mrb[56].mxu0 %vm14852_vm2, %v6079_v19  ;;  %vm14859_vm2 = vmmov %vm14854_vm1 }
0x16b6   :  { %7989 = vset.pattern.permute.xlu1 %v14851_v20 }
0x1714   :  { %v5930_v59 = vpop.trf.xlu1 }
0x1715   :  { %7822 = vmatprep.mubr.msk.bf16.mxu1 %vm14853_vm11, %v5930_v59  ;;  %vm14860_vm11 = vmmov %vm14854_vm1 }
0x1718   :  { %v5931_v25 = vpop.trf.xlu1 }
0x1719   :  { %7823 = vmatmul.mubr.msk.bf16.vlgmr.msra.gmra.mrb[40].mxu1 %vm14854_vm1, %v5931_v25 }
0x171c   :  { %v5932_v8 = vpop.trf.xlu1 }
0x171d   :  { %7826 = vmatprep.mubr.msk.bf16.mxu1 %vm14855_vm10, %v5932_v8 }
0x1720   :  { %v5933_v22 = vpop.trf.xlu1 }
0x1721   :  { %7827 = vmatmul.mubr.msk.bf16.gmra.mrb[44].mxu1 %vm14856_vm12, %v5933_v22  ;;  %vm14865_vm12 = vnez %v14864_v23 }
0x1724   :  { %v5934_v24 = vpop.trf.xlu1 }
0x1725   :  { %7830 = vmatprep.mubr.msk.bf16.mxu1 %vm14857_vm6, %v5934_v24 }
0x1728   :  { %v5935_v47 = vpop.trf.xlu1 }
0x1729   :  { %7831 = vmatmul.mubr.msk.bf16.gmra.mrb[48].mxu1 %vm14858_vm15, %v5935_v47  ;;  %vm14867_vm15 = vnez %v14866_v29 }
0x172c   :  { %v5936_v53 = vpop.trf.xlu1 }
0x172d   :  { %7834 = vmatprep.mubr.msk.bf16.mxu1 %vm14859_vm2, %v5936_v53  ;;  %v14872_v53 = vld [vmem:[#allocation14_spill] sm:$0xff] }
0x1730   :  { %v5937_v17 = vpop.trf.xlu1 }
0x1731   :  { %7835 = vmatmul.mubr.msk.bf16.gmra.mrb[52].mxu1 %vm14860_vm11, %v5937_v17  ;;  %vm14869_vm11 = vnez %v14868_v5 }
0x1732   :  { %7862 = vmatprep.mubr.bf16.mxu1 %v5920_v6 }
0x1788   :  { %v6124_v9 = vpop.f32.mrb[56].mxu0 }
0x1789   :  { %v7844_v61 = vpop.f32.mrb[57].mxu0  ;;  %v13469_v50 = vrot.slane %v6124_v9, %v14863_v36 }
0x178a   :  { %v6127_v4 = vpop.f32.mrb[58].mxu0 }
0x178b   :  { %v7845_v48 = vpop.f32.mrb[59].mxu0 }
0x17ec   :  { %v7824_v16 = vpop.f32.mrb[40].mxu1 }
0x17ed   :  { %v6008_v56 = vpop.f32.mrb[41].mxu1 }
0x17ee   :  { %6132 = vperm.xlu0 %7988, %v6008_v56   ;;  %v7825_v52 = vpop.f32.mrb[42].mxu1 }
0x17ef   :  { %v6011_v13 = vpop.f32.mrb[43].mxu1 }
0x17f0   :  { %6137 = vperm.xlu1 %7989, %v6011_v13  }
0x17f2   :  { %6142 = vperm.xlu0 %7988, %v7824_v16  }
0x17f4   :  { %v7828_v27 = vpop.f32.mrb[44].mxu1 }
0x17f5   :  { %v6024_v41 = vpop.f32.mrb[45].mxu1 }
0x17f6   :  { %6147 = vperm.xlu0 %7988, %v7825_v52   ;;  %v7829_v42 = vpop.f32.mrb[46].mxu1  ;;  %v14874_v52 = vld [vmem:[#allocation18_spill] sm:$0xff] }
0x17f7   :  { %v6027_v14 = vpop.f32.mrb[47].mxu1 }
0x17fa   :  { %6162 = vperm.xlu0 %7988, %v7828_v27  }
0x17fc   :  { %v7832_v63 = vpop.f32.mrb[48].mxu1 }
0x17fd   :  { %v6040_v40 = vpop.f32.mrb[49].mxu1 }
0x17fe   :  { %6152 = vperm.xlu0 %7988, %v6024_v41   ;;  %6172 = vperm.xlu1 %7989, %v6040_v40   ;;  %v7833_v58 = vpop.f32.mrb[50].mxu1 }
0x17ff   :  { %v6043_v2 = vpop.f32.mrb[51].mxu1 }
0x1802   :  { %6167 = vperm.xlu0 %7988, %v7829_v42   ;;  %6182 = vperm.xlu1 %7989, %v7832_v63  }
0x1804   :  { %v7836_v35 = vpop.f32.mrb[52].mxu1 }
0x1805   :  { %v6056_v21 = vpop.f32.mrb[53].mxu1 }
0x1806   :  { %6157 = vperm.xlu0 %7988, %v6027_v14   ;;  %6192 = vperm.xlu1 %7989, %v6056_v21   ;;  %v7837_v15 = vpop.f32.mrb[54].mxu1 }
0x1807   :  { %v6059_v62 = vpop.f32.mrb[55].mxu1 }
0x180a   :  { %6187 = vperm.xlu0 %7988, %v7833_v58   ;;  %6202 = vperm.xlu1 %7989, %v7836_v35  }
0x180e   :  { %6177 = vperm.xlu0 %7988, %v6043_v2   ;;  %7990 = vset.pattern.permute.xlu1 %v14861_v38 }
0x1812   :  { %6207 = vperm.xlu0 %7988, %v7837_v15   ;;  %v14877_v15 = vld [vmem:[#allocation41_spill] sm:$0xff] }
0x1816   :  { %6197 = vperm.xlu0 %7988, %v6059_v62  }
0x181a   :  { %7991 = vset.pattern.permute.xlu0 %v14861_v38 }
0x186d   :  { %v6133_v0 = vpop.permute.xlu0 %6132 }
0x186e   :  { %v6214_v11 = vadd.f32 %v13469_v50, %v6133_v0 }
0x186f   :  { %v6138_v26 = vpop.permute.xlu1 %6137 }
0x1870   :  { %v6246_v34 = vmul.f32 0.2, %v6214_v11  ;;  %v6215_v3 = vadd.f32 %v13469_v50, %v6138_v26  ;;  %vm6230_vm1 = vcmp.ge.f32.partialorder %v6214_v11, 0.0 }
0x1871   :  { %v6143_v46 = vpop.permute.xlu0 %6142 }
0x1872   :  { %v6247_v12 = vmul.f32 0.2, %v6215_v3  ;;  %v6216_v28 = vadd.f32 %v13469_v50, %v6143_v46  ;;  %v6262_v33 = vsel %vm6230_vm1, %v6214_v11, %v6246_v34  ;;  %vm6231_vm10 = vcmp.ge.f32.partialorder %v6215_v3, 0.0 }
0x1873   :  { %v13476_v37 = vsel %vm14865_vm12, %v6262_v33, -1e+30  ;;  %vm14871_vm1 = vnez %v14870_v7 }
0x1874   :  { %v6248_v45 = vmul.f32 0.2, %v6216_v28  ;;  %6294 = vmax.xlane.f32.xlu1 %v13476_v37  ;;  %v6263_v32 = vsel %vm6231_vm10, %v6215_v3, %v6247_v12  ;;  %vm6232_vm6 = vcmp.ge.f32.partialorder %v6216_v28, 0.0 }
0x1875   :  { %v6148_v49 = vpop.permute.xlu0 %6147  ;;  %v13481_v18 = vsel %vm14867_vm15, %v6263_v32, -1e+30 }
0x1876   :  { %v6217_v51 = vadd.f32 %v13469_v50, %v6148_v49  ;;  %6296 = vmax.xlane.f32.xlu0 %v13481_v18  ;;  %v6264_v54 = vsel %vm6232_vm6, %v6216_v28, %v6248_v45  ;;  %vm14873_vm6 = vnez %v14872_v53 }
0x1877   :  { %v13487_v39 = vsel %vm14869_vm11, %v6264_v54, -1e+30 }
0x1878   :  { %v6249_v55 = vmul.f32 0.2, %v6217_v51  ;;  %vm6233_vm2 = vcmp.ge.f32.partialorder %v6217_v51, 0.0 }
0x1879   :  { %v6163_v57 = vpop.permute.xlu0 %6162 }
0x187a   :  { %6298 = vmax.xlane.f32.xlu0 %v13487_v39  ;;  %v6265_v10 = vsel %vm6233_vm2, %v6217_v51, %v6249_v55  ;;  %v6220_v31 = vadd.f32 %v13469_v50, %v6163_v57  ;;  %vm14875_vm2 = vnez %v14874_v52 }
0x187b   :  { %v13493_v30 = vsel %vm14871_vm1, %v6265_v10, -1e+30 }
0x187c   :  { %v6252_v19 = vmul.f32 0.2, %v6220_v31  ;;  %vm6236_vm12 = vcmp.ge.f32.partialorder %v6220_v31, 0.0 }
0x187d   :  { %v6173_v20 = vpop.permute.xlu1 %6172  ;;  %v6153_v1 = vpop.permute.xlu0 %6152 }
0x187e   :  { %v6218_v44 = vadd.f32 %v13469_v50, %v6153_v1  ;;  %6300 = vmax.xlane.f32.xlu0 %v13493_v30  ;;  %v6222_v6 = vadd.f32 %v13469_v50, %v6173_v20  ;;  %v6268_v61 = vsel %vm6236_vm12, %v6220_v31, %v6252_v19  ;;  %vm14878_vm12 = vnez %v14877_v15 }
0x187f   :  { %v13508_v13 = vsel %vm14875_vm2, %v6268_v61, -1e+30 }
0x1880   :  { %v6250_v59 = vmul.f32 0.2, %v6218_v44  ;;  %vm6234_vm10 = vcmp.ge.f32.partialorder %v6218_v44, 0.0  ;;  %v6254_v24 = vmul.f32 0.2, %v6222_v6  ;;  %vm6238_vm15 = vcmp.ge.f32.partialorder %v6222_v6, 0.0 }
0x1881   :  { %v6183_v25 = vpop.permute.xlu1 %6182  ;;  %v6168_v8 = vpop.permute.xlu0 %6167 }
0x1882   :  { %v6266_v22 = vsel %vm6234_vm10, %v6218_v44, %v6250_v59  ;;  %v6224_v47 = vadd.f32 %v13469_v50, %v6183_v25  ;;  %v6221_v9 = vadd.f32 %v13469_v50, %v6168_v8  ;;  %v6270_v27 = vsel %vm6238_vm15, %v6222_v6, %v6254_v24 }
0x1883   :  { %v13501_v17 = vsel %vm14873_vm6, %v6266_v22, -1e+30  ;;  %v13515_v21 = vsel %vm12707_vm3, %v6270_v27, -1e+30 }
0x1884   :  { %6302 = vmax.xlane.f32.xlu1 %v13501_v17  ;;  %v6256_v56 = vmul.f32 0.2, %v6224_v47  ;;  %v6253_v41 = vmul.f32 0.2, %v6221_v9  ;;  %vm6240_vm1 = vcmp.ge.f32.partialorder %v6224_v47, 0.0  ;;  %vm6237_vm10 = vcmp.ge.f32.partialorder %v6221_v9, 0.0 }
0x1885   :  { %v6193_v4 = vpop.permute.xlu1 %6192  ;;  %v6158_v48 = vpop.permute.xlu0 %6157 }
0x1886   :  { %v6219_v16 = vadd.f32 %v13469_v50, %v6158_v48  ;;  %v6226_v42 = vadd.f32 %v13469_v50, %v6193_v4  ;;  %v6272_v36 = vsel %vm6240_vm1, %v6224_v47, %v6256_v56  ;;  %v6269_v0 = vsel %vm6237_vm10, %v6221_v9, %v6253_v41 }
0x1887   :  { %v13527_v46 = vsel %vm12763_vm5, %v6272_v36, -1e+30  ;;  %v13531_v28 = vsel %vm12594_vm9, %v6269_v0, -1e+30 }
0x1888   :  { %v6251_v14 = vmul.f32 0.2, %v6219_v16  ;;  %6306 = vmax.xlane.f32.xlu1 %v13508_v13  ;;  %vm6235_vm11 = vcmp.ge.f32.partialorder %v6219_v16, 0.0  ;;  %v6258_v38 = vmul.f32 0.2, %v6226_v42  ;;  %vm6242_vm6 = vcmp.ge.f32.partialorder %v6226_v42, 0.0 }
0x1889   :  { %v6203_v63 = vpop.permute.xlu1 %6202  ;;  %v6188_v40 = vpop.permute.xlu0 %6187 }
0x188a   :  { %v6267_v58 = vsel %vm6235_vm11, %v6219_v16, %v6251_v14  ;;  %v6228_v2 = vadd.f32 %v13469_v50, %v6203_v63  ;;  %v6225_v60 = vadd.f32 %v13469_v50, %v6188_v40  ;;  %v6274_v45 = vsel %vm6242_vm6, %v6226_v42, %v6258_v38 }
0x188b   :  { %v13519_v62 = vsel %vm14878_vm12, %v6267_v58, -1e+30  ;;  %v13537_v51 = vsel %vm12803_vm13, %v6274_v45, -1e+30 }
0x188c   :  { %6310 = vmax.xlane.f32.xlu1 %v13515_v21  ;;  %6304 = vmax.xlane.f32.xlu0 %v13519_v62  ;;  %v6260_v34 = vmul.f32 0.2, %v6228_v2  ;;  %v6257_v33 = vmul.f32 0.2, %v6225_v60  ;;  %vm6244_vm15 = vcmp.ge.f32.partialorder %v6228_v2, 0.0  ;;  %vm6241_vm2 = vcmp.ge.f32.partialorder %v6225_v60, 0.0 }
0x188d   :  { %v6178_v11 = vpop.permute.xlu0 %6177 }
0x188e   :  { %v6223_v26 = vadd.f32 %v13469_v50, %v6178_v11  ;;  %v6276_v5 = vsel %vm6244_vm15, %v6228_v2, %v6260_v34  ;;  %v6273_v10 = vsel %vm6241_vm2, %v6225_v60, %v6257_v33 }
0x188f   :  { %v13549_v7 = vsel %vm12852_vm8, %v6276_v5, -1e+30  ;;  %v13553_v6 = vsel %vm12680_vm4, %v6273_v10, -1e+30  ;;  %vm14887_vm4 = vcmask 261120  }
0x1890   :  { %v6255_v23 = vmul.f32 0.2, %v6223_v26  ;;  %6314 = vmax.xlane.f32.xlu1 %v13527_v46  ;;  %6308 = vmax.xlane.f32.xlu0 %v13531_v28  ;;  %vm6239_vm3 = vcmp.ge.f32.partialorder %v6223_v26, 0.0 }
0x1891   :  { %v6208_v32 = vpop.permute.xlu0 %6207 }
0x1892   :  { %v6271_v49 = vsel %vm6239_vm3, %v6223_v26, %v6255_v23  ;;  %v6229_v57 = vadd.f32 %v13469_v50, %v6208_v32 }
0x1893   :  { %v13541_v55 = vsel %vm12648_vm7, %v6271_v49, -1e+30 }
0x1894   :  { %6318 = vmax.xlane.f32.xlu1 %v13537_v51  ;;  %6312 = vmax.xlane.f32.xlu0 %v13541_v55  ;;  %v6261_v19 = vmul.f32 0.2, %v6229_v57  ;;  %vm6245_vm7 = vcmp.ge.f32.partialorder %v6229_v57, 0.0 }
0x1895   :  { %v6198_v31 = vpop.permute.xlu0 %6197 }
0x1896   :  { %v6227_v20 = vadd.f32 %v13469_v50, %v6198_v31  ;;  %v6277_v22 = vsel %vm6245_vm7, %v6229_v57, %v6261_v19 }
0x1897   :  { %v13564_v47 = vsel %vm12819_vm14, %v6277_v22, -1e+30  ;;  %vm6736_vm14 = vcmask 523264  }
0x1898   :  { %v6259_v59 = vmul.f32 0.2, %v6227_v20  ;;  %6322 = vmax.xlane.f32.xlu1 %v13549_v7  ;;  %6316 = vmax.xlane.f32.xlu0 %v13553_v6  ;;  %vm6243_vm9 = vcmp.ge.f32.partialorder %v6227_v20, 0.0 }
0x189a   :  { %v6275_v25 = vsel %vm6243_vm9, %v6227_v20, %v6259_v59 }
0x189b   :  { %v13559_v50 = vsel %vm12721_vm0, %v6275_v25, -1e+30  ;;  %vm14888_vm0 = vmmov %vm14887_vm4 }
0x189c   :  { %6320 = vmax.xlane.f32.xlu0 %v13559_v50  ;;  %vm14889_vm5 = vmmov %vm14888_vm0 }
0x189d   :  { %vm14890_vm13 = vmmov %vm14888_vm0 }
0x189e   :  { %vm14891_vm8 = vmmov %vm14888_vm0 }
0x189f   :  { %vm14892_vm11 = vmmov %vm14888_vm0 }
0x18a0   :  { %6324 = vmax.xlane.f32.xlu0 %v13564_v47  ;;  %vm14893_vm1 = vmmov %vm14888_vm0 }
0x18a1   :  { %vm14894_vm10 = vmmov %vm14888_vm0 }
0x1901   :  { %v6295_v53 = vpop.xlane.xlu1 %6294 }
0x1902   :  { %v6326_v9 = vsub.f32 %v13476_v37, %v6295_v53 }
0x1903   :  { %v6297_v61 = vpop.xlane.xlu0 %6296 }
0x1904   :  { %v6342_v4 = vmul.f32 1.442695, %v6326_v9  ;;  %v6327_v48 = vsub.f32 %v13481_v18, %v6297_v61  ;;  %v5847_v9 = vld [vmem:[%s13853_s14] sm:$0xff]  ;;  %v5849_v61 = vld [vmem:[%s13853_s14 + $0x10] sm:$0xff] }
0x1906   :  { %8334 = vpow2.f32 %v6342_v4  ;;  %v6344_v16 = vmul.f32 1.442695, %v6327_v48  ;;  %v5848_v4 = vld [vmem:[%s13853_s14 + $0x8] sm:$0xff]  ;;  %v5850_v48 = vld [vmem:[%s13853_s14 + $0x18] sm:$0xff] }
0x1907   :  { %v6299_v56 = vpop.xlane.xlu0 %6298 }
0x1908   :  { %8336 = vpow2.f32 %v6344_v16  ;;  %v6328_v52 = vsub.f32 %v13487_v39, %v6299_v56  ;;  %v6547_v16 = vld [vmem:[%s13854_s16 + $0x30] sm:$0xff]  ;;  %v6541_v56 = vld [vmem:[%s13854_s16] sm:$0xff] }
0x190a   :  { %v6346_v27 = vmul.f32 1.442695, %v6328_v52  ;;  %v6702_v52 = vld [vmem:[%s13855_s18] sm:$0xff] }
0x190b   :  { %v6301_v41 = vpop.xlane.xlu0 %6300 }
0x190c   :  { %8338 = vpow2.f32 %v6346_v27  ;;  %v6329_v42 = vsub.f32 %v13493_v30, %v6301_v41  ;;  %v6542_v27 = vld [vmem:[%s13854_s16 + $0x8] sm:$0xff]  ;;  %v6704_v41 = vld [vmem:[%s13855_s18 + $0x10] sm:$0xff] }
0x190e   :  { %v6348_v14 = vmul.f32 1.442695, %v6329_v42  ;;  %v6543_v42 = vld [vmem:[%s13854_s16 + $0x10] sm:$0xff] }
0x1910   :  { %v13571_v63 = vpop.eup %8334  ;;  %8340 = vpow2.f32 %v6348_v14  ;;  %v6806_v14 = vld [vmem:[%s13856_s20] sm:$0xff] }
0x1911   :  { %6374 = vadd.xlane.f32.xlu1 %v13571_v63  ;;  %v6303_v37 = vpop.xlane.xlu1 %6302 }
0x1912   :  { %v13574_v40 = vpop.eup %8336  ;;  %v6330_v18 = vsub.f32 %v13501_v17, %v6303_v37  ;;  %v6544_v37 = vld [vmem:[%s13854_s16 + $0x18] sm:$0xff] }
0x1913   :  { %6376 = vadd.xlane.f32.xlu0 %v13574_v40 }
0x1914   :  { %v6350_v58 = vmul.f32 1.442695, %v6330_v18  ;;  %v6808_v18 = vld [vmem:[%s13856_s20 + $0x10] sm:$0xff] }
0x1915   :  { %v6307_v39 = vpop.xlane.xlu1 %6306 }
0x1916   :  { %v13578_v2 = vpop.eup %8338  ;;  %8342 = vpow2.f32 %v6350_v58  ;;  %v6332_v30 = vsub.f32 %v13508_v13, %v6307_v39  ;;  %v6545_v58 = vld [vmem:[%s13854_s16 + $0x20] sm:$0xff] }
0x1917   :  { %6378 = vadd.xlane.f32.xlu1 %v13578_v2  ;;  %v6810_v39 = vld [vmem:[%s13856_s20 + $0x20] sm:$0xff] }
0x1918   :  { %v6354_v35 = vmul.f32 1.442695, %v6332_v30  ;;  %v6546_v30 = vld [vmem:[%s13854_s16 + $0x28] sm:$0xff] }
0x1919   :  { %v6311_v15 = vpop.xlane.xlu1 %6310  ;;  %v6305_v38 = vpop.xlane.xlu0 %6304 }
0x191a   :  { %v13582_v60 = vpop.eup %8340  ;;  %8344 = vpow2.f32 %v6354_v35  ;;  %v6334_v36 = vsub.f32 %v13515_v21, %v6311_v15  ;;  %v6331_v17 = vsub.f32 %v13519_v62, %v6305_v38  ;;  %v6812_v35 = vld [vmem:[%s13856_s20 + $0x30] sm:$0xff]  ;;  %v6548_v15 = vld [vmem:[%s13854_s16 + $0x38] sm:$0xff]  ;;  %v6967_v38 = vld [vmem:[%s13857_s22] sm:$0xff] }
0x191b   :  { %6380 = vadd.xlane.f32.xlu0 %v13582_v60 }
0x191c   :  { %v6358_v0 = vmul.f32 1.442695, %v6334_v36  ;;  %v6352_v11 = vmul.f32 1.442695, %v6331_v17  ;;  %v6703_v36 = vld [vmem:[%s13855_s18 + $0x8] sm:$0xff]  ;;  %v6969_v17 = vld [vmem:[%s13857_s22 + $0x10] sm:$0xff] }
0x191d   :  { %v6315_v26 = vpop.xlane.xlu1 %6314  ;;  %v6309_v34 = vpop.xlane.xlu0 %6308 }
0x191e   :  { %8346 = vpow2.f32 %v6358_v0  ;;  %v6336_v13 = vsub.f32 %v13527_v46, %v6315_v26  ;;  %v6333_v3 = vsub.f32 %v13531_v28, %v6309_v34  ;;  %v6705_v26 = vld [vmem:[%s13855_s18 + $0x18] sm:$0xff]  ;;  %v7066_v34 = vld [vmem:[%s13858_s24] sm:$0xff] }
0x191f   :  { %8348 = vpow2.f32 %v6352_v11 }
0x1920   :  { %v13589_v12 = vpop.eup %8342  ;;  %v6362_v33 = vmul.f32 1.442695, %v6336_v13  ;;  %v6356_v23 = vmul.f32 1.442695, %v6333_v3 }
0x1921   :  { %v6319_v45 = vpop.xlane.xlu1 %6318  ;;  %6382 = vadd.xlane.f32.xlu1 %v13589_v12  ;;  %v6313_v21 = vpop.xlane.xlu0 %6312 }
0x1922   :  { %8350 = vpow2.f32 %v6362_v33  ;;  %v6338_v62 = vsub.f32 %v13537_v51, %v6319_v45  ;;  %v6335_v32 = vsub.f32 %v13541_v55, %v6313_v21  ;;  %v6807_v33 = vld [vmem:[%s13856_s20 + $0x8] sm:$0xff] }
0x1923   :  { %8352 = vpow2.f32 %v6356_v23  ;;  %v7068_v23 = vld [vmem:[%s13858_s24 + $0x10] sm:$0xff] }
0x1924   :  { %v13594_v49 = vpop.eup %8344  ;;  %v6366_v46 = vmul.f32 1.442695, %v6338_v62  ;;  %v6360_v29 = vmul.f32 1.442695, %v6335_v32  ;;  %v6809_v62 = vld [vmem:[%s13856_s20 + $0x18] sm:$0xff]  ;;  %v7165_v32 = vld [vmem:[%s13859_s26] sm:$0xff] }
0x1925   :  { %v6323_v28 = vpop.xlane.xlu1 %6322  ;;  %6386 = vadd.xlane.f32.xlu1 %v13594_v49  ;;  %v6317_v54 = vpop.xlane.xlu0 %6316 }
0x1926   :  { %8354 = vpow2.f32 %v6366_v46  ;;  %v6340_v57 = vsub.f32 %v13549_v7, %v6323_v28  ;;  %v6337_v5 = vsub.f32 %v13553_v6, %v6317_v54  ;;  %v6811_v54 = vld [vmem:[%s13856_s20 + $0x28] sm:$0xff] }
0x1927   :  { %8356 = vpow2.f32 %v6360_v29 }
0x1928   :  { %v13599_v10 = vpop.eup %8346  ;;  %v6370_v51 = vmul.f32 1.442695, %v6340_v57  ;;  %v6364_v31 = vmul.f32 1.442695, %v6337_v5  ;;  %v7167_v57 = vld [vmem:[%s13859_s26 + $0x10] sm:$0xff] }
0x1929   :  { %v13601_v55 = vpop.eup %8348  ;;  %6390 = vadd.xlane.f32.xlu1 %v13599_v10  ;;  %v6321_v20 = vpop.xlane.xlu0 %6320 }
0x192a   :  { %8358 = vpow2.f32 %v6370_v51  ;;  %6384 = vadd.xlane.f32.xlu0 %v13601_v55  ;;  %v6339_v1 = vsub.f32 %v13559_v50, %v6321_v20 }
0x192b   :  { %8360 = vpow2.f32 %v6364_v31 }
0x192c   :  { %v13606_v44 = vpop.eup %8350  ;;  %v6368_v7 = vmul.f32 1.442695, %v6339_v1  ;;  %v6813_v1 = vld [vmem:[%s13856_s20 + $0x38] sm:$0xff] }
0x192d   :  { %v13608_v6 = vpop.eup %8352  ;;  %6394 = vadd.xlane.f32.xlu1 %v13606_v44  ;;  %v6325_v19 = vpop.xlane.xlu0 %6324 }
0x192e   :  { %8362 = vpow2.f32 %v6368_v7  ;;  %6388 = vadd.xlane.f32.xlu0 %v13608_v6  ;;  %v6341_v59 = vsub.f32 %v13564_v47, %v6325_v19 }
0x1930   :  { %v13613_v25 = vpop.eup %8354  ;;  %v6372_v8 = vmul.f32 1.442695, %v6341_v59  ;;  %v6968_v59 = vld [vmem:[%s13857_s22 + $0x8] sm:$0xff] }
0x1931   :  { %v13615_v22 = vpop.eup %8356  ;;  %6398 = vadd.xlane.f32.xlu1 %v13613_v25 }
0x1932   :  { %8364 = vpow2.f32 %v6372_v8  ;;  %6392 = vadd.xlane.f32.xlu0 %v13615_v22 }
0x1934   :  { %v13619_v50 = vpop.eup %8358 }
0x1935   :  { %v13621_v24 = vpop.eup %8360  ;;  %6402 = vadd.xlane.f32.xlu1 %v13619_v50 }
0x1936   :  { %6396 = vadd.xlane.f32.xlu0 %v13621_v24 }
0x1938   :  { %v13625_v53 = vpop.eup %8362 }
0x193a   :  { %6400 = vadd.xlane.f32.xlu0 %v13625_v53 }
0x193c   :  { %v13628_v47 = vpop.eup %8364 }
0x193e   :  { %6404 = vadd.xlane.f32.xlu0 %v13628_v47 }
0x1946   :  { %6464 = vperm.xlu1 %7990, %v5847_v9  }
0x194a   :  { %6474 = vperm.xlu1 %7990, %v5849_v61  }
0x194e   :  { %6479 = vperm.xlu1 %7990, %v5850_v48   ;;  %v6970_v48 = vld [vmem:[%s13857_s22 + $0x18] sm:$0xff] }
0x1952   :  { %6551 = vperm.xlu1 %7990, %v6541_v56  }
0x1954   :  { %6469 = vperm.xlu0 %7991, %v5848_v4  }
0x1956   :  { %6556 = vperm.xlu1 %7990, %v6542_v27  }
0x1958   :  { %6581 = vperm.xlu0 %7991, %v6547_v16  }
0x195a   :  { %6561 = vperm.xlu1 %7990, %v6543_v42  }
0x195c   :  { %6708 = vperm.xlu0 %7991, %v6702_v52  }
0x195e   :  { %6566 = vperm.xlu1 %7990, %v6544_v37   ;;  %v7069_v37 = vld [vmem:[%s13858_s24 + $0x18] sm:$0xff] }
0x1960   :  { %6718 = vperm.xlu0 %7991, %v6704_v41  }
0x1962   :  { %6571 = vperm.xlu1 %7990, %v6545_v58  }
0x1964   :  { %6816 = vperm.xlu0 %7991, %v6806_v14  }
0x1966   :  { %6576 = vperm.xlu1 %7990, %v6546_v30  }
0x1968   :  { %6826 = vperm.xlu0 %7991, %v6808_v18  }
0x196a   :  { %6586 = vperm.xlu1 %7990, %v6548_v15  }
0x196c   :  { %6836 = vperm.xlu0 %7991, %v6810_v39  }
0x196e   :  { %6713 = vperm.xlu1 %7990, %v6703_v36  }
0x1970   :  { %6846 = vperm.xlu0 %7991, %v6812_v35   ;;  %v7166_v35 = vld [vmem:[%s13859_s26 + $0x8] sm:$0xff] }
0x1972   :  { %6723 = vperm.xlu1 %7990, %v6705_v26  }
0x1974   :  { %6973 = vperm.xlu0 %7991, %v6967_v38  }
0x1976   :  { %6821 = vperm.xlu1 %7990, %v6807_v33  }
0x1978   :  { %6983 = vperm.xlu0 %7991, %v6969_v17  }
0x197a   :  { %6831 = vperm.xlu1 %7990, %v6809_v62  }
0x197c   :  { %7072 = vperm.xlu0 %7991, %v7066_v34   ;;  %v7168_v34 = vld [vmem:[%s13859_s26 + $0x18] sm:$0xff] }
0x197e   :  { %6841 = vperm.xlu1 %7990, %v6811_v54  }
0x1980   :  { %7082 = vperm.xlu0 %7991, %v7068_v23  }
0x1982   :  { %6851 = vperm.xlu1 %7990, %v6813_v1  }
0x1984   :  { %7171 = vperm.xlu0 %7991, %v7165_v32  }
0x1986   :  { %6978 = vperm.xlu1 %7990, %v6968_v59  }
0x1988   :  { %7181 = vperm.xlu0 %7991, %v7167_v57  }
0x198a   :  { %6988 = vperm.xlu1 %7990, %v6970_v48  }
0x199e   :  { %v6375_v0 = vpop.xlane.xlu1 %6374 }
0x199f   :  { %v6406_v11 = vadd.f32 1e-16, %v6375_v0 }
0x19a0   :  { %v6377_v13 = vpop.xlane.xlu0 %6376 }
0x19a1   :  { %8366 = vrcp.f32 %v6406_v11  ;;  %v6407_v3 = vadd.f32 1e-16, %v6377_v13 }
0x19a3   :  { %8368 = vrcp.f32 %v6407_v3 }
0x19a4   :  { %v6379_v45 = vpop.xlane.xlu1 %6378 }
0x19a5   :  { %v6408_v21 = vadd.f32 1e-16, %v6379_v45 }
0x19a7   :  { %8370 = vrcp.f32 %v6408_v21 }
0x19a8   :  { %v6381_v46 = vpop.xlane.xlu0 %6380 }
0x19a9   :  { %v6409_v29 = vadd.f32 1e-16, %v6381_v46 }
0x19ab   :  { %v8367_v28 = vpop.eup %8366  ;;  %8372 = vrcp.f32 %v6409_v29 }
0x19ac   :  { %v6438_v31 = vmul.f32 %v8367_v28, %v13571_v63 }
0x19ad   :  { %v8369_v5 = vpop.eup %8368 }
0x19ae   :  { %v6383_v51 = vpop.xlane.xlu1 %6382  ;;  %v6439_v20 = vmul.f32 %v8369_v5, %v13574_v40 }
0x19af   :  { %v6410_v8 = vadd.f32 1e-16, %v6383_v51 }
0x19b0   :  { %v6454_v7 = vpack.c.bf16 %v6439_v20, %v6438_v31 }
0x19b1   :  { %v8371_v19 = vpop.eup %8370  ;;  %8374 = vrcp.f32 %v6410_v8 }
0x19b2   :  { %7846 = vmatprep.subr.bf16.mxu1 %v6454_v7  ;;  %v6387_v9 = vpop.xlane.xlu1 %6386  ;;  %v6440_v40 = vmul.f32 %v8371_v19, %v13578_v2  ;;  %v7067_v2 = vld [vmem:[%s13858_s24 + $0x8] sm:$0xff] }
0x19b3   :  { %7847 = vmatpush3.bf16.xpose.msra.mxu1 %v6454_v7  ;;  %v6412_v16 = vadd.f32 1e-16, %v6387_v9  ;;  %7077 = vperm.xlu1 %7990, %v7067_v2  }
0x19b5   :  { %v8373_v63 = vpop.eup %8372 }
0x19b6   :  { %v6441_v61 = vmul.f32 %v8373_v63, %v13582_v60  ;;  %v6391_v27 = vpop.xlane.xlu1 %6390 }
0x19b7   :  { %v6385_v4 = vpop.xlane.xlu0 %6384  ;;  %v6414_v42 = vadd.f32 1e-16, %v6391_v27  ;;  %7087 = vperm.xlu1 %7990, %v7069_v37   ;;  %v8028_v37 = vld [vmem:[%s13861_s17] sm:$0xff]  }
0x19b8   :  { %v6411_v56 = vadd.f32 1e-16, %v6385_v4  ;;  %v6455_v52 = vpack.c.bf16 %v6441_v61, %v6440_v40 }
0x19ba   :  { %8376 = vrcp.f32 %v6411_v56  ;;  %7848 = vmatprep.subr.bf16.mxu1 %v6455_v52  ;;  %v6395_v39 = vpop.xlane.xlu1 %6394 }
0x19bb   :  { %v6389_v41 = vpop.xlane.xlu0 %6388  ;;  %7849 = vmatpush3.bf16.xpose.msra.mxu1 %v6455_v52  ;;  %8378 = vrcp.f32 %v6412_v16  ;;  %v8375_v58 = vpop.eup %8374  ;;  %v6416_v11 = vadd.f32 1e-16, %v6395_v39  ;;  %7176 = vperm.xlu1 %7990, %v7166_v35  }
0x19bc   :  { %v6413_v60 = vadd.f32 1e-16, %v6389_v41  ;;  %v6442_v36 = vmul.f32 %v8375_v58, %v13589_v12 }
0x19be   :  { %8380 = vrcp.f32 %v6413_v60  ;;  %v8025_v60 = vld [vmem:[%s13860_s15 + $0x8] sm:$0xff]  }
0x19bf   :  { %v6393_v14 = vpop.xlane.xlu0 %6392  ;;  %8382 = vrcp.f32 %v6414_v42  ;;  %7186 = vperm.xlu1 %7990, %v7168_v34   ;;  %v8026_v42 = vld [vmem:[%s13860_s15 + $0x10] sm:$0xff]  }
0x19c0   :  { %v6415_v18 = vadd.f32 1e-16, %v6393_v14  ;;  %v8027_v14 = vld [vmem:[%s13860_s15 + $0x18] sm:$0xff]  }
0x19c2   :  { %8384 = vrcp.f32 %v6415_v18 }
0x19c3   :  { %v6397_v30 = vpop.xlane.xlu0 %6396 }
0x19c4   :  { %v8377_v15 = vpop.eup %8376  ;;  %v6417_v38 = vadd.f32 1e-16, %v6397_v30 }
0x19c5   :  { %v6443_v17 = vmul.f32 %v8377_v15, %v13601_v55  ;;  %v8379_v0 = vpop.eup %8378  ;;  %v6399_v55 = vpop.xlane.xlu1 %6398 }
0x19c6   :  { %8386 = vrcp.f32 %v6417_v38  ;;  %v6444_v33 = vmul.f32 %v8379_v0, %v13594_v49  ;;  %v6418_v46 = vadd.f32 1e-16, %v6399_v55 }
0x19c7   :  { %v6456_v26 = vpack.c.bf16 %v6443_v17, %v6442_v36  ;;  %v6401_v3 = vpop.xlane.xlu0 %6400  ;;  %8388 = vrcp.f32 %v6416_v11 }
0x19c8   :  { %v8381_v13 = vpop.eup %8380  ;;  %v6419_v62 = vadd.f32 1e-16, %v6401_v3 }
0x19c9   :  { %7850 = vmatprep.subr.bf16.mxu1 %v6456_v26  ;;  %v6445_v23 = vmul.f32 %v8381_v13, %v13608_v6  ;;  %v8383_v12 = vpop.eup %8382  ;;  %v6403_v6 = vpop.xlane.xlu1 %6402 }
0x19ca   :  { %7851 = vmatpush3.bf16.xpose.msra.mxu1 %v6456_v26  ;;  %v6446_v29 = vmul.f32 %v8383_v12, %v13599_v10  ;;  %8390 = vrcp.f32 %v6419_v62  ;;  %v6420_v31 = vadd.f32 1e-16, %v6403_v6 }
0x19cb   :  { %v6457_v45 = vpack.c.bf16 %v6445_v23, %v6444_v33  ;;  %v6405_v28 = vpop.xlane.xlu0 %6404  ;;  %8392 = vrcp.f32 %v6418_v46 }
0x19cc   :  { %v8385_v21 = vpop.eup %8384  ;;  %v6421_v5 = vadd.f32 1e-16, %v6405_v28 }
0x19cd   :  { %7852 = vmatprep.subr.bf16.mxu1 %v6457_v45  ;;  %v6447_v32 = vmul.f32 %v8385_v21, %v13615_v22 }
0x19ce   :  { %8394 = vrcp.f32 %v6421_v5 }
0x19cf   :  { %v6458_v54 = vpack.c.bf16 %v6447_v32, %v6446_v29  ;;  %8396 = vrcp.f32 %v6420_v31 }
0x19d0   :  { %v8387_v49 = vpop.eup %8386 }
0x19d1   :  { %v8389_v57 = vpop.eup %8388  ;;  %v6449_v51 = vmul.f32 %v8387_v49, %v13621_v24 }
0x19d2   :  { %7853 = vmatpush3.bf16.xpose.msra.mxu1 %v6457_v45  ;;  %v6448_v20 = vmul.f32 %v8389_v57, %v13606_v44 }
0x19d3   :  { %7854 = vmatprep.subr.bf16.mxu1 %v6458_v54  ;;  %v6470_v16 = vpop.permute.xlu0 %6469 }
0x19d4   :  { %v6459_v22 = vpack.c.bf16 %v6449_v51, %v6448_v20  ;;  %v8391_v1 = vpop.eup %8390 }
0x19d5   :  { %v8393_v10 = vpop.eup %8392  ;;  %v6451_v7 = vmul.f32 %v8391_v1, %v13625_v53  ;;  %v8024_v53 = vld [vmem:[%s13860_s15] sm:$0xff]  }
0x19d6   :  { %v6450_v19 = vmul.f32 %v8393_v10, %v13613_v25  ;;  %7870 = vmatprep.mubr.msk.bf16.mxu0 %vm14887_vm4, %v8024_v53  ;;  %v6465_v25 = vpop.permute.xlu1 %6464  ;;  %v8029_v10 = vld [vmem:[%s13861_s17 + $0x8] sm:$0xff]  }
0x19d7   :  { %v6582_v45 = vpop.permute.xlu0 %6581 }
0x19d8   :  { %v6460_v59 = vpack.c.bf16 %v6451_v7, %v6450_v19  ;;  %v8395_v8 = vpop.eup %8394  ;;  %v8398_v7 = vld [vmem:[%s14135_s27] sm:$0xff]   ;;  %v8399_v19 = vld [vmem:[%s14135_s27 + $0x8] sm:$0xff]  }
0x19d9   :  { %v8397_v9 = vpop.eup %8396  ;;  %v6453_v24 = vmul.f32 %v8395_v8, %v13628_v47 }
0x19da   :  { %7855 = vmatpush3.bf16.xpose.msra.mxu1 %v6458_v54  ;;  %v6452_v44 = vmul.f32 %v8397_v9, %v13619_v50  ;;  %v6475_v40 = vpop.permute.xlu1 %6474 }
0x19db   :  { %7856 = vmatprep.subr.bf16.mxu1 %v6459_v22  ;;  %v6709_v8 = vpop.permute.xlu0 %6708 }
0x19dc   :  { %v6461_v63 = vpack.c.bf16 %v6453_v24, %v6452_v44 }
0x19de   :  { %v6480_v48 = vpop.permute.xlu1 %6479 }
0x19df   :  { %v6719_v24 = vpop.permute.xlu0 %6718 }
0x19e2   :  { %7857 = vmatpush3.bf16.xpose.msra.mxu1 %v6459_v22  ;;  %v6552_v18 = vpop.permute.xlu1 %6551 }
0x19e3   :  { %7858 = vmatprep.subr.bf16.mxu1 %v6460_v59 }
0x19e6   :  { %v6557_v58 = vpop.permute.xlu1 %6556 }
0x19ea   :  { %7859 = vmatpush3.bf16.xpose.msra.mxu1 %v6460_v59  ;;  %v6562_v39 = vpop.permute.xlu1 %6561  ;;  %v8030_v59 = vld [vmem:[%s13862_s19] sm:$0xff]  }
0x19eb   :  { %7860 = vmatprep.subr.bf16.mxu1 %v6461_v63 }
0x19ee   :  { %v6567_v30 = vpop.permute.xlu1 %6566 }
0x19f2   :  { %7861 = vmatpush3.bf16.xpose.msra.mxu1 %v6461_v63  ;;  %v6572_v35 = vpop.permute.xlu1 %6571 }
0x19f6   :  { %v6577_v34 = vpop.permute.xlu1 %6576 }
0x19f9   :  { %7863 = vmatmul.mubr.bf16.vlgmr.msra.gmra.mrb[56].mxu1 %v13450_v43 }
0x19fa   :  { %v6587_v29 = vpop.permute.xlu1 %6586 }
0x19fe   :  { %v6714_v9 = vpop.permute.xlu1 %6713 }
0x1acc   :  { %v7864_v61 = vpop.f32.mrb[56].mxu1 }
0x1acd   :  { %v6516_v4 = vpop.f32.mrb[57].mxu1  ;;  %v6525_v50 = vadd.f32 %v7864_v61, %v6475_v40 }
0x1ace   :  { %v7865_v47 = vpop.f32.mrb[58].mxu1  ;;  %v6517_v27 = vadd.f32 %v6516_v4, %v6465_v25  ;;  %v6724_v25 = vpop.permute.xlu1 %6723 }
0x1acf   :  { %v6528_v56 = vadd.f32 %v7865_v47, %v6480_v48  ;;  %v6519_v52 = vpop.f32.mrb[59].mxu1 }
0x1ad0   :  { %v6520_v41 = vadd.f32 %v6519_v52, %v6470_v16 }
0x1ad1   :  { %v6540_v2 = vpack.c.bf16 %v6528_v56, %v6525_v50 }
0x1ad2   :  { %v6539_v43 = vpack.c.bf16 %v6520_v41, %v6517_v27 }
0x1ad4   :  { %7866 = vmatprep.subr.bf16.mxu0 %v6539_v43 }
0x1ad5   :  { %7867 = vmatpush3.bf16.msra.mxu0 %v6539_v43  ;;  %v8032_v43 = vld [vmem:[%s13862_s19 + $0x10] sm:$0xff]  }
0x1ad6   :  { %7868 = vmatprep.subr.bf16.mxu0 %v6540_v2 }
0x1ad9   :  { %7869 = vmatpush3.bf16.msra.mxu0 %v6540_v2  ;;  %v8031_v2 = vld [vmem:[%s13862_s19 + $0x8] sm:$0xff]  }
0x1adc   :  { %7871 = vmatmul.mubr.msk.bf16.vlgmr.msra.gmra.mrb[60].mxu0 %vm14888_vm0, %v8025_v60  ;;  %v8033_v60 = vld [vmem:[%s13862_s19 + $0x18] sm:$0xff]  }
0x1add   :  { %7874 = vmatprep.mubr.msk.bf16.mxu0 %vm14889_vm5, %v8026_v42  ;;  %v8034_v42 = vld [vmem:[%s13863_s21] sm:$0xff]  }
0x1ade   :  { %7914 = vmatprep.mubr.msk.bf16.mxu1 %vm6736_vm14, %v8034_v42 }
0x1ae4   :  { %7875 = vmatmul.mubr.msk.bf16.gmra.mrb[64].mxu0 %vm14890_vm13, %v8027_v14  ;;  %v6817_v14 = vpop.permute.xlu0 %6816 }
0x1ae5   :  { %7886 = vmatprep.mubr.msk.bf16.mxu0 %vm6736_vm14, %v8028_v37  ;;  %v6822_v37 = vpop.permute.xlu1 %6821 }
0x1baf   :  { %v7872_v15 = vpop.f32.mrb[60].mxu0 }
0x1bb0   :  { %v6664_v38 = vadd.f32 %v7872_v15, %v6562_v39  ;;  %v6655_v36 = vpop.f32.mrb[61].mxu0 }
0x1bb1   :  { %v6656_v17 = vadd.f32 %v6655_v36, %v6552_v18  ;;  %v7873_v0 = vpop.f32.mrb[62].mxu0  ;;  %v6827_v18 = vpop.permute.xlu0 %6826 }
0x1bb2   :  { %v6667_v11 = vadd.f32 %v7873_v0, %v6567_v30  ;;  %v6658_v26 = vpop.f32.mrb[63].mxu0  ;;  %v6688_v3 = vmax.f32 %v6664_v38, 0.0 }
0x1bb3   :  { %v6659_v13 = vadd.f32 %v6658_v26, %v6557_v58  ;;  %v6686_v23 = vmax.f32 %v6656_v17, 0.0  ;;  %v6832_v58 = vpop.permute.xlu1 %6831 }
0x1bb4   :  { %v6689_v33 = vmax.f32 %v6667_v11, 0.0 }
0x1bb5   :  { %v6687_v12 = vmax.f32 %v6659_v13, 0.0  ;;  %v6837_v15 = vpop.permute.xlu0 %6836 }
0x1bb6   :  { %v6699_v55 = vpack.c.bf16 %v6689_v33, %v6688_v3 }
0x1bb7   :  { %v6698_v21 = vpack.c.bf16 %v6687_v12, %v6686_v23  ;;  %v7876_v62 = vpop.f32.mrb[64].mxu0  ;;  %v6842_v11 = vpop.permute.xlu1 %6841 }
0x1bb8   :  { %v6680_v32 = vadd.f32 %v7876_v62, %v6582_v45  ;;  %v6671_v46 = vpop.f32.mrb[65].mxu0 }
0x1bb9   :  { %v6672_v28 = vadd.f32 %v6671_v46, %v6572_v35  ;;  %v7877_v54 = vpop.f32.mrb[66].mxu0  ;;  %7878 = vmatprep.subr.bf16.mxu0 %v6698_v21  ;;  %v6847_v12 = vpop.permute.xlu0 %6846 }
0x1bba   :  { %v6683_v49 = vadd.f32 %v7877_v54, %v6587_v29  ;;  %v6674_v6 = vpop.f32.mrb[67].mxu0  ;;  %7879 = vmatpush3.bf16.msra.mxu0 %v6698_v21  ;;  %v6692_v5 = vmax.f32 %v6680_v32, 0.0 }
0x1bbb   :  { %v6675_v57 = vadd.f32 %v6674_v6, %v6577_v34  ;;  %7880 = vmatprep.subr.bf16.mxu0 %v6699_v55  ;;  %v6690_v31 = vmax.f32 %v6672_v28, 0.0  ;;  %v6852_v32 = vpop.permute.xlu1 %6851 }
0x1bbc   :  { %v6693_v51 = vmax.f32 %v6683_v49, 0.0 }
0x1bbd   :  { %v6691_v20 = vmax.f32 %v6675_v57, 0.0 }
0x1bbe   :  { %v6701_v22 = vpack.c.bf16 %v6693_v51, %v6692_v5  ;;  %7881 = vmatpush3.bf16.msra.mxu0 %v6699_v55 }
0x1bbf   :  { %v6700_v1 = vpack.c.bf16 %v6691_v20, %v6690_v31 }
0x1bc1   :  { %7882 = vmatprep.subr.bf16.mxu0 %v6700_v1 }
0x1bc2   :  { %7883 = vmatpush3.bf16.msra.mxu0 %v6700_v1  ;;  %v8036_v1 = vld [vmem:[%s13864_s23] sm:$0xff]  }
0x1bc3   :  { %7884 = vmatprep.subr.bf16.mxu0 %v6701_v22 }
0x1bc6   :  { %7885 = vmatpush3.bf16.msra.mxu0 %v6701_v22  ;;  %v8035_v22 = vld [vmem:[%s13863_s21 + $0x8] sm:$0xff]  }
0x1bc7   :  { %7890 = vmatprep.subr.bf16.mxu0 %v8398_v7 }
0x1bc9   :  { %7887 = vmatmul.mubr.msk.bf16.vlgmr.msra.gmra.mrb[68].mxu0 %vm6736_vm14, %v8029_v10  ;;  %v6974_v10 = vpop.permute.xlu0 %6973 }
0x1bca   :  { %7891 = vmatpush3.bf16.msra.mxu0 %v8398_v7  ;;  %7898 = vmatprep.mubr.msk.bf16.mxu0 %vm6736_vm14, %v8030_v59  ;;  %v6979_v7 = vpop.permute.xlu1 %6978 }
0x1bcb   :  { %7892 = vmatprep.subr.bf16.mxu0 %v8399_v19 }
0x1bce   :  { %7893 = vmatpush3.bf16.msra.mxu0 %v8399_v19  ;;  %v6984_v19 = vpop.permute.xlu0 %6983 }
0x1c9c   :  { %v7888_v44 = vpop.f32.mrb[68].mxu0 }
0x1c9d   :  { %v6786_v63 = vadd.f32 %v7888_v44, %v6719_v24  ;;  %v6777_v53 = vpop.f32.mrb[69].mxu0  ;;  %v6989_v24 = vpop.permute.xlu1 %6988 }
0x1c9e   :  { %v6778_v40 = vadd.f32 %v6777_v53, %v6709_v8  ;;  %v7889_v61 = vpop.f32.mrb[70].mxu0 }
0x1c9f   :  { %v6789_v4 = vadd.f32 %v7889_v61, %v6724_v25  ;;  %v6780_v48 = vpop.f32.mrb[71].mxu0  ;;  %v6794_v16 = vmax.f32 %v6786_v63, 0.0 }
0x1ca0   :  { %v6781_v47 = vadd.f32 %v6780_v48, %v6714_v9  ;;  %v6792_v56 = vmax.f32 %v6778_v40, 0.0 }
0x1ca1   :  { %v6795_v50 = vmax.f32 %v6789_v4, 0.0 }
0x1ca2   :  { %v6793_v52 = vmax.f32 %v6781_v47, 0.0 }
0x1ca3   :  { %v6797_v27 = vpack.c.bf16 %v6795_v50, %v6794_v16 }
0x1ca4   :  { %v6796_v41 = vpack.c.bf16 %v6793_v52, %v6792_v56  ;;  %v8037_v56 = vld [vmem:[%s13864_s23 + $0x8] sm:$0xff]   ;;  %v8038_v52 = vld [vmem:[%s13865_s25] sm:$0xff]  }
0x1ca6   :  { %7894 = vmatprep.subr.bf16.mxu0 %v6796_v41 }
0x1ca7   :  { %7895 = vmatpush3.bf16.msra.mxu0 %v6796_v41  ;;  %v7078_v41 = vpop.permute.xlu1 %7077 }
0x1ca8   :  { %7896 = vmatprep.subr.bf16.mxu0 %v6797_v27 }
0x1cab   :  { %7897 = vmatpush3.bf16.msra.mxu0 %v6797_v27  ;;  %v7073_v27 = vpop.permute.xlu0 %7072 }
0x1cae   :  { %7899 = vmatmul.mubr.msk.bf16.vlgmr.msra.gmra.mrb[72].mxu0 %vm6736_vm14, %v8031_v2 }
0x1caf   :  { %7902 = vmatprep.mubr.msk.bf16.mxu0 %vm6736_vm14, %v8032_v43  ;;  %v7083_v2 = vpop.permute.xlu0 %7082 }
0x1cb6   :  { %7903 = vmatmul.mubr.msk.bf16.gmra.mrb[76].mxu0 %vm6736_vm14, %v8033_v60 }
0x1cb7   :  { %7922 = vmatprep.mubr.msk.bf16.mxu0 %vm14891_vm8, %v8036_v1 }
0x1d81   :  { %v7900_v39 = vpop.f32.mrb[72].mxu0 }
0x1d82   :  { %v6929_v30 = vadd.f32 %v7900_v39, %v6827_v18  ;;  %v6920_v35 = vpop.f32.mrb[73].mxu0 }
0x1d83   :  { %v6921_v38 = vadd.f32 %v6920_v35, %v6817_v14  ;;  %v7901_v36 = vpop.f32.mrb[74].mxu0  ;;  %v7088_v14 = vpop.permute.xlu1 %7087 }
0x1d84   :  { %v6932_v17 = vadd.f32 %v7901_v36, %v6832_v58  ;;  %v6923_v0 = vpop.f32.mrb[75].mxu0  ;;  %v6953_v34 = vmax.f32 %v6929_v30, 0.0 }
0x1d85   :  { %v6924_v26 = vadd.f32 %v6923_v0, %v6822_v37  ;;  %v6951_v3 = vmax.f32 %v6921_v38, 0.0 }
0x1d86   :  { %v6954_v13 = vmax.f32 %v6932_v17, 0.0 }
0x1d87   :  { %v6952_v33 = vmax.f32 %v6924_v26, 0.0  ;;  %v7172_v26 = vpop.permute.xlu0 %7171 }
0x1d88   :  { %v6964_v23 = vpack.c.bf16 %v6954_v13, %v6953_v34  ;;  %v7177_v34 = vpop.permute.xlu1 %7176 }
0x1d89   :  { %v6963_v55 = vpack.c.bf16 %v6952_v33, %v6951_v3  ;;  %v7904_v45 = vpop.f32.mrb[76].mxu0 }
0x1d8a   :  { %v6945_v21 = vadd.f32 %v7904_v45, %v6847_v12  ;;  %v6936_v62 = vpop.f32.mrb[77].mxu0 }
0x1d8b   :  { %v6937_v46 = vadd.f32 %v6936_v62, %v6837_v15  ;;  %v7905_v29 = vpop.f32.mrb[78].mxu0  ;;  %7906 = vmatprep.subr.bf16.mxu1 %v6963_v55  ;;  %v7182_v13 = vpop.permute.xlu0 %7181 }
0x1d8c   :  { %v6948_v28 = vadd.f32 %v7905_v29, %v6852_v32  ;;  %v6939_v54 = vpop.f32.mrb[79].mxu0  ;;  %7907 = vmatpush3.bf16.msra.mxu1 %v6963_v55  ;;  %v6957_v6 = vmax.f32 %v6945_v21, 0.0  ;;  %v7187_v12 = vpop.permute.xlu1 %7186 }
0x1d8d   :  { %v6940_v49 = vadd.f32 %v6939_v54, %v6842_v11  ;;  %7908 = vmatprep.subr.bf16.mxu1 %v6964_v23  ;;  %v6955_v5 = vmax.f32 %v6937_v46, 0.0  ;;  %v8039_v11 = vld [vmem:[%s13865_s25 + $0x8] sm:$0xff]  }
0x1d8e   :  { %v6958_v57 = vmax.f32 %v6948_v28, 0.0 }
0x1d8f   :  { %v6956_v51 = vmax.f32 %v6940_v49, 0.0 }
0x1d90   :  { %v6966_v31 = vpack.c.bf16 %v6958_v57, %v6957_v6  ;;  %7909 = vmatpush3.bf16.msra.mxu1 %v6964_v23 }
0x1d91   :  { %v6965_v20 = vpack.c.bf16 %v6956_v51, %v6955_v5 }
0x1d93   :  { %7910 = vmatprep.subr.bf16.mxu1 %v6965_v20 }
0x1d94   :  { %7911 = vmatpush3.bf16.msra.mxu1 %v6965_v20 }
0x1d95   :  { %7912 = vmatprep.subr.bf16.mxu1 %v6966_v31 }
0x1d98   :  { %7913 = vmatpush3.bf16.msra.mxu1 %v6966_v31 }
0x1d9b   :  { %7915 = vmatmul.mubr.msk.bf16.vlgmr.msra.gmra.mrb[60].mxu1 %vm6736_vm14, %v8035_v22 }
0x1d9c   :  { %7930 = vmatprep.mubr.msk.bf16.mxu1 %vm14893_vm1, %v8038_v52 }
0x1e6e   :  { %v7916_v59 = vpop.f32.mrb[60].mxu1 }
0x1e6f   :  { %v7050_v8 = vadd.f32 %v7916_v59, %v6984_v19  ;;  %v7041_v9 = vpop.f32.mrb[61].mxu1 }
0x1e70   :  { %v7042_v44 = vadd.f32 %v7041_v9, %v6974_v10  ;;  %v7917_v63 = vpop.f32.mrb[62].mxu1 }
0x1e71   :  { %v7053_v53 = vadd.f32 %v7917_v63, %v6989_v24  ;;  %v7044_v25 = vpop.f32.mrb[63].mxu1  ;;  %v7058_v61 = vmax.f32 %v7050_v8, 0.0 }
0x1e72   :  { %v7045_v40 = vadd.f32 %v7044_v25, %v6979_v7  ;;  %v7056_v48 = vmax.f32 %v7042_v44, 0.0 }
0x1e73   :  { %v7059_v4 = vmax.f32 %v7053_v53, 0.0 }
0x1e74   :  { %v7057_v47 = vmax.f32 %v7045_v40, 0.0 }
0x1e75   :  { %v7065_v16 = vpack.c.bf16 %v7059_v4, %v7058_v61 }
0x1e76   :  { %v7064_v50 = vpack.c.bf16 %v7057_v47, %v7056_v48 }
0x1e78   :  { %7918 = vmatprep.subr.bf16.mxu0 %v7064_v50 }
0x1e79   :  { %7919 = vmatpush3.bf16.msra.mxu0 %v7064_v50 }
0x1e7a   :  { %7920 = vmatprep.subr.bf16.mxu0 %v7065_v16 }
0x1e7d   :  { %7921 = vmatpush3.bf16.msra.mxu0 %v7065_v16 }
0x1e80   :  { %7923 = vmatmul.mubr.msk.bf16.vlgmr.msra.gmra.mrb[80].mxu0 %vm14892_vm11, %v8037_v56 }
0x1f53   :  { %v7924_v43 = vpop.f32.mrb[80].mxu0 }
0x1f54   :  { %v7149_v60 = vadd.f32 %v7924_v43, %v7083_v2  ;;  %v7140_v42 = vpop.f32.mrb[81].mxu0 }
0x1f55   :  { %v7141_v37 = vadd.f32 %v7140_v42, %v7073_v27  ;;  %v7925_v18 = vpop.f32.mrb[82].mxu0 }
0x1f56   :  { %v7152_v58 = vadd.f32 %v7925_v18, %v7088_v14  ;;  %v7143_v39 = vpop.f32.mrb[83].mxu0  ;;  %v7157_v35 = vmax.f32 %v7149_v60, 0.0 }
0x1f57   :  { %v7144_v30 = vadd.f32 %v7143_v39, %v7078_v41  ;;  %v7155_v38 = vmax.f32 %v7141_v37, 0.0 }
0x1f58   :  { %v7158_v15 = vmax.f32 %v7152_v58, 0.0 }
0x1f59   :  { %v7156_v36 = vmax.f32 %v7144_v30, 0.0 }
0x1f5a   :  { %v7164_v17 = vpack.c.bf16 %v7158_v15, %v7157_v35 }
0x1f5b   :  { %v7163_v0 = vpack.c.bf16 %v7156_v36, %v7155_v38 }
0x1f5d   :  { %7926 = vmatprep.subr.bf16.mxu1 %v7163_v0 }
0x1f5e   :  { %7927 = vmatpush3.bf16.msra.mxu1 %v7163_v0 }
0x1f5f   :  { %7928 = vmatprep.subr.bf16.mxu1 %v7164_v17 }
0x1f62   :  { %7929 = vmatpush3.bf16.msra.mxu1 %v7164_v17 }
0x1f65   :  { %7931 = vmatmul.mubr.msk.bf16.vlgmr.msra.gmra.mrb[64].mxu1 %vm14894_vm10, %v8039_v11 }
0x2038   :  { %v7932_v3 = vpop.f32.mrb[64].mxu1 }
0x2039   :  { %v7248_v33 = vadd.f32 %v7932_v3, %v7182_v13  ;;  %v7239_v23 = vpop.f32.mrb[65].mxu1 }
0x203a   :  { %v7240_v55 = vadd.f32 %v7239_v23, %v7172_v26  ;;  %v7933_v45 = vpop.f32.mrb[66].mxu1 }
0x203b   :  { %7256 = vst [vmem:[%s13866_s28 + $0x10] sm:$0xff] %v7248_v33  ;;  %v7251_v21 = vadd.f32 %v7933_v45, %v7187_v12  ;;  %v7242_v62 = vpop.f32.mrb[67].mxu1 }
0x203c   :  { %7254 = vst [vmem:[%s13866_s28] sm:$0xff] %v7240_v55  ;;  %v7243_v32 = vadd.f32 %v7242_v62, %v7177_v34 }
0x203d   :  { %7257 = vst [vmem:[%s13866_s28 + $0x18] sm:$0xff] %v7251_v21 }
0x203e   :  { %7255 = vst [vmem:[%s13866_s28 + $0x8] sm:$0xff] %v7243_v32 }

</bundles_post_ra>
